<compile_context>
chip_gen: v7x
topology: tpu7x:2x2x1
jax: 0.10.0
libtpu: 0.0.40
codegen_flags: <defaults>
</compile_context>

<pallas_src>
import math

import jax
import jax.numpy as jnp
from jax.experimental import pallas as pl
from jax.experimental.pallas import tpu as pltpu

VMEM_SPEC = pl.BlockSpec(memory_space=pltpu.MemorySpace.VMEM)


def _const_spec(shape):
    nd = len(shape)
    return pl.BlockSpec(tuple(shape), lambda b: (0,) * nd)


# ----------------------------------------------------------------------------
# Kernel A: causal Conv1d over T (encoder / decoder) -- one un-gridded slab
# ----------------------------------------------------------------------------
def _causal_conv1d_kernel(x_ref, w_ref, b_ref, o_ref):
    f32 = jnp.float32
    x = x_ref[...].astype(f32)                       # (N, T, Cin)
    N, T, Cin = x.shape
    K = w_ref.shape[0]
    Cout = w_ref.shape[2]
    # single front pad; each tap is then a static slice (no per-tap copies)
    xp = jnp.concatenate([jnp.zeros((N, K - 1, Cin), f32), x], axis=1)
    xp = xp.astype(jnp.bfloat16)
    acc = jnp.zeros((N * T, Cout), f32)
    for k in range(K):                               # tap k has causal delay K-1-k
        xs = xp[:, k:k + T, :].reshape(N * T, Cin)
        acc = acc + jnp.dot(xs, w_ref[k], preferred_element_type=f32)
    y = acc + b_ref[...]
    o_ref[...] = y.reshape(N, T, Cout).astype(o_ref.dtype)


def causal_conv1d(x, w_kic, bias):
    # x: [N, T, Cin] -> [N, T, Cout]
    N, T, Cin = x.shape
    K, _, Cout = w_kic.shape
    return pl.pallas_call(
        _causal_conv1d_kernel,
        in_specs=[VMEM_SPEC] * 3,
        out_specs=VMEM_SPEC,
        out_shape=jax.ShapeDtypeStruct((N, T, Cout), x.dtype),
    )(x, w_kic, bias)


# ----------------------------------------------------------------------------
# Kernel B: fully fused per-block kernel
#   local-F conv + SiLU + res  ->  LN + bi-LSTM(F) + proj + res  ->
#   local-T LN + grouped causal conv + SiLU + res
# Gridded over B ("parallel"), LSTM batch per grid step is T rows.
# ----------------------------------------------------------------------------
def _make_block_kernel(with_local_t):
    def kernel(*refs):
        (x_ref, h0_ref, c0_ref, loc_w, loc_b, ln_g, ln_b,
         wih_f, whh_f, b_f, wih_b, whh_b, b_b,
         proj_wf, proj_wb, proj_b) = refs[:16]
        if with_local_t:
            lt_g, lt_be, lt_w1, lt_w2, lt_b = refs[16:21]
            xo_ref, ho_ref, co_ref, of_sc, ob_sc = refs[21:26]
        else:
            xo_ref, ho_ref, co_ref, of_sc, ob_sc = refs[16:21]

        f32 = jnp.float32
        bf16 = jnp.bfloat16

        x = x_ref[0].astype(f32)                     # (F, T, H)
        F, T, H = x.shape

        # ---------- local-F: (1,5) conv over F + SiLU + residual ----------
        K5 = loc_w.shape[0]
        pad = (K5 - 1) // 2
        zpad = jnp.zeros((pad, T, H), f32)
        xpad = jnp.concatenate([zpad, x, zpad], axis=0).astype(bf16)   # (F+2*pad, T, H)
        acc = jnp.zeros((F * T, H), f32)
        for k in range(K5):
            xs = xpad[k:k + F].reshape(F * T, H)
            acc = acc + jnp.dot(xs, loc_w[k], preferred_element_type=f32)
        y = acc.reshape(F, T, H) + loc_b[...]
        x1 = x + y * jax.nn.sigmoid(y)               # SiLU + residual

        # ---------- global-F: LayerNorm + bi-LSTM over F + proj + residual ----------
        mean = jnp.mean(x1, axis=-1, keepdims=True)
        var = jnp.mean((x1 - mean) ** 2, axis=-1, keepdims=True)
        xn = (x1 - mean) * jax.lax.rsqrt(var + 1e-5) * ln_g[...] + ln_b[...]
        xn2 = xn.astype(bf16).reshape(F * T, H)
        # lane-dense (.., 4H) gate pre-compute for both directions (one big matmul each)
        xg_f = (jnp.dot(xn2, wih_f[...], preferred_element_type=f32)
                + b_f[...]).reshape(F, T, 4 * H)
        xg_b = (jnp.dot(xn2, wih_b[...], preferred_element_type=f32)
                + b_b[...]).reshape(F, T, 4 * H)
        whhf = whh_f[...]
        whhb = whh_b[...]

        def cell(gates, c_prev):                     # torch gate order: i, f, g, o
            i_g = jax.nn.sigmoid(gates[:, 0 * H:1 * H])
            f_g = jax.nn.sigmoid(gates[:, 1 * H:2 * H])
            g_g = jnp.tanh(gates[:, 2 * H:3 * H])
            o_g = jax.nn.sigmoid(gates[:, 3 * H:4 * H])
            c_new = f_g * c_prev + i_g * g_g
            h_new = o_g * jnp.tanh(c_new)            # single tanh(c) per step (f32 path)
            return h_new, c_new

        h0 = h0_ref[...].astype(f32)                 # (2, 1, T, H)
        c0 = c0_ref[...].astype(f32)
        h_f, c_f = h0[0, 0], c0[0, 0]
        h_b, c_b = h0[1, 0], c0[1, 0]
        # interleave the two independent recurrences (fwd step t, bwd step F-1-t)
        for s in range(F):
            t_fw = s
            t_bw = F - 1 - s
            g_fw = xg_f[t_fw] + jnp.dot(h_f.astype(bf16), whhf,
                                        preferred_element_type=f32)
            g_bw = xg_b[t_bw] + jnp.dot(h_b.astype(bf16), whhb,
                                        preferred_element_type=f32)
            h_f, c_f = cell(g_fw, c_f)
            h_b, c_b = cell(g_bw, c_b)
            of_sc[t_fw] = h_f                        # per-step store -> bounded live ranges
            ob_sc[t_bw] = h_b

        ho_ref[...] = jnp.stack([h_f, h_b], axis=0).reshape(2, 1, T, H).astype(ho_ref.dtype)
        co_ref[...] = jnp.stack([c_f, c_b], axis=0).reshape(2, 1, T, H).astype(co_ref.dtype)

        out_f = of_sc[...].reshape(F * T, H).astype(bf16)
        out_b = ob_sc[...].reshape(F * T, H).astype(bf16)
        yp = (jnp.dot(out_f, proj_wf[...], preferred_element_type=f32)
              + jnp.dot(out_b, proj_wb[...], preferred_element_type=f32)
              + proj_b[...]).reshape(F, T, H)
        x2 = x1 + yp                                 # residual on the pre-LN input

        # ---------- local-T: LN + grouped (groups=2) causal conv over T + SiLU + residual
        if with_local_t:
            m2 = jnp.mean(x2, axis=-1, keepdims=True)
            v2 = jnp.mean((x2 - m2) ** 2, axis=-1, keepdims=True)
            z = (x2 - m2) * jax.lax.rsqrt(v2 + 1e-5) * lt_g[...] + lt_be[...]
            Kt = lt_w1.shape[0]
            half = lt_w1.shape[1]
            zp = jnp.concatenate([jnp.zeros((F, Kt - 1, H), f32), z],
                                 axis=1).astype(bf16)
            acc1 = jnp.zeros((F * T, half), f32)
            acc2 = jnp.zeros((F * T, half), f32)
            for k in range(Kt):
                xs = zp[:, k:k + T, :].reshape(F * T, H)
                acc1 = acc1 + jnp.dot(xs[:, :half], lt_w1[k],
                                      preferred_element_type=f32)
                acc2 = acc2 + jnp.dot(xs[:, half:], lt_w2[k],
                                      preferred_element_type=f32)
            yt = jnp.concatenate([acc1, acc2], axis=-1).reshape(F, T, H) + lt_b[...]
            x3 = x2 + yt * jax.nn.sigmoid(yt)
        else:
            x3 = x2

        xo_ref[0] = x3.astype(xo_ref.dtype)
    return kernel


def fused_block(X, h0, c0, bp, with_local_t):
    B, F, T, H = X.shape
    args = [X, h0, c0,
            bp["loc_w"], bp["loc_b"], bp["ln_g"], bp["ln_b"],
            bp["lstm_wih_f"], bp["lstm_whh_f"], bp["lstm_b_f"],
            bp["lstm_wih_b"], bp["lstm_whh_b"], bp["lstm_b_b"],
            bp["proj_wf"], bp["proj_wb"], bp["proj_b"]]
    in_specs = [pl.BlockSpec((1, F, T, H), lambda b: (b, 0, 0, 0)),
                pl.BlockSpec((2, 1, T, H), lambda b: (0, b, 0, 0)),
                pl.BlockSpec((2, 1, T, H), lambda b: (0, b, 0, 0))]
    in_specs += [_const_spec(a.shape) for a in args[3:]]
    if with_local_t:
        extra = [bp["lt_ln_g"], bp["lt_ln_b"], bp["lt_w1"], bp["lt_w2"], bp["lt_b"]]
        args += extra
        in_specs += [_const_spec(a.shape) for a in extra]
    out_shape = (jax.ShapeDtypeStruct((B, F, T, H), X.dtype),
                 jax.ShapeDtypeStruct((2, B, T, H), X.dtype),
                 jax.ShapeDtypeStruct((2, B, T, H), X.dtype))
    out_specs = (pl.BlockSpec((1, F, T, H), lambda b: (b, 0, 0, 0)),
                 pl.BlockSpec((2, 1, T, H), lambda b: (0, b, 0, 0)),
                 pl.BlockSpec((2, 1, T, H), lambda b: (0, b, 0, 0)))
    return pl.pallas_call(
        _make_block_kernel(with_local_t),
        grid=(B,),
        in_specs=in_specs,
        out_specs=out_specs,
        out_shape=out_shape,
        scratch_shapes=[pltpu.VMEM((F, T, H), jnp.float32),
                        pltpu.VMEM((F, T, H), jnp.float32)],
        compiler_params=pltpu.CompilerParams(
            dimension_semantics=("parallel",),
            vmem_limit_bytes=64 * 1024 * 1024),
    )(*args)


# ----------------------------------------------------------------------------
# Kernel C: fused h-net / c-net (uni-directional LSTM over T + per-step LN + residual)
# Both nets share one kernel; their independent recurrences are interleaved.
# ----------------------------------------------------------------------------
def _hc_net_kernel(x_ref, wih_ref, whh_ref, b_ref, g_ref, be_ref, o_ref):
    f32 = jnp.float32
    bf16 = jnp.bfloat16
    S, B, T, D = x_ref.shape
    xs_all, xg_all, whh_all = [], [], []
    for s in range(S):
        xs = x_ref[s].astype(f32)                            # (B, T, D)
        xg = (jnp.dot(xs.astype(bf16).reshape(B * T, D), wih_ref[s],
                      preferred_element_type=f32)
              + b_ref[s]).reshape(B, T, 4 * D)
        xs_all.append(xs)
        xg_all.append(xg)
        whh_all.append(whh_ref[s])
    h = [jnp.zeros((B, D), f32) for _ in range(S)]
    c = [jnp.zeros((B, D), f32) for _ in range(S)]
    for t in range(T):
        for s in range(S):                                   # interleave independent nets
            gates = xg_all[s][:, t, :] + jnp.dot(h[s].astype(bf16), whh_all[s],
                                                 preferred_element_type=f32)
            i_g = jax.nn.sigmoid(gates[:, 0 * D:1 * D])
            f_g = jax.nn.sigmoid(gates[:, 1 * D:2 * D])
            g_g = jnp.tanh(gates[:, 2 * D:3 * D])
            o_g = jax.nn.sigmoid(gates[:, 3 * D:4 * D])
            c[s] = f_g * c[s] + i_g * g_g
            h[s] = o_g * jnp.tanh(c[s])
            # fused per-step LayerNorm + residual, streamed straight to the output
            m = jnp.mean(h[s], axis=-1, keepdims=True)
            v = jnp.mean((h[s] - m) ** 2, axis=-1, keepdims=True)
            yln = (h[s] - m) * jax.lax.rsqrt(v + 1e-5) * g_ref[s] + be_ref[s]
            o_ref[s * T + t] = (yln + xs_all[s][:, t, :]).astype(o_ref.dtype)


def hc_nets(x_stacked, wih, whh, b, g, be):
    S, B, T, D = x_stacked.shape
    out = pl.pallas_call(
        _hc_net_kernel,
        in_specs=[VMEM_SPEC] * 6,
        out_specs=VMEM_SPEC,
        out_shape=jax.ShapeDtypeStruct((S * T, B, D), x_stacked.dtype),
    )(x_stacked, wih, whh, b, g, be)
    return out.reshape(S, T, B, D)


# ----------------------------------------------------------------------------
# Parameter initialization (torch-like uniform(-1/sqrt(fan), +1/sqrt(fan)))
# Matmul weights are stored in bf16 (MXU operands); biases / LN params stay f32.
# ----------------------------------------------------------------------------
def _uniform(key, shape, fan):
    s = 1.0 / math.sqrt(fan)
    return jax.random.uniform(key, shape, jnp.float32, -s, s)


def init_params(key, cfg):
    H = cfg["hidden"]
    Cin, Cout = cfg["in_ch"], cfg["out_ch"]
    K, Kt, blocks = cfg["K"], cfg["Kt"], cfg["blocks"]
    bf16 = jnp.bfloat16
    keys = iter(jax.random.split(key, 1024))

    def u(shape, fan):
        return _uniform(next(keys), shape, fan)

    p = {}
    # encoder Conv1d(Cin -> H), torch weight layout [H, Cin, K]
    w = u((H, Cin, K), Cin * K)
    p["enc_w"] = jnp.transpose(w, (2, 1, 0)).astype(bf16)         # [K, Cin, H]
    p["enc_b"] = u((1, H), Cin * K)
    # decoder Conv1d(H -> Cout)
    w = u((Cout, H, K), H * K)
    p["dec_w"] = jnp.transpose(w, (2, 1, 0)).astype(bf16)         # [K, H, Cout]
    p["dec_b"] = u((1, Cout), H * K)

    p["blocks"] = []
    for i in range(blocks):
        bp = {}
        # local-F Conv2d(H, H, (1,5)), torch weight [H, H, 1, 5]
        w = u((H, H, 1, 5), H * 5)
        bp["loc_w"] = jnp.transpose(w[:, :, 0, :], (2, 1, 0)).astype(bf16)   # [5, Hin, Hout]
        bp["loc_b"] = u((1, H), H * 5)
        # global-F: LN + bi-LSTM(H->H) + Linear(2H->H)
        bp["ln_g"] = jnp.ones((1, H), jnp.float32)
        bp["ln_b"] = jnp.zeros((1, H), jnp.float32)
        for d in ("f", "b"):
            wih = u((4 * H, H), H)
            whh = u((4 * H, H), H)
            bih = u((4 * H,), H)
            bhh = u((4 * H,), H)
            bp[f"lstm_wih_{d}"] = wih.T.astype(bf16)              # [H, 4H]
            bp[f"lstm_whh_{d}"] = whh.T.astype(bf16)              # [H, 4H]
            bp[f"lstm_b_{d}"] = (bih + bhh).reshape(1, 4 * H)
        wp = u((H, 2 * H), 2 * H).T                               # [2H, H]
        bp["proj_wf"] = wp[:H].astype(bf16)
        bp["proj_wb"] = wp[H:].astype(bf16)
        bp["proj_b"] = u((1, H), 2 * H)
        # local-T: LN(seq_last) + grouped causal Conv1d(H, H, Kt, groups=2) + SiLU
        if cfg["with_local_t"]:
            bp["lt_ln_g"] = jnp.ones((1, H), jnp.float32)
            bp["lt_ln_b"] = jnp.zeros((1, H), jnp.float32)
            half = H // 2
            w = u((H, half, Kt), half * Kt)                       # torch grouped weight
            bp["lt_w1"] = jnp.transpose(w[:half], (2, 1, 0)).astype(bf16)   # [Kt, h, h]
            bp["lt_w2"] = jnp.transpose(w[half:], (2, 1, 0)).astype(bf16)   # [Kt, h, h]
            bp["lt_b"] = u((1, H), half * Kt)
        # h-net / c-net (only for i < blocks-1), stacked for the fused kernel
        if i < blocks - 1:
            D = 2 * H
            wihs, whhs, bs, gs, bes = [], [], [], [], []
            for name, flag in (("h", cfg["with_h_net"]), ("c", cfg["with_c_net"])):
                if not flag:
                    continue
                wih = u((4 * D, D), D)
                whh = u((4 * D, D), D)
                bih = u((4 * D,), D)
                bhh = u((4 * D,), D)
                wihs.append(wih.T.astype(bf16))
                whhs.append(whh.T.astype(bf16))
                bs.append((bih + bhh).reshape(1, 4 * D))
                gs.append(jnp.ones((1, D), jnp.float32))
                bes.append(jnp.zeros((1, D), jnp.float32))
            if wihs:
                bp["hc_wih"] = jnp.stack(wihs)
                bp["hc_whh"] = jnp.stack(whhs)
                bp["hc_b"] = jnp.stack(bs)
                bp["hc_ln_g"] = jnp.stack(gs)
                bp["hc_ln_b"] = jnp.stack(bes)
        p["blocks"].append(bp)
    return p


# ----------------------------------------------------------------------------
# Full forward pass (only cheap metadata reshapes / tiny state transposes in JAX)
# ----------------------------------------------------------------------------
def tf_skimnet_forward(X, params, cfg):
    B, F, T, Cin = X.shape
    H = cfg["hidden"]
    blocks = cfg["blocks"]

    # encoder: causal conv over T, Cin -> H  (single un-gridded slab)
    xe = causal_conv1d(X.reshape(B * F, T, Cin), params["enc_w"], params["enc_b"])
    X = xe.reshape(B, F, T, H)

    hc = None
    for i in range(blocks):
        bp = params["blocks"][i]
        if hc is None:
            h0 = jnp.zeros((2, B, T, H), jnp.float32)
            c0 = jnp.zeros((2, B, T, H), jnp.float32)
        else:
            h0, c0 = hc
        X, hfin, cfin = fused_block(X, h0, c0, bp, cfg["with_local_t"])

        if cfg["with_global_t"]:
            if i < blocks - 1:
                h = jnp.transpose(hfin, (1, 2, 0, 3)).reshape(B, T, 2 * H)
                c = jnp.transpose(cfin, (1, 2, 0, 3)).reshape(B, T, 2 * H)
                nets = []
                if cfg["with_h_net"]:
                    nets.append("h")
                if cfg["with_c_net"]:
                    nets.append("c")
                if nets:
                    xin = jnp.stack([h if n == "h" else c for n in nets], axis=0)
                    out = hc_nets(xin, bp["hc_wih"], bp["hc_whh"], bp["hc_b"],
                                  bp["hc_ln_g"], bp["hc_ln_b"])    # (S, T, B, 2H)
                    for idx, n in enumerate(nets):
                        val = jnp.transpose(out[idx], (1, 0, 2))   # (B, T, 2H)
                        if n == "h":
                            h = val
                        else:
                            c = val
                h0n = jnp.transpose(h.reshape(B, T, 2, H), (2, 0, 1, 3))
                c0n = jnp.transpose(c.reshape(B, T, 2, H), (2, 0, 1, 3))
                hc = (h0n, c0n)
        else:
            hc = None

    # decoder: causal conv over T, H -> out_ch
    xd = causal_conv1d(X.reshape(B * F, T, H), params["dec_w"], params["dec_b"])
    return xd.reshape(B, F, T, cfg["out_ch"])


# ----------------------------------------------------------------------------
if __name__ == "__main__":
    cfg = dict(
        blocks=2, in_ch=4, out_ch=4, hidden=32, K=3, Kt=3,
        with_h_net=True, with_c_net=True, with_global_t=True, with_local_t=True,
    )
    # NOTE: dim_t_local must equal hidden_size for the module's local-T path (as in torch).

    key = jax.random.PRNGKey(0)
    pkey, xkey = jax.random.split(key)
    params = init_params(pkey, cfg)

    B, F, T = 2, 4, 8
    X = jax.random.normal(xkey, (B, F, T, cfg["in_ch"]), jnp.float32)

    fwd = jax.jit(lambda x: tf_skimnet_forward(x, params, cfg))
    Y = fwd(X)
    jax.block_until_ready(Y)

    assert Y.shape == (B, F, T, cfg["out_ch"]), Y.shape
    assert bool(jnp.all(jnp.isfinite(Y)))
    print("KERNEL_OK")
</pallas_src>

<mosaic_0001>
module attributes {stable_mosaic.version = 11 : i64} {
  func.func @_causal_conv1d_kernel(%arg0: memref<8x8x4xf32, #tpu.memory_space<vmem>>, %arg1: memref<3x4x32xbf16, #tpu.memory_space<vmem>>, %arg2: memref<1x32xf32, #tpu.memory_space<vmem>>, %arg3: memref<8x8x32xf32, #tpu.memory_space<vmem>>) attributes {dimension_semantics = [], scalar_prefetch = 0 : i64, scratch_operands = 0 : i64, tpu.core_type = #tpu.core_type<tc>} {
    %c0 = arith.constant 0 : index
    %c0_0 = arith.constant 0 : index
    %c0_1 = arith.constant 0 : index
    %0 = vector.load %arg0[%c0, %c0_0, %c0_1] : memref<8x8x4xf32, #tpu.memory_space<vmem>>, vector<8x8x4xf32>
    %cst = arith.constant 0.000000e+00 : f32
    %1 = vector.broadcast %cst : f32 to vector<8x2x4xf32>
    %2 = tpu.concatenate %1, %0 in 1 : vector<8x2x4xf32>, vector<8x8x4xf32> -> vector<8x10x4xf32>
    %3 = arith.truncf %2 : vector<8x10x4xf32> to vector<8x10x4xbf16>
    %cst_2 = arith.constant 0.000000e+00 : f32
    %4 = vector.broadcast %cst_2 : f32 to vector<64x32xf32>
    %5 = vector.extract_strided_slice %3 {offsets = [0, 0, 0], sizes = [8, 8, 4], strides = [1, 1, 1]} : vector<8x10x4xbf16> to vector<8x8x4xbf16>
    %6 = vector.shape_cast %5 : vector<8x8x4xbf16> to vector<64x4xbf16>
    %c0_3 = arith.constant 0 : index
    %c0_4 = arith.constant 0 : index
    %c0_5 = arith.constant 0 : index
    %7 = vector.load %arg1[%c0_3, %c0_4, %c0_5] : memref<3x4x32xbf16, #tpu.memory_space<vmem>>, vector<1x4x32xbf16>
    %8 = vector.shape_cast %7 : vector<1x4x32xbf16> to vector<4x32xbf16>
    %cst_6 = arith.constant dense<0.000000e+00> : vector<64x32xf32>
    %9 = tpu.matmul %6, %8, %cst_6 {dimension_numbers = #tpu.dot_dimension_numbers<[1], [0], [0], [1], [0, 0, 1, 1], [], []>} : vector<64x4xbf16>, vector<4x32xbf16>, vector<64x32xf32> -> vector<64x32xf32>
    %10 = arith.addf %4, %9 : vector<64x32xf32>
    %11 = vector.extract_strided_slice %3 {offsets = [0, 1, 0], sizes = [8, 8, 4], strides = [1, 1, 1]} : vector<8x10x4xbf16> to vector<8x8x4xbf16>
    %12 = vector.shape_cast %11 : vector<8x8x4xbf16> to vector<64x4xbf16>
    %c1 = arith.constant 1 : index
    %c0_7 = arith.constant 0 : index
    %c0_8 = arith.constant 0 : index
    %13 = vector.load %arg1[%c1, %c0_7, %c0_8] : memref<3x4x32xbf16, #tpu.memory_space<vmem>>, vector<1x4x32xbf16>
    %14 = vector.shape_cast %13 : vector<1x4x32xbf16> to vector<4x32xbf16>
    %cst_9 = arith.constant dense<0.000000e+00> : vector<64x32xf32>
    %15 = tpu.matmul %12, %14, %cst_9 {dimension_numbers = #tpu.dot_dimension_numbers<[1], [0], [0], [1], [0, 0, 1, 1], [], []>} : vector<64x4xbf16>, vector<4x32xbf16>, vector<64x32xf32> -> vector<64x32xf32>
    %16 = arith.addf %10, %15 : vector<64x32xf32>
    %17 = vector.extract_strided_slice %3 {offsets = [0, 2, 0], sizes = [8, 8, 4], strides = [1, 1, 1]} : vector<8x10x4xbf16> to vector<8x8x4xbf16>
    %18 = vector.shape_cast %17 : vector<8x8x4xbf16> to vector<64x4xbf16>
    %c2 = arith.constant 2 : index
    %c0_10 = arith.constant 0 : index
    %c0_11 = arith.constant 0 : index
    %19 = vector.load %arg1[%c2, %c0_10, %c0_11] : memref<3x4x32xbf16, #tpu.memory_space<vmem>>, vector<1x4x32xbf16>
    %20 = vector.shape_cast %19 : vector<1x4x32xbf16> to vector<4x32xbf16>
    %cst_12 = arith.constant dense<0.000000e+00> : vector<64x32xf32>
    %21 = tpu.matmul %18, %20, %cst_12 {dimension_numbers = #tpu.dot_dimension_numbers<[1], [0], [0], [1], [0, 0, 1, 1], [], []>} : vector<64x4xbf16>, vector<4x32xbf16>, vector<64x32xf32> -> vector<64x32xf32>
    %22 = arith.addf %16, %21 : vector<64x32xf32>
    %c0_13 = arith.constant 0 : index
    %c0_14 = arith.constant 0 : index
    %23 = vector.load %arg2[%c0_13, %c0_14] : memref<1x32xf32, #tpu.memory_space<vmem>>, vector<1x32xf32>
    %24 = vector.broadcast %23 : vector<1x32xf32> to vector<64x32xf32>
    %25 = arith.addf %22, %24 : vector<64x32xf32>
    %26 = vector.shape_cast %25 : vector<64x32xf32> to vector<8x8x32xf32>
    %c0_15 = arith.constant 0 : index
    %c0_16 = arith.constant 0 : index
    %c0_17 = arith.constant 0 : index
    %27 = vector.load %arg3[%c0_15, %c0_16, %c0_17] : memref<8x8x32xf32, #tpu.memory_space<vmem>>, vector<8x8x32xf32>
    tpu.vector_store %arg3[%c0_15, %c0_16, %c0_17], %26 {strides = array<i32>} : memref<8x8x32xf32, #tpu.memory_space<vmem>>, vector<8x8x32xf32>,
    return
  }
}

module attributes {stable_mosaic.version = 11 : i64} {
  func.func @kernel(%arg0: i32, %arg1: memref<1x4x8x32xf32, #tpu.memory_space<vmem>>, %arg2: memref<2x1x8x32xf32, #tpu.memory_space<vmem>>, %arg3: memref<2x1x8x32xf32, #tpu.memory_space<vmem>>, %arg4: memref<5x32x32xbf16, #tpu.memory_space<vmem>>, %arg5: memref<1x32xf32, #tpu.memory_space<vmem>>, %arg6: memref<1x32xf32, #tpu.memory_space<vmem>>, %arg7: memref<1x32xf32, #tpu.memory_space<vmem>>, %arg8: memref<32x128xbf16, #tpu.memory_space<vmem>>, %arg9: memref<32x128xbf16, #tpu.memory_space<vmem>>, %arg10: memref<1x128xf32, #tpu.memory_space<vmem>>, %arg11: memref<32x128xbf16, #tpu.memory_space<vmem>>, %arg12: memref<32x128xbf16, #tpu.memory_space<vmem>>, %arg13: memref<1x128xf32, #tpu.memory_space<vmem>>, %arg14: memref<32x32xbf16, #tpu.memory_space<vmem>>, %arg15: memref<32x32xbf16, #tpu.memory_space<vmem>>, %arg16: memref<1x32xf32, #tpu.memory_space<vmem>>, %arg17: memref<1x32xf32, #tpu.memory_space<vmem>>, %arg18: memref<1x32xf32, #tpu.memory_space<vmem>>, %arg19: memref<3x16x16xbf16, #tpu.memory_space<vmem>>, %arg20: memref<3x16x16xbf16, #tpu.memory_space<vmem>>, %arg21: memref<1x32xf32, #tpu.memory_space<vmem>>, %arg22: memref<1x4x8x32xf32, #tpu.memory_space<vmem>>, %arg23: memref<2x1x8x32xf32, #tpu.memory_space<vmem>>, %arg24: memref<2x1x8x32xf32, #tpu.memory_space<vmem>>, %arg25: memref<4x8x32xf32, #tpu.memory_space<vmem>>, %arg26: memref<4x8x32xf32, #tpu.memory_space<vmem>>) attributes {dimension_semantics = [#tpu.dimension_semantics<parallel>], iteration_bounds = array<i64: 2>, scalar_prefetch = 0 : i64, scratch_operands = 2 : i64, tpu.core_type = #tpu.core_type<tc>, window_params = [{transform_indices = @transform_0, window_bounds = array<i64: 1, 4, 8, 32>}, {transform_indices = @transform_1, window_bounds = array<i64: 2, 1, 8, 32>}, {transform_indices = @transform_2, window_bounds = array<i64: 2, 1, 8, 32>}, {pipeline_mode = #tpu.pipeline_mode<synchronous>, transform_indices = @transform_3, window_bounds = array<i64: 5, 32, 32>}, {pipeline_mode = #tpu.pipeline_mode<synchronous>, transform_indices = @transform_4, window_bounds = array<i64: 1, 32>}, {pipeline_mode = #tpu.pipeline_mode<synchronous>, transform_indices = @transform_5, window_bounds = array<i64: 1, 32>}, {pipeline_mode = #tpu.pipeline_mode<synchronous>, transform_indices = @transform_6, window_bounds = array<i64: 1, 32>}, {pipeline_mode = #tpu.pipeline_mode<synchronous>, transform_indices = @transform_7, window_bounds = array<i64: 32, 128>}, {pipeline_mode = #tpu.pipeline_mode<synchronous>, transform_indices = @transform_8, window_bounds = array<i64: 32, 128>}, {pipeline_mode = #tpu.pipeline_mode<synchronous>, transform_indices = @transform_9, window_bounds = array<i64: 1, 128>}, {pipeline_mode = #tpu.pipeline_mode<synchronous>, transform_indices = @transform_10, window_bounds = array<i64: 32, 128>}, {pipeline_mode = #tpu.pipeline_mode<synchronous>, transform_indices = @transform_11, window_bounds = array<i64: 32, 128>}, {pipeline_mode = #tpu.pipeline_mode<synchronous>, transform_indices = @transform_12, window_bounds = array<i64: 1, 128>}, {pipeline_mode = #tpu.pipeline_mode<synchronous>, transform_indices = @transform_13, window_bounds = array<i64: 32, 32>}, {pipeline_mode = #tpu.pipeline_mode<synchronous>, transform_indices = @transform_14, window_bounds = array<i64: 32, 32>}, {pipeline_mode = #tpu.pipeline_mode<synchronous>, transform_indices = @transform_15, window_bounds = array<i64: 1, 32>}, {pipeline_mode = #tpu.pipeline_mode<synchronous>, transform_indices = @transform_16, window_bounds = array<i64: 1, 32>}, {pipeline_mode = #tpu.pipeline_mode<synchronous>, transform_indices = @transform_17, window_bounds = array<i64: 1, 32>}, {pipeline_mode = #tpu.pipeline_mode<synchronous>, transform_indices = @transform_18, window_bounds = array<i64: 3, 16, 16>}, {pipeline_mode = #tpu.pipeline_mode<synchronous>, transform_indices = @transform_19, window_bounds = array<i64: 3, 16, 16>}, {pipeline_mode = #tpu.pipeline_mode<synchronous>, transform_indices = @transform_20, window_bounds = array<i64: 1, 32>}, {transform_indices = @transform_21, window_bounds = array<i64: 1, 4, 8, 32>}, {transform_indices = @transform_22, window_bounds = array<i64: 2, 1, 8, 32>}, {transform_indices = @transform_23, window_bounds = array<i64: 2, 1, 8, 32>}]} {
    %c0 = arith.constant 0 : index
    %c0_0 = arith.constant 0 : index
    %c0_1 = arith.constant 0 : index
    %c0_2 = arith.constant 0 : index
    %0 = vector.load %arg1[%c0, %c0_0, %c0_1, %c0_2] : memref<1x4x8x32xf32, #tpu.memory_space<vmem>>, vector<1x4x8x32xf32>
    %1 = vector.shape_cast %0 : vector<1x4x8x32xf32> to vector<4x8x32xf32>
    %cst = arith.constant 0.000000e+00 : f32
    %2 = vector.broadcast %cst : f32 to vector<2x8x32xf32>
    %3 = tpu.concatenate %2, %1, %2 in 0 : vector<2x8x32xf32>, vector<4x8x32xf32>, vector<2x8x32xf32> -> vector<8x8x32xf32>
    %4 = arith.truncf %3 : vector<8x8x32xf32> to vector<8x8x32xbf16>
    %cst_3 = arith.constant 0.000000e+00 : f32
    %5 = vector.broadcast %cst_3 : f32 to vector<32x32xf32>
    %6 = vector.extract_strided_slice %4 {offsets = [0, 0, 0], sizes = [4, 8, 32], strides = [1, 1, 1]} : vector<8x8x32xbf16> to vector<4x8x32xbf16>
    %7 = vector.shape_cast %6 : vector<4x8x32xbf16> to vector<32x32xbf16>
    %c0_4 = arith.constant 0 : index
    %c0_5 = arith.constant 0 : index
    %c0_6 = arith.constant 0 : index
    %8 = vector.load %arg4[%c0_4, %c0_5, %c0_6] : memref<5x32x32xbf16, #tpu.memory_space<vmem>>, vector<1x32x32xbf16>
    %9 = vector.shape_cast %8 : vector<1x32x32xbf16> to vector<32x32xbf16>
    %cst_7 = arith.constant dense<0.000000e+00> : vector<32x32xf32>
    %10 = tpu.matmul %7, %9, %cst_7 {dimension_numbers = #tpu.dot_dimension_numbers<[1], [0], [0], [1], [0, 0, 1, 1], [], []>} : vector<32x32xbf16>, vector<32x32xbf16>, vector<32x32xf32> -> vector<32x32xf32>
    %11 = arith.addf %5, %10 : vector<32x32xf32>
    %12 = vector.extract_strided_slice %4 {offsets = [1, 0, 0], sizes = [4, 8, 32], strides = [1, 1, 1]} : vector<8x8x32xbf16> to vector<4x8x32xbf16>
    %13 = vector.shape_cast %12 : vector<4x8x32xbf16> to vector<32x32xbf16>
    %c1 = arith.constant 1 : index
    %c0_8 = arith.constant 0 : index
    %c0_9 = arith.constant 0 : index
    %14 = vector.load %arg4[%c1, %c0_8, %c0_9] : memref<5x32x32xbf16, #tpu.memory_space<vmem>>, vector<1x32x32xbf16>
    %15 = vector.shape_cast %14 : vector<1x32x32xbf16> to vector<32x32xbf16>
    %cst_10 = arith.constant dense<0.000000e+00> : vector<32x32xf32>
    %16 = tpu.matmul %13, %15, %cst_10 {dimension_numbers = #tpu.dot_dimension_numbers<[1], [0], [0], [1], [0, 0, 1, 1], [], []>} : vector<32x32xbf16>, vector<32x32xbf16>, vector<32x32xf32> -> vector<32x32xf32>
    %17 = arith.addf %11, %16 : vector<32x32xf32>
    %18 = vector.extract_strided_slice %4 {offsets = [2, 0, 0], sizes = [4, 8, 32], strides = [1, 1, 1]} : vector<8x8x32xbf16> to vector<4x8x32xbf16>
    %19 = vector.shape_cast %18 : vector<4x8x32xbf16> to vector<32x32xbf16>
    %c2 = arith.constant 2 : index
    %c0_11 = arith.constant 0 : index
    %c0_12 = arith.constant 0 : index
    %20 = vector.load %arg4[%c2, %c0_11, %c0_12] : memref<5x32x32xbf16, #tpu.memory_space<vmem>>, vector<1x32x32xbf16>
    %21 = vector.shape_cast %20 : vector<1x32x32xbf16> to vector<32x32xbf16>
    %cst_13 = arith.constant dense<0.000000e+00> : vector<32x32xf32>
    %22 = tpu.matmul %19, %21, %cst_13 {dimension_numbers = #tpu.dot_dimension_numbers<[1], [0], [0], [1], [0, 0, 1, 1], [], []>} : vector<32x32xbf16>, vector<32x32xbf16>, vector<32x32xf32> -> vector<32x32xf32>
    %23 = arith.addf %17, %22 : vector<32x32xf32>
    %24 = vector.extract_strided_slice %4 {offsets = [3, 0, 0], sizes = [4, 8, 32], strides = [1, 1, 1]} : vector<8x8x32xbf16> to vector<4x8x32xbf16>
    %25 = vector.shape_cast %24 : vector<4x8x32xbf16> to vector<32x32xbf16>
    %c3 = arith.constant 3 : index
    %c0_14 = arith.constant 0 : index
    %c0_15 = arith.constant 0 : index
    %26 = vector.load %arg4[%c3, %c0_14, %c0_15] : memref<5x32x32xbf16, #tpu.memory_space<vmem>>, vector<1x32x32xbf16>
    %27 = vector.shape_cast %26 : vector<1x32x32xbf16> to vector<32x32xbf16>
    %cst_16 = arith.constant dense<0.000000e+00> : vector<32x32xf32>
    %28 = tpu.matmul %25, %27, %cst_16 {dimension_numbers = #tpu.dot_dimension_numbers<[1], [0], [0], [1], [0, 0, 1, 1], [], []>} : vector<32x32xbf16>, vector<32x32xbf16>, vector<32x32xf32> -> vector<32x32xf32>
    %29 = arith.addf %23, %28 : vector<32x32xf32>
    %30 = vector.extract_strided_slice %4 {offsets = [4, 0, 0], sizes = [4, 8, 32], strides = [1, 1, 1]} : vector<8x8x32xbf16> to vector<4x8x32xbf16>
    %31 = vector.shape_cast %30 : vector<4x8x32xbf16> to vector<32x32xbf16>
    %c4 = arith.constant 4 : index
    %c0_17 = arith.constant 0 : index
    %c0_18 = arith.constant 0 : index
    %32 = vector.load %arg4[%c4, %c0_17, %c0_18] : memref<5x32x32xbf16, #tpu.memory_space<vmem>>, vector<1x32x32xbf16>
    %33 = vector.shape_cast %32 : vector<1x32x32xbf16> to vector<32x32xbf16>
    %cst_19 = arith.constant dense<0.000000e+00> : vector<32x32xf32>
    %34 = tpu.matmul %31, %33, %cst_19 {dimension_numbers = #tpu.dot_dimension_numbers<[1], [0], [0], [1], [0, 0, 1, 1], [], []>} : vector<32x32xbf16>, vector<32x32xbf16>, vector<32x32xf32> -> vector<32x32xf32>
    %35 = arith.addf %29, %34 : vector<32x32xf32>
    %36 = vector.shape_cast %35 : vector<32x32xf32> to vector<4x8x32xf32>
    %c0_20 = arith.constant 0 : index
    %c0_21 = arith.constant 0 : index
    %37 = vector.load %arg5[%c0_20, %c0_21] : memref<1x32xf32, #tpu.memory_space<vmem>>, vector<1x32xf32>
    %38 = vector.shape_cast %37 : vector<1x32xf32> to vector<1x1x32xf32>
    %39 = vector.broadcast %38 : vector<1x1x32xf32> to vector<4x8x32xf32>
    %40 = arith.addf %36, %39 : vector<4x8x32xf32>
    %41 = arith.negf %40 : vector<4x8x32xf32>
    %42 = math.exp %41 : vector<4x8x32xf32>
    %cst_22 = arith.constant 1.000000e+00 : f32
    %43 = vector.broadcast %cst_22 : f32 to vector<4x8x32xf32>
    %44 = arith.addf %43, %42 : vector<4x8x32xf32>
    %45 = arith.divf %43, %44 : vector<4x8x32xf32>
    %46 = arith.mulf %40, %45 : vector<4x8x32xf32>
    %47 = arith.addf %1, %46 : vector<4x8x32xf32>
    %cst_23 = arith.constant dense<0.000000e+00> : vector<4x8xf32>
    %48 = vector.multi_reduction <add>, %47, %cst_23 [2] : vector<4x8x32xf32> to vector<4x8xf32>
    %49 = vector.shape_cast %48 : vector<4x8xf32> to vector<4x8x1xf32>
    %cst_24 = arith.constant 3.200000e+01 : f32
    %50 = vector.broadcast %cst_24 : f32 to vector<4x8x1xf32>
    %51 = arith.divf %49, %50 : vector<4x8x1xf32>
    %52 = vector.broadcast %51 : vector<4x8x1xf32> to vector<4x8x32xf32>
    %53 = arith.subf %47, %52 : vector<4x8x32xf32>
    %54 = arith.mulf %53, %53 : vector<4x8x32xf32>
    %cst_25 = arith.constant dense<0.000000e+00> : vector<4x8xf32>
    %55 = vector.multi_reduction <add>, %54, %cst_25 [2] : vector<4x8x32xf32> to vector<4x8xf32>
    %56 = vector.shape_cast %55 : vector<4x8xf32> to vector<4x8x1xf32>
    %cst_26 = arith.constant 3.200000e+01 : f32
    %57 = vector.broadcast %cst_26 : f32 to vector<4x8x1xf32>
    %58 = arith.divf %56, %57 : vector<4x8x1xf32>
    %59 = vector.broadcast %51 : vector<4x8x1xf32> to vector<4x8x32xf32>
    %60 = arith.subf %47, %59 : vector<4x8x32xf32>
    %cst_27 = arith.constant 9.99999974E-6 : f32
    %61 = vector.broadcast %cst_27 : f32 to vector<4x8x1xf32>
    %62 = arith.addf %58, %61 : vector<4x8x1xf32>
    %63 = math.rsqrt %62 : vector<4x8x1xf32>
    %64 = vector.broadcast %63 : vector<4x8x1xf32> to vector<4x8x32xf32>
    %65 = arith.mulf %60, %64 : vector<4x8x32xf32>
    %c0_28 = arith.constant 0 : index
    %c0_29 = arith.constant 0 : index
    %66 = vector.load %arg6[%c0_28, %c0_29] : memref<1x32xf32, #tpu.memory_space<vmem>>, vector<1x32xf32>
    %67 = vector.shape_cast %66 : vector<1x32xf32> to vector<1x1x32xf32>
    %68 = vector.broadcast %67 : vector<1x1x32xf32> to vector<4x8x32xf32>
    %69 = arith.mulf %65, %68 : vector<4x8x32xf32>
    %c0_30 = arith.constant 0 : index
    %c0_31 = arith.constant 0 : index
    %70 = vector.load %arg7[%c0_30, %c0_31] : memref<1x32xf32, #tpu.memory_space<vmem>>, vector<1x32xf32>
    %71 = vector.shape_cast %70 : vector<1x32xf32> to vector<1x1x32xf32>
    %72 = vector.broadcast %71 : vector<1x1x32xf32> to vector<4x8x32xf32>
    %73 = arith.addf %69, %72 : vector<4x8x32xf32>
    %74 = arith.truncf %73 : vector<4x8x32xf32> to vector<4x8x32xbf16>
    %75 = vector.shape_cast %74 : vector<4x8x32xbf16> to vector<32x32xbf16>
    %c0_32 = arith.constant 0 : index
    %c0_33 = arith.constant 0 : index
    %76 = vector.load %arg8[%c0_32, %c0_33] : memref<32x128xbf16, #tpu.memory_space<vmem>>, vector<32x128xbf16>
    %cst_34 = arith.constant dense<0.000000e+00> : vector<32x128xf32>
    %77 = tpu.matmul %75, %76, %cst_34 {dimension_numbers = #tpu.dot_dimension_numbers<[1], [0], [0], [1], [0, 0, 1, 1], [], []>} : vector<32x32xbf16>, vector<32x128xbf16>, vector<32x128xf32> -> vector<32x128xf32>
    %c0_35 = arith.constant 0 : index
    %c0_36 = arith.constant 0 : index
    %78 = vector.load %arg10[%c0_35, %c0_36] : memref<1x128xf32, #tpu.memory_space<vmem>>, vector<1x128xf32>
    %79 = vector.broadcast %78 : vector<1x128xf32> to vector<32x128xf32>
    %80 = arith.addf %77, %79 : vector<32x128xf32>
    %81 = vector.shape_cast %80 : vector<32x128xf32> to vector<4x8x128xf32>
    %c0_37 = arith.constant 0 : index
    %c0_38 = arith.constant 0 : index
    %82 = vector.load %arg11[%c0_37, %c0_38] : memref<32x128xbf16, #tpu.memory_space<vmem>>, vector<32x128xbf16>
    %cst_39 = arith.constant dense<0.000000e+00> : vector<32x128xf32>
    %83 = tpu.matmul %75, %82, %cst_39 {dimension_numbers = #tpu.dot_dimension_numbers<[1], [0], [0], [1], [0, 0, 1, 1], [], []>} : vector<32x32xbf16>, vector<32x128xbf16>, vector<32x128xf32> -> vector<32x128xf32>
    %c0_40 = arith.constant 0 : index
    %c0_41 = arith.constant 0 : index
    %84 = vector.load %arg13[%c0_40, %c0_41] : memref<1x128xf32, #tpu.memory_space<vmem>>, vector<1x128xf32>
    %85 = vector.broadcast %84 : vector<1x128xf32> to vector<32x128xf32>
    %86 = arith.addf %83, %85 : vector<32x128xf32>
    %87 = vector.shape_cast %86 : vector<32x128xf32> to vector<4x8x128xf32>
    %c0_42 = arith.constant 0 : index
    %c0_43 = arith.constant 0 : index
    %88 = vector.load %arg9[%c0_42, %c0_43] : memref<32x128xbf16, #tpu.memory_space<vmem>>, vector<32x128xbf16>
    %c0_44 = arith.constant 0 : index
    %c0_45 = arith.constant 0 : index
    %89 = vector.load %arg12[%c0_44, %c0_45] : memref<32x128xbf16, #tpu.memory_space<vmem>>, vector<32x128xbf16>
    %c0_46 = arith.constant 0 : index
    %c0_47 = arith.constant 0 : index
    %c0_48 = arith.constant 0 : index
    %c0_49 = arith.constant 0 : index
    %90 = vector.load %arg2[%c0_46, %c0_47, %c0_48, %c0_49] : memref<2x1x8x32xf32, #tpu.memory_space<vmem>>, vector<2x1x8x32xf32>
    %c0_50 = arith.constant 0 : index
    %c0_51 = arith.constant 0 : index
    %c0_52 = arith.constant 0 : index
    %c0_53 = arith.constant 0 : index
    %91 = vector.load %arg3[%c0_50, %c0_51, %c0_52, %c0_53] : memref<2x1x8x32xf32, #tpu.memory_space<vmem>>, vector<2x1x8x32xf32>
    %92 = vector.extract_strided_slice %90 {offsets = [0, 0, 0, 0], sizes = [1, 1, 8, 32], strides = [1, 1, 1, 1]} : vector<2x1x8x32xf32> to vector<1x1x8x32xf32>
    %93 = vector.shape_cast %92 : vector<1x1x8x32xf32> to vector<8x32xf32>
    %94 = vector.extract_strided_slice %91 {offsets = [0, 0, 0, 0], sizes = [1, 1, 8, 32], strides = [1, 1, 1, 1]} : vector<2x1x8x32xf32> to vector<1x1x8x32xf32>
    %95 = vector.shape_cast %94 : vector<1x1x8x32xf32> to vector<8x32xf32>
    %96 = vector.extract_strided_slice %90 {offsets = [1, 0, 0, 0], sizes = [1, 1, 8, 32], strides = [1, 1, 1, 1]} : vector<2x1x8x32xf32> to vector<1x1x8x32xf32>
    %97 = vector.shape_cast %96 : vector<1x1x8x32xf32> to vector<8x32xf32>
    %98 = vector.extract_strided_slice %91 {offsets = [1, 0, 0, 0], sizes = [1, 1, 8, 32], strides = [1, 1, 1, 1]} : vector<2x1x8x32xf32> to vector<1x1x8x32xf32>
    %99 = vector.shape_cast %98 : vector<1x1x8x32xf32> to vector<8x32xf32>
    %100 = vector.extract_strided_slice %81 {offsets = [0, 0, 0], sizes = [1, 8, 128], strides = [1, 1, 1]} : vector<4x8x128xf32> to vector<1x8x128xf32>
    %101 = vector.shape_cast %100 : vector<1x8x128xf32> to vector<8x128xf32>
    %102 = arith.truncf %93 : vector<8x32xf32> to vector<8x32xbf16>
    %cst_54 = arith.constant dense<0.000000e+00> : vector<8x128xf32>
    %103 = tpu.matmul %102, %88, %cst_54 {dimension_numbers = #tpu.dot_dimension_numbers<[1], [0], [0], [1], [0, 0, 1, 1], [], []>} : vector<8x32xbf16>, vector<32x128xbf16>, vector<8x128xf32> -> vector<8x128xf32>
    %104 = arith.addf %101, %103 : vector<8x128xf32>
    %105 = vector.extract_strided_slice %87 {offsets = [3, 0, 0], sizes = [1, 8, 128], strides = [1, 1, 1]} : vector<4x8x128xf32> to vector<1x8x128xf32>
    %106 = vector.shape_cast %105 : vector<1x8x128xf32> to vector<8x128xf32>
    %107 = arith.truncf %97 : vector<8x32xf32> to vector<8x32xbf16>
    %cst_55 = arith.constant dense<0.000000e+00> : vector<8x128xf32>
    %108 = tpu.matmul %107, %89, %cst_55 {dimension_numbers = #tpu.dot_dimension_numbers<[1], [0], [0], [1], [0, 0, 1, 1], [], []>} : vector<8x32xbf16>, vector<32x128xbf16>, vector<8x128xf32> -> vector<8x128xf32>
    %109 = arith.addf %106, %108 : vector<8x128xf32>
    %110 = vector.extract_strided_slice %104 {offsets = [0, 0], sizes = [8, 32], strides = [1, 1]} : vector<8x128xf32> to vector<8x32xf32>
    %111 = arith.negf %110 : vector<8x32xf32>
    %112 = math.exp %111 : vector<8x32xf32>
    %cst_56 = arith.constant 1.000000e+00 : f32
    %113 = vector.broadcast %cst_56 : f32 to vector<8x32xf32>
    %114 = arith.addf %113, %112 : vector<8x32xf32>
    %115 = arith.divf %113, %114 : vector<8x32xf32>
    %116 = vector.extract_strided_slice %104 {offsets = [0, 32], sizes = [8, 32], strides = [1, 1]} : vector<8x128xf32> to vector<8x32xf32>
    %117 = arith.negf %116 : vector<8x32xf32>
    %118 = math.exp %117 : vector<8x32xf32>
    %cst_57 = arith.constant 1.000000e+00 : f32
    %119 = vector.broadcast %cst_57 : f32 to vector<8x32xf32>
    %120 = arith.addf %119, %118 : vector<8x32xf32>
    %121 = arith.divf %119, %120 : vector<8x32xf32>
    %122 = vector.extract_strided_slice %104 {offsets = [0, 64], sizes = [8, 32], strides = [1, 1]} : vector<8x128xf32> to vector<8x32xf32>
    %123 = math.tanh %122 : vector<8x32xf32>
    %124 = vector.extract_strided_slice %104 {offsets = [0, 96], sizes = [8, 32], strides = [1, 1]} : vector<8x128xf32> to vector<8x32xf32>
    %125 = arith.negf %124 : vector<8x32xf32>
    %126 = math.exp %125 : vector<8x32xf32>
    %cst_58 = arith.constant 1.000000e+00 : f32
    %127 = vector.broadcast %cst_58 : f32 to vector<8x32xf32>
    %128 = arith.addf %127, %126 : vector<8x32xf32>
    %129 = arith.divf %127, %128 : vector<8x32xf32>
    %130 = arith.mulf %121, %95 : vector<8x32xf32>
    %131 = arith.mulf %115, %123 : vector<8x32xf32>
    %132 = arith.addf %130, %131 : vector<8x32xf32>
    %133 = math.tanh %132 : vector<8x32xf32>
    %134 = arith.mulf %129, %133 : vector<8x32xf32>
    %135 = vector.extract_strided_slice %109 {offsets = [0, 0], sizes = [8, 32], strides = [1, 1]} : vector<8x128xf32> to vector<8x32xf32>
    %136 = arith.negf %135 : vector<8x32xf32>
    %137 = math.exp %136 : vector<8x32xf32>
    %cst_59 = arith.constant 1.000000e+00 : f32
    %138 = vector.broadcast %cst_59 : f32 to vector<8x32xf32>
    %139 = arith.addf %138, %137 : vector<8x32xf32>
    %140 = arith.divf %138, %139 : vector<8x32xf32>
    %141 = vector.extract_strided_slice %109 {offsets = [0, 32], sizes = [8, 32], strides = [1, 1]} : vector<8x128xf32> to vector<8x32xf32>
    %142 = arith.negf %141 : vector<8x32xf32>
    %143 = math.exp %142 : vector<8x32xf32>
    %cst_60 = arith.constant 1.000000e+00 : f32
    %144 = vector.broadcast %cst_60 : f32 to vector<8x32xf32>
    %145 = arith.addf %144, %143 : vector<8x32xf32>
    %146 = arith.divf %144, %145 : vector<8x32xf32>
    %147 = vector.extract_strided_slice %109 {offsets = [0, 64], sizes = [8, 32], strides = [1, 1]} : vector<8x128xf32> to vector<8x32xf32>
    %148 = math.tanh %147 : vector<8x32xf32>
    %149 = vector.extract_strided_slice %109 {offsets = [0, 96], sizes = [8, 32], strides = [1, 1]} : vector<8x128xf32> to vector<8x32xf32>
    %150 = arith.negf %149 : vector<8x32xf32>
    %151 = math.exp %150 : vector<8x32xf32>
    %cst_61 = arith.constant 1.000000e+00 : f32
    %152 = vector.broadcast %cst_61 : f32 to vector<8x32xf32>
    %153 = arith.addf %152, %151 : vector<8x32xf32>
    %154 = arith.divf %152, %153 : vector<8x32xf32>
    %155 = arith.mulf %146, %99 : vector<8x32xf32>
    %156 = arith.mulf %140, %148 : vector<8x32xf32>
    %157 = arith.addf %155, %156 : vector<8x32xf32>
    %158 = math.tanh %157 : vector<8x32xf32>
    %159 = arith.mulf %154, %158 : vector<8x32xf32>
    %c0_62 = arith.constant 0 : index
    %c0_63 = arith.constant 0 : index
    %c0_64 = arith.constant 0 : index
    %160 = vector.load %arg25[%c0_62, %c0_63, %c0_64] : memref<4x8x32xf32, #tpu.memory_space<vmem>>, vector<1x8x32xf32>
    %161 = vector.shape_cast %160 : vector<1x8x32xf32> to vector<8x32xf32>
    %162 = vector.shape_cast %134 : vector<8x32xf32> to vector<1x8x32xf32>
    tpu.vector_store %arg25[%c0_62, %c0_63, %c0_64], %162 {strides = array<i32>} : memref<4x8x32xf32, #tpu.memory_space<vmem>>, vector<1x8x32xf32>,
    %c3_65 = arith.constant 3 : index
    %c0_66 = arith.constant 0 : index
    %c0_67 = arith.constant 0 : index
    %163 = vector.load %arg26[%c3_65, %c0_66, %c0_67] : memref<4x8x32xf32, #tpu.memory_space<vmem>>, vector<1x8x32xf32>
    %164 = vector.shape_cast %163 : vector<1x8x32xf32> to vector<8x32xf32>
    %165 = vector.shape_cast %159 : vector<8x32xf32> to vector<1x8x32xf32>
    tpu.vector_store %arg26[%c3_65, %c0_66, %c0_67], %165 {strides = array<i32>} : memref<4x8x32xf32, #tpu.memory_space<vmem>>, vector<1x8x32xf32>,
    %166 = vector.extract_strided_slice %81 {offsets = [1, 0, 0], sizes = [1, 8, 128], strides = [1, 1, 1]} : vector<4x8x128xf32> to vector<1x8x128xf32>
    %167 = vector.shape_cast %166 : vector<1x8x128xf32> to vector<8x128xf32>
    %168 = arith.truncf %134 : vector<8x32xf32> to vector<8x32xbf16>
    %cst_68 = arith.constant dense<0.000000e+00> : vector<8x128xf32>
    %169 = tpu.matmul %168, %88, %cst_68 {dimension_numbers = #tpu.dot_dimension_numbers<[1], [0], [0], [1], [0, 0, 1, 1], [], []>} : vector<8x32xbf16>, vector<32x128xbf16>, vector<8x128xf32> -> vector<8x128xf32>
    %170 = arith.addf %167, %169 : vector<8x128xf32>
    %171 = vector.extract_strided_slice %87 {offsets = [2, 0, 0], sizes = [1, 8, 128], strides = [1, 1, 1]} : vector<4x8x128xf32> to vector<1x8x128xf32>
    %172 = vector.shape_cast %171 : vector<1x8x128xf32> to vector<8x128xf32>
    %173 = arith.truncf %159 : vector<8x32xf32> to vector<8x32xbf16>
    %cst_69 = arith.constant dense<0.000000e+00> : vector<8x128xf32>
    %174 = tpu.matmul %173, %89, %cst_69 {dimension_numbers = #tpu.dot_dimension_numbers<[1], [0], [0], [1], [0, 0, 1, 1], [], []>} : vector<8x32xbf16>, vector<32x128xbf16>, vector<8x128xf32> -> vector<8x128xf32>
    %175 = arith.addf %172, %174 : vector<8x128xf32>
    %176 = vector.extract_strided_slice %170 {offsets = [0, 0], sizes = [8, 32], strides = [1, 1]} : vector<8x128xf32> to vector<8x32xf32>
    %177 = arith.negf %176 : vector<8x32xf32>
    %178 = math.exp %177 : vector<8x32xf32>
    %cst_70 = arith.constant 1.000000e+00 : f32
    %179 = vector.broadcast %cst_70 : f32 to vector<8x32xf32>
    %180 = arith.addf %179, %178 : vector<8x32xf32>
    %181 = arith.divf %179, %180 : vector<8x32xf32>
    %182 = vector.extract_strided_slice %170 {offsets = [0, 32], sizes = [8, 32], strides = [1, 1]} : vector<8x128xf32> to vector<8x32xf32>
    %183 = arith.negf %182 : vector<8x32xf32>
    %184 = math.exp %183 : vector<8x32xf32>
    %cst_71 = arith.constant 1.000000e+00 : f32
    %185 = vector.broadcast %cst_71 : f32 to vector<8x32xf32>
    %186 = arith.addf %185, %184 : vector<8x32xf32>
    %187 = arith.divf %185, %186 : vector<8x32xf32>
    %188 = vector.extract_strided_slice %170 {offsets = [0, 64], sizes = [8, 32], strides = [1, 1]} : vector<8x128xf32> to vector<8x32xf32>
    %189 = math.tanh %188 : vector<8x32xf32>
    %190 = vector.extract_strided_slice %170 {offsets = [0, 96], sizes = [8, 32], strides = [1, 1]} : vector<8x128xf32> to vector<8x32xf32>
    %191 = arith.negf %190 : vector<8x32xf32>
    %192 = math.exp %191 : vector<8x32xf32>
    %cst_72 = arith.constant 1.000000e+00 : f32
    %193 = vector.broadcast %cst_72 : f32 to vector<8x32xf32>
    %194 = arith.addf %193, %192 : vector<8x32xf32>
    %195 = arith.divf %193, %194 : vector<8x32xf32>
    %196 = arith.mulf %187, %132 : vector<8x32xf32>
    %197 = arith.mulf %181, %189 : vector<8x32xf32>
    %198 = arith.addf %196, %197 : vector<8x32xf32>
    %199 = math.tanh %198 : vector<8x32xf32>
    %200 = arith.mulf %195, %199 : vector<8x32xf32>
    %201 = vector.extract_strided_slice %175 {offsets = [0, 0], sizes = [8, 32], strides = [1, 1]} : vector<8x128xf32> to vector<8x32xf32>
    %202 = arith.negf %201 : vector<8x32xf32>
    %203 = math.exp %202 : vector<8x32xf32>
    %cst_73 = arith.constant 1.000000e+00 : f32
    %204 = vector.broadcast %cst_73 : f32 to vector<8x32xf32>
    %205 = arith.addf %204, %203 : vector<8x32xf32>
    %206 = arith.divf %204, %205 : vector<8x32xf32>
    %207 = vector.extract_strided_slice %175 {offsets = [0, 32], sizes = [8, 32], strides = [1, 1]} : vector<8x128xf32> to vector<8x32xf32>
    %208 = arith.negf %207 : vector<8x32xf32>
    %209 = math.exp %208 : vector<8x32xf32>
    %cst_74 = arith.constant 1.000000e+00 : f32
    %210 = vector.broadcast %cst_74 : f32 to vector<8x32xf32>
    %211 = arith.addf %210, %209 : vector<8x32xf32>
    %212 = arith.divf %210, %211 : vector<8x32xf32>
    %213 = vector.extract_strided_slice %175 {offsets = [0, 64], sizes = [8, 32], strides = [1, 1]} : vector<8x128xf32> to vector<8x32xf32>
    %214 = math.tanh %213 : vector<8x32xf32>
    %215 = vector.extract_strided_slice %175 {offsets = [0, 96], sizes = [8, 32], strides = [1, 1]} : vector<8x128xf32> to vector<8x32xf32>
    %216 = arith.negf %215 : vector<8x32xf32>
    %217 = math.exp %216 : vector<8x32xf32>
    %cst_75 = arith.constant 1.000000e+00 : f32
    %218 = vector.broadcast %cst_75 : f32 to vector<8x32xf32>
    %219 = arith.addf %218, %217 : vector<8x32xf32>
    %220 = arith.divf %218, %219 : vector<8x32xf32>
    %221 = arith.mulf %212, %157 : vector<8x32xf32>
    %222 = arith.mulf %206, %214 : vector<8x32xf32>
    %223 = arith.addf %221, %222 : vector<8x32xf32>
    %224 = math.tanh %223 : vector<8x32xf32>
    %225 = arith.mulf %220, %224 : vector<8x32xf32>
    %c1_76 = arith.constant 1 : index
    %c0_77 = arith.constant 0 : index
    %c0_78 = arith.constant 0 : index
    %226 = vector.load %arg25[%c1_76, %c0_77, %c0_78] : memref<4x8x32xf32, #tpu.memory_space<vmem>>, vector<1x8x32xf32>
    %227 = vector.shape_cast %226 : vector<1x8x32xf32> to vector<8x32xf32>
    %228 = vector.shape_cast %200 : vector<8x32xf32> to vector<1x8x32xf32>
    tpu.vector_store %arg25[%c1_76, %c0_77, %c0_78], %228 {strides = array<i32>} : memref<4x8x32xf32, #tpu.memory_space<vmem>>, vector<1x8x32xf32>,
    %c2_79 = arith.constant 2 : index
    %c0_80 = arith.constant 0 : index
    %c0_81 = arith.constant 0 : index
    %229 = vector.load %arg26[%c2_79, %c0_80, %c0_81] : memref<4x8x32xf32, #tpu.memory_space<vmem>>, vector<1x8x32xf32>
    %230 = vector.shape_cast %229 : vector<1x8x32xf32> to vector<8x32xf32>
    %231 = vector.shape_cast %225 : vector<8x32xf32> to vector<1x8x32xf32>
    tpu.vector_store %arg26[%c2_79, %c0_80, %c0_81], %231 {strides = array<i32>} : memref<4x8x32xf32, #tpu.memory_space<vmem>>, vector<1x8x32xf32>,
    %232 = vector.extract_strided_slice %81 {offsets = [2, 0, 0], sizes = [1, 8, 128], strides = [1, 1, 1]} : vector<4x8x128xf32> to vector<1x8x128xf32>
    %233 = vector.shape_cast %232 : vector<1x8x128xf32> to vector<8x128xf32>
    %234 = arith.truncf %200 : vector<8x32xf32> to vector<8x32xbf16>
    %cst_82 = arith.constant dense<0.000000e+00> : vector<8x128xf32>
    %235 = tpu.matmul %234, %88, %cst_82 {dimension_numbers = #tpu.dot_dimension_numbers<[1], [0], [0], [1], [0, 0, 1, 1], [], []>} : vector<8x32xbf16>, vector<32x128xbf16>, vector<8x128xf32> -> vector<8x128xf32>
    %236 = arith.addf %233, %235 : vector<8x128xf32>
    %237 = vector.extract_strided_slice %87 {offsets = [1, 0, 0], sizes = [1, 8, 128], strides = [1, 1, 1]} : vector<4x8x128xf32> to vector<1x8x128xf32>
    %238 = vector.shape_cast %237 : vector<1x8x128xf32> to vector<8x128xf32>
    %239 = arith.truncf %225 : vector<8x32xf32> to vector<8x32xbf16>
    %cst_83 = arith.constant dense<0.000000e+00> : vector<8x128xf32>
    %240 = tpu.matmul %239, %89, %cst_83 {dimension_numbers = #tpu.dot_dimension_numbers<[1], [0], [0], [1], [0, 0, 1, 1], [], []>} : vector<8x32xbf16>, vector<32x128xbf16>, vector<8x128xf32> -> vector<8x128xf32>
    %241 = arith.addf %238, %240 : vector<8x128xf32>
    %242 = vector.extract_strided_slice %236 {offsets = [0, 0], sizes = [8, 32], strides = [1, 1]} : vector<8x128xf32> to vector<8x32xf32>
    %243 = arith.negf %242 : vector<8x32xf32>
    %244 = math.exp %243 : vector<8x32xf32>
    %cst_84 = arith.constant 1.000000e+00 : f32
    %245 = vector.broadcast %cst_84 : f32 to vector<8x32xf32>
    %246 = arith.addf %245, %244 : vector<8x32xf32>
    %247 = arith.divf %245, %246 : vector<8x32xf32>
    %248 = vector.extract_strided_slice %236 {offsets = [0, 32], sizes = [8, 32], strides = [1, 1]} : vector<8x128xf32> to vector<8x32xf32>
    %249 = arith.negf %248 : vector<8x32xf32>
    %250 = math.exp %249 : vector<8x32xf32>
    %cst_85 = arith.constant 1.000000e+00 : f32
    %251 = vector.broadcast %cst_85 : f32 to vector<8x32xf32>
    %252 = arith.addf %251, %250 : vector<8x32xf32>
    %253 = arith.divf %251, %252 : vector<8x32xf32>
    %254 = vector.extract_strided_slice %236 {offsets = [0, 64], sizes = [8, 32], strides = [1, 1]} : vector<8x128xf32> to vector<8x32xf32>
    %255 = math.tanh %254 : vector<8x32xf32>
    %256 = vector.extract_strided_slice %236 {offsets = [0, 96], sizes = [8, 32], strides = [1, 1]} : vector<8x128xf32> to vector<8x32xf32>
    %257 = arith.negf %256 : vector<8x32xf32>
    %258 = math.exp %257 : vector<8x32xf32>
    %cst_86 = arith.constant 1.000000e+00 : f32
    %259 = vector.broadcast %cst_86 : f32 to vector<8x32xf32>
    %260 = arith.addf %259, %258 : vector<8x32xf32>
    %261 = arith.divf %259, %260 : vector<8x32xf32>
    %262 = arith.mulf %253, %198 : vector<8x32xf32>
    %263 = arith.mulf %247, %255 : vector<8x32xf32>
    %264 = arith.addf %262, %263 : vector<8x32xf32>
    %265 = math.tanh %264 : vector<8x32xf32>
    %266 = arith.mulf %261, %265 : vector<8x32xf32>
    %267 = vector.extract_strided_slice %241 {offsets = [0, 0], sizes = [8, 32], strides = [1, 1]} : vector<8x128xf32> to vector<8x32xf32>
    %268 = arith.negf %267 : vector<8x32xf32>
    %269 = math.exp %268 : vector<8x32xf32>
    %cst_87 = arith.constant 1.000000e+00 : f32
    %270 = vector.broadcast %cst_87 : f32 to vector<8x32xf32>
    %271 = arith.addf %270, %269 : vector<8x32xf32>
    %272 = arith.divf %270, %271 : vector<8x32xf32>
    %273 = vector.extract_strided_slice %241 {offsets = [0, 32], sizes = [8, 32], strides = [1, 1]} : vector<8x128xf32> to vector<8x32xf32>
    %274 = arith.negf %273 : vector<8x32xf32>
    %275 = math.exp %274 : vector<8x32xf32>
    %cst_88 = arith.constant 1.000000e+00 : f32
    %276 = vector.broadcast %cst_88 : f32 to vector<8x32xf32>
    %277 = arith.addf %276, %275 : vector<8x32xf32>
    %278 = arith.divf %276, %277 : vector<8x32xf32>
    %279 = vector.extract_strided_slice %241 {offsets = [0, 64], sizes = [8, 32], strides = [1, 1]} : vector<8x128xf32> to vector<8x32xf32>
    %280 = math.tanh %279 : vector<8x32xf32>
    %281 = vector.extract_strided_slice %241 {offsets = [0, 96], sizes = [8, 32], strides = [1, 1]} : vector<8x128xf32> to vector<8x32xf32>
    %282 = arith.negf %281 : vector<8x32xf32>
    %283 = math.exp %282 : vector<8x32xf32>
    %cst_89 = arith.constant 1.000000e+00 : f32
    %284 = vector.broadcast %cst_89 : f32 to vector<8x32xf32>
    %285 = arith.addf %284, %283 : vector<8x32xf32>
    %286 = arith.divf %284, %285 : vector<8x32xf32>
    %287 = arith.mulf %278, %223 : vector<8x32xf32>
    %288 = arith.mulf %272, %280 : vector<8x32xf32>
    %289 = arith.addf %287, %288 : vector<8x32xf32>
    %290 = math.tanh %289 : vector<8x32xf32>
    %291 = arith.mulf %286, %290 : vector<8x32xf32>
    %c2_90 = arith.constant 2 : index
    %c0_91 = arith.constant 0 : index
    %c0_92 = arith.constant 0 : index
    %292 = vector.load %arg25[%c2_90, %c0_91, %c0_92] : memref<4x8x32xf32, #tpu.memory_space<vmem>>, vector<1x8x32xf32>
    %293 = vector.shape_cast %292 : vector<1x8x32xf32> to vector<8x32xf32>
    %294 = vector.shape_cast %266 : vector<8x32xf32> to vector<1x8x32xf32>
    tpu.vector_store %arg25[%c2_90, %c0_91, %c0_92], %294 {strides = array<i32>} : memref<4x8x32xf32, #tpu.memory_space<vmem>>, vector<1x8x32xf32>,
    %c1_93 = arith.constant 1 : index
    %c0_94 = arith.constant 0 : index
    %c0_95 = arith.constant 0 : index
    %295 = vector.load %arg26[%c1_93, %c0_94, %c0_95] : memref<4x8x32xf32, #tpu.memory_space<vmem>>, vector<1x8x32xf32>
    %296 = vector.shape_cast %295 : vector<1x8x32xf32> to vector<8x32xf32>
    %297 = vector.shape_cast %291 : vector<8x32xf32> to vector<1x8x32xf32>
    tpu.vector_store %arg26[%c1_93, %c0_94, %c0_95], %297 {strides = array<i32>} : memref<4x8x32xf32, #tpu.memory_space<vmem>>, vector<1x8x32xf32>,
    %298 = vector.extract_strided_slice %81 {offsets = [3, 0, 0], sizes = [1, 8, 128], strides = [1, 1, 1]} : vector<4x8x128xf32> to vector<1x8x128xf32>
    %299 = vector.shape_cast %298 : vector<1x8x128xf32> to vector<8x128xf32>
    %300 = arith.truncf %266 : vector<8x32xf32> to vector<8x32xbf16>
    %cst_96 = arith.constant dense<0.000000e+00> : vector<8x128xf32>
    %301 = tpu.matmul %300, %88, %cst_96 {dimension_numbers = #tpu.dot_dimension_numbers<[1], [0], [0], [1], [0, 0, 1, 1], [], []>} : vector<8x32xbf16>, vector<32x128xbf16>, vector<8x128xf32> -> vector<8x128xf32>
    %302 = arith.addf %299, %301 : vector<8x128xf32>
    %303 = vector.extract_strided_slice %87 {offsets = [0, 0, 0], sizes = [1, 8, 128], strides = [1, 1, 1]} : vector<4x8x128xf32> to vector<1x8x128xf32>
    %304 = vector.shape_cast %303 : vector<1x8x128xf32> to vector<8x128xf32>
    %305 = arith.truncf %291 : vector<8x32xf32> to vector<8x32xbf16>
    %cst_97 = arith.constant dense<0.000000e+00> : vector<8x128xf32>
    %306 = tpu.matmul %305, %89, %cst_97 {dimension_numbers = #tpu.dot_dimension_numbers<[1], [0], [0], [1], [0, 0, 1, 1], [], []>} : vector<8x32xbf16>, vector<32x128xbf16>, vector<8x128xf32> -> vector<8x128xf32>
    %307 = arith.addf %304, %306 : vector<8x128xf32>
    %308 = vector.extract_strided_slice %302 {offsets = [0, 0], sizes = [8, 32], strides = [1, 1]} : vector<8x128xf32> to vector<8x32xf32>
    %309 = arith.negf %308 : vector<8x32xf32>
    %310 = math.exp %309 : vector<8x32xf32>
    %cst_98 = arith.constant 1.000000e+00 : f32
    %311 = vector.broadcast %cst_98 : f32 to vector<8x32xf32>
    %312 = arith.addf %311, %310 : vector<8x32xf32>
    %313 = arith.divf %311, %312 : vector<8x32xf32>
    %314 = vector.extract_strided_slice %302 {offsets = [0, 32], sizes = [8, 32], strides = [1, 1]} : vector<8x128xf32> to vector<8x32xf32>
    %315 = arith.negf %314 : vector<8x32xf32>
    %316 = math.exp %315 : vector<8x32xf32>
    %cst_99 = arith.constant 1.000000e+00 : f32
    %317 = vector.broadcast %cst_99 : f32 to vector<8x32xf32>
    %318 = arith.addf %317, %316 : vector<8x32xf32>
    %319 = arith.divf %317, %318 : vector<8x32xf32>
    %320 = vector.extract_strided_slice %302 {offsets = [0, 64], sizes = [8, 32], strides = [1, 1]} : vector<8x128xf32> to vector<8x32xf32>
    %321 = math.tanh %320 : vector<8x32xf32>
    %322 = vector.extract_strided_slice %302 {offsets = [0, 96], sizes = [8, 32], strides = [1, 1]} : vector<8x128xf32> to vector<8x32xf32>
    %323 = arith.negf %322 : vector<8x32xf32>
    %324 = math.exp %323 : vector<8x32xf32>
    %cst_100 = arith.constant 1.000000e+00 : f32
    %325 = vector.broadcast %cst_100 : f32 to vector<8x32xf32>
    %326 = arith.addf %325, %324 : vector<8x32xf32>
    %327 = arith.divf %325, %326 : vector<8x32xf32>
    %328 = arith.mulf %319, %264 : vector<8x32xf32>
    %329 = arith.mulf %313, %321 : vector<8x32xf32>
    %330 = arith.addf %328, %329 : vector<8x32xf32>
    %331 = math.tanh %330 : vector<8x32xf32>
    %332 = arith.mulf %327, %331 : vector<8x32xf32>
    %333 = vector.extract_strided_slice %307 {offsets = [0, 0], sizes = [8, 32], strides = [1, 1]} : vector<8x128xf32> to vector<8x32xf32>
    %334 = arith.negf %333 : vector<8x32xf32>
    %335 = math.exp %334 : vector<8x32xf32>
    %cst_101 = arith.constant 1.000000e+00 : f32
    %336 = vector.broadcast %cst_101 : f32 to vector<8x32xf32>
    %337 = arith.addf %336, %335 : vector<8x32xf32>
    %338 = arith.divf %336, %337 : vector<8x32xf32>
    %339 = vector.extract_strided_slice %307 {offsets = [0, 32], sizes = [8, 32], strides = [1, 1]} : vector<8x128xf32> to vector<8x32xf32>
    %340 = arith.negf %339 : vector<8x32xf32>
    %341 = math.exp %340 : vector<8x32xf32>
    %cst_102 = arith.constant 1.000000e+00 : f32
    %342 = vector.broadcast %cst_102 : f32 to vector<8x32xf32>
    %343 = arith.addf %342, %341 : vector<8x32xf32>
    %344 = arith.divf %342, %343 : vector<8x32xf32>
    %345 = vector.extract_strided_slice %307 {offsets = [0, 64], sizes = [8, 32], strides = [1, 1]} : vector<8x128xf32> to vector<8x32xf32>
    %346 = math.tanh %345 : vector<8x32xf32>
    %347 = vector.extract_strided_slice %307 {offsets = [0, 96], sizes = [8, 32], strides = [1, 1]} : vector<8x128xf32> to vector<8x32xf32>
    %348 = arith.negf %347 : vector<8x32xf32>
    %349 = math.exp %348 : vector<8x32xf32>
    %cst_103 = arith.constant 1.000000e+00 : f32
    %350 = vector.broadcast %cst_103 : f32 to vector<8x32xf32>
    %351 = arith.addf %350, %349 : vector<8x32xf32>
    %352 = arith.divf %350, %351 : vector<8x32xf32>
    %353 = arith.mulf %344, %289 : vector<8x32xf32>
    %354 = arith.mulf %338, %346 : vector<8x32xf32>
    %355 = arith.addf %353, %354 : vector<8x32xf32>
    %356 = math.tanh %355 : vector<8x32xf32>
    %357 = arith.mulf %352, %356 : vector<8x32xf32>
    %c3_104 = arith.constant 3 : index
    %c0_105 = arith.constant 0 : index
    %c0_106 = arith.constant 0 : index
    %358 = vector.load %arg25[%c3_104, %c0_105, %c0_106] : memref<4x8x32xf32, #tpu.memory_space<vmem>>, vector<1x8x32xf32>
    %359 = vector.shape_cast %358 : vector<1x8x32xf32> to vector<8x32xf32>
    %360 = vector.shape_cast %332 : vector<8x32xf32> to vector<1x8x32xf32>
    tpu.vector_store %arg25[%c3_104, %c0_105, %c0_106], %360 {strides = array<i32>} : memref<4x8x32xf32, #tpu.memory_space<vmem>>, vector<1x8x32xf32>,
    %c0_107 = arith.constant 0 : index
    %c0_108 = arith.constant 0 : index
    %c0_109 = arith.constant 0 : index
    %361 = vector.load %arg26[%c0_107, %c0_108, %c0_109] : memref<4x8x32xf32, #tpu.memory_space<vmem>>, vector<1x8x32xf32>
    %362 = vector.shape_cast %361 : vector<1x8x32xf32> to vector<8x32xf32>
    %363 = vector.shape_cast %357 : vector<8x32xf32> to vector<1x8x32xf32>
    tpu.vector_store %arg26[%c0_107, %c0_108, %c0_109], %363 {strides = array<i32>} : memref<4x8x32xf32, #tpu.memory_space<vmem>>, vector<1x8x32xf32>,
    %364 = vector.shape_cast %332 : vector<8x32xf32> to vector<1x8x32xf32>
    %365 = vector.shape_cast %357 : vector<8x32xf32> to vector<1x8x32xf32>
    %366 = tpu.concatenate %364, %365 in 0 : vector<1x8x32xf32>, vector<1x8x32xf32> -> vector<2x8x32xf32>
    %367 = vector.shape_cast %366 : vector<2x8x32xf32> to vector<2x1x8x32xf32>
    %c0_110 = arith.constant 0 : index
    %c0_111 = arith.constant 0 : index
    %c0_112 = arith.constant 0 : index
    %c0_113 = arith.constant 0 : index
    %368 = vector.load %arg23[%c0_110, %c0_111, %c0_112, %c0_113] : memref<2x1x8x32xf32, #tpu.memory_space<vmem>>, vector<2x1x8x32xf32>
    tpu.vector_store %arg23[%c0_110, %c0_111, %c0_112, %c0_113], %367 {strides = array<i32>} : memref<2x1x8x32xf32, #tpu.memory_space<vmem>>, vector<2x1x8x32xf32>,
    %369 = vector.shape_cast %330 : vector<8x32xf32> to vector<1x8x32xf32>
    %370 = vector.shape_cast %355 : vector<8x32xf32> to vector<1x8x32xf32>
    %371 = tpu.concatenate %369, %370 in 0 : vector<1x8x32xf32>, vector<1x8x32xf32> -> vector<2x8x32xf32>
    %372 = vector.shape_cast %371 : vector<2x8x32xf32> to vector<2x1x8x32xf32>
    %c0_114 = arith.constant 0 : index
    %c0_115 = arith.constant 0 : index
    %c0_116 = arith.constant 0 : index
    %c0_117 = arith.constant 0 : index
    %373 = vector.load %arg24[%c0_114, %c0_115, %c0_116, %c0_117] : memref<2x1x8x32xf32, #tpu.memory_space<vmem>>, vector<2x1x8x32xf32>
    tpu.vector_store %arg24[%c0_114, %c0_115, %c0_116, %c0_117], %372 {strides = array<i32>} : memref<2x1x8x32xf32, #tpu.memory_space<vmem>>, vector<2x1x8x32xf32>,
    %c0_118 = arith.constant 0 : index
    %c0_119 = arith.constant 0 : index
    %c0_120 = arith.constant 0 : index
    %374 = vector.load %arg25[%c0_118, %c0_119, %c0_120] : memref<4x8x32xf32, #tpu.memory_space<vmem>>, vector<4x8x32xf32>
    %375 = vector.shape_cast %374 : vector<4x8x32xf32> to vector<32x32xf32>
    %376 = arith.truncf %375 : vector<32x32xf32> to vector<32x32xbf16>
    %c0_121 = arith.constant 0 : index
    %c0_122 = arith.constant 0 : index
    %c0_123 = arith.constant 0 : index
    %377 = vector.load %arg26[%c0_121, %c0_122, %c0_123] : memref<4x8x32xf32, #tpu.memory_space<vmem>>, vector<4x8x32xf32>
    %378 = vector.shape_cast %377 : vector<4x8x32xf32> to vector<32x32xf32>
    %379 = arith.truncf %378 : vector<32x32xf32> to vector<32x32xbf16>
    %c0_124 = arith.constant 0 : index
    %c0_125 = arith.constant 0 : index
    %380 = vector.load %arg14[%c0_124, %c0_125] : memref<32x32xbf16, #tpu.memory_space<vmem>>, vector<32x32xbf16>
    %cst_126 = arith.constant dense<0.000000e+00> : vector<32x32xf32>
    %381 = tpu.matmul %376, %380, %cst_126 {dimension_numbers = #tpu.dot_dimension_numbers<[1], [0], [0], [1], [0, 0, 1, 1], [], []>} : vector<32x32xbf16>, vector<32x32xbf16>, vector<32x32xf32> -> vector<32x32xf32>
    %c0_127 = arith.constant 0 : index
    %c0_128 = arith.constant 0 : index
    %382 = vector.load %arg15[%c0_127, %c0_128] : memref<32x32xbf16, #tpu.memory_space<vmem>>, vector<32x32xbf16>
    %cst_129 = arith.constant dense<0.000000e+00> : vector<32x32xf32>
    %383 = tpu.matmul %379, %382, %cst_129 {dimension_numbers = #tpu.dot_dimension_numbers<[1], [0], [0], [1], [0, 0, 1, 1], [], []>} : vector<32x32xbf16>, vector<32x32xbf16>, vector<32x32xf32> -> vector<32x32xf32>
    %384 = arith.addf %381, %383 : vector<32x32xf32>
    %c0_130 = arith.constant 0 : index
    %c0_131 = arith.constant 0 : index
    %385 = vector.load %arg16[%c0_130, %c0_131] : memref<1x32xf32, #tpu.memory_space<vmem>>, vector<1x32xf32>
    %386 = vector.broadcast %385 : vector<1x32xf32> to vector<32x32xf32>
    %387 = arith.addf %384, %386 : vector<32x32xf32>
    %388 = vector.shape_cast %387 : vector<32x32xf32> to vector<4x8x32xf32>
    %389 = arith.addf %47, %388 : vector<4x8x32xf32>
    %cst_132 = arith.constant dense<0.000000e+00> : vector<4x8xf32>
    %390 = vector.multi_reduction <add>, %389, %cst_132 [2] : vector<4x8x32xf32> to vector<4x8xf32>
    %391 = vector.shape_cast %390 : vector<4x8xf32> to vector<4x8x1xf32>
    %cst_133 = arith.constant 3.200000e+01 : f32
    %392 = vector.broadcast %cst_133 : f32 to vector<4x8x1xf32>
    %393 = arith.divf %391, %392 : vector<4x8x1xf32>
    %394 = vector.broadcast %393 : vector<4x8x1xf32> to vector<4x8x32xf32>
    %395 = arith.subf %389, %394 : vector<4x8x32xf32>
    %396 = arith.mulf %395, %395 : vector<4x8x32xf32>
    %cst_134 = arith.constant dense<0.000000e+00> : vector<4x8xf32>
    %397 = vector.multi_reduction <add>, %396, %cst_134 [2] : vector<4x8x32xf32> to vector<4x8xf32>
    %398 = vector.shape_cast %397 : vector<4x8xf32> to vector<4x8x1xf32>
    %cst_135 = arith.constant 3.200000e+01 : f32
    %399 = vector.broadcast %cst_135 : f32 to vector<4x8x1xf32>
    %400 = arith.divf %398, %399 : vector<4x8x1xf32>
    %401 = vector.broadcast %393 : vector<4x8x1xf32> to vector<4x8x32xf32>
    %402 = arith.subf %389, %401 : vector<4x8x32xf32>
    %cst_136 = arith.constant 9.99999974E-6 : f32
    %403 = vector.broadcast %cst_136 : f32 to vector<4x8x1xf32>
    %404 = arith.addf %400, %403 : vector<4x8x1xf32>
    %405 = math.rsqrt %404 : vector<4x8x1xf32>
    %406 = vector.broadcast %405 : vector<4x8x1xf32> to vector<4x8x32xf32>
    %407 = arith.mulf %402, %406 : vector<4x8x32xf32>
    %c0_137 = arith.constant 0 : index
    %c0_138 = arith.constant 0 : index
    %408 = vector.load %arg17[%c0_137, %c0_138] : memref<1x32xf32, #tpu.memory_space<vmem>>, vector<1x32xf32>
    %409 = vector.shape_cast %408 : vector<1x32xf32> to vector<1x1x32xf32>
    %410 = vector.broadcast %409 : vector<1x1x32xf32> to vector<4x8x32xf32>
    %411 = arith.mulf %407, %410 : vector<4x8x32xf32>
    %c0_139 = arith.constant 0 : index
    %c0_140 = arith.constant 0 : index
    %412 = vector.load %arg18[%c0_139, %c0_140] : memref<1x32xf32, #tpu.memory_space<vmem>>, vector<1x32xf32>
    %413 = vector.shape_cast %412 : vector<1x32xf32> to vector<1x1x32xf32>
    %414 = vector.broadcast %413 : vector<1x1x32xf32> to vector<4x8x32xf32>
    %415 = arith.addf %411, %414 : vector<4x8x32xf32>
    %cst_141 = arith.constant 0.000000e+00 : f32
    %416 = vector.broadcast %cst_141 : f32 to vector<4x2x32xf32>
    %417 = tpu.concatenate %416, %415 in 1 : vector<4x2x32xf32>, vector<4x8x32xf32> -> vector<4x10x32xf32>
    %418 = arith.truncf %417 : vector<4x10x32xf32> to vector<4x10x32xbf16>
    %cst_142 = arith.constant 0.000000e+00 : f32
    %419 = vector.broadcast %cst_142 : f32 to vector<32x16xf32>
    %cst_143 = arith.constant 0.000000e+00 : f32
    %420 = vector.broadcast %cst_143 : f32 to vector<32x16xf32>
    %421 = vector.extract_strided_slice %418 {offsets = [0, 0, 0], sizes = [4, 8, 32], strides = [1, 1, 1]} : vector<4x10x32xbf16> to vector<4x8x32xbf16>
    %422 = vector.shape_cast %421 : vector<4x8x32xbf16> to vector<32x32xbf16>
    %423 = vector.extract_strided_slice %422 {offsets = [0, 0], sizes = [32, 16], strides = [1, 1]} : vector<32x32xbf16> to vector<32x16xbf16>
    %c0_144 = arith.constant 0 : index
    %c0_145 = arith.constant 0 : index
    %c0_146 = arith.constant 0 : index
    %424 = vector.load %arg19[%c0_144, %c0_145, %c0_146] : memref<3x16x16xbf16, #tpu.memory_space<vmem>>, vector<1x16x16xbf16>
    %425 = vector.shape_cast %424 : vector<1x16x16xbf16> to vector<16x16xbf16>
    %cst_147 = arith.constant dense<0.000000e+00> : vector<32x16xf32>
    %426 = tpu.matmul %423, %425, %cst_147 {dimension_numbers = #tpu.dot_dimension_numbers<[1], [0], [0], [1], [0, 0, 1, 1], [], []>} : vector<32x16xbf16>, vector<16x16xbf16>, vector<32x16xf32> -> vector<32x16xf32>
    %427 = arith.addf %419, %426 : vector<32x16xf32>
    %428 = vector.extract_strided_slice %422 {offsets = [0, 16], sizes = [32, 16], strides = [1, 1]} : vector<32x32xbf16> to vector<32x16xbf16>
    %c0_148 = arith.constant 0 : index
    %c0_149 = arith.constant 0 : index
    %c0_150 = arith.constant 0 : index
    %429 = vector.load %arg20[%c0_148, %c0_149, %c0_150] : memref<3x16x16xbf16, #tpu.memory_space<vmem>>, vector<1x16x16xbf16>
    %430 = vector.shape_cast %429 : vector<1x16x16xbf16> to vector<16x16xbf16>
    %cst_151 = arith.constant dense<0.000000e+00> : vector<32x16xf32>
    %431 = tpu.matmul %428, %430, %cst_151 {dimension_numbers = #tpu.dot_dimension_numbers<[1], [0], [0], [1], [0, 0, 1, 1], [], []>} : vector<32x16xbf16>, vector<16x16xbf16>, vector<32x16xf32> -> vector<32x16xf32>
    %432 = arith.addf %420, %431 : vector<32x16xf32>
    %433 = vector.extract_strided_slice %418 {offsets = [0, 1, 0], sizes = [4, 8, 32], strides = [1, 1, 1]} : vector<4x10x32xbf16> to vector<4x8x32xbf16>
    %434 = vector.shape_cast %433 : vector<4x8x32xbf16> to vector<32x32xbf16>
    %435 = vector.extract_strided_slice %434 {offsets = [0, 0], sizes = [32, 16], strides = [1, 1]} : vector<32x32xbf16> to vector<32x16xbf16>
    %c1_152 = arith.constant 1 : index
    %c0_153 = arith.constant 0 : index
    %c0_154 = arith.constant 0 : index
    %436 = vector.load %arg19[%c1_152, %c0_153, %c0_154] : memref<3x16x16xbf16, #tpu.memory_space<vmem>>, vector<1x16x16xbf16>
    %437 = vector.shape_cast %436 : vector<1x16x16xbf16> to vector<16x16xbf16>
    %cst_155 = arith.constant dense<0.000000e+00> : vector<32x16xf32>
    %438 = tpu.matmul %435, %437, %cst_155 {dimension_numbers = #tpu.dot_dimension_numbers<[1], [0], [0], [1], [0, 0, 1, 1], [], []>} : vector<32x16xbf16>, vector<16x16xbf16>, vector<32x16xf32> -> vector<32x16xf32>
    %439 = arith.addf %427, %438 : vector<32x16xf32>
    %440 = vector.extract_strided_slice %434 {offsets = [0, 16], sizes = [32, 16], strides = [1, 1]} : vector<32x32xbf16> to vector<32x16xbf16>
    %c1_156 = arith.constant 1 : index
    %c0_157 = arith.constant 0 : index
    %c0_158 = arith.constant 0 : index
    %441 = vector.load %arg20[%c1_156, %c0_157, %c0_158] : memref<3x16x16xbf16, #tpu.memory_space<vmem>>, vector<1x16x16xbf16>
    %442 = vector.shape_cast %441 : vector<1x16x16xbf16> to vector<16x16xbf16>
    %cst_159 = arith.constant dense<0.000000e+00> : vector<32x16xf32>
    %443 = tpu.matmul %440, %442, %cst_159 {dimension_numbers = #tpu.dot_dimension_numbers<[1], [0], [0], [1], [0, 0, 1, 1], [], []>} : vector<32x16xbf16>, vector<16x16xbf16>, vector<32x16xf32> -> vector<32x16xf32>
    %444 = arith.addf %432, %443 : vector<32x16xf32>
    %445 = vector.extract_strided_slice %418 {offsets = [0, 2, 0], sizes = [4, 8, 32], strides = [1, 1, 1]} : vector<4x10x32xbf16> to vector<4x8x32xbf16>
    %446 = vector.shape_cast %445 : vector<4x8x32xbf16> to vector<32x32xbf16>
    %447 = vector.extract_strided_slice %446 {offsets = [0, 0], sizes = [32, 16], strides = [1, 1]} : vector<32x32xbf16> to vector<32x16xbf16>
    %c2_160 = arith.constant 2 : index
    %c0_161 = arith.constant 0 : index
    %c0_162 = arith.constant 0 : index
    %448 = vector.load %arg19[%c2_160, %c0_161, %c0_162] : memref<3x16x16xbf16, #tpu.memory_space<vmem>>, vector<1x16x16xbf16>
    %449 = vector.shape_cast %448 : vector<1x16x16xbf16> to vector<16x16xbf16>
    %cst_163 = arith.constant dense<0.000000e+00> : vector<32x16xf32>
    %450 = tpu.matmul %447, %449, %cst_163 {dimension_numbers = #tpu.dot_dimension_numbers<[1], [0], [0], [1], [0, 0, 1, 1], [], []>} : vector<32x16xbf16>, vector<16x16xbf16>, vector<32x16xf32> -> vector<32x16xf32>
    %451 = arith.addf %439, %450 : vector<32x16xf32>
    %452 = vector.extract_strided_slice %446 {offsets = [0, 16], sizes = [32, 16], strides = [1, 1]} : vector<32x32xbf16> to vector<32x16xbf16>
    %c2_164 = arith.constant 2 : index
    %c0_165 = arith.constant 0 : index
    %c0_166 = arith.constant 0 : index
    %453 = vector.load %arg20[%c2_164, %c0_165, %c0_166] : memref<3x16x16xbf16, #tpu.memory_space<vmem>>, vector<1x16x16xbf16>
    %454 = vector.shape_cast %453 : vector<1x16x16xbf16> to vector<16x16xbf16>
    %cst_167 = arith.constant dense<0.000000e+00> : vector<32x16xf32>
    %455 = tpu.matmul %452, %454, %cst_167 {dimension_numbers = #tpu.dot_dimension_numbers<[1], [0], [0], [1], [0, 0, 1, 1], [], []>} : vector<32x16xbf16>, vector<16x16xbf16>, vector<32x16xf32> -> vector<32x16xf32>
    %456 = arith.addf %444, %455 : vector<32x16xf32>
    %457 = tpu.concatenate %451, %456 in 1 : vector<32x16xf32>, vector<32x16xf32> -> vector<32x32xf32>
    %458 = vector.shape_cast %457 : vector<32x32xf32> to vector<4x8x32xf32>
    %c0_168 = arith.constant 0 : index
    %c0_169 = arith.constant 0 : index
    %459 = vector.load %arg21[%c0_168, %c0_169] : memref<1x32xf32, #tpu.memory_space<vmem>>, vector<1x32xf32>
    %460 = vector.shape_cast %459 : vector<1x32xf32> to vector<1x1x32xf32>
    %461 = vector.broadcast %460 : vector<1x1x32xf32> to vector<4x8x32xf32>
    %462 = arith.addf %458, %461 : vector<4x8x32xf32>
    %463 = arith.negf %462 : vector<4x8x32xf32>
    %464 = math.exp %463 : vector<4x8x32xf32>
    %cst_170 = arith.constant 1.000000e+00 : f32
    %465 = vector.broadcast %cst_170 : f32 to vector<4x8x32xf32>
    %466 = arith.addf %465, %464 : vector<4x8x32xf32>
    %467 = arith.divf %465, %466 : vector<4x8x32xf32>
    %468 = arith.mulf %462, %467 : vector<4x8x32xf32>
    %469 = arith.addf %389, %468 : vector<4x8x32xf32>
    %c0_171 = arith.constant 0 : index
    %c0_172 = arith.constant 0 : index
    %c0_173 = arith.constant 0 : index
    %c0_174 = arith.constant 0 : index
    %470 = vector.load %arg22[%c0_171, %c0_172, %c0_173, %c0_174] : memref<1x4x8x32xf32, #tpu.memory_space<vmem>>, vector<1x4x8x32xf32>
    %471 = vector.shape_cast %470 : vector<1x4x8x32xf32> to vector<4x8x32xf32>
    %472 = vector.shape_cast %469 : vector<4x8x32xf32> to vector<1x4x8x32xf32>
    tpu.vector_store %arg22[%c0_171, %c0_172, %c0_173, %c0_174], %472 {strides = array<i32>} : memref<1x4x8x32xf32, #tpu.memory_space<vmem>>, vector<1x4x8x32xf32>,
    return
  }
  func.func @transform_0(%arg0: i32) -> (i32, i32, i32, i32) {
    %c0_i32 = arith.constant 0 : i32
    %c0_i32_0 = arith.constant 0 : i32
    %c0_i32_1 = arith.constant 0 : i32
    %c0_i32_2 = arith.constant 0 : i32
    return %arg0, %c0_i32, %c0_i32_0, %c0_i32_1 : i32, i32, i32, i32
  }
  func.func @transform_1(%arg0: i32) -> (i32, i32, i32, i32) {
    %c0_i32 = arith.constant 0 : i32
    %c0_i32_0 = arith.constant 0 : i32
    %c0_i32_1 = arith.constant 0 : i32
    %c0_i32_2 = arith.constant 0 : i32
    return %c0_i32, %arg0, %c0_i32_0, %c0_i32_1 : i32, i32, i32, i32
  }
  func.func @transform_2(%arg0: i32) -> (i32, i32, i32, i32) {
    %c0_i32 = arith.constant 0 : i32
    %c0_i32_0 = arith.constant 0 : i32
    %c0_i32_1 = arith.constant 0 : i32
    %c0_i32_2 = arith.constant 0 : i32
    return %c0_i32, %arg0, %c0_i32_0, %c0_i32_1 : i32, i32, i32, i32
  }
  func.func @transform_3(%arg0: i32) -> (i32, i32, i32) {
    %c0_i32 = arith.constant 0 : i32
    %c0_i32_0 = arith.constant 0 : i32
    %c0_i32_1 = arith.constant 0 : i32
    %c0_i32_2 = arith.constant 0 : i32
    return %c0_i32, %c0_i32_0, %c0_i32_1 : i32, i32, i32
  }
  func.func @transform_4(%arg0: i32) -> (i32, i32) {
    %c0_i32 = arith.constant 0 : i32
    %c0_i32_0 = arith.constant 0 : i32
    %c0_i32_1 = arith.constant 0 : i32
    return %c0_i32, %c0_i32_0 : i32, i32
  }
  func.func @transform_5(%arg0: i32) -> (i32, i32) {
    %c0_i32 = arith.constant 0 : i32
    %c0_i32_0 = arith.constant 0 : i32
    %c0_i32_1 = arith.constant 0 : i32
    return %c0_i32, %c0_i32_0 : i32, i32
  }
  func.func @transform_6(%arg0: i32) -> (i32, i32) {
    %c0_i32 = arith.constant 0 : i32
    %c0_i32_0 = arith.constant 0 : i32
    %c0_i32_1 = arith.constant 0 : i32
    return %c0_i32, %c0_i32_0 : i32, i32
  }
  func.func @transform_7(%arg0: i32) -> (i32, i32) {
    %c0_i32 = arith.constant 0 : i32
    %c0_i32_0 = arith.constant 0 : i32
    %c0_i32_1 = arith.constant 0 : i32
    return %c0_i32, %c0_i32_0 : i32, i32
  }
  func.func @transform_8(%arg0: i32) -> (i32, i32) {
    %c0_i32 = arith.constant 0 : i32
    %c0_i32_0 = arith.constant 0 : i32
    %c0_i32_1 = arith.constant 0 : i32
    return %c0_i32, %c0_i32_0 : i32, i32
  }
  func.func @transform_9(%arg0: i32) -> (i32, i32) {
    %c0_i32 = arith.constant 0 : i32
    %c0_i32_0 = arith.constant 0 : i32
    %c0_i32_1 = arith.constant 0 : i32
    return %c0_i32, %c0_i32_0 : i32, i32
  }
  func.func @transform_10(%arg0: i32) -> (i32, i32) {
    %c0_i32 = arith.constant 0 : i32
    %c0_i32_0 = arith.constant 0 : i32
    %c0_i32_1 = arith.constant 0 : i32
    return %c0_i32, %c0_i32_0 : i32, i32
  }
  func.func @transform_11(%arg0: i32) -> (i32, i32) {
    %c0_i32 = arith.constant 0 : i32
    %c0_i32_0 = arith.constant 0 : i32
    %c0_i32_1 = arith.constant 0 : i32
    return %c0_i32, %c0_i32_0 : i32, i32
  }
  func.func @transform_12(%arg0: i32) -> (i32, i32) {
    %c0_i32 = arith.constant 0 : i32
    %c0_i32_0 = arith.constant 0 : i32
    %c0_i32_1 = arith.constant 0 : i32
    return %c0_i32, %c0_i32_0 : i32, i32
  }
  func.func @transform_13(%arg0: i32) -> (i32, i32) {
    %c0_i32 = arith.constant 0 : i32
    %c0_i32_0 = arith.constant 0 : i32
    %c0_i32_1 = arith.constant 0 : i32
    return %c0_i32, %c0_i32_0 : i32, i32
  }
  func.func @transform_14(%arg0: i32) -> (i32, i32) {
    %c0_i32 = arith.constant 0 : i32
    %c0_i32_0 = arith.constant 0 : i32
    %c0_i32_1 = arith.constant 0 : i32
    return %c0_i32, %c0_i32_0 : i32, i32
  }
  func.func @transform_15(%arg0: i32) -> (i32, i32) {
    %c0_i32 = arith.constant 0 : i32
    %c0_i32_0 = arith.constant 0 : i32
    %c0_i32_1 = arith.constant 0 : i32
    return %c0_i32, %c0_i32_0 : i32, i32
  }
  func.func @transform_16(%arg0: i32) -> (i32, i32) {
    %c0_i32 = arith.constant 0 : i32
    %c0_i32_0 = arith.constant 0 : i32
    %c0_i32_1 = arith.constant 0 : i32
    return %c0_i32, %c0_i32_0 : i32, i32
  }
  func.func @transform_17(%arg0: i32) -> (i32, i32) {
    %c0_i32 = arith.constant 0 : i32
    %c0_i32_0 = arith.constant 0 : i32
    %c0_i32_1 = arith.constant 0 : i32
    return %c0_i32, %c0_i32_0 : i32, i32
  }
  func.func @transform_18(%arg0: i32) -> (i32, i32, i32) {
    %c0_i32 = arith.constant 0 : i32
    %c0_i32_0 = arith.constant 0 : i32
    %c0_i32_1 = arith.constant 0 : i32
    %c0_i32_2 = arith.constant 0 : i32
    return %c0_i32, %c0_i32_0, %c0_i32_1 : i32, i32, i32
  }
  func.func @transform_19(%arg0: i32) -> (i32, i32, i32) {
    %c0_i32 = arith.constant 0 : i32
    %c0_i32_0 = arith.constant 0 : i32
    %c0_i32_1 = arith.constant 0 : i32
    %c0_i32_2 = arith.constant 0 : i32
    return %c0_i32, %c0_i32_0, %c0_i32_1 : i32, i32, i32
  }
  func.func @transform_20(%arg0: i32) -> (i32, i32) {
    %c0_i32 = arith.constant 0 : i32
    %c0_i32_0 = arith.constant 0 : i32
    %c0_i32_1 = arith.constant 0 : i32
    return %c0_i32, %c0_i32_0 : i32, i32
  }
  func.func @transform_21(%arg0: i32) -> (i32, i32, i32, i32) {
    %c0_i32 = arith.constant 0 : i32
    %c0_i32_0 = arith.constant 0 : i32
    %c0_i32_1 = arith.constant 0 : i32
    %c0_i32_2 = arith.constant 0 : i32
    return %arg0, %c0_i32, %c0_i32_0, %c0_i32_1 : i32, i32, i32, i32
  }
  func.func @transform_22(%arg0: i32) -> (i32, i32, i32, i32) {
    %c0_i32 = arith.constant 0 : i32
    %c0_i32_0 = arith.constant 0 : i32
    %c0_i32_1 = arith.constant 0 : i32
    %c0_i32_2 = arith.constant 0 : i32
    return %c0_i32, %arg0, %c0_i32_0, %c0_i32_1 : i32, i32, i32, i32
  }
  func.func @transform_23(%arg0: i32) -> (i32, i32, i32, i32) {
    %c0_i32 = arith.constant 0 : i32
    %c0_i32_0 = arith.constant 0 : i32
    %c0_i32_1 = arith.constant 0 : i32
    %c0_i32_2 = arith.constant 0 : i32
    return %c0_i32, %arg0, %c0_i32_0, %c0_i32_1 : i32, i32, i32, i32
  }
}

module attributes {stable_mosaic.version = 11 : i64} {
  func.func @_hc_net_kernel(%arg0: memref<2x2x8x64xf32, #tpu.memory_space<vmem>>, %arg1: memref<2x64x256xbf16, #tpu.memory_space<vmem>>, %arg2: memref<2x64x256xbf16, #tpu.memory_space<vmem>>, %arg3: memref<2x1x256xf32, #tpu.memory_space<vmem>>, %arg4: memref<2x1x64xf32, #tpu.memory_space<vmem>>, %arg5: memref<2x1x64xf32, #tpu.memory_space<vmem>>, %arg6: memref<16x2x64xf32, #tpu.memory_space<vmem>>) attributes {dimension_semantics = [], scalar_prefetch = 0 : i64, scratch_operands = 0 : i64, tpu.core_type = #tpu.core_type<tc>} {
    %c0 = arith.constant 0 : index
    %c0_0 = arith.constant 0 : index
    %c0_1 = arith.constant 0 : index
    %c0_2 = arith.constant 0 : index
    %0 = vector.load %arg0[%c0, %c0_0, %c0_1, %c0_2] : memref<2x2x8x64xf32, #tpu.memory_space<vmem>>, vector<1x2x8x64xf32>
    %1 = vector.shape_cast %0 : vector<1x2x8x64xf32> to vector<2x8x64xf32>
    %2 = arith.truncf %1 : vector<2x8x64xf32> to vector<2x8x64xbf16>
    %3 = vector.shape_cast %2 : vector<2x8x64xbf16> to vector<16x64xbf16>
    %c0_3 = arith.constant 0 : index
    %c0_4 = arith.constant 0 : index
    %c0_5 = arith.constant 0 : index
    %4 = vector.load %arg1[%c0_3, %c0_4, %c0_5] : memref<2x64x256xbf16, #tpu.memory_space<vmem>>, vector<1x64x256xbf16>
    %5 = vector.shape_cast %4 : vector<1x64x256xbf16> to vector<64x256xbf16>
    %cst = arith.constant dense<0.000000e+00> : vector<16x256xf32>
    %6 = tpu.matmul %3, %5, %cst {dimension_numbers = #tpu.dot_dimension_numbers<[1], [0], [0], [1], [0, 0, 1, 1], [], []>} : vector<16x64xbf16>, vector<64x256xbf16>, vector<16x256xf32> -> vector<16x256xf32>
    %c0_6 = arith.constant 0 : index
    %c0_7 = arith.constant 0 : index
    %c0_8 = arith.constant 0 : index
    %7 = vector.load %arg3[%c0_6, %c0_7, %c0_8] : memref<2x1x256xf32, #tpu.memory_space<vmem>>, vector<1x1x256xf32>
    %8 = vector.shape_cast %7 : vector<1x1x256xf32> to vector<1x256xf32>
    %9 = vector.broadcast %8 : vector<1x256xf32> to vector<16x256xf32>
    %10 = arith.addf %6, %9 : vector<16x256xf32>
    %11 = vector.shape_cast %10 : vector<16x256xf32> to vector<2x8x256xf32>
    %c0_9 = arith.constant 0 : index
    %c0_10 = arith.constant 0 : index
    %c0_11 = arith.constant 0 : index
    %12 = vector.load %arg2[%c0_9, %c0_10, %c0_11] : memref<2x64x256xbf16, #tpu.memory_space<vmem>>, vector<1x64x256xbf16>
    %13 = vector.shape_cast %12 : vector<1x64x256xbf16> to vector<64x256xbf16>
    %c1 = arith.constant 1 : index
    %c0_12 = arith.constant 0 : index
    %c0_13 = arith.constant 0 : index
    %c0_14 = arith.constant 0 : index
    %14 = vector.load %arg0[%c1, %c0_12, %c0_13, %c0_14] : memref<2x2x8x64xf32, #tpu.memory_space<vmem>>, vector<1x2x8x64xf32>
    %15 = vector.shape_cast %14 : vector<1x2x8x64xf32> to vector<2x8x64xf32>
    %16 = arith.truncf %15 : vector<2x8x64xf32> to vector<2x8x64xbf16>
    %17 = vector.shape_cast %16 : vector<2x8x64xbf16> to vector<16x64xbf16>
    %c1_15 = arith.constant 1 : index
    %c0_16 = arith.constant 0 : index
    %c0_17 = arith.constant 0 : index
    %18 = vector.load %arg1[%c1_15, %c0_16, %c0_17] : memref<2x64x256xbf16, #tpu.memory_space<vmem>>, vector<1x64x256xbf16>
    %19 = vector.shape_cast %18 : vector<1x64x256xbf16> to vector<64x256xbf16>
    %cst_18 = arith.constant dense<0.000000e+00> : vector<16x256xf32>
    %20 = tpu.matmul %17, %19, %cst_18 {dimension_numbers = #tpu.dot_dimension_numbers<[1], [0], [0], [1], [0, 0, 1, 1], [], []>} : vector<16x64xbf16>, vector<64x256xbf16>, vector<16x256xf32> -> vector<16x256xf32>
    %c1_19 = arith.constant 1 : index
    %c0_20 = arith.constant 0 : index
    %c0_21 = arith.constant 0 : index
    %21 = vector.load %arg3[%c1_19, %c0_20, %c0_21] : memref<2x1x256xf32, #tpu.memory_space<vmem>>, vector<1x1x256xf32>
    %22 = vector.shape_cast %21 : vector<1x1x256xf32> to vector<1x256xf32>
    %23 = vector.broadcast %22 : vector<1x256xf32> to vector<16x256xf32>
    %24 = arith.addf %20, %23 : vector<16x256xf32>
    %25 = vector.shape_cast %24 : vector<16x256xf32> to vector<2x8x256xf32>
    %c1_22 = arith.constant 1 : index
    %c0_23 = arith.constant 0 : index
    %c0_24 = arith.constant 0 : index
    %26 = vector.load %arg2[%c1_22, %c0_23, %c0_24] : memref<2x64x256xbf16, #tpu.memory_space<vmem>>, vector<1x64x256xbf16>
    %27 = vector.shape_cast %26 : vector<1x64x256xbf16> to vector<64x256xbf16>
    %cst_25 = arith.constant 0.000000e+00 : f32
    %28 = vector.broadcast %cst_25 : f32 to vector<2x64xf32>
    %cst_26 = arith.constant 0.000000e+00 : f32
    %29 = vector.broadcast %cst_26 : f32 to vector<2x64xf32>
    %cst_27 = arith.constant 0.000000e+00 : f32
    %30 = vector.broadcast %cst_27 : f32 to vector<2x64xf32>
    %cst_28 = arith.constant 0.000000e+00 : f32
    %31 = vector.broadcast %cst_28 : f32 to vector<2x64xf32>
    %32 = vector.extract_strided_slice %11 {offsets = [0, 0, 0], sizes = [2, 1, 256], strides = [1, 1, 1]} : vector<2x8x256xf32> to vector<2x1x256xf32>
    %33 = vector.shape_cast %32 : vector<2x1x256xf32> to vector<2x256xf32>
    %34 = arith.truncf %28 : vector<2x64xf32> to vector<2x64xbf16>
    %cst_29 = arith.constant dense<0.000000e+00> : vector<2x256xf32>
    %35 = tpu.matmul %34, %13, %cst_29 {dimension_numbers = #tpu.dot_dimension_numbers<[1], [0], [0], [1], [0, 0, 1, 1], [], []>} : vector<2x64xbf16>, vector<64x256xbf16>, vector<2x256xf32> -> vector<2x256xf32>
    %36 = arith.addf %33, %35 : vector<2x256xf32>
    %37 = vector.extract_strided_slice %36 {offsets = [0, 0], sizes = [2, 64], strides = [1, 1]} : vector<2x256xf32> to vector<2x64xf32>
    %38 = arith.negf %37 : vector<2x64xf32>
    %39 = math.exp %38 : vector<2x64xf32>
    %cst_30 = arith.constant 1.000000e+00 : f32
    %40 = vector.broadcast %cst_30 : f32 to vector<2x64xf32>
    %41 = arith.addf %40, %39 : vector<2x64xf32>
    %42 = arith.divf %40, %41 : vector<2x64xf32>
    %43 = vector.extract_strided_slice %36 {offsets = [0, 64], sizes = [2, 64], strides = [1, 1]} : vector<2x256xf32> to vector<2x64xf32>
    %44 = arith.negf %43 : vector<2x64xf32>
    %45 = math.exp %44 : vector<2x64xf32>
    %cst_31 = arith.constant 1.000000e+00 : f32
    %46 = vector.broadcast %cst_31 : f32 to vector<2x64xf32>
    %47 = arith.addf %46, %45 : vector<2x64xf32>
    %48 = arith.divf %46, %47 : vector<2x64xf32>
    %49 = vector.extract_strided_slice %36 {offsets = [0, 128], sizes = [2, 64], strides = [1, 1]} : vector<2x256xf32> to vector<2x64xf32>
    %50 = math.tanh %49 : vector<2x64xf32>
    %51 = vector.extract_strided_slice %36 {offsets = [0, 192], sizes = [2, 64], strides = [1, 1]} : vector<2x256xf32> to vector<2x64xf32>
    %52 = arith.negf %51 : vector<2x64xf32>
    %53 = math.exp %52 : vector<2x64xf32>
    %cst_32 = arith.constant 1.000000e+00 : f32
    %54 = vector.broadcast %cst_32 : f32 to vector<2x64xf32>
    %55 = arith.addf %54, %53 : vector<2x64xf32>
    %56 = arith.divf %54, %55 : vector<2x64xf32>
    %57 = arith.mulf %48, %30 : vector<2x64xf32>
    %58 = arith.mulf %42, %50 : vector<2x64xf32>
    %59 = arith.addf %57, %58 : vector<2x64xf32>
    %60 = math.tanh %59 : vector<2x64xf32>
    %61 = arith.mulf %56, %60 : vector<2x64xf32>
    %cst_33 = arith.constant dense<0.000000e+00> : vector<2xf32>
    %62 = vector.multi_reduction <add>, %61, %cst_33 [1] : vector<2x64xf32> to vector<2xf32>
    %63 = vector.shape_cast %62 : vector<2xf32> to vector<2x1xf32>
    %cst_34 = arith.constant 6.400000e+01 : f32
    %64 = vector.broadcast %cst_34 : f32 to vector<2x1xf32>
    %65 = arith.divf %63, %64 : vector<2x1xf32>
    %66 = vector.broadcast %65 : vector<2x1xf32> to vector<2x64xf32>
    %67 = arith.subf %61, %66 : vector<2x64xf32>
    %68 = arith.mulf %67, %67 : vector<2x64xf32>
    %cst_35 = arith.constant dense<0.000000e+00> : vector<2xf32>
    %69 = vector.multi_reduction <add>, %68, %cst_35 [1] : vector<2x64xf32> to vector<2xf32>
    %70 = vector.shape_cast %69 : vector<2xf32> to vector<2x1xf32>
    %cst_36 = arith.constant 6.400000e+01 : f32
    %71 = vector.broadcast %cst_36 : f32 to vector<2x1xf32>
    %72 = arith.divf %70, %71 : vector<2x1xf32>
    %73 = vector.broadcast %65 : vector<2x1xf32> to vector<2x64xf32>
    %74 = arith.subf %61, %73 : vector<2x64xf32>
    %cst_37 = arith.constant 9.99999974E-6 : f32
    %75 = vector.broadcast %cst_37 : f32 to vector<2x1xf32>
    %76 = arith.addf %72, %75 : vector<2x1xf32>
    %77 = math.rsqrt %76 : vector<2x1xf32>
    %78 = vector.broadcast %77 : vector<2x1xf32> to vector<2x64xf32>
    %79 = arith.mulf %74, %78 : vector<2x64xf32>
    %c0_38 = arith.constant 0 : index
    %c0_39 = arith.constant 0 : index
    %c0_40 = arith.constant 0 : index
    %80 = vector.load %arg4[%c0_38, %c0_39, %c0_40] : memref<2x1x64xf32, #tpu.memory_space<vmem>>, vector<1x1x64xf32>
    %81 = vector.shape_cast %80 : vector<1x1x64xf32> to vector<1x64xf32>
    %82 = vector.broadcast %81 : vector<1x64xf32> to vector<2x64xf32>
    %83 = arith.mulf %79, %82 : vector<2x64xf32>
    %c0_41 = arith.constant 0 : index
    %c0_42 = arith.constant 0 : index
    %c0_43 = arith.constant 0 : index
    %84 = vector.load %arg5[%c0_41, %c0_42, %c0_43] : memref<2x1x64xf32, #tpu.memory_space<vmem>>, vector<1x1x64xf32>
    %85 = vector.shape_cast %84 : vector<1x1x64xf32> to vector<1x64xf32>
    %86 = vector.broadcast %85 : vector<1x64xf32> to vector<2x64xf32>
    %87 = arith.addf %83, %86 : vector<2x64xf32>
    %88 = vector.extract_strided_slice %1 {offsets = [0, 0, 0], sizes = [2, 1, 64], strides = [1, 1, 1]} : vector<2x8x64xf32> to vector<2x1x64xf32>
    %89 = vector.shape_cast %88 : vector<2x1x64xf32> to vector<2x64xf32>
    %90 = arith.addf %87, %89 : vector<2x64xf32>
    %c0_44 = arith.constant 0 : index
    %c0_45 = arith.constant 0 : index
    %c0_46 = arith.constant 0 : index
    %91 = vector.load %arg6[%c0_44, %c0_45, %c0_46] : memref<16x2x64xf32, #tpu.memory_space<vmem>>, vector<1x2x64xf32>
    %92 = vector.shape_cast %91 : vector<1x2x64xf32> to vector<2x64xf32>
    %93 = vector.shape_cast %90 : vector<2x64xf32> to vector<1x2x64xf32>
    tpu.vector_store %arg6[%c0_44, %c0_45, %c0_46], %93 {strides = array<i32>} : memref<16x2x64xf32, #tpu.memory_space<vmem>>, vector<1x2x64xf32>,
    %94 = vector.extract_strided_slice %25 {offsets = [0, 0, 0], sizes = [2, 1, 256], strides = [1, 1, 1]} : vector<2x8x256xf32> to vector<2x1x256xf32>
    %95 = vector.shape_cast %94 : vector<2x1x256xf32> to vector<2x256xf32>
    %96 = arith.truncf %29 : vector<2x64xf32> to vector<2x64xbf16>
    %cst_47 = arith.constant dense<0.000000e+00> : vector<2x256xf32>
    %97 = tpu.matmul %96, %27, %cst_47 {dimension_numbers = #tpu.dot_dimension_numbers<[1], [0], [0], [1], [0, 0, 1, 1], [], []>} : vector<2x64xbf16>, vector<64x256xbf16>, vector<2x256xf32> -> vector<2x256xf32>
    %98 = arith.addf %95, %97 : vector<2x256xf32>
    %99 = vector.extract_strided_slice %98 {offsets = [0, 0], sizes = [2, 64], strides = [1, 1]} : vector<2x256xf32> to vector<2x64xf32>
    %100 = arith.negf %99 : vector<2x64xf32>
    %101 = math.exp %100 : vector<2x64xf32>
    %cst_48 = arith.constant 1.000000e+00 : f32
    %102 = vector.broadcast %cst_48 : f32 to vector<2x64xf32>
    %103 = arith.addf %102, %101 : vector<2x64xf32>
    %104 = arith.divf %102, %103 : vector<2x64xf32>
    %105 = vector.extract_strided_slice %98 {offsets = [0, 64], sizes = [2, 64], strides = [1, 1]} : vector<2x256xf32> to vector<2x64xf32>
    %106 = arith.negf %105 : vector<2x64xf32>
    %107 = math.exp %106 : vector<2x64xf32>
    %cst_49 = arith.constant 1.000000e+00 : f32
    %108 = vector.broadcast %cst_49 : f32 to vector<2x64xf32>
    %109 = arith.addf %108, %107 : vector<2x64xf32>
    %110 = arith.divf %108, %109 : vector<2x64xf32>
    %111 = vector.extract_strided_slice %98 {offsets = [0, 128], sizes = [2, 64], strides = [1, 1]} : vector<2x256xf32> to vector<2x64xf32>
    %112 = math.tanh %111 : vector<2x64xf32>
    %113 = vector.extract_strided_slice %98 {offsets = [0, 192], sizes = [2, 64], strides = [1, 1]} : vector<2x256xf32> to vector<2x64xf32>
    %114 = arith.negf %113 : vector<2x64xf32>
    %115 = math.exp %114 : vector<2x64xf32>
    %cst_50 = arith.constant 1.000000e+00 : f32
    %116 = vector.broadcast %cst_50 : f32 to vector<2x64xf32>
    %117 = arith.addf %116, %115 : vector<2x64xf32>
    %118 = arith.divf %116, %117 : vector<2x64xf32>
    %119 = arith.mulf %110, %31 : vector<2x64xf32>
    %120 = arith.mulf %104, %112 : vector<2x64xf32>
    %121 = arith.addf %119, %120 : vector<2x64xf32>
    %122 = math.tanh %121 : vector<2x64xf32>
    %123 = arith.mulf %118, %122 : vector<2x64xf32>
    %cst_51 = arith.constant dense<0.000000e+00> : vector<2xf32>
    %124 = vector.multi_reduction <add>, %123, %cst_51 [1] : vector<2x64xf32> to vector<2xf32>
    %125 = vector.shape_cast %124 : vector<2xf32> to vector<2x1xf32>
    %cst_52 = arith.constant 6.400000e+01 : f32
    %126 = vector.broadcast %cst_52 : f32 to vector<2x1xf32>
    %127 = arith.divf %125, %126 : vector<2x1xf32>
    %128 = vector.broadcast %127 : vector<2x1xf32> to vector<2x64xf32>
    %129 = arith.subf %123, %128 : vector<2x64xf32>
    %130 = arith.mulf %129, %129 : vector<2x64xf32>
    %cst_53 = arith.constant dense<0.000000e+00> : vector<2xf32>
    %131 = vector.multi_reduction <add>, %130, %cst_53 [1] : vector<2x64xf32> to vector<2xf32>
    %132 = vector.shape_cast %131 : vector<2xf32> to vector<2x1xf32>
    %cst_54 = arith.constant 6.400000e+01 : f32
    %133 = vector.broadcast %cst_54 : f32 to vector<2x1xf32>
    %134 = arith.divf %132, %133 : vector<2x1xf32>
    %135 = vector.broadcast %127 : vector<2x1xf32> to vector<2x64xf32>
    %136 = arith.subf %123, %135 : vector<2x64xf32>
    %cst_55 = arith.constant 9.99999974E-6 : f32
    %137 = vector.broadcast %cst_55 : f32 to vector<2x1xf32>
    %138 = arith.addf %134, %137 : vector<2x1xf32>
    %139 = math.rsqrt %138 : vector<2x1xf32>
    %140 = vector.broadcast %139 : vector<2x1xf32> to vector<2x64xf32>
    %141 = arith.mulf %136, %140 : vector<2x64xf32>
    %c1_56 = arith.constant 1 : index
    %c0_57 = arith.constant 0 : index
    %c0_58 = arith.constant 0 : index
    %142 = vector.load %arg4[%c1_56, %c0_57, %c0_58] : memref<2x1x64xf32, #tpu.memory_space<vmem>>, vector<1x1x64xf32>
    %143 = vector.shape_cast %142 : vector<1x1x64xf32> to vector<1x64xf32>
    %144 = vector.broadcast %143 : vector<1x64xf32> to vector<2x64xf32>
    %145 = arith.mulf %141, %144 : vector<2x64xf32>
    %c1_59 = arith.constant 1 : index
    %c0_60 = arith.constant 0 : index
    %c0_61 = arith.constant 0 : index
    %146 = vector.load %arg5[%c1_59, %c0_60, %c0_61] : memref<2x1x64xf32, #tpu.memory_space<vmem>>, vector<1x1x64xf32>
    %147 = vector.shape_cast %146 : vector<1x1x64xf32> to vector<1x64xf32>
    %148 = vector.broadcast %147 : vector<1x64xf32> to vector<2x64xf32>
    %149 = arith.addf %145, %148 : vector<2x64xf32>
    %150 = vector.extract_strided_slice %15 {offsets = [0, 0, 0], sizes = [2, 1, 64], strides = [1, 1, 1]} : vector<2x8x64xf32> to vector<2x1x64xf32>
    %151 = vector.shape_cast %150 : vector<2x1x64xf32> to vector<2x64xf32>
    %152 = arith.addf %149, %151 : vector<2x64xf32>
    %c8 = arith.constant 8 : index
    %c0_62 = arith.constant 0 : index
    %c0_63 = arith.constant 0 : index
    %153 = vector.load %arg6[%c8, %c0_62, %c0_63] : memref<16x2x64xf32, #tpu.memory_space<vmem>>, vector<1x2x64xf32>
    %154 = vector.shape_cast %153 : vector<1x2x64xf32> to vector<2x64xf32>
    %155 = vector.shape_cast %152 : vector<2x64xf32> to vector<1x2x64xf32>
    tpu.vector_store %arg6[%c8, %c0_62, %c0_63], %155 {strides = array<i32>} : memref<16x2x64xf32, #tpu.memory_space<vmem>>, vector<1x2x64xf32>,
    %156 = vector.extract_strided_slice %11 {offsets = [0, 1, 0], sizes = [2, 1, 256], strides = [1, 1, 1]} : vector<2x8x256xf32> to vector<2x1x256xf32>
    %157 = vector.shape_cast %156 : vector<2x1x256xf32> to vector<2x256xf32>
    %158 = arith.truncf %61 : vector<2x64xf32> to vector<2x64xbf16>
    %cst_64 = arith.constant dense<0.000000e+00> : vector<2x256xf32>
    %159 = tpu.matmul %158, %13, %cst_64 {dimension_numbers = #tpu.dot_dimension_numbers<[1], [0], [0], [1], [0, 0, 1, 1], [], []>} : vector<2x64xbf16>, vector<64x256xbf16>, vector<2x256xf32> -> vector<2x256xf32>
    %160 = arith.addf %157, %159 : vector<2x256xf32>
    %161 = vector.extract_strided_slice %160 {offsets = [0, 0], sizes = [2, 64], strides = [1, 1]} : vector<2x256xf32> to vector<2x64xf32>
    %162 = arith.negf %161 : vector<2x64xf32>
    %163 = math.exp %162 : vector<2x64xf32>
    %cst_65 = arith.constant 1.000000e+00 : f32
    %164 = vector.broadcast %cst_65 : f32 to vector<2x64xf32>
    %165 = arith.addf %164, %163 : vector<2x64xf32>
    %166 = arith.divf %164, %165 : vector<2x64xf32>
    %167 = vector.extract_strided_slice %160 {offsets = [0, 64], sizes = [2, 64], strides = [1, 1]} : vector<2x256xf32> to vector<2x64xf32>
    %168 = arith.negf %167 : vector<2x64xf32>
    %169 = math.exp %168 : vector<2x64xf32>
    %cst_66 = arith.constant 1.000000e+00 : f32
    %170 = vector.broadcast %cst_66 : f32 to vector<2x64xf32>
    %171 = arith.addf %170, %169 : vector<2x64xf32>
    %172 = arith.divf %170, %171 : vector<2x64xf32>
    %173 = vector.extract_strided_slice %160 {offsets = [0, 128], sizes = [2, 64], strides = [1, 1]} : vector<2x256xf32> to vector<2x64xf32>
    %174 = math.tanh %173 : vector<2x64xf32>
    %175 = vector.extract_strided_slice %160 {offsets = [0, 192], sizes = [2, 64], strides = [1, 1]} : vector<2x256xf32> to vector<2x64xf32>
    %176 = arith.negf %175 : vector<2x64xf32>
    %177 = math.exp %176 : vector<2x64xf32>
    %cst_67 = arith.constant 1.000000e+00 : f32
    %178 = vector.broadcast %cst_67 : f32 to vector<2x64xf32>
    %179 = arith.addf %178, %177 : vector<2x64xf32>
    %180 = arith.divf %178, %179 : vector<2x64xf32>
    %181 = arith.mulf %172, %59 : vector<2x64xf32>
    %182 = arith.mulf %166, %174 : vector<2x64xf32>
    %183 = arith.addf %181, %182 : vector<2x64xf32>
    %184 = math.tanh %183 : vector<2x64xf32>
    %185 = arith.mulf %180, %184 : vector<2x64xf32>
    %cst_68 = arith.constant dense<0.000000e+00> : vector<2xf32>
    %186 = vector.multi_reduction <add>, %185, %cst_68 [1] : vector<2x64xf32> to vector<2xf32>
    %187 = vector.shape_cast %186 : vector<2xf32> to vector<2x1xf32>
    %cst_69 = arith.constant 6.400000e+01 : f32
    %188 = vector.broadcast %cst_69 : f32 to vector<2x1xf32>
    %189 = arith.divf %187, %188 : vector<2x1xf32>
    %190 = vector.broadcast %189 : vector<2x1xf32> to vector<2x64xf32>
    %191 = arith.subf %185, %190 : vector<2x64xf32>
    %192 = arith.mulf %191, %191 : vector<2x64xf32>
    %cst_70 = arith.constant dense<0.000000e+00> : vector<2xf32>
    %193 = vector.multi_reduction <add>, %192, %cst_70 [1] : vector<2x64xf32> to vector<2xf32>
    %194 = vector.shape_cast %193 : vector<2xf32> to vector<2x1xf32>
    %cst_71 = arith.constant 6.400000e+01 : f32
    %195 = vector.broadcast %cst_71 : f32 to vector<2x1xf32>
    %196 = arith.divf %194, %195 : vector<2x1xf32>
    %197 = vector.broadcast %189 : vector<2x1xf32> to vector<2x64xf32>
    %198 = arith.subf %185, %197 : vector<2x64xf32>
    %cst_72 = arith.constant 9.99999974E-6 : f32
    %199 = vector.broadcast %cst_72 : f32 to vector<2x1xf32>
    %200 = arith.addf %196, %199 : vector<2x1xf32>
    %201 = math.rsqrt %200 : vector<2x1xf32>
    %202 = vector.broadcast %201 : vector<2x1xf32> to vector<2x64xf32>
    %203 = arith.mulf %198, %202 : vector<2x64xf32>
    %c0_73 = arith.constant 0 : index
    %c0_74 = arith.constant 0 : index
    %c0_75 = arith.constant 0 : index
    %204 = vector.load %arg4[%c0_73, %c0_74, %c0_75] : memref<2x1x64xf32, #tpu.memory_space<vmem>>, vector<1x1x64xf32>
    %205 = vector.shape_cast %204 : vector<1x1x64xf32> to vector<1x64xf32>
    %206 = vector.broadcast %205 : vector<1x64xf32> to vector<2x64xf32>
    %207 = arith.mulf %203, %206 : vector<2x64xf32>
    %c0_76 = arith.constant 0 : index
    %c0_77 = arith.constant 0 : index
    %c0_78 = arith.constant 0 : index
    %208 = vector.load %arg5[%c0_76, %c0_77, %c0_78] : memref<2x1x64xf32, #tpu.memory_space<vmem>>, vector<1x1x64xf32>
    %209 = vector.shape_cast %208 : vector<1x1x64xf32> to vector<1x64xf32>
    %210 = vector.broadcast %209 : vector<1x64xf32> to vector<2x64xf32>
    %211 = arith.addf %207, %210 : vector<2x64xf32>
    %212 = vector.extract_strided_slice %1 {offsets = [0, 1, 0], sizes = [2, 1, 64], strides = [1, 1, 1]} : vector<2x8x64xf32> to vector<2x1x64xf32>
    %213 = vector.shape_cast %212 : vector<2x1x64xf32> to vector<2x64xf32>
    %214 = arith.addf %211, %213 : vector<2x64xf32>
    %c1_79 = arith.constant 1 : index
    %c0_80 = arith.constant 0 : index
    %c0_81 = arith.constant 0 : index
    %215 = vector.load %arg6[%c1_79, %c0_80, %c0_81] : memref<16x2x64xf32, #tpu.memory_space<vmem>>, vector<1x2x64xf32>
    %216 = vector.shape_cast %215 : vector<1x2x64xf32> to vector<2x64xf32>
    %217 = vector.shape_cast %214 : vector<2x64xf32> to vector<1x2x64xf32>
    tpu.vector_store %arg6[%c1_79, %c0_80, %c0_81], %217 {strides = array<i32>} : memref<16x2x64xf32, #tpu.memory_space<vmem>>, vector<1x2x64xf32>,
    %218 = vector.extract_strided_slice %25 {offsets = [0, 1, 0], sizes = [2, 1, 256], strides = [1, 1, 1]} : vector<2x8x256xf32> to vector<2x1x256xf32>
    %219 = vector.shape_cast %218 : vector<2x1x256xf32> to vector<2x256xf32>
    %220 = arith.truncf %123 : vector<2x64xf32> to vector<2x64xbf16>
    %cst_82 = arith.constant dense<0.000000e+00> : vector<2x256xf32>
    %221 = tpu.matmul %220, %27, %cst_82 {dimension_numbers = #tpu.dot_dimension_numbers<[1], [0], [0], [1], [0, 0, 1, 1], [], []>} : vector<2x64xbf16>, vector<64x256xbf16>, vector<2x256xf32> -> vector<2x256xf32>
    %222 = arith.addf %219, %221 : vector<2x256xf32>
    %223 = vector.extract_strided_slice %222 {offsets = [0, 0], sizes = [2, 64], strides = [1, 1]} : vector<2x256xf32> to vector<2x64xf32>
    %224 = arith.negf %223 : vector<2x64xf32>
    %225 = math.exp %224 : vector<2x64xf32>
    %cst_83 = arith.constant 1.000000e+00 : f32
    %226 = vector.broadcast %cst_83 : f32 to vector<2x64xf32>
    %227 = arith.addf %226, %225 : vector<2x64xf32>
    %228 = arith.divf %226, %227 : vector<2x64xf32>
    %229 = vector.extract_strided_slice %222 {offsets = [0, 64], sizes = [2, 64], strides = [1, 1]} : vector<2x256xf32> to vector<2x64xf32>
    %230 = arith.negf %229 : vector<2x64xf32>
    %231 = math.exp %230 : vector<2x64xf32>
    %cst_84 = arith.constant 1.000000e+00 : f32
    %232 = vector.broadcast %cst_84 : f32 to vector<2x64xf32>
    %233 = arith.addf %232, %231 : vector<2x64xf32>
    %234 = arith.divf %232, %233 : vector<2x64xf32>
    %235 = vector.extract_strided_slice %222 {offsets = [0, 128], sizes = [2, 64], strides = [1, 1]} : vector<2x256xf32> to vector<2x64xf32>
    %236 = math.tanh %235 : vector<2x64xf32>
    %237 = vector.extract_strided_slice %222 {offsets = [0, 192], sizes = [2, 64], strides = [1, 1]} : vector<2x256xf32> to vector<2x64xf32>
    %238 = arith.negf %237 : vector<2x64xf32>
    %239 = math.exp %238 : vector<2x64xf32>
    %cst_85 = arith.constant 1.000000e+00 : f32
    %240 = vector.broadcast %cst_85 : f32 to vector<2x64xf32>
    %241 = arith.addf %240, %239 : vector<2x64xf32>
    %242 = arith.divf %240, %241 : vector<2x64xf32>
    %243 = arith.mulf %234, %121 : vector<2x64xf32>
    %244 = arith.mulf %228, %236 : vector<2x64xf32>
    %245 = arith.addf %243, %244 : vector<2x64xf32>
    %246 = math.tanh %245 : vector<2x64xf32>
    %247 = arith.mulf %242, %246 : vector<2x64xf32>
    %cst_86 = arith.constant dense<0.000000e+00> : vector<2xf32>
    %248 = vector.multi_reduction <add>, %247, %cst_86 [1] : vector<2x64xf32> to vector<2xf32>
    %249 = vector.shape_cast %248 : vector<2xf32> to vector<2x1xf32>
    %cst_87 = arith.constant 6.400000e+01 : f32
    %250 = vector.broadcast %cst_87 : f32 to vector<2x1xf32>
    %251 = arith.divf %249, %250 : vector<2x1xf32>
    %252 = vector.broadcast %251 : vector<2x1xf32> to vector<2x64xf32>
    %253 = arith.subf %247, %252 : vector<2x64xf32>
    %254 = arith.mulf %253, %253 : vector<2x64xf32>
    %cst_88 = arith.constant dense<0.000000e+00> : vector<2xf32>
    %255 = vector.multi_reduction <add>, %254, %cst_88 [1] : vector<2x64xf32> to vector<2xf32>
    %256 = vector.shape_cast %255 : vector<2xf32> to vector<2x1xf32>
    %cst_89 = arith.constant 6.400000e+01 : f32
    %257 = vector.broadcast %cst_89 : f32 to vector<2x1xf32>
    %258 = arith.divf %256, %257 : vector<2x1xf32>
    %259 = vector.broadcast %251 : vector<2x1xf32> to vector<2x64xf32>
    %260 = arith.subf %247, %259 : vector<2x64xf32>
    %cst_90 = arith.constant 9.99999974E-6 : f32
    %261 = vector.broadcast %cst_90 : f32 to vector<2x1xf32>
    %262 = arith.addf %258, %261 : vector<2x1xf32>
    %263 = math.rsqrt %262 : vector<2x1xf32>
    %264 = vector.broadcast %263 : vector<2x1xf32> to vector<2x64xf32>
    %265 = arith.mulf %260, %264 : vector<2x64xf32>
    %c1_91 = arith.constant 1 : index
    %c0_92 = arith.constant 0 : index
    %c0_93 = arith.constant 0 : index
    %266 = vector.load %arg4[%c1_91, %c0_92, %c0_93] : memref<2x1x64xf32, #tpu.memory_space<vmem>>, vector<1x1x64xf32>
    %267 = vector.shape_cast %266 : vector<1x1x64xf32> to vector<1x64xf32>
    %268 = vector.broadcast %267 : vector<1x64xf32> to vector<2x64xf32>
    %269 = arith.mulf %265, %268 : vector<2x64xf32>
    %c1_94 = arith.constant 1 : index
    %c0_95 = arith.constant 0 : index
    %c0_96 = arith.constant 0 : index
    %270 = vector.load %arg5[%c1_94, %c0_95, %c0_96] : memref<2x1x64xf32, #tpu.memory_space<vmem>>, vector<1x1x64xf32>
    %271 = vector.shape_cast %270 : vector<1x1x64xf32> to vector<1x64xf32>
    %272 = vector.broadcast %271 : vector<1x64xf32> to vector<2x64xf32>
    %273 = arith.addf %269, %272 : vector<2x64xf32>
    %274 = vector.extract_strided_slice %15 {offsets = [0, 1, 0], sizes = [2, 1, 64], strides = [1, 1, 1]} : vector<2x8x64xf32> to vector<2x1x64xf32>
    %275 = vector.shape_cast %274 : vector<2x1x64xf32> to vector<2x64xf32>
    %276 = arith.addf %273, %275 : vector<2x64xf32>
    %c9 = arith.constant 9 : index
    %c0_97 = arith.constant 0 : index
    %c0_98 = arith.constant 0 : index
    %277 = vector.load %arg6[%c9, %c0_97, %c0_98] : memref<16x2x64xf32, #tpu.memory_space<vmem>>, vector<1x2x64xf32>
    %278 = vector.shape_cast %277 : vector<1x2x64xf32> to vector<2x64xf32>
    %279 = vector.shape_cast %276 : vector<2x64xf32> to vector<1x2x64xf32>
    tpu.vector_store %arg6[%c9, %c0_97, %c0_98], %279 {strides = array<i32>} : memref<16x2x64xf32, #tpu.memory_space<vmem>>, vector<1x2x64xf32>,
    %280 = vector.extract_strided_slice %11 {offsets = [0, 2, 0], sizes = [2, 1, 256], strides = [1, 1, 1]} : vector<2x8x256xf32> to vector<2x1x256xf32>
    %281 = vector.shape_cast %280 : vector<2x1x256xf32> to vector<2x256xf32>
    %282 = arith.truncf %185 : vector<2x64xf32> to vector<2x64xbf16>
    %cst_99 = arith.constant dense<0.000000e+00> : vector<2x256xf32>
    %283 = tpu.matmul %282, %13, %cst_99 {dimension_numbers = #tpu.dot_dimension_numbers<[1], [0], [0], [1], [0, 0, 1, 1], [], []>} : vector<2x64xbf16>, vector<64x256xbf16>, vector<2x256xf32> -> vector<2x256xf32>
    %284 = arith.addf %281, %283 : vector<2x256xf32>
    %285 = vector.extract_strided_slice %284 {offsets = [0, 0], sizes = [2, 64], strides = [1, 1]} : vector<2x256xf32> to vector<2x64xf32>
    %286 = arith.negf %285 : vector<2x64xf32>
    %287 = math.exp %286 : vector<2x64xf32>
    %cst_100 = arith.constant 1.000000e+00 : f32
    %288 = vector.broadcast %cst_100 : f32 to vector<2x64xf32>
    %289 = arith.addf %288, %287 : vector<2x64xf32>
    %290 = arith.divf %288, %289 : vector<2x64xf32>
    %291 = vector.extract_strided_slice %284 {offsets = [0, 64], sizes = [2, 64], strides = [1, 1]} : vector<2x256xf32> to vector<2x64xf32>
    %292 = arith.negf %291 : vector<2x64xf32>
    %293 = math.exp %292 : vector<2x64xf32>
    %cst_101 = arith.constant 1.000000e+00 : f32
    %294 = vector.broadcast %cst_101 : f32 to vector<2x64xf32>
    %295 = arith.addf %294, %293 : vector<2x64xf32>
    %296 = arith.divf %294, %295 : vector<2x64xf32>
    %297 = vector.extract_strided_slice %284 {offsets = [0, 128], sizes = [2, 64], strides = [1, 1]} : vector<2x256xf32> to vector<2x64xf32>
    %298 = math.tanh %297 : vector<2x64xf32>
    %299 = vector.extract_strided_slice %284 {offsets = [0, 192], sizes = [2, 64], strides = [1, 1]} : vector<2x256xf32> to vector<2x64xf32>
    %300 = arith.negf %299 : vector<2x64xf32>
    %301 = math.exp %300 : vector<2x64xf32>
    %cst_102 = arith.constant 1.000000e+00 : f32
    %302 = vector.broadcast %cst_102 : f32 to vector<2x64xf32>
    %303 = arith.addf %302, %301 : vector<2x64xf32>
    %304 = arith.divf %302, %303 : vector<2x64xf32>
    %305 = arith.mulf %296, %183 : vector<2x64xf32>
    %306 = arith.mulf %290, %298 : vector<2x64xf32>
    %307 = arith.addf %305, %306 : vector<2x64xf32>
    %308 = math.tanh %307 : vector<2x64xf32>
    %309 = arith.mulf %304, %308 : vector<2x64xf32>
    %cst_103 = arith.constant dense<0.000000e+00> : vector<2xf32>
    %310 = vector.multi_reduction <add>, %309, %cst_103 [1] : vector<2x64xf32> to vector<2xf32>
    %311 = vector.shape_cast %310 : vector<2xf32> to vector<2x1xf32>
    %cst_104 = arith.constant 6.400000e+01 : f32
    %312 = vector.broadcast %cst_104 : f32 to vector<2x1xf32>
    %313 = arith.divf %311, %312 : vector<2x1xf32>
    %314 = vector.broadcast %313 : vector<2x1xf32> to vector<2x64xf32>
    %315 = arith.subf %309, %314 : vector<2x64xf32>
    %316 = arith.mulf %315, %315 : vector<2x64xf32>
    %cst_105 = arith.constant dense<0.000000e+00> : vector<2xf32>
    %317 = vector.multi_reduction <add>, %316, %cst_105 [1] : vector<2x64xf32> to vector<2xf32>
    %318 = vector.shape_cast %317 : vector<2xf32> to vector<2x1xf32>
    %cst_106 = arith.constant 6.400000e+01 : f32
    %319 = vector.broadcast %cst_106 : f32 to vector<2x1xf32>
    %320 = arith.divf %318, %319 : vector<2x1xf32>
    %321 = vector.broadcast %313 : vector<2x1xf32> to vector<2x64xf32>
    %322 = arith.subf %309, %321 : vector<2x64xf32>
    %cst_107 = arith.constant 9.99999974E-6 : f32
    %323 = vector.broadcast %cst_107 : f32 to vector<2x1xf32>
    %324 = arith.addf %320, %323 : vector<2x1xf32>
    %325 = math.rsqrt %324 : vector<2x1xf32>
    %326 = vector.broadcast %325 : vector<2x1xf32> to vector<2x64xf32>
    %327 = arith.mulf %322, %326 : vector<2x64xf32>
    %c0_108 = arith.constant 0 : index
    %c0_109 = arith.constant 0 : index
    %c0_110 = arith.constant 0 : index
    %328 = vector.load %arg4[%c0_108, %c0_109, %c0_110] : memref<2x1x64xf32, #tpu.memory_space<vmem>>, vector<1x1x64xf32>
    %329 = vector.shape_cast %328 : vector<1x1x64xf32> to vector<1x64xf32>
    %330 = vector.broadcast %329 : vector<1x64xf32> to vector<2x64xf32>
    %331 = arith.mulf %327, %330 : vector<2x64xf32>
    %c0_111 = arith.constant 0 : index
    %c0_112 = arith.constant 0 : index
    %c0_113 = arith.constant 0 : index
    %332 = vector.load %arg5[%c0_111, %c0_112, %c0_113] : memref<2x1x64xf32, #tpu.memory_space<vmem>>, vector<1x1x64xf32>
    %333 = vector.shape_cast %332 : vector<1x1x64xf32> to vector<1x64xf32>
    %334 = vector.broadcast %333 : vector<1x64xf32> to vector<2x64xf32>
    %335 = arith.addf %331, %334 : vector<2x64xf32>
    %336 = vector.extract_strided_slice %1 {offsets = [0, 2, 0], sizes = [2, 1, 64], strides = [1, 1, 1]} : vector<2x8x64xf32> to vector<2x1x64xf32>
    %337 = vector.shape_cast %336 : vector<2x1x64xf32> to vector<2x64xf32>
    %338 = arith.addf %335, %337 : vector<2x64xf32>
    %c2 = arith.constant 2 : index
    %c0_114 = arith.constant 0 : index
    %c0_115 = arith.constant 0 : index
    %339 = vector.load %arg6[%c2, %c0_114, %c0_115] : memref<16x2x64xf32, #tpu.memory_space<vmem>>, vector<1x2x64xf32>
    %340 = vector.shape_cast %339 : vector<1x2x64xf32> to vector<2x64xf32>
    %341 = vector.shape_cast %338 : vector<2x64xf32> to vector<1x2x64xf32>
    tpu.vector_store %arg6[%c2, %c0_114, %c0_115], %341 {strides = array<i32>} : memref<16x2x64xf32, #tpu.memory_space<vmem>>, vector<1x2x64xf32>,
    %342 = vector.extract_strided_slice %25 {offsets = [0, 2, 0], sizes = [2, 1, 256], strides = [1, 1, 1]} : vector<2x8x256xf32> to vector<2x1x256xf32>
    %343 = vector.shape_cast %342 : vector<2x1x256xf32> to vector<2x256xf32>
    %344 = arith.truncf %247 : vector<2x64xf32> to vector<2x64xbf16>
    %cst_116 = arith.constant dense<0.000000e+00> : vector<2x256xf32>
    %345 = tpu.matmul %344, %27, %cst_116 {dimension_numbers = #tpu.dot_dimension_numbers<[1], [0], [0], [1], [0, 0, 1, 1], [], []>} : vector<2x64xbf16>, vector<64x256xbf16>, vector<2x256xf32> -> vector<2x256xf32>
    %346 = arith.addf %343, %345 : vector<2x256xf32>
    %347 = vector.extract_strided_slice %346 {offsets = [0, 0], sizes = [2, 64], strides = [1, 1]} : vector<2x256xf32> to vector<2x64xf32>
    %348 = arith.negf %347 : vector<2x64xf32>
    %349 = math.exp %348 : vector<2x64xf32>
    %cst_117 = arith.constant 1.000000e+00 : f32
    %350 = vector.broadcast %cst_117 : f32 to vector<2x64xf32>
    %351 = arith.addf %350, %349 : vector<2x64xf32>
    %352 = arith.divf %350, %351 : vector<2x64xf32>
    %353 = vector.extract_strided_slice %346 {offsets = [0, 64], sizes = [2, 64], strides = [1, 1]} : vector<2x256xf32> to vector<2x64xf32>
    %354 = arith.negf %353 : vector<2x64xf32>
    %355 = math.exp %354 : vector<2x64xf32>
    %cst_118 = arith.constant 1.000000e+00 : f32
    %356 = vector.broadcast %cst_118 : f32 to vector<2x64xf32>
    %357 = arith.addf %356, %355 : vector<2x64xf32>
    %358 = arith.divf %356, %357 : vector<2x64xf32>
    %359 = vector.extract_strided_slice %346 {offsets = [0, 128], sizes = [2, 64], strides = [1, 1]} : vector<2x256xf32> to vector<2x64xf32>
    %360 = math.tanh %359 : vector<2x64xf32>
    %361 = vector.extract_strided_slice %346 {offsets = [0, 192], sizes = [2, 64], strides = [1, 1]} : vector<2x256xf32> to vector<2x64xf32>
    %362 = arith.negf %361 : vector<2x64xf32>
    %363 = math.exp %362 : vector<2x64xf32>
    %cst_119 = arith.constant 1.000000e+00 : f32
    %364 = vector.broadcast %cst_119 : f32 to vector<2x64xf32>
    %365 = arith.addf %364, %363 : vector<2x64xf32>
    %366 = arith.divf %364, %365 : vector<2x64xf32>
    %367 = arith.mulf %358, %245 : vector<2x64xf32>
    %368 = arith.mulf %352, %360 : vector<2x64xf32>
    %369 = arith.addf %367, %368 : vector<2x64xf32>
    %370 = math.tanh %369 : vector<2x64xf32>
    %371 = arith.mulf %366, %370 : vector<2x64xf32>
    %cst_120 = arith.constant dense<0.000000e+00> : vector<2xf32>
    %372 = vector.multi_reduction <add>, %371, %cst_120 [1] : vector<2x64xf32> to vector<2xf32>
    %373 = vector.shape_cast %372 : vector<2xf32> to vector<2x1xf32>
    %cst_121 = arith.constant 6.400000e+01 : f32
    %374 = vector.broadcast %cst_121 : f32 to vector<2x1xf32>
    %375 = arith.divf %373, %374 : vector<2x1xf32>
    %376 = vector.broadcast %375 : vector<2x1xf32> to vector<2x64xf32>
    %377 = arith.subf %371, %376 : vector<2x64xf32>
    %378 = arith.mulf %377, %377 : vector<2x64xf32>
    %cst_122 = arith.constant dense<0.000000e+00> : vector<2xf32>
    %379 = vector.multi_reduction <add>, %378, %cst_122 [1] : vector<2x64xf32> to vector<2xf32>
    %380 = vector.shape_cast %379 : vector<2xf32> to vector<2x1xf32>
    %cst_123 = arith.constant 6.400000e+01 : f32
    %381 = vector.broadcast %cst_123 : f32 to vector<2x1xf32>
    %382 = arith.divf %380, %381 : vector<2x1xf32>
    %383 = vector.broadcast %375 : vector<2x1xf32> to vector<2x64xf32>
    %384 = arith.subf %371, %383 : vector<2x64xf32>
    %cst_124 = arith.constant 9.99999974E-6 : f32
    %385 = vector.broadcast %cst_124 : f32 to vector<2x1xf32>
    %386 = arith.addf %382, %385 : vector<2x1xf32>
    %387 = math.rsqrt %386 : vector<2x1xf32>
    %388 = vector.broadcast %387 : vector<2x1xf32> to vector<2x64xf32>
    %389 = arith.mulf %384, %388 : vector<2x64xf32>
    %c1_125 = arith.constant 1 : index
    %c0_126 = arith.constant 0 : index
    %c0_127 = arith.constant 0 : index
    %390 = vector.load %arg4[%c1_125, %c0_126, %c0_127] : memref<2x1x64xf32, #tpu.memory_space<vmem>>, vector<1x1x64xf32>
    %391 = vector.shape_cast %390 : vector<1x1x64xf32> to vector<1x64xf32>
    %392 = vector.broadcast %391 : vector<1x64xf32> to vector<2x64xf32>
    %393 = arith.mulf %389, %392 : vector<2x64xf32>
    %c1_128 = arith.constant 1 : index
    %c0_129 = arith.constant 0 : index
    %c0_130 = arith.constant 0 : index
    %394 = vector.load %arg5[%c1_128, %c0_129, %c0_130] : memref<2x1x64xf32, #tpu.memory_space<vmem>>, vector<1x1x64xf32>
    %395 = vector.shape_cast %394 : vector<1x1x64xf32> to vector<1x64xf32>
    %396 = vector.broadcast %395 : vector<1x64xf32> to vector<2x64xf32>
    %397 = arith.addf %393, %396 : vector<2x64xf32>
    %398 = vector.extract_strided_slice %15 {offsets = [0, 2, 0], sizes = [2, 1, 64], strides = [1, 1, 1]} : vector<2x8x64xf32> to vector<2x1x64xf32>
    %399 = vector.shape_cast %398 : vector<2x1x64xf32> to vector<2x64xf32>
    %400 = arith.addf %397, %399 : vector<2x64xf32>
    %c10 = arith.constant 10 : index
    %c0_131 = arith.constant 0 : index
    %c0_132 = arith.constant 0 : index
    %401 = vector.load %arg6[%c10, %c0_131, %c0_132] : memref<16x2x64xf32, #tpu.memory_space<vmem>>, vector<1x2x64xf32>
    %402 = vector.shape_cast %401 : vector<1x2x64xf32> to vector<2x64xf32>
    %403 = vector.shape_cast %400 : vector<2x64xf32> to vector<1x2x64xf32>
    tpu.vector_store %arg6[%c10, %c0_131, %c0_132], %403 {strides = array<i32>} : memref<16x2x64xf32, #tpu.memory_space<vmem>>, vector<1x2x64xf32>,
    %404 = vector.extract_strided_slice %11 {offsets = [0, 3, 0], sizes = [2, 1, 256], strides = [1, 1, 1]} : vector<2x8x256xf32> to vector<2x1x256xf32>
    %405 = vector.shape_cast %404 : vector<2x1x256xf32> to vector<2x256xf32>
    %406 = arith.truncf %309 : vector<2x64xf32> to vector<2x64xbf16>
    %cst_133 = arith.constant dense<0.000000e+00> : vector<2x256xf32>
    %407 = tpu.matmul %406, %13, %cst_133 {dimension_numbers = #tpu.dot_dimension_numbers<[1], [0], [0], [1], [0, 0, 1, 1], [], []>} : vector<2x64xbf16>, vector<64x256xbf16>, vector<2x256xf32> -> vector<2x256xf32>
    %408 = arith.addf %405, %407 : vector<2x256xf32>
    %409 = vector.extract_strided_slice %408 {offsets = [0, 0], sizes = [2, 64], strides = [1, 1]} : vector<2x256xf32> to vector<2x64xf32>
    %410 = arith.negf %409 : vector<2x64xf32>
    %411 = math.exp %410 : vector<2x64xf32>
    %cst_134 = arith.constant 1.000000e+00 : f32
    %412 = vector.broadcast %cst_134 : f32 to vector<2x64xf32>
    %413 = arith.addf %412, %411 : vector<2x64xf32>
    %414 = arith.divf %412, %413 : vector<2x64xf32>
    %415 = vector.extract_strided_slice %408 {offsets = [0, 64], sizes = [2, 64], strides = [1, 1]} : vector<2x256xf32> to vector<2x64xf32>
    %416 = arith.negf %415 : vector<2x64xf32>
    %417 = math.exp %416 : vector<2x64xf32>
    %cst_135 = arith.constant 1.000000e+00 : f32
    %418 = vector.broadcast %cst_135 : f32 to vector<2x64xf32>
    %419 = arith.addf %418, %417 : vector<2x64xf32>
    %420 = arith.divf %418, %419 : vector<2x64xf32>
    %421 = vector.extract_strided_slice %408 {offsets = [0, 128], sizes = [2, 64], strides = [1, 1]} : vector<2x256xf32> to vector<2x64xf32>
    %422 = math.tanh %421 : vector<2x64xf32>
    %423 = vector.extract_strided_slice %408 {offsets = [0, 192], sizes = [2, 64], strides = [1, 1]} : vector<2x256xf32> to vector<2x64xf32>
    %424 = arith.negf %423 : vector<2x64xf32>
    %425 = math.exp %424 : vector<2x64xf32>
    %cst_136 = arith.constant 1.000000e+00 : f32
    %426 = vector.broadcast %cst_136 : f32 to vector<2x64xf32>
    %427 = arith.addf %426, %425 : vector<2x64xf32>
    %428 = arith.divf %426, %427 : vector<2x64xf32>
    %429 = arith.mulf %420, %307 : vector<2x64xf32>
    %430 = arith.mulf %414, %422 : vector<2x64xf32>
    %431 = arith.addf %429, %430 : vector<2x64xf32>
    %432 = math.tanh %431 : vector<2x64xf32>
    %433 = arith.mulf %428, %432 : vector<2x64xf32>
    %cst_137 = arith.constant dense<0.000000e+00> : vector<2xf32>
    %434 = vector.multi_reduction <add>, %433, %cst_137 [1] : vector<2x64xf32> to vector<2xf32>
    %435 = vector.shape_cast %434 : vector<2xf32> to vector<2x1xf32>
    %cst_138 = arith.constant 6.400000e+01 : f32
    %436 = vector.broadcast %cst_138 : f32 to vector<2x1xf32>
    %437 = arith.divf %435, %436 : vector<2x1xf32>
    %438 = vector.broadcast %437 : vector<2x1xf32> to vector<2x64xf32>
    %439 = arith.subf %433, %438 : vector<2x64xf32>
    %440 = arith.mulf %439, %439 : vector<2x64xf32>
    %cst_139 = arith.constant dense<0.000000e+00> : vector<2xf32>
    %441 = vector.multi_reduction <add>, %440, %cst_139 [1] : vector<2x64xf32> to vector<2xf32>
    %442 = vector.shape_cast %441 : vector<2xf32> to vector<2x1xf32>
    %cst_140 = arith.constant 6.400000e+01 : f32
    %443 = vector.broadcast %cst_140 : f32 to vector<2x1xf32>
    %444 = arith.divf %442, %443 : vector<2x1xf32>
    %445 = vector.broadcast %437 : vector<2x1xf32> to vector<2x64xf32>
    %446 = arith.subf %433, %445 : vector<2x64xf32>
    %cst_141 = arith.constant 9.99999974E-6 : f32
    %447 = vector.broadcast %cst_141 : f32 to vector<2x1xf32>
    %448 = arith.addf %444, %447 : vector<2x1xf32>
    %449 = math.rsqrt %448 : vector<2x1xf32>
    %450 = vector.broadcast %449 : vector<2x1xf32> to vector<2x64xf32>
    %451 = arith.mulf %446, %450 : vector<2x64xf32>
    %c0_142 = arith.constant 0 : index
    %c0_143 = arith.constant 0 : index
    %c0_144 = arith.constant 0 : index
    %452 = vector.load %arg4[%c0_142, %c0_143, %c0_144] : memref<2x1x64xf32, #tpu.memory_space<vmem>>, vector<1x1x64xf32>
    %453 = vector.shape_cast %452 : vector<1x1x64xf32> to vector<1x64xf32>
    %454 = vector.broadcast %453 : vector<1x64xf32> to vector<2x64xf32>
    %455 = arith.mulf %451, %454 : vector<2x64xf32>
    %c0_145 = arith.constant 0 : index
    %c0_146 = arith.constant 0 : index
    %c0_147 = arith.constant 0 : index
    %456 = vector.load %arg5[%c0_145, %c0_146, %c0_147] : memref<2x1x64xf32, #tpu.memory_space<vmem>>, vector<1x1x64xf32>
    %457 = vector.shape_cast %456 : vector<1x1x64xf32> to vector<1x64xf32>
    %458 = vector.broadcast %457 : vector<1x64xf32> to vector<2x64xf32>
    %459 = arith.addf %455, %458 : vector<2x64xf32>
    %460 = vector.extract_strided_slice %1 {offsets = [0, 3, 0], sizes = [2, 1, 64], strides = [1, 1, 1]} : vector<2x8x64xf32> to vector<2x1x64xf32>
    %461 = vector.shape_cast %460 : vector<2x1x64xf32> to vector<2x64xf32>
    %462 = arith.addf %459, %461 : vector<2x64xf32>
    %c3 = arith.constant 3 : index
    %c0_148 = arith.constant 0 : index
    %c0_149 = arith.constant 0 : index
    %463 = vector.load %arg6[%c3, %c0_148, %c0_149] : memref<16x2x64xf32, #tpu.memory_space<vmem>>, vector<1x2x64xf32>
    %464 = vector.shape_cast %463 : vector<1x2x64xf32> to vector<2x64xf32>
    %465 = vector.shape_cast %462 : vector<2x64xf32> to vector<1x2x64xf32>
    tpu.vector_store %arg6[%c3, %c0_148, %c0_149], %465 {strides = array<i32>} : memref<16x2x64xf32, #tpu.memory_space<vmem>>, vector<1x2x64xf32>,
    %466 = vector.extract_strided_slice %25 {offsets = [0, 3, 0], sizes = [2, 1, 256], strides = [1, 1, 1]} : vector<2x8x256xf32> to vector<2x1x256xf32>
    %467 = vector.shape_cast %466 : vector<2x1x256xf32> to vector<2x256xf32>
    %468 = arith.truncf %371 : vector<2x64xf32> to vector<2x64xbf16>
    %cst_150 = arith.constant dense<0.000000e+00> : vector<2x256xf32>
    %469 = tpu.matmul %468, %27, %cst_150 {dimension_numbers = #tpu.dot_dimension_numbers<[1], [0], [0], [1], [0, 0, 1, 1], [], []>} : vector<2x64xbf16>, vector<64x256xbf16>, vector<2x256xf32> -> vector<2x256xf32>
    %470 = arith.addf %467, %469 : vector<2x256xf32>
    %471 = vector.extract_strided_slice %470 {offsets = [0, 0], sizes = [2, 64], strides = [1, 1]} : vector<2x256xf32> to vector<2x64xf32>
    %472 = arith.negf %471 : vector<2x64xf32>
    %473 = math.exp %472 : vector<2x64xf32>
    %cst_151 = arith.constant 1.000000e+00 : f32
    %474 = vector.broadcast %cst_151 : f32 to vector<2x64xf32>
    %475 = arith.addf %474, %473 : vector<2x64xf32>
    %476 = arith.divf %474, %475 : vector<2x64xf32>
    %477 = vector.extract_strided_slice %470 {offsets = [0, 64], sizes = [2, 64], strides = [1, 1]} : vector<2x256xf32> to vector<2x64xf32>
    %478 = arith.negf %477 : vector<2x64xf32>
    %479 = math.exp %478 : vector<2x64xf32>
    %cst_152 = arith.constant 1.000000e+00 : f32
    %480 = vector.broadcast %cst_152 : f32 to vector<2x64xf32>
    %481 = arith.addf %480, %479 : vector<2x64xf32>
    %482 = arith.divf %480, %481 : vector<2x64xf32>
    %483 = vector.extract_strided_slice %470 {offsets = [0, 128], sizes = [2, 64], strides = [1, 1]} : vector<2x256xf32> to vector<2x64xf32>
    %484 = math.tanh %483 : vector<2x64xf32>
    %485 = vector.extract_strided_slice %470 {offsets = [0, 192], sizes = [2, 64], strides = [1, 1]} : vector<2x256xf32> to vector<2x64xf32>
    %486 = arith.negf %485 : vector<2x64xf32>
    %487 = math.exp %486 : vector<2x64xf32>
    %cst_153 = arith.constant 1.000000e+00 : f32
    %488 = vector.broadcast %cst_153 : f32 to vector<2x64xf32>
    %489 = arith.addf %488, %487 : vector<2x64xf32>
    %490 = arith.divf %488, %489 : vector<2x64xf32>
    %491 = arith.mulf %482, %369 : vector<2x64xf32>
    %492 = arith.mulf %476, %484 : vector<2x64xf32>
    %493 = arith.addf %491, %492 : vector<2x64xf32>
    %494 = math.tanh %493 : vector<2x64xf32>
    %495 = arith.mulf %490, %494 : vector<2x64xf32>
    %cst_154 = arith.constant dense<0.000000e+00> : vector<2xf32>
    %496 = vector.multi_reduction <add>, %495, %cst_154 [1] : vector<2x64xf32> to vector<2xf32>
    %497 = vector.shape_cast %496 : vector<2xf32> to vector<2x1xf32>
    %cst_155 = arith.constant 6.400000e+01 : f32
    %498 = vector.broadcast %cst_155 : f32 to vector<2x1xf32>
    %499 = arith.divf %497, %498 : vector<2x1xf32>
    %500 = vector.broadcast %499 : vector<2x1xf32> to vector<2x64xf32>
    %501 = arith.subf %495, %500 : vector<2x64xf32>
    %502 = arith.mulf %501, %501 : vector<2x64xf32>
    %cst_156 = arith.constant dense<0.000000e+00> : vector<2xf32>
    %503 = vector.multi_reduction <add>, %502, %cst_156 [1] : vector<2x64xf32> to vector<2xf32>
    %504 = vector.shape_cast %503 : vector<2xf32> to vector<2x1xf32>
    %cst_157 = arith.constant 6.400000e+01 : f32
    %505 = vector.broadcast %cst_157 : f32 to vector<2x1xf32>
    %506 = arith.divf %504, %505 : vector<2x1xf32>
    %507 = vector.broadcast %499 : vector<2x1xf32> to vector<2x64xf32>
    %508 = arith.subf %495, %507 : vector<2x64xf32>
    %cst_158 = arith.constant 9.99999974E-6 : f32
    %509 = vector.broadcast %cst_158 : f32 to vector<2x1xf32>
    %510 = arith.addf %506, %509 : vector<2x1xf32>
    %511 = math.rsqrt %510 : vector<2x1xf32>
    %512 = vector.broadcast %511 : vector<2x1xf32> to vector<2x64xf32>
    %513 = arith.mulf %508, %512 : vector<2x64xf32>
    %c1_159 = arith.constant 1 : index
    %c0_160 = arith.constant 0 : index
    %c0_161 = arith.constant 0 : index
    %514 = vector.load %arg4[%c1_159, %c0_160, %c0_161] : memref<2x1x64xf32, #tpu.memory_space<vmem>>, vector<1x1x64xf32>
    %515 = vector.shape_cast %514 : vector<1x1x64xf32> to vector<1x64xf32>
    %516 = vector.broadcast %515 : vector<1x64xf32> to vector<2x64xf32>
    %517 = arith.mulf %513, %516 : vector<2x64xf32>
    %c1_162 = arith.constant 1 : index
    %c0_163 = arith.constant 0 : index
    %c0_164 = arith.constant 0 : index
    %518 = vector.load %arg5[%c1_162, %c0_163, %c0_164] : memref<2x1x64xf32, #tpu.memory_space<vmem>>, vector<1x1x64xf32>
    %519 = vector.shape_cast %518 : vector<1x1x64xf32> to vector<1x64xf32>
    %520 = vector.broadcast %519 : vector<1x64xf32> to vector<2x64xf32>
    %521 = arith.addf %517, %520 : vector<2x64xf32>
    %522 = vector.extract_strided_slice %15 {offsets = [0, 3, 0], sizes = [2, 1, 64], strides = [1, 1, 1]} : vector<2x8x64xf32> to vector<2x1x64xf32>
    %523 = vector.shape_cast %522 : vector<2x1x64xf32> to vector<2x64xf32>
    %524 = arith.addf %521, %523 : vector<2x64xf32>
    %c11 = arith.constant 11 : index
    %c0_165 = arith.constant 0 : index
    %c0_166 = arith.constant 0 : index
    %525 = vector.load %arg6[%c11, %c0_165, %c0_166] : memref<16x2x64xf32, #tpu.memory_space<vmem>>, vector<1x2x64xf32>
    %526 = vector.shape_cast %525 : vector<1x2x64xf32> to vector<2x64xf32>
    %527 = vector.shape_cast %524 : vector<2x64xf32> to vector<1x2x64xf32>
    tpu.vector_store %arg6[%c11, %c0_165, %c0_166], %527 {strides = array<i32>} : memref<16x2x64xf32, #tpu.memory_space<vmem>>, vector<1x2x64xf32>,
    %528 = vector.extract_strided_slice %11 {offsets = [0, 4, 0], sizes = [2, 1, 256], strides = [1, 1, 1]} : vector<2x8x256xf32> to vector<2x1x256xf32>
    %529 = vector.shape_cast %528 : vector<2x1x256xf32> to vector<2x256xf32>
    %530 = arith.truncf %433 : vector<2x64xf32> to vector<2x64xbf16>
    %cst_167 = arith.constant dense<0.000000e+00> : vector<2x256xf32>
    %531 = tpu.matmul %530, %13, %cst_167 {dimension_numbers = #tpu.dot_dimension_numbers<[1], [0], [0], [1], [0, 0, 1, 1], [], []>} : vector<2x64xbf16>, vector<64x256xbf16>, vector<2x256xf32> -> vector<2x256xf32>
    %532 = arith.addf %529, %531 : vector<2x256xf32>
    %533 = vector.extract_strided_slice %532 {offsets = [0, 0], sizes = [2, 64], strides = [1, 1]} : vector<2x256xf32> to vector<2x64xf32>
    %534 = arith.negf %533 : vector<2x64xf32>
    %535 = math.exp %534 : vector<2x64xf32>
    %cst_168 = arith.constant 1.000000e+00 : f32
    %536 = vector.broadcast %cst_168 : f32 to vector<2x64xf32>
    %537 = arith.addf %536, %535 : vector<2x64xf32>
    %538 = arith.divf %536, %537 : vector<2x64xf32>
    %539 = vector.extract_strided_slice %532 {offsets = [0, 64], sizes = [2, 64], strides = [1, 1]} : vector<2x256xf32> to vector<2x64xf32>
    %540 = arith.negf %539 : vector<2x64xf32>
    %541 = math.exp %540 : vector<2x64xf32>
    %cst_169 = arith.constant 1.000000e+00 : f32
    %542 = vector.broadcast %cst_169 : f32 to vector<2x64xf32>
    %543 = arith.addf %542, %541 : vector<2x64xf32>
    %544 = arith.divf %542, %543 : vector<2x64xf32>
    %545 = vector.extract_strided_slice %532 {offsets = [0, 128], sizes = [2, 64], strides = [1, 1]} : vector<2x256xf32> to vector<2x64xf32>
    %546 = math.tanh %545 : vector<2x64xf32>
    %547 = vector.extract_strided_slice %532 {offsets = [0, 192], sizes = [2, 64], strides = [1, 1]} : vector<2x256xf32> to vector<2x64xf32>
    %548 = arith.negf %547 : vector<2x64xf32>
    %549 = math.exp %548 : vector<2x64xf32>
    %cst_170 = arith.constant 1.000000e+00 : f32
    %550 = vector.broadcast %cst_170 : f32 to vector<2x64xf32>
    %551 = arith.addf %550, %549 : vector<2x64xf32>
    %552 = arith.divf %550, %551 : vector<2x64xf32>
    %553 = arith.mulf %544, %431 : vector<2x64xf32>
    %554 = arith.mulf %538, %546 : vector<2x64xf32>
    %555 = arith.addf %553, %554 : vector<2x64xf32>
    %556 = math.tanh %555 : vector<2x64xf32>
    %557 = arith.mulf %552, %556 : vector<2x64xf32>
    %cst_171 = arith.constant dense<0.000000e+00> : vector<2xf32>
    %558 = vector.multi_reduction <add>, %557, %cst_171 [1] : vector<2x64xf32> to vector<2xf32>
    %559 = vector.shape_cast %558 : vector<2xf32> to vector<2x1xf32>
    %cst_172 = arith.constant 6.400000e+01 : f32
    %560 = vector.broadcast %cst_172 : f32 to vector<2x1xf32>
    %561 = arith.divf %559, %560 : vector<2x1xf32>
    %562 = vector.broadcast %561 : vector<2x1xf32> to vector<2x64xf32>
    %563 = arith.subf %557, %562 : vector<2x64xf32>
    %564 = arith.mulf %563, %563 : vector<2x64xf32>
    %cst_173 = arith.constant dense<0.000000e+00> : vector<2xf32>
    %565 = vector.multi_reduction <add>, %564, %cst_173 [1] : vector<2x64xf32> to vector<2xf32>
    %566 = vector.shape_cast %565 : vector<2xf32> to vector<2x1xf32>
    %cst_174 = arith.constant 6.400000e+01 : f32
    %567 = vector.broadcast %cst_174 : f32 to vector<2x1xf32>
    %568 = arith.divf %566, %567 : vector<2x1xf32>
    %569 = vector.broadcast %561 : vector<2x1xf32> to vector<2x64xf32>
    %570 = arith.subf %557, %569 : vector<2x64xf32>
    %cst_175 = arith.constant 9.99999974E-6 : f32
    %571 = vector.broadcast %cst_175 : f32 to vector<2x1xf32>
    %572 = arith.addf %568, %571 : vector<2x1xf32>
    %573 = math.rsqrt %572 : vector<2x1xf32>
    %574 = vector.broadcast %573 : vector<2x1xf32> to vector<2x64xf32>
    %575 = arith.mulf %570, %574 : vector<2x64xf32>
    %c0_176 = arith.constant 0 : index
    %c0_177 = arith.constant 0 : index
    %c0_178 = arith.constant 0 : index
    %576 = vector.load %arg4[%c0_176, %c0_177, %c0_178] : memref<2x1x64xf32, #tpu.memory_space<vmem>>, vector<1x1x64xf32>
    %577 = vector.shape_cast %576 : vector<1x1x64xf32> to vector<1x64xf32>
    %578 = vector.broadcast %577 : vector<1x64xf32> to vector<2x64xf32>
    %579 = arith.mulf %575, %578 : vector<2x64xf32>
    %c0_179 = arith.constant 0 : index
    %c0_180 = arith.constant 0 : index
    %c0_181 = arith.constant 0 : index
    %580 = vector.load %arg5[%c0_179, %c0_180, %c0_181] : memref<2x1x64xf32, #tpu.memory_space<vmem>>, vector<1x1x64xf32>
    %581 = vector.shape_cast %580 : vector<1x1x64xf32> to vector<1x64xf32>
    %582 = vector.broadcast %581 : vector<1x64xf32> to vector<2x64xf32>
    %583 = arith.addf %579, %582 : vector<2x64xf32>
    %584 = vector.extract_strided_slice %1 {offsets = [0, 4, 0], sizes = [2, 1, 64], strides = [1, 1, 1]} : vector<2x8x64xf32> to vector<2x1x64xf32>
    %585 = vector.shape_cast %584 : vector<2x1x64xf32> to vector<2x64xf32>
    %586 = arith.addf %583, %585 : vector<2x64xf32>
    %c4 = arith.constant 4 : index
    %c0_182 = arith.constant 0 : index
    %c0_183 = arith.constant 0 : index
    %587 = vector.load %arg6[%c4, %c0_182, %c0_183] : memref<16x2x64xf32, #tpu.memory_space<vmem>>, vector<1x2x64xf32>
    %588 = vector.shape_cast %587 : vector<1x2x64xf32> to vector<2x64xf32>
    %589 = vector.shape_cast %586 : vector<2x64xf32> to vector<1x2x64xf32>
    tpu.vector_store %arg6[%c4, %c0_182, %c0_183], %589 {strides = array<i32>} : memref<16x2x64xf32, #tpu.memory_space<vmem>>, vector<1x2x64xf32>,
    %590 = vector.extract_strided_slice %25 {offsets = [0, 4, 0], sizes = [2, 1, 256], strides = [1, 1, 1]} : vector<2x8x256xf32> to vector<2x1x256xf32>
    %591 = vector.shape_cast %590 : vector<2x1x256xf32> to vector<2x256xf32>
    %592 = arith.truncf %495 : vector<2x64xf32> to vector<2x64xbf16>
    %cst_184 = arith.constant dense<0.000000e+00> : vector<2x256xf32>
    %593 = tpu.matmul %592, %27, %cst_184 {dimension_numbers = #tpu.dot_dimension_numbers<[1], [0], [0], [1], [0, 0, 1, 1], [], []>} : vector<2x64xbf16>, vector<64x256xbf16>, vector<2x256xf32> -> vector<2x256xf32>
    %594 = arith.addf %591, %593 : vector<2x256xf32>
    %595 = vector.extract_strided_slice %594 {offsets = [0, 0], sizes = [2, 64], strides = [1, 1]} : vector<2x256xf32> to vector<2x64xf32>
    %596 = arith.negf %595 : vector<2x64xf32>
    %597 = math.exp %596 : vector<2x64xf32>
    %cst_185 = arith.constant 1.000000e+00 : f32
    %598 = vector.broadcast %cst_185 : f32 to vector<2x64xf32>
    %599 = arith.addf %598, %597 : vector<2x64xf32>
    %600 = arith.divf %598, %599 : vector<2x64xf32>
    %601 = vector.extract_strided_slice %594 {offsets = [0, 64], sizes = [2, 64], strides = [1, 1]} : vector<2x256xf32> to vector<2x64xf32>
    %602 = arith.negf %601 : vector<2x64xf32>
    %603 = math.exp %602 : vector<2x64xf32>
    %cst_186 = arith.constant 1.000000e+00 : f32
    %604 = vector.broadcast %cst_186 : f32 to vector<2x64xf32>
    %605 = arith.addf %604, %603 : vector<2x64xf32>
    %606 = arith.divf %604, %605 : vector<2x64xf32>
    %607 = vector.extract_strided_slice %594 {offsets = [0, 128], sizes = [2, 64], strides = [1, 1]} : vector<2x256xf32> to vector<2x64xf32>
    %608 = math.tanh %607 : vector<2x64xf32>
    %609 = vector.extract_strided_slice %594 {offsets = [0, 192], sizes = [2, 64], strides = [1, 1]} : vector<2x256xf32> to vector<2x64xf32>
    %610 = arith.negf %609 : vector<2x64xf32>
    %611 = math.exp %610 : vector<2x64xf32>
    %cst_187 = arith.constant 1.000000e+00 : f32
    %612 = vector.broadcast %cst_187 : f32 to vector<2x64xf32>
    %613 = arith.addf %612, %611 : vector<2x64xf32>
    %614 = arith.divf %612, %613 : vector<2x64xf32>
    %615 = arith.mulf %606, %493 : vector<2x64xf32>
    %616 = arith.mulf %600, %608 : vector<2x64xf32>
    %617 = arith.addf %615, %616 : vector<2x64xf32>
    %618 = math.tanh %617 : vector<2x64xf32>
    %619 = arith.mulf %614, %618 : vector<2x64xf32>
    %cst_188 = arith.constant dense<0.000000e+00> : vector<2xf32>
    %620 = vector.multi_reduction <add>, %619, %cst_188 [1] : vector<2x64xf32> to vector<2xf32>
    %621 = vector.shape_cast %620 : vector<2xf32> to vector<2x1xf32>
    %cst_189 = arith.constant 6.400000e+01 : f32
    %622 = vector.broadcast %cst_189 : f32 to vector<2x1xf32>
    %623 = arith.divf %621, %622 : vector<2x1xf32>
    %624 = vector.broadcast %623 : vector<2x1xf32> to vector<2x64xf32>
    %625 = arith.subf %619, %624 : vector<2x64xf32>
    %626 = arith.mulf %625, %625 : vector<2x64xf32>
    %cst_190 = arith.constant dense<0.000000e+00> : vector<2xf32>
    %627 = vector.multi_reduction <add>, %626, %cst_190 [1] : vector<2x64xf32> to vector<2xf32>
    %628 = vector.shape_cast %627 : vector<2xf32> to vector<2x1xf32>
    %cst_191 = arith.constant 6.400000e+01 : f32
    %629 = vector.broadcast %cst_191 : f32 to vector<2x1xf32>
    %630 = arith.divf %628, %629 : vector<2x1xf32>
    %631 = vector.broadcast %623 : vector<2x1xf32> to vector<2x64xf32>
    %632 = arith.subf %619, %631 : vector<2x64xf32>
    %cst_192 = arith.constant 9.99999974E-6 : f32
    %633 = vector.broadcast %cst_192 : f32 to vector<2x1xf32>
    %634 = arith.addf %630, %633 : vector<2x1xf32>
    %635 = math.rsqrt %634 : vector<2x1xf32>
    %636 = vector.broadcast %635 : vector<2x1xf32> to vector<2x64xf32>
    %637 = arith.mulf %632, %636 : vector<2x64xf32>
    %c1_193 = arith.constant 1 : index
    %c0_194 = arith.constant 0 : index
    %c0_195 = arith.constant 0 : index
    %638 = vector.load %arg4[%c1_193, %c0_194, %c0_195] : memref<2x1x64xf32, #tpu.memory_space<vmem>>, vector<1x1x64xf32>
    %639 = vector.shape_cast %638 : vector<1x1x64xf32> to vector<1x64xf32>
    %640 = vector.broadcast %639 : vector<1x64xf32> to vector<2x64xf32>
    %641 = arith.mulf %637, %640 : vector<2x64xf32>
    %c1_196 = arith.constant 1 : index
    %c0_197 = arith.constant 0 : index
    %c0_198 = arith.constant 0 : index
    %642 = vector.load %arg5[%c1_196, %c0_197, %c0_198] : memref<2x1x64xf32, #tpu.memory_space<vmem>>, vector<1x1x64xf32>
    %643 = vector.shape_cast %642 : vector<1x1x64xf32> to vector<1x64xf32>
    %644 = vector.broadcast %643 : vector<1x64xf32> to vector<2x64xf32>
    %645 = arith.addf %641, %644 : vector<2x64xf32>
    %646 = vector.extract_strided_slice %15 {offsets = [0, 4, 0], sizes = [2, 1, 64], strides = [1, 1, 1]} : vector<2x8x64xf32> to vector<2x1x64xf32>
    %647 = vector.shape_cast %646 : vector<2x1x64xf32> to vector<2x64xf32>
    %648 = arith.addf %645, %647 : vector<2x64xf32>
    %c12 = arith.constant 12 : index
    %c0_199 = arith.constant 0 : index
    %c0_200 = arith.constant 0 : index
    %649 = vector.load %arg6[%c12, %c0_199, %c0_200] : memref<16x2x64xf32, #tpu.memory_space<vmem>>, vector<1x2x64xf32>
    %650 = vector.shape_cast %649 : vector<1x2x64xf32> to vector<2x64xf32>
    %651 = vector.shape_cast %648 : vector<2x64xf32> to vector<1x2x64xf32>
    tpu.vector_store %arg6[%c12, %c0_199, %c0_200], %651 {strides = array<i32>} : memref<16x2x64xf32, #tpu.memory_space<vmem>>, vector<1x2x64xf32>,
    %652 = vector.extract_strided_slice %11 {offsets = [0, 5, 0], sizes = [2, 1, 256], strides = [1, 1, 1]} : vector<2x8x256xf32> to vector<2x1x256xf32>
    %653 = vector.shape_cast %652 : vector<2x1x256xf32> to vector<2x256xf32>
    %654 = arith.truncf %557 : vector<2x64xf32> to vector<2x64xbf16>
    %cst_201 = arith.constant dense<0.000000e+00> : vector<2x256xf32>
    %655 = tpu.matmul %654, %13, %cst_201 {dimension_numbers = #tpu.dot_dimension_numbers<[1], [0], [0], [1], [0, 0, 1, 1], [], []>} : vector<2x64xbf16>, vector<64x256xbf16>, vector<2x256xf32> -> vector<2x256xf32>
    %656 = arith.addf %653, %655 : vector<2x256xf32>
    %657 = vector.extract_strided_slice %656 {offsets = [0, 0], sizes = [2, 64], strides = [1, 1]} : vector<2x256xf32> to vector<2x64xf32>
    %658 = arith.negf %657 : vector<2x64xf32>
    %659 = math.exp %658 : vector<2x64xf32>
    %cst_202 = arith.constant 1.000000e+00 : f32
    %660 = vector.broadcast %cst_202 : f32 to vector<2x64xf32>
    %661 = arith.addf %660, %659 : vector<2x64xf32>
    %662 = arith.divf %660, %661 : vector<2x64xf32>
    %663 = vector.extract_strided_slice %656 {offsets = [0, 64], sizes = [2, 64], strides = [1, 1]} : vector<2x256xf32> to vector<2x64xf32>
    %664 = arith.negf %663 : vector<2x64xf32>
    %665 = math.exp %664 : vector<2x64xf32>
    %cst_203 = arith.constant 1.000000e+00 : f32
    %666 = vector.broadcast %cst_203 : f32 to vector<2x64xf32>
    %667 = arith.addf %666, %665 : vector<2x64xf32>
    %668 = arith.divf %666, %667 : vector<2x64xf32>
    %669 = vector.extract_strided_slice %656 {offsets = [0, 128], sizes = [2, 64], strides = [1, 1]} : vector<2x256xf32> to vector<2x64xf32>
    %670 = math.tanh %669 : vector<2x64xf32>
    %671 = vector.extract_strided_slice %656 {offsets = [0, 192], sizes = [2, 64], strides = [1, 1]} : vector<2x256xf32> to vector<2x64xf32>
    %672 = arith.negf %671 : vector<2x64xf32>
    %673 = math.exp %672 : vector<2x64xf32>
    %cst_204 = arith.constant 1.000000e+00 : f32
    %674 = vector.broadcast %cst_204 : f32 to vector<2x64xf32>
    %675 = arith.addf %674, %673 : vector<2x64xf32>
    %676 = arith.divf %674, %675 : vector<2x64xf32>
    %677 = arith.mulf %668, %555 : vector<2x64xf32>
    %678 = arith.mulf %662, %670 : vector<2x64xf32>
    %679 = arith.addf %677, %678 : vector<2x64xf32>
    %680 = math.tanh %679 : vector<2x64xf32>
    %681 = arith.mulf %676, %680 : vector<2x64xf32>
    %cst_205 = arith.constant dense<0.000000e+00> : vector<2xf32>
    %682 = vector.multi_reduction <add>, %681, %cst_205 [1] : vector<2x64xf32> to vector<2xf32>
    %683 = vector.shape_cast %682 : vector<2xf32> to vector<2x1xf32>
    %cst_206 = arith.constant 6.400000e+01 : f32
    %684 = vector.broadcast %cst_206 : f32 to vector<2x1xf32>
    %685 = arith.divf %683, %684 : vector<2x1xf32>
    %686 = vector.broadcast %685 : vector<2x1xf32> to vector<2x64xf32>
    %687 = arith.subf %681, %686 : vector<2x64xf32>
    %688 = arith.mulf %687, %687 : vector<2x64xf32>
    %cst_207 = arith.constant dense<0.000000e+00> : vector<2xf32>
    %689 = vector.multi_reduction <add>, %688, %cst_207 [1] : vector<2x64xf32> to vector<2xf32>
    %690 = vector.shape_cast %689 : vector<2xf32> to vector<2x1xf32>
    %cst_208 = arith.constant 6.400000e+01 : f32
    %691 = vector.broadcast %cst_208 : f32 to vector<2x1xf32>
    %692 = arith.divf %690, %691 : vector<2x1xf32>
    %693 = vector.broadcast %685 : vector<2x1xf32> to vector<2x64xf32>
    %694 = arith.subf %681, %693 : vector<2x64xf32>
    %cst_209 = arith.constant 9.99999974E-6 : f32
    %695 = vector.broadcast %cst_209 : f32 to vector<2x1xf32>
    %696 = arith.addf %692, %695 : vector<2x1xf32>
    %697 = math.rsqrt %696 : vector<2x1xf32>
    %698 = vector.broadcast %697 : vector<2x1xf32> to vector<2x64xf32>
    %699 = arith.mulf %694, %698 : vector<2x64xf32>
    %c0_210 = arith.constant 0 : index
    %c0_211 = arith.constant 0 : index
    %c0_212 = arith.constant 0 : index
    %700 = vector.load %arg4[%c0_210, %c0_211, %c0_212] : memref<2x1x64xf32, #tpu.memory_space<vmem>>, vector<1x1x64xf32>
    %701 = vector.shape_cast %700 : vector<1x1x64xf32> to vector<1x64xf32>
    %702 = vector.broadcast %701 : vector<1x64xf32> to vector<2x64xf32>
    %703 = arith.mulf %699, %702 : vector<2x64xf32>
    %c0_213 = arith.constant 0 : index
    %c0_214 = arith.constant 0 : index
    %c0_215 = arith.constant 0 : index
    %704 = vector.load %arg5[%c0_213, %c0_214, %c0_215] : memref<2x1x64xf32, #tpu.memory_space<vmem>>, vector<1x1x64xf32>
    %705 = vector.shape_cast %704 : vector<1x1x64xf32> to vector<1x64xf32>
    %706 = vector.broadcast %705 : vector<1x64xf32> to vector<2x64xf32>
    %707 = arith.addf %703, %706 : vector<2x64xf32>
    %708 = vector.extract_strided_slice %1 {offsets = [0, 5, 0], sizes = [2, 1, 64], strides = [1, 1, 1]} : vector<2x8x64xf32> to vector<2x1x64xf32>
    %709 = vector.shape_cast %708 : vector<2x1x64xf32> to vector<2x64xf32>
    %710 = arith.addf %707, %709 : vector<2x64xf32>
    %c5 = arith.constant 5 : index
    %c0_216 = arith.constant 0 : index
    %c0_217 = arith.constant 0 : index
    %711 = vector.load %arg6[%c5, %c0_216, %c0_217] : memref<16x2x64xf32, #tpu.memory_space<vmem>>, vector<1x2x64xf32>
    %712 = vector.shape_cast %711 : vector<1x2x64xf32> to vector<2x64xf32>
    %713 = vector.shape_cast %710 : vector<2x64xf32> to vector<1x2x64xf32>
    tpu.vector_store %arg6[%c5, %c0_216, %c0_217], %713 {strides = array<i32>} : memref<16x2x64xf32, #tpu.memory_space<vmem>>, vector<1x2x64xf32>,
    %714 = vector.extract_strided_slice %25 {offsets = [0, 5, 0], sizes = [2, 1, 256], strides = [1, 1, 1]} : vector<2x8x256xf32> to vector<2x1x256xf32>
    %715 = vector.shape_cast %714 : vector<2x1x256xf32> to vector<2x256xf32>
    %716 = arith.truncf %619 : vector<2x64xf32> to vector<2x64xbf16>
    %cst_218 = arith.constant dense<0.000000e+00> : vector<2x256xf32>
    %717 = tpu.matmul %716, %27, %cst_218 {dimension_numbers = #tpu.dot_dimension_numbers<[1], [0], [0], [1], [0, 0, 1, 1], [], []>} : vector<2x64xbf16>, vector<64x256xbf16>, vector<2x256xf32> -> vector<2x256xf32>
    %718 = arith.addf %715, %717 : vector<2x256xf32>
    %719 = vector.extract_strided_slice %718 {offsets = [0, 0], sizes = [2, 64], strides = [1, 1]} : vector<2x256xf32> to vector<2x64xf32>
    %720 = arith.negf %719 : vector<2x64xf32>
    %721 = math.exp %720 : vector<2x64xf32>
    %cst_219 = arith.constant 1.000000e+00 : f32
    %722 = vector.broadcast %cst_219 : f32 to vector<2x64xf32>
    %723 = arith.addf %722, %721 : vector<2x64xf32>
    %724 = arith.divf %722, %723 : vector<2x64xf32>
    %725 = vector.extract_strided_slice %718 {offsets = [0, 64], sizes = [2, 64], strides = [1, 1]} : vector<2x256xf32> to vector<2x64xf32>
    %726 = arith.negf %725 : vector<2x64xf32>
    %727 = math.exp %726 : vector<2x64xf32>
    %cst_220 = arith.constant 1.000000e+00 : f32
    %728 = vector.broadcast %cst_220 : f32 to vector<2x64xf32>
    %729 = arith.addf %728, %727 : vector<2x64xf32>
    %730 = arith.divf %728, %729 : vector<2x64xf32>
    %731 = vector.extract_strided_slice %718 {offsets = [0, 128], sizes = [2, 64], strides = [1, 1]} : vector<2x256xf32> to vector<2x64xf32>
    %732 = math.tanh %731 : vector<2x64xf32>
    %733 = vector.extract_strided_slice %718 {offsets = [0, 192], sizes = [2, 64], strides = [1, 1]} : vector<2x256xf32> to vector<2x64xf32>
    %734 = arith.negf %733 : vector<2x64xf32>
    %735 = math.exp %734 : vector<2x64xf32>
    %cst_221 = arith.constant 1.000000e+00 : f32
    %736 = vector.broadcast %cst_221 : f32 to vector<2x64xf32>
    %737 = arith.addf %736, %735 : vector<2x64xf32>
    %738 = arith.divf %736, %737 : vector<2x64xf32>
    %739 = arith.mulf %730, %617 : vector<2x64xf32>
    %740 = arith.mulf %724, %732 : vector<2x64xf32>
    %741 = arith.addf %739, %740 : vector<2x64xf32>
    %742 = math.tanh %741 : vector<2x64xf32>
    %743 = arith.mulf %738, %742 : vector<2x64xf32>
    %cst_222 = arith.constant dense<0.000000e+00> : vector<2xf32>
    %744 = vector.multi_reduction <add>, %743, %cst_222 [1] : vector<2x64xf32> to vector<2xf32>
    %745 = vector.shape_cast %744 : vector<2xf32> to vector<2x1xf32>
    %cst_223 = arith.constant 6.400000e+01 : f32
    %746 = vector.broadcast %cst_223 : f32 to vector<2x1xf32>
    %747 = arith.divf %745, %746 : vector<2x1xf32>
    %748 = vector.broadcast %747 : vector<2x1xf32> to vector<2x64xf32>
    %749 = arith.subf %743, %748 : vector<2x64xf32>
    %750 = arith.mulf %749, %749 : vector<2x64xf32>
    %cst_224 = arith.constant dense<0.000000e+00> : vector<2xf32>
    %751 = vector.multi_reduction <add>, %750, %cst_224 [1] : vector<2x64xf32> to vector<2xf32>
    %752 = vector.shape_cast %751 : vector<2xf32> to vector<2x1xf32>
    %cst_225 = arith.constant 6.400000e+01 : f32
    %753 = vector.broadcast %cst_225 : f32 to vector<2x1xf32>
    %754 = arith.divf %752, %753 : vector<2x1xf32>
    %755 = vector.broadcast %747 : vector<2x1xf32> to vector<2x64xf32>
    %756 = arith.subf %743, %755 : vector<2x64xf32>
    %cst_226 = arith.constant 9.99999974E-6 : f32
    %757 = vector.broadcast %cst_226 : f32 to vector<2x1xf32>
    %758 = arith.addf %754, %757 : vector<2x1xf32>
    %759 = math.rsqrt %758 : vector<2x1xf32>
    %760 = vector.broadcast %759 : vector<2x1xf32> to vector<2x64xf32>
    %761 = arith.mulf %756, %760 : vector<2x64xf32>
    %c1_227 = arith.constant 1 : index
    %c0_228 = arith.constant 0 : index
    %c0_229 = arith.constant 0 : index
    %762 = vector.load %arg4[%c1_227, %c0_228, %c0_229] : memref<2x1x64xf32, #tpu.memory_space<vmem>>, vector<1x1x64xf32>
    %763 = vector.shape_cast %762 : vector<1x1x64xf32> to vector<1x64xf32>
    %764 = vector.broadcast %763 : vector<1x64xf32> to vector<2x64xf32>
    %765 = arith.mulf %761, %764 : vector<2x64xf32>
    %c1_230 = arith.constant 1 : index
    %c0_231 = arith.constant 0 : index
    %c0_232 = arith.constant 0 : index
    %766 = vector.load %arg5[%c1_230, %c0_231, %c0_232] : memref<2x1x64xf32, #tpu.memory_space<vmem>>, vector<1x1x64xf32>
    %767 = vector.shape_cast %766 : vector<1x1x64xf32> to vector<1x64xf32>
    %768 = vector.broadcast %767 : vector<1x64xf32> to vector<2x64xf32>
    %769 = arith.addf %765, %768 : vector<2x64xf32>
    %770 = vector.extract_strided_slice %15 {offsets = [0, 5, 0], sizes = [2, 1, 64], strides = [1, 1, 1]} : vector<2x8x64xf32> to vector<2x1x64xf32>
    %771 = vector.shape_cast %770 : vector<2x1x64xf32> to vector<2x64xf32>
    %772 = arith.addf %769, %771 : vector<2x64xf32>
    %c13 = arith.constant 13 : index
    %c0_233 = arith.constant 0 : index
    %c0_234 = arith.constant 0 : index
    %773 = vector.load %arg6[%c13, %c0_233, %c0_234] : memref<16x2x64xf32, #tpu.memory_space<vmem>>, vector<1x2x64xf32>
    %774 = vector.shape_cast %773 : vector<1x2x64xf32> to vector<2x64xf32>
    %775 = vector.shape_cast %772 : vector<2x64xf32> to vector<1x2x64xf32>
    tpu.vector_store %arg6[%c13, %c0_233, %c0_234], %775 {strides = array<i32>} : memref<16x2x64xf32, #tpu.memory_space<vmem>>, vector<1x2x64xf32>,
    %776 = vector.extract_strided_slice %11 {offsets = [0, 6, 0], sizes = [2, 1, 256], strides = [1, 1, 1]} : vector<2x8x256xf32> to vector<2x1x256xf32>
    %777 = vector.shape_cast %776 : vector<2x1x256xf32> to vector<2x256xf32>
    %778 = arith.truncf %681 : vector<2x64xf32> to vector<2x64xbf16>
    %cst_235 = arith.constant dense<0.000000e+00> : vector<2x256xf32>
    %779 = tpu.matmul %778, %13, %cst_235 {dimension_numbers = #tpu.dot_dimension_numbers<[1], [0], [0], [1], [0, 0, 1, 1], [], []>} : vector<2x64xbf16>, vector<64x256xbf16>, vector<2x256xf32> -> vector<2x256xf32>
    %780 = arith.addf %777, %779 : vector<2x256xf32>
    %781 = vector.extract_strided_slice %780 {offsets = [0, 0], sizes = [2, 64], strides = [1, 1]} : vector<2x256xf32> to vector<2x64xf32>
    %782 = arith.negf %781 : vector<2x64xf32>
    %783 = math.exp %782 : vector<2x64xf32>
    %cst_236 = arith.constant 1.000000e+00 : f32
    %784 = vector.broadcast %cst_236 : f32 to vector<2x64xf32>
    %785 = arith.addf %784, %783 : vector<2x64xf32>
    %786 = arith.divf %784, %785 : vector<2x64xf32>
    %787 = vector.extract_strided_slice %780 {offsets = [0, 64], sizes = [2, 64], strides = [1, 1]} : vector<2x256xf32> to vector<2x64xf32>
    %788 = arith.negf %787 : vector<2x64xf32>
    %789 = math.exp %788 : vector<2x64xf32>
    %cst_237 = arith.constant 1.000000e+00 : f32
    %790 = vector.broadcast %cst_237 : f32 to vector<2x64xf32>
    %791 = arith.addf %790, %789 : vector<2x64xf32>
    %792 = arith.divf %790, %791 : vector<2x64xf32>
    %793 = vector.extract_strided_slice %780 {offsets = [0, 128], sizes = [2, 64], strides = [1, 1]} : vector<2x256xf32> to vector<2x64xf32>
    %794 = math.tanh %793 : vector<2x64xf32>
    %795 = vector.extract_strided_slice %780 {offsets = [0, 192], sizes = [2, 64], strides = [1, 1]} : vector<2x256xf32> to vector<2x64xf32>
    %796 = arith.negf %795 : vector<2x64xf32>
    %797 = math.exp %796 : vector<2x64xf32>
    %cst_238 = arith.constant 1.000000e+00 : f32
    %798 = vector.broadcast %cst_238 : f32 to vector<2x64xf32>
    %799 = arith.addf %798, %797 : vector<2x64xf32>
    %800 = arith.divf %798, %799 : vector<2x64xf32>
    %801 = arith.mulf %792, %679 : vector<2x64xf32>
    %802 = arith.mulf %786, %794 : vector<2x64xf32>
    %803 = arith.addf %801, %802 : vector<2x64xf32>
    %804 = math.tanh %803 : vector<2x64xf32>
    %805 = arith.mulf %800, %804 : vector<2x64xf32>
    %cst_239 = arith.constant dense<0.000000e+00> : vector<2xf32>
    %806 = vector.multi_reduction <add>, %805, %cst_239 [1] : vector<2x64xf32> to vector<2xf32>
    %807 = vector.shape_cast %806 : vector<2xf32> to vector<2x1xf32>
    %cst_240 = arith.constant 6.400000e+01 : f32
    %808 = vector.broadcast %cst_240 : f32 to vector<2x1xf32>
    %809 = arith.divf %807, %808 : vector<2x1xf32>
    %810 = vector.broadcast %809 : vector<2x1xf32> to vector<2x64xf32>
    %811 = arith.subf %805, %810 : vector<2x64xf32>
    %812 = arith.mulf %811, %811 : vector<2x64xf32>
    %cst_241 = arith.constant dense<0.000000e+00> : vector<2xf32>
    %813 = vector.multi_reduction <add>, %812, %cst_241 [1] : vector<2x64xf32> to vector<2xf32>
    %814 = vector.shape_cast %813 : vector<2xf32> to vector<2x1xf32>
    %cst_242 = arith.constant 6.400000e+01 : f32
    %815 = vector.broadcast %cst_242 : f32 to vector<2x1xf32>
    %816 = arith.divf %814, %815 : vector<2x1xf32>
    %817 = vector.broadcast %809 : vector<2x1xf32> to vector<2x64xf32>
    %818 = arith.subf %805, %817 : vector<2x64xf32>
    %cst_243 = arith.constant 9.99999974E-6 : f32
    %819 = vector.broadcast %cst_243 : f32 to vector<2x1xf32>
    %820 = arith.addf %816, %819 : vector<2x1xf32>
    %821 = math.rsqrt %820 : vector<2x1xf32>
    %822 = vector.broadcast %821 : vector<2x1xf32> to vector<2x64xf32>
    %823 = arith.mulf %818, %822 : vector<2x64xf32>
    %c0_244 = arith.constant 0 : index
    %c0_245 = arith.constant 0 : index
    %c0_246 = arith.constant 0 : index
    %824 = vector.load %arg4[%c0_244, %c0_245, %c0_246] : memref<2x1x64xf32, #tpu.memory_space<vmem>>, vector<1x1x64xf32>
    %825 = vector.shape_cast %824 : vector<1x1x64xf32> to vector<1x64xf32>
    %826 = vector.broadcast %825 : vector<1x64xf32> to vector<2x64xf32>
    %827 = arith.mulf %823, %826 : vector<2x64xf32>
    %c0_247 = arith.constant 0 : index
    %c0_248 = arith.constant 0 : index
    %c0_249 = arith.constant 0 : index
    %828 = vector.load %arg5[%c0_247, %c0_248, %c0_249] : memref<2x1x64xf32, #tpu.memory_space<vmem>>, vector<1x1x64xf32>
    %829 = vector.shape_cast %828 : vector<1x1x64xf32> to vector<1x64xf32>
    %830 = vector.broadcast %829 : vector<1x64xf32> to vector<2x64xf32>
    %831 = arith.addf %827, %830 : vector<2x64xf32>
    %832 = vector.extract_strided_slice %1 {offsets = [0, 6, 0], sizes = [2, 1, 64], strides = [1, 1, 1]} : vector<2x8x64xf32> to vector<2x1x64xf32>
    %833 = vector.shape_cast %832 : vector<2x1x64xf32> to vector<2x64xf32>
    %834 = arith.addf %831, %833 : vector<2x64xf32>
    %c6 = arith.constant 6 : index
    %c0_250 = arith.constant 0 : index
    %c0_251 = arith.constant 0 : index
    %835 = vector.load %arg6[%c6, %c0_250, %c0_251] : memref<16x2x64xf32, #tpu.memory_space<vmem>>, vector<1x2x64xf32>
    %836 = vector.shape_cast %835 : vector<1x2x64xf32> to vector<2x64xf32>
    %837 = vector.shape_cast %834 : vector<2x64xf32> to vector<1x2x64xf32>
    tpu.vector_store %arg6[%c6, %c0_250, %c0_251], %837 {strides = array<i32>} : memref<16x2x64xf32, #tpu.memory_space<vmem>>, vector<1x2x64xf32>,
    %838 = vector.extract_strided_slice %25 {offsets = [0, 6, 0], sizes = [2, 1, 256], strides = [1, 1, 1]} : vector<2x8x256xf32> to vector<2x1x256xf32>
    %839 = vector.shape_cast %838 : vector<2x1x256xf32> to vector<2x256xf32>
    %840 = arith.truncf %743 : vector<2x64xf32> to vector<2x64xbf16>
    %cst_252 = arith.constant dense<0.000000e+00> : vector<2x256xf32>
    %841 = tpu.matmul %840, %27, %cst_252 {dimension_numbers = #tpu.dot_dimension_numbers<[1], [0], [0], [1], [0, 0, 1, 1], [], []>} : vector<2x64xbf16>, vector<64x256xbf16>, vector<2x256xf32> -> vector<2x256xf32>
    %842 = arith.addf %839, %841 : vector<2x256xf32>
    %843 = vector.extract_strided_slice %842 {offsets = [0, 0], sizes = [2, 64], strides = [1, 1]} : vector<2x256xf32> to vector<2x64xf32>
    %844 = arith.negf %843 : vector<2x64xf32>
    %845 = math.exp %844 : vector<2x64xf32>
    %cst_253 = arith.constant 1.000000e+00 : f32
    %846 = vector.broadcast %cst_253 : f32 to vector<2x64xf32>
    %847 = arith.addf %846, %845 : vector<2x64xf32>
    %848 = arith.divf %846, %847 : vector<2x64xf32>
    %849 = vector.extract_strided_slice %842 {offsets = [0, 64], sizes = [2, 64], strides = [1, 1]} : vector<2x256xf32> to vector<2x64xf32>
    %850 = arith.negf %849 : vector<2x64xf32>
    %851 = math.exp %850 : vector<2x64xf32>
    %cst_254 = arith.constant 1.000000e+00 : f32
    %852 = vector.broadcast %cst_254 : f32 to vector<2x64xf32>
    %853 = arith.addf %852, %851 : vector<2x64xf32>
    %854 = arith.divf %852, %853 : vector<2x64xf32>
    %855 = vector.extract_strided_slice %842 {offsets = [0, 128], sizes = [2, 64], strides = [1, 1]} : vector<2x256xf32> to vector<2x64xf32>
    %856 = math.tanh %855 : vector<2x64xf32>
    %857 = vector.extract_strided_slice %842 {offsets = [0, 192], sizes = [2, 64], strides = [1, 1]} : vector<2x256xf32> to vector<2x64xf32>
    %858 = arith.negf %857 : vector<2x64xf32>
    %859 = math.exp %858 : vector<2x64xf32>
    %cst_255 = arith.constant 1.000000e+00 : f32
    %860 = vector.broadcast %cst_255 : f32 to vector<2x64xf32>
    %861 = arith.addf %860, %859 : vector<2x64xf32>
    %862 = arith.divf %860, %861 : vector<2x64xf32>
    %863 = arith.mulf %854, %741 : vector<2x64xf32>
    %864 = arith.mulf %848, %856 : vector<2x64xf32>
    %865 = arith.addf %863, %864 : vector<2x64xf32>
    %866 = math.tanh %865 : vector<2x64xf32>
    %867 = arith.mulf %862, %866 : vector<2x64xf32>
    %cst_256 = arith.constant dense<0.000000e+00> : vector<2xf32>
    %868 = vector.multi_reduction <add>, %867, %cst_256 [1] : vector<2x64xf32> to vector<2xf32>
    %869 = vector.shape_cast %868 : vector<2xf32> to vector<2x1xf32>
    %cst_257 = arith.constant 6.400000e+01 : f32
    %870 = vector.broadcast %cst_257 : f32 to vector<2x1xf32>
    %871 = arith.divf %869, %870 : vector<2x1xf32>
    %872 = vector.broadcast %871 : vector<2x1xf32> to vector<2x64xf32>
    %873 = arith.subf %867, %872 : vector<2x64xf32>
    %874 = arith.mulf %873, %873 : vector<2x64xf32>
    %cst_258 = arith.constant dense<0.000000e+00> : vector<2xf32>
    %875 = vector.multi_reduction <add>, %874, %cst_258 [1] : vector<2x64xf32> to vector<2xf32>
    %876 = vector.shape_cast %875 : vector<2xf32> to vector<2x1xf32>
    %cst_259 = arith.constant 6.400000e+01 : f32
    %877 = vector.broadcast %cst_259 : f32 to vector<2x1xf32>
    %878 = arith.divf %876, %877 : vector<2x1xf32>
    %879 = vector.broadcast %871 : vector<2x1xf32> to vector<2x64xf32>
    %880 = arith.subf %867, %879 : vector<2x64xf32>
    %cst_260 = arith.constant 9.99999974E-6 : f32
    %881 = vector.broadcast %cst_260 : f32 to vector<2x1xf32>
    %882 = arith.addf %878, %881 : vector<2x1xf32>
    %883 = math.rsqrt %882 : vector<2x1xf32>
    %884 = vector.broadcast %883 : vector<2x1xf32> to vector<2x64xf32>
    %885 = arith.mulf %880, %884 : vector<2x64xf32>
    %c1_261 = arith.constant 1 : index
    %c0_262 = arith.constant 0 : index
    %c0_263 = arith.constant 0 : index
    %886 = vector.load %arg4[%c1_261, %c0_262, %c0_263] : memref<2x1x64xf32, #tpu.memory_space<vmem>>, vector<1x1x64xf32>
    %887 = vector.shape_cast %886 : vector<1x1x64xf32> to vector<1x64xf32>
    %888 = vector.broadcast %887 : vector<1x64xf32> to vector<2x64xf32>
    %889 = arith.mulf %885, %888 : vector<2x64xf32>
    %c1_264 = arith.constant 1 : index
    %c0_265 = arith.constant 0 : index
    %c0_266 = arith.constant 0 : index
    %890 = vector.load %arg5[%c1_264, %c0_265, %c0_266] : memref<2x1x64xf32, #tpu.memory_space<vmem>>, vector<1x1x64xf32>
    %891 = vector.shape_cast %890 : vector<1x1x64xf32> to vector<1x64xf32>
    %892 = vector.broadcast %891 : vector<1x64xf32> to vector<2x64xf32>
    %893 = arith.addf %889, %892 : vector<2x64xf32>
    %894 = vector.extract_strided_slice %15 {offsets = [0, 6, 0], sizes = [2, 1, 64], strides = [1, 1, 1]} : vector<2x8x64xf32> to vector<2x1x64xf32>
    %895 = vector.shape_cast %894 : vector<2x1x64xf32> to vector<2x64xf32>
    %896 = arith.addf %893, %895 : vector<2x64xf32>
    %c14 = arith.constant 14 : index
    %c0_267 = arith.constant 0 : index
    %c0_268 = arith.constant 0 : index
    %897 = vector.load %arg6[%c14, %c0_267, %c0_268] : memref<16x2x64xf32, #tpu.memory_space<vmem>>, vector<1x2x64xf32>
    %898 = vector.shape_cast %897 : vector<1x2x64xf32> to vector<2x64xf32>
    %899 = vector.shape_cast %896 : vector<2x64xf32> to vector<1x2x64xf32>
    tpu.vector_store %arg6[%c14, %c0_267, %c0_268], %899 {strides = array<i32>} : memref<16x2x64xf32, #tpu.memory_space<vmem>>, vector<1x2x64xf32>,
    %900 = vector.extract_strided_slice %11 {offsets = [0, 7, 0], sizes = [2, 1, 256], strides = [1, 1, 1]} : vector<2x8x256xf32> to vector<2x1x256xf32>
    %901 = vector.shape_cast %900 : vector<2x1x256xf32> to vector<2x256xf32>
    %902 = arith.truncf %805 : vector<2x64xf32> to vector<2x64xbf16>
    %cst_269 = arith.constant dense<0.000000e+00> : vector<2x256xf32>
    %903 = tpu.matmul %902, %13, %cst_269 {dimension_numbers = #tpu.dot_dimension_numbers<[1], [0], [0], [1], [0, 0, 1, 1], [], []>} : vector<2x64xbf16>, vector<64x256xbf16>, vector<2x256xf32> -> vector<2x256xf32>
    %904 = arith.addf %901, %903 : vector<2x256xf32>
    %905 = vector.extract_strided_slice %904 {offsets = [0, 0], sizes = [2, 64], strides = [1, 1]} : vector<2x256xf32> to vector<2x64xf32>
    %906 = arith.negf %905 : vector<2x64xf32>
    %907 = math.exp %906 : vector<2x64xf32>
    %cst_270 = arith.constant 1.000000e+00 : f32
    %908 = vector.broadcast %cst_270 : f32 to vector<2x64xf32>
    %909 = arith.addf %908, %907 : vector<2x64xf32>
    %910 = arith.divf %908, %909 : vector<2x64xf32>
    %911 = vector.extract_strided_slice %904 {offsets = [0, 64], sizes = [2, 64], strides = [1, 1]} : vector<2x256xf32> to vector<2x64xf32>
    %912 = arith.negf %911 : vector<2x64xf32>
    %913 = math.exp %912 : vector<2x64xf32>
    %cst_271 = arith.constant 1.000000e+00 : f32
    %914 = vector.broadcast %cst_271 : f32 to vector<2x64xf32>
    %915 = arith.addf %914, %913 : vector<2x64xf32>
    %916 = arith.divf %914, %915 : vector<2x64xf32>
    %917 = vector.extract_strided_slice %904 {offsets = [0, 128], sizes = [2, 64], strides = [1, 1]} : vector<2x256xf32> to vector<2x64xf32>
    %918 = math.tanh %917 : vector<2x64xf32>
    %919 = vector.extract_strided_slice %904 {offsets = [0, 192], sizes = [2, 64], strides = [1, 1]} : vector<2x256xf32> to vector<2x64xf32>
    %920 = arith.negf %919 : vector<2x64xf32>
    %921 = math.exp %920 : vector<2x64xf32>
    %cst_272 = arith.constant 1.000000e+00 : f32
    %922 = vector.broadcast %cst_272 : f32 to vector<2x64xf32>
    %923 = arith.addf %922, %921 : vector<2x64xf32>
    %924 = arith.divf %922, %923 : vector<2x64xf32>
    %925 = arith.mulf %916, %803 : vector<2x64xf32>
    %926 = arith.mulf %910, %918 : vector<2x64xf32>
    %927 = arith.addf %925, %926 : vector<2x64xf32>
    %928 = math.tanh %927 : vector<2x64xf32>
    %929 = arith.mulf %924, %928 : vector<2x64xf32>
    %cst_273 = arith.constant dense<0.000000e+00> : vector<2xf32>
    %930 = vector.multi_reduction <add>, %929, %cst_273 [1] : vector<2x64xf32> to vector<2xf32>
    %931 = vector.shape_cast %930 : vector<2xf32> to vector<2x1xf32>
    %cst_274 = arith.constant 6.400000e+01 : f32
    %932 = vector.broadcast %cst_274 : f32 to vector<2x1xf32>
    %933 = arith.divf %931, %932 : vector<2x1xf32>
    %934 = vector.broadcast %933 : vector<2x1xf32> to vector<2x64xf32>
    %935 = arith.subf %929, %934 : vector<2x64xf32>
    %936 = arith.mulf %935, %935 : vector<2x64xf32>
    %cst_275 = arith.constant dense<0.000000e+00> : vector<2xf32>
    %937 = vector.multi_reduction <add>, %936, %cst_275 [1] : vector<2x64xf32> to vector<2xf32>
    %938 = vector.shape_cast %937 : vector<2xf32> to vector<2x1xf32>
    %cst_276 = arith.constant 6.400000e+01 : f32
    %939 = vector.broadcast %cst_276 : f32 to vector<2x1xf32>
    %940 = arith.divf %938, %939 : vector<2x1xf32>
    %941 = vector.broadcast %933 : vector<2x1xf32> to vector<2x64xf32>
    %942 = arith.subf %929, %941 : vector<2x64xf32>
    %cst_277 = arith.constant 9.99999974E-6 : f32
    %943 = vector.broadcast %cst_277 : f32 to vector<2x1xf32>
    %944 = arith.addf %940, %943 : vector<2x1xf32>
    %945 = math.rsqrt %944 : vector<2x1xf32>
    %946 = vector.broadcast %945 : vector<2x1xf32> to vector<2x64xf32>
    %947 = arith.mulf %942, %946 : vector<2x64xf32>
    %c0_278 = arith.constant 0 : index
    %c0_279 = arith.constant 0 : index
    %c0_280 = arith.constant 0 : index
    %948 = vector.load %arg4[%c0_278, %c0_279, %c0_280] : memref<2x1x64xf32, #tpu.memory_space<vmem>>, vector<1x1x64xf32>
    %949 = vector.shape_cast %948 : vector<1x1x64xf32> to vector<1x64xf32>
    %950 = vector.broadcast %949 : vector<1x64xf32> to vector<2x64xf32>
    %951 = arith.mulf %947, %950 : vector<2x64xf32>
    %c0_281 = arith.constant 0 : index
    %c0_282 = arith.constant 0 : index
    %c0_283 = arith.constant 0 : index
    %952 = vector.load %arg5[%c0_281, %c0_282, %c0_283] : memref<2x1x64xf32, #tpu.memory_space<vmem>>, vector<1x1x64xf32>
    %953 = vector.shape_cast %952 : vector<1x1x64xf32> to vector<1x64xf32>
    %954 = vector.broadcast %953 : vector<1x64xf32> to vector<2x64xf32>
    %955 = arith.addf %951, %954 : vector<2x64xf32>
    %956 = vector.extract_strided_slice %1 {offsets = [0, 7, 0], sizes = [2, 1, 64], strides = [1, 1, 1]} : vector<2x8x64xf32> to vector<2x1x64xf32>
    %957 = vector.shape_cast %956 : vector<2x1x64xf32> to vector<2x64xf32>
    %958 = arith.addf %955, %957 : vector<2x64xf32>
    %c7 = arith.constant 7 : index
    %c0_284 = arith.constant 0 : index
    %c0_285 = arith.constant 0 : index
    %959 = vector.load %arg6[%c7, %c0_284, %c0_285] : memref<16x2x64xf32, #tpu.memory_space<vmem>>, vector<1x2x64xf32>
    %960 = vector.shape_cast %959 : vector<1x2x64xf32> to vector<2x64xf32>
    %961 = vector.shape_cast %958 : vector<2x64xf32> to vector<1x2x64xf32>
    tpu.vector_store %arg6[%c7, %c0_284, %c0_285], %961 {strides = array<i32>} : memref<16x2x64xf32, #tpu.memory_space<vmem>>, vector<1x2x64xf32>,
    %962 = vector.extract_strided_slice %25 {offsets = [0, 7, 0], sizes = [2, 1, 256], strides = [1, 1, 1]} : vector<2x8x256xf32> to vector<2x1x256xf32>
    %963 = vector.shape_cast %962 : vector<2x1x256xf32> to vector<2x256xf32>
    %964 = arith.truncf %867 : vector<2x64xf32> to vector<2x64xbf16>
    %cst_286 = arith.constant dense<0.000000e+00> : vector<2x256xf32>
    %965 = tpu.matmul %964, %27, %cst_286 {dimension_numbers = #tpu.dot_dimension_numbers<[1], [0], [0], [1], [0, 0, 1, 1], [], []>} : vector<2x64xbf16>, vector<64x256xbf16>, vector<2x256xf32> -> vector<2x256xf32>
    %966 = arith.addf %963, %965 : vector<2x256xf32>
    %967 = vector.extract_strided_slice %966 {offsets = [0, 0], sizes = [2, 64], strides = [1, 1]} : vector<2x256xf32> to vector<2x64xf32>
    %968 = arith.negf %967 : vector<2x64xf32>
    %969 = math.exp %968 : vector<2x64xf32>
    %cst_287 = arith.constant 1.000000e+00 : f32
    %970 = vector.broadcast %cst_287 : f32 to vector<2x64xf32>
    %971 = arith.addf %970, %969 : vector<2x64xf32>
    %972 = arith.divf %970, %971 : vector<2x64xf32>
    %973 = vector.extract_strided_slice %966 {offsets = [0, 64], sizes = [2, 64], strides = [1, 1]} : vector<2x256xf32> to vector<2x64xf32>
    %974 = arith.negf %973 : vector<2x64xf32>
    %975 = math.exp %974 : vector<2x64xf32>
    %cst_288 = arith.constant 1.000000e+00 : f32
    %976 = vector.broadcast %cst_288 : f32 to vector<2x64xf32>
    %977 = arith.addf %976, %975 : vector<2x64xf32>
    %978 = arith.divf %976, %977 : vector<2x64xf32>
    %979 = vector.extract_strided_slice %966 {offsets = [0, 128], sizes = [2, 64], strides = [1, 1]} : vector<2x256xf32> to vector<2x64xf32>
    %980 = math.tanh %979 : vector<2x64xf32>
    %981 = vector.extract_strided_slice %966 {offsets = [0, 192], sizes = [2, 64], strides = [1, 1]} : vector<2x256xf32> to vector<2x64xf32>
    %982 = arith.negf %981 : vector<2x64xf32>
    %983 = math.exp %982 : vector<2x64xf32>
    %cst_289 = arith.constant 1.000000e+00 : f32
    %984 = vector.broadcast %cst_289 : f32 to vector<2x64xf32>
    %985 = arith.addf %984, %983 : vector<2x64xf32>
    %986 = arith.divf %984, %985 : vector<2x64xf32>
    %987 = arith.mulf %978, %865 : vector<2x64xf32>
    %988 = arith.mulf %972, %980 : vector<2x64xf32>
    %989 = arith.addf %987, %988 : vector<2x64xf32>
    %990 = math.tanh %989 : vector<2x64xf32>
    %991 = arith.mulf %986, %990 : vector<2x64xf32>
    %cst_290 = arith.constant dense<0.000000e+00> : vector<2xf32>
    %992 = vector.multi_reduction <add>, %991, %cst_290 [1] : vector<2x64xf32> to vector<2xf32>
    %993 = vector.shape_cast %992 : vector<2xf32> to vector<2x1xf32>
    %cst_291 = arith.constant 6.400000e+01 : f32
    %994 = vector.broadcast %cst_291 : f32 to vector<2x1xf32>
    %995 = arith.divf %993, %994 : vector<2x1xf32>
    %996 = vector.broadcast %995 : vector<2x1xf32> to vector<2x64xf32>
    %997 = arith.subf %991, %996 : vector<2x64xf32>
    %998 = arith.mulf %997, %997 : vector<2x64xf32>
    %cst_292 = arith.constant dense<0.000000e+00> : vector<2xf32>
    %999 = vector.multi_reduction <add>, %998, %cst_292 [1] : vector<2x64xf32> to vector<2xf32>
    %1000 = vector.shape_cast %999 : vector<2xf32> to vector<2x1xf32>
    %cst_293 = arith.constant 6.400000e+01 : f32
    %1001 = vector.broadcast %cst_293 : f32 to vector<2x1xf32>
    %1002 = arith.divf %1000, %1001 : vector<2x1xf32>
    %1003 = vector.broadcast %995 : vector<2x1xf32> to vector<2x64xf32>
    %1004 = arith.subf %991, %1003 : vector<2x64xf32>
    %cst_294 = arith.constant 9.99999974E-6 : f32
    %1005 = vector.broadcast %cst_294 : f32 to vector<2x1xf32>
    %1006 = arith.addf %1002, %1005 : vector<2x1xf32>
    %1007 = math.rsqrt %1006 : vector<2x1xf32>
    %1008 = vector.broadcast %1007 : vector<2x1xf32> to vector<2x64xf32>
    %1009 = arith.mulf %1004, %1008 : vector<2x64xf32>
    %c1_295 = arith.constant 1 : index
    %c0_296 = arith.constant 0 : index
    %c0_297 = arith.constant 0 : index
    %1010 = vector.load %arg4[%c1_295, %c0_296, %c0_297] : memref<2x1x64xf32, #tpu.memory_space<vmem>>, vector<1x1x64xf32>
    %1011 = vector.shape_cast %1010 : vector<1x1x64xf32> to vector<1x64xf32>
    %1012 = vector.broadcast %1011 : vector<1x64xf32> to vector<2x64xf32>
    %1013 = arith.mulf %1009, %1012 : vector<2x64xf32>
    %c1_298 = arith.constant 1 : index
    %c0_299 = arith.constant 0 : index
    %c0_300 = arith.constant 0 : index
    %1014 = vector.load %arg5[%c1_298, %c0_299, %c0_300] : memref<2x1x64xf32, #tpu.memory_space<vmem>>, vector<1x1x64xf32>
    %1015 = vector.shape_cast %1014 : vector<1x1x64xf32> to vector<1x64xf32>
    %1016 = vector.broadcast %1015 : vector<1x64xf32> to vector<2x64xf32>
    %1017 = arith.addf %1013, %1016 : vector<2x64xf32>
    %1018 = vector.extract_strided_slice %15 {offsets = [0, 7, 0], sizes = [2, 1, 64], strides = [1, 1, 1]} : vector<2x8x64xf32> to vector<2x1x64xf32>
    %1019 = vector.shape_cast %1018 : vector<2x1x64xf32> to vector<2x64xf32>
    %1020 = arith.addf %1017, %1019 : vector<2x64xf32>
    %c15 = arith.constant 15 : index
    %c0_301 = arith.constant 0 : index
    %c0_302 = arith.constant 0 : index
    %1021 = vector.load %arg6[%c15, %c0_301, %c0_302] : memref<16x2x64xf32, #tpu.memory_space<vmem>>, vector<1x2x64xf32>
    %1022 = vector.shape_cast %1021 : vector<1x2x64xf32> to vector<2x64xf32>
    %1023 = vector.shape_cast %1020 : vector<2x64xf32> to vector<1x2x64xf32>
    tpu.vector_store %arg6[%c15, %c0_301, %c0_302], %1023 {strides = array<i32>} : memref<16x2x64xf32, #tpu.memory_space<vmem>>, vector<1x2x64xf32>,
    return
  }
}

module attributes {stable_mosaic.version = 11 : i64} {
  func.func @_causal_conv1d_kernel(%arg0: memref<8x8x32xf32, #tpu.memory_space<vmem>>, %arg1: memref<3x32x4xbf16, #tpu.memory_space<vmem>>, %arg2: memref<1x4xf32, #tpu.memory_space<vmem>>, %arg3: memref<8x8x4xf32, #tpu.memory_space<vmem>>) attributes {dimension_semantics = [], scalar_prefetch = 0 : i64, scratch_operands = 0 : i64, tpu.core_type = #tpu.core_type<tc>} {
    %c0 = arith.constant 0 : index
    %c0_0 = arith.constant 0 : index
    %c0_1 = arith.constant 0 : index
    %0 = vector.load %arg0[%c0, %c0_0, %c0_1] : memref<8x8x32xf32, #tpu.memory_space<vmem>>, vector<8x8x32xf32>
    %cst = arith.constant 0.000000e+00 : f32
    %1 = vector.broadcast %cst : f32 to vector<8x2x32xf32>
    %2 = tpu.concatenate %1, %0 in 1 : vector<8x2x32xf32>, vector<8x8x32xf32> -> vector<8x10x32xf32>
    %3 = arith.truncf %2 : vector<8x10x32xf32> to vector<8x10x32xbf16>
    %cst_2 = arith.constant 0.000000e+00 : f32
    %4 = vector.broadcast %cst_2 : f32 to vector<64x4xf32>
    %5 = vector.extract_strided_slice %3 {offsets = [0, 0, 0], sizes = [8, 8, 32], strides = [1, 1, 1]} : vector<8x10x32xbf16> to vector<8x8x32xbf16>
    %6 = vector.shape_cast %5 : vector<8x8x32xbf16> to vector<64x32xbf16>
    %c0_3 = arith.constant 0 : index
    %c0_4 = arith.constant 0 : index
    %c0_5 = arith.constant 0 : index
    %7 = vector.load %arg1[%c0_3, %c0_4, %c0_5] : memref<3x32x4xbf16, #tpu.memory_space<vmem>>, vector<1x32x4xbf16>
    %8 = vector.shape_cast %7 : vector<1x32x4xbf16> to vector<32x4xbf16>
    %cst_6 = arith.constant dense<0.000000e+00> : vector<64x4xf32>
    %9 = tpu.matmul %6, %8, %cst_6 {dimension_numbers = #tpu.dot_dimension_numbers<[1], [0], [0], [1], [0, 0, 1, 1], [], []>} : vector<64x32xbf16>, vector<32x4xbf16>, vector<64x4xf32> -> vector<64x4xf32>
    %10 = arith.addf %4, %9 : vector<64x4xf32>
    %11 = vector.extract_strided_slice %3 {offsets = [0, 1, 0], sizes = [8, 8, 32], strides = [1, 1, 1]} : vector<8x10x32xbf16> to vector<8x8x32xbf16>
    %12 = vector.shape_cast %11 : vector<8x8x32xbf16> to vector<64x32xbf16>
    %c1 = arith.constant 1 : index
    %c0_7 = arith.constant 0 : index
    %c0_8 = arith.constant 0 : index
    %13 = vector.load %arg1[%c1, %c0_7, %c0_8] : memref<3x32x4xbf16, #tpu.memory_space<vmem>>, vector<1x32x4xbf16>
    %14 = vector.shape_cast %13 : vector<1x32x4xbf16> to vector<32x4xbf16>
    %cst_9 = arith.constant dense<0.000000e+00> : vector<64x4xf32>
    %15 = tpu.matmul %12, %14, %cst_9 {dimension_numbers = #tpu.dot_dimension_numbers<[1], [0], [0], [1], [0, 0, 1, 1], [], []>} : vector<64x32xbf16>, vector<32x4xbf16>, vector<64x4xf32> -> vector<64x4xf32>
    %16 = arith.addf %10, %15 : vector<64x4xf32>
    %17 = vector.extract_strided_slice %3 {offsets = [0, 2, 0], sizes = [8, 8, 32], strides = [1, 1, 1]} : vector<8x10x32xbf16> to vector<8x8x32xbf16>
    %18 = vector.shape_cast %17 : vector<8x8x32xbf16> to vector<64x32xbf16>
    %c2 = arith.constant 2 : index
    %c0_10 = arith.constant 0 : index
    %c0_11 = arith.constant 0 : index
    %19 = vector.load %arg1[%c2, %c0_10, %c0_11] : memref<3x32x4xbf16, #tpu.memory_space<vmem>>, vector<1x32x4xbf16>
    %20 = vector.shape_cast %19 : vector<1x32x4xbf16> to vector<32x4xbf16>
    %cst_12 = arith.constant dense<0.000000e+00> : vector<64x4xf32>
    %21 = tpu.matmul %18, %20, %cst_12 {dimension_numbers = #tpu.dot_dimension_numbers<[1], [0], [0], [1], [0, 0, 1, 1], [], []>} : vector<64x32xbf16>, vector<32x4xbf16>, vector<64x4xf32> -> vector<64x4xf32>
    %22 = arith.addf %16, %21 : vector<64x4xf32>
    %c0_13 = arith.constant 0 : index
    %c0_14 = arith.constant 0 : index
    %23 = vector.load %arg2[%c0_13, %c0_14] : memref<1x4xf32, #tpu.memory_space<vmem>>, vector<1x4xf32>
    %24 = vector.broadcast %23 : vector<1x4xf32> to vector<64x4xf32>
    %25 = arith.addf %22, %24 : vector<64x4xf32>
    %26 = vector.shape_cast %25 : vector<64x4xf32> to vector<8x8x4xf32>
    %c0_15 = arith.constant 0 : index
    %c0_16 = arith.constant 0 : index
    %c0_17 = arith.constant 0 : index
    %27 = vector.load %arg3[%c0_15, %c0_16, %c0_17] : memref<8x8x4xf32, #tpu.memory_space<vmem>>, vector<8x8x4xf32>
    tpu.vector_store %arg3[%c0_15, %c0_16, %c0_17], %26 {strides = array<i32>} : memref<8x8x4xf32, #tpu.memory_space<vmem>>, vector<8x8x4xf32>,
    return
  }
}

</mosaic_0001>

<bundles_post_ra>
// kernel: _lambda_.5
= control target key start
LH: loop header
LB: loop body
LE: loop exit
PB: predicated region body
PF: predicated region fallthrough
CT: control target
= control target key end

     0   :  { %vm48_vm0 = vcmask 1041408   ;;  %vm235_vm1 = vcmask 31744   ;;  %s944_s0 = inlined_call_operand.vmem [shape: f32[8,8,4], index: 0, kind: input, shape index: {}]   ;;  %s945_s1 = inlined_call_operand.vmem [shape: bf16[3,4,32], index: 1, kind: input, shape index: {}]   ;;  %s946_s2 = inlined_call_operand.vmem [shape: f32[1,32], index: 2, kind: input, shape index: {}]   ;;  %s947_s3 = inlined_call_operand.hbm [shape: f32[8,8,32], index: 3, kind: output, shape index: {}]  }
   0x1   :  { %v768_v0 = vld [vmem:[%s945_s1] sm:$0x3]  ;;  %v17_v2 = vld [vmem:[%s944_s0 + $0x8] sm:$0xff]  ;;  %v18_v6 = vld [vmem:[%s944_s0 + $0x10] sm:$0xff] }
   0x2   :  { %v16_v1 = vld [vmem:[%s944_s0] sm:$0xff]  ;;  %712 = vmatprep.subr.msk.bf16.mxu0 %vm48_vm0, %v768_v0  ;;  %v780_v3 = vsel %vm48_vm0, %v768_v0, 0  ;;  %v33_v5 = vrot.slane %v17_v2, 6  ;;  %v19_v7 = vld [vmem:[%s944_s0 + $0x18] sm:$0xff]  ;;  %v34_v8 = vrot.slane %v18_v6, 6 }
   0x3   :  { %v32_v4 = vrot.slane %v16_v1, 6  ;;  %674 = vmatpush3.bf16.msra.mxu0 %v780_v3  ;;  %v35_v9 = vrot.slane %v19_v7, 6  ;;  %v593_v10 = vld [vmem:[%s945_s1 + $0x2] sm:$0x3]  ;;  %v618_v11 = vld [vmem:[%s945_s1 + $0x4] sm:$0x3] }
   0x4   :  { %v50_v13 = vsel %vm48_vm0, 0.0, %v33_v5  ;;  %v799_v15 = vpack.c.bf16 %v33_v5, %v33_v5  ;;  %711 = vmatprep.subr.msk.bf16.mxu1 %vm48_vm0, %v593_v10  ;;  %714 = vmatprep.subr.msk.bf16.mxu0 %vm48_vm0, %v618_v11  ;;  %v51_v19 = vsel %vm48_vm0, 0.0, %v34_v8 }
   0x5   :  { %v49_v12 = vsel %vm48_vm0, 0.0, %v32_v4  ;;  %v797_v14 = vpack.c.bf16 %v32_v4, %v32_v4  ;;  %v805_v17 = vpack.c.bf16 %v50_v13, %v50_v13 }
   0x6   :  { %v803_v16 = vpack.c.bf16 %v49_v12, %v49_v12  ;;  %v644_v18 = vpack.c.bf16 %v50_v13, %v49_v12 }
   0x7   :  { %8 = vsyncpa [#allocation3], 0  ;;  %v405_v20 = vrot.slane %v797_v14, 5  ;;  %v409_v21 = vrot.slane %v799_v15, 5  ;;  %v52_v22 = vsel %vm48_vm0, 0.0, %v35_v9  ;;  %v811_v23 = vpack.c.bf16 %v51_v19, %v51_v19  ;;  %v20_v63 = vld [vmem:[%s944_s0 + $0x20] sm:$0xff] }
   0x8   :  { %v110_v24 = vshrl.u32 %v803_v16, 16  ;;  %v113_v25 = vshll.u32 %v803_v16, 16  ;;  %v124_v26 = vshrl.u32 %v805_v17, 16  ;;  %v127_v27 = vshll.u32 %v805_v17, 16  ;;  %675 = vmatprep.mubr.msk.bf16.mxu0 %vm235_vm1, %v644_v18  ;;  %v21_v1 = vld [vmem:[%s944_s0 + $0x28] sm:$0xff] }
   0x9   :  { %v610_v28 = vrot.slane %v803_v16, 9  ;;  %v611_v29 = vrot.slane %v805_v17, 9  ;;  %v820_v30 = vpack.c.bf16 %v34_v8, %v34_v8  ;;  %v822_v31 = vpack.c.bf16 %v52_v22, %v52_v22 }
   0xa   :  { %vm400_vm2 = vcmask 1042432   ;;  %v112_v32 = vrot.slane %v110_v24, 4  ;;  %v115_v33 = vrot.slane %v113_v25, 5  ;;  %v126_v34 = vrot.slane %v124_v26, 4 }
   0xb   :  { %v129_v35 = vrot.slane %v127_v27, 5  ;;  %v635_v36 = vpack.c.bf16 %v35_v9, %v35_v9  ;;  %v138_v37 = vshrl.u32 %v811_v23, 16  ;;  %v141_v38 = vshll.u32 %v811_v23, 16 }
   0xc   :  { %v152_v39 = vshrl.u32 %v822_v31, 16  ;;  %v155_v40 = vshll.u32 %v822_v31, 16  ;;  %v645_v41 = vpack.c.bf16 %v52_v22, %v51_v19  ;;  %v612_v42 = vrot.slane %v811_v23, 9  ;;  %v22_v22 = vld [vmem:[%s944_s0 + $0x30] sm:$0xff] }
   0xd   :  { %v413_v43 = vrot.slane %v820_v30, 5  ;;  %v140_v44 = vrot.slane %v138_v37, 4  ;;  %v143_v45 = vrot.slane %v141_v38, 5  ;;  %v613_v47 = vrot.slane %v822_v31, 9 }
   0xe   :  { %v154_v46 = vrot.slane %v152_v39, 4  ;;  %v157_v48 = vrot.slane %v155_v40, 5  ;;  %676 = vmatmul.mubr.msk.bf16.vlgmr.msra.gmra.mrb[0].mxu0 %vm235_vm1, %v645_v41  ;;  %v417_v49 = vrot.slane %v635_v36, 5  ;;  %v249_v50 = vsel %vm48_vm0, %v593_v10, 0 }
   0xf   :  { %v462_v51 = vsel %vm48_vm0, %v618_v11, 0  ;;  %664 = vmatpush3.bf16.msra.mxu1 %v249_v50  ;;  %vm106_vm3 = vsmask.f32 3328  ;;  %vm107_vm4 = vsmask.f32 7440  ;;  %v116_v52 = vor.u32 %v115_v33, %v112_v32 }
  0x10   :  { %684 = vmatpush3.bf16.msra.mxu0 %v462_v51  ;;  %v119_v53 = vshll.u32 %v797_v14, 16  ;;  %vm835_vm5 = vmor %vm106_vm3, %vm107_vm4  ;;  %v130_v55 = vor.u32 %v129_v35, %v126_v34  ;;  %v133_v56 = vshll.u32 %v799_v15, 16  ;;  %713 = vmatprep.subr.msk.bf16.mxu1 %vm48_vm0, %v768_v0  ;;  %v144_v57 = vor.u32 %v143_v45, %v140_v44 }
  0x11   :  { %v147_v58 = vshll.u32 %v820_v30, 16  ;;  %v117_v59 = vrot.slane %v116_v52, 4  ;;  %v158_v61 = vor.u32 %v157_v48, %v154_v46  ;;  %v161_v62 = vshll.u32 %v635_v36, 16 }
  0x12   :  { %v121_v60 = vrot.slane %v119_v53, 5  ;;  %v131_v2 = vrot.slane %v130_v55, 4  ;;  %v135_v4 = vrot.slane %v133_v56, 5  ;;  %v145_v5 = vrot.slane %v144_v57, 4 }
  0x13   :  { %v149_v6 = vrot.slane %v147_v58, 5  ;;  %v159_v7 = vrot.slane %v158_v61, 4  ;;  %v163_v8 = vrot.slane %v161_v62, 5  ;;  %vm401_vm6 = vcmask 1046532  }
  0x14   :  { %v122_v0 = vsel %vm835_vm5, %v117_v59, %v121_v60  ;;  %v136_v9 = vsel %vm835_vm5, %v131_v2, %v135_v4  ;;  %vm856_vm7 = vmor %vm400_vm2, %vm401_vm6  ;;  %v36_v12 = vrot.slane %v20_v63, 6  ;;  %v37_v13 = vrot.slane %v21_v1, 6 }
  0x15   :  { %v150_v10 = vsel %vm835_vm5, %v145_v5, %v149_v6  ;;  %v594_v16 = vcombine.low %v122_v0, %v136_v9  ;;  %v164_v17 = vsel %vm835_vm5, %v159_v7, %v163_v8  ;;  %v406_v18 = vsel %vm856_vm7, %v610_v28, %v405_v20  ;;  %v23_v20 = vld [vmem:[%s944_s0 + $0x38] sm:$0xff] }
  0x16   :  { %v410_v19 = vsel %vm856_vm7, %v611_v29, %v409_v21  ;;  %v595_v23 = vcombine.low %v150_v10, %v164_v17  ;;  %v414_v25 = vsel %vm856_vm7, %v612_v42, %v413_v43  ;;  %v418_v14 = vsel %vm856_vm7, %v613_v47, %v417_v49 }
  0x17   :  { %v619_v24 = vcombine.low %v406_v18, %v410_v19  ;;  %665 = vmatprep.mubr.msk.bf16.mxu1 %vm235_vm1, %v594_v16  ;;  %v620_v15 = vcombine.low %v414_v25, %v418_v14  ;;  %v882_v21 = vsel %vm48_vm0, 0.0, %v36_v12  ;;  %v885_v26 = vsel %vm48_vm0, 0.0, %v37_v13 }
  0x18   :  { %v637_v27 = vpack.c.bf16 %v36_v12, %v36_v12  ;;  %666 = vmatmul.mubr.msk.bf16.vlgmr.msra.gmra.mrb[0].mxu1 %vm235_vm1, %v595_v23  ;;  %v636_v28 = vpack.c.bf16 %v882_v21, %v882_v21  ;;  %v638_v29 = vpack.c.bf16 %v885_v26, %v885_v26  ;;  %v639_v30 = vpack.c.bf16 %v37_v13, %v37_v13 }
  0x19   :  { %685 = vmatprep.mubr.msk.bf16.mxu0 %vm235_vm1, %v619_v24  ;;  %v38_v31 = vrot.slane %v22_v22, 6  ;;  %694 = vmatpush3.bf16.msra.mxu1 %v780_v3  ;;  %v39_v33 = vrot.slane %v23_v20, 6  ;;  %vm552_vm8 = vcmask 261120  }
  0x1a   :  { %v175_v32 = vshll.u32 %v637_v27, 16  ;;  %v421_v34 = vrot.slane %v637_v27, 5  ;;  %686 = vmatmul.mubr.msk.bf16.vlgmr.msra.gmra.mrb[0].mxu0 %vm235_vm1, %v620_v15  ;;  %v166_v35 = vshrl.u32 %v636_v28, 16  ;;  %v169_v36 = vshll.u32 %v636_v28, 16 }
  0x1b   :  { %v180_v37 = vshrl.u32 %v638_v29, 16  ;;  %v183_v38 = vshll.u32 %v638_v29, 16  ;;  %v189_v40 = vshll.u32 %v639_v30, 16  ;;  %v55_v41 = vsel %vm48_vm0, 0.0, %v38_v31 }
  0x1c   :  { %v177_v39 = vrot.slane %v175_v32, 5  ;;  %v56_v42 = vsel %vm48_vm0, 0.0, %v39_v33  ;;  %v168_v43 = vrot.slane %v166_v35, 4  ;;  %v171_v44 = vrot.slane %v169_v36, 5 }
  0x1d   :  { %v182_v45 = vrot.slane %v180_v37, 4  ;;  %v185_v46 = vrot.slane %v183_v38, 5  ;;  %v191_v3 = vrot.slane %v189_v40, 5  ;;  %v640_v47 = vpack.c.bf16 %v55_v41, %v55_v41 }
  0x1e   :  { %v641_v48 = vpack.c.bf16 %v38_v31, %v38_v31  ;;  %v642_v49 = vpack.c.bf16 %v56_v42, %v56_v42  ;;  %v172_v50 = vor.u32 %v171_v44, %v168_v43  ;;  %v643_v52 = vpack.c.bf16 %v39_v33, %v39_v33 }
  0x1f   :  { %v186_v51 = vor.u32 %v185_v46, %v182_v45  ;;  %v614_v53 = vrot.slane %v636_v28, 9  ;;  %v194_v55 = vshrl.u32 %v640_v47, 16  ;;  %v197_v56 = vshll.u32 %v640_v47, 16 }
  0x20   :  { %v203_v57 = vshll.u32 %v641_v48, 16  ;;  %v208_v58 = vshrl.u32 %v642_v49, 16  ;;  %v173_v59 = vrot.slane %v172_v50, 4  ;;  %v211_v61 = vshll.u32 %v642_v49, 16 }
  0x21   :  { %v187_v60 = vrot.slane %v186_v51, 4  ;;  %v217_v62 = vshll.u32 %v643_v52, 16  ;;  %v196_v63 = vrot.slane %v194_v55, 4  ;;  %v199_v1 = vrot.slane %v197_v56, 5 }
  0x22   :  { %v205_v2 = vrot.slane %v203_v57, 5  ;;  %v210_v4 = vrot.slane %v208_v58, 4  ;;  %v178_v5 = vsel %vm835_vm5, %v173_v59, %v177_v39  ;;  %v213_v0 = vrot.slane %v211_v61, 5 }
  0x23   :  { %v192_v6 = vsel %vm835_vm5, %v187_v60, %v191_v3  ;;  %v219_v7 = vrot.slane %v217_v62, 5  ;;  %v200_v9 = vor.u32 %v199_v1, %v196_v63  ;;  %v422_v10 = vsel %vm856_vm7, %v614_v53, %v421_v34  ;;  %v627_v34 = vld [vmem:[%s946_s2] ss:$0 sm:$0xff]  ;;  %s742_s2 = smov [#allocation2]  }
  0x24   :  { %v596_v8 = vcombine.low %v178_v5, %v192_v6  ;;  %v615_v12 = vrot.slane %v638_v29, 9  ;;  %v214_v13 = vor.u32 %v213_v0, %v210_v4  ;;  %v425_v16 = vrot.slane %v639_v30, 5  ;;  %s566_s7 = sshll.u32 %s742_s2, 4  ;;  %s567_s7 = int_to_ptr.vmem [resolvable:$true] %s566_s7 }
  0x25   :  { %v616_v17 = vrot.slane %v640_v47, 9  ;;  %v429_v18 = vrot.slane %v641_v48, 5  ;;  %v201_v19 = vrot.slane %v200_v9, 4  ;;  %v617_v22 = vrot.slane %v642_v49, 9  ;;  %s718_s8 = scalar_lea.vmem %s567_s7, 1024  ;;  %p723_p1 = scmp.lt.s32.totalorder %s567_s7, %s567_s7 }
  0x26   :  { %669 = vmatprep.mubr.msk.bf16.mxu1 %vm235_vm1, %v596_v8  ;;  %v433_v23 = vrot.slane %v643_v52, 5  ;;  %v215_v24 = vrot.slane %v214_v13, 4  ;;  %v426_v25 = vsel %vm856_vm7, %v615_v12, %v425_v16  ;;  %v646_v30 = vpack.c.bf16 %v885_v26, %v882_v21  ;;  %p719_p0 = scmp.ne.s32.totalorder %s567_s7, %s718_s8  ;;  %p724_p2 = scmp.lt.s32.totalorder %s718_s8, %s718_s8 }
  0x27   :  { %v430_v14 = vsel %vm856_vm7, %v616_v17, %v429_v18  ;;  %v206_v20 = vsel %vm835_vm5, %v201_v19, %v205_v2  ;;  %v621_v15 = vcombine.low %v422_v10, %v426_v25  ;;  %v647_v32 = vpack.c.bf16 %v56_v42, %v55_v41 }
  0x28   :  { %v434_v27 = vsel %vm856_vm7, %v617_v22, %v433_v23  ;;  %v220_v28 = vsel %vm835_vm5, %v215_v24, %v219_v7  ;;  %p725_p3 = por %p724_p2, %p723_p1 }
  0x29   :  { %v622_v29 = vcombine.low %v430_v14, %v434_v27  ;;  %v597_v31 = vcombine.low %v206_v20, %v220_v28  ;;  %689 = vmatprep.mubr.msk.bf16.mxu0 %vm235_vm1, %v621_v15 }
  0x2a   :  { %p726_p4 = pnand %p725_p3, %p719_p0 }
  0x2b   :  { %690 = vmatmul.mubr.msk.bf16.gmra.mrb[4].mxu0 %vm235_vm1, %v622_v29  ;;  %670 = vmatmul.mubr.msk.bf16.gmra.mrb[4].mxu1 %vm235_vm1, %v597_v31 }
  0x2c   :  { %679 = vmatprep.mubr.msk.bf16.mxu1 %vm235_vm1, %v646_v30 }
  0x37   :  { %680 = vmatmul.mubr.msk.bf16.vlgmr.msra.gmra.mrb[4].mxu1 %vm235_vm1, %v647_v32 }
  0xeb   :  { %v667_v11 = vpop.f32.mrb[0].mxu1 }
  0xec   :  { %v285_v33 = vpop.f32.mrb[1].mxu1 }
  0xed   :  { %v687_v54 = vpop.f32.mrb[0].mxu0  ;;  %v668_v21 = vpop.f32.mrb[2].mxu1 }
  0xee   :  { %v695_v26 = vadd.f32 %v687_v54, %v667_v11  ;;  %v498_v35 = vpop.f32.mrb[1].mxu0  ;;  %v288_v36 = vpop.f32.mrb[3].mxu1 }
  0xef   :  { %v696_v37 = vadd.f32 %v498_v35, %v285_v33  ;;  %v688_v38 = vpop.f32.mrb[2].mxu0 }
  0xf0   :  { %v546_v39 = vadd.f32 %v695_v26, %v627_v34  ;;  %v697_v40 = vadd.f32 %v688_v38, %v668_v21  ;;  %v501_v43 = vpop.f32.mrb[3].mxu0 }
  0xf1   :  { %v544_v41 = vadd.f32 %v696_v37, %v627_v34  ;;  %v698_v42 = vadd.f32 %v501_v43, %v288_v36 }
  0xf2   :  { %555 = vst.msk [vmem:[#allocation2 + $0x10] sm:$0xff] %vm552_vm8, %v546_v39  ;;  %v547_v44 = vadd.f32 %v697_v40, %v627_v34 }
  0xf3   :  { %553 = vst.msk [vmem:[#allocation2] sm:$0xff] %vm552_vm8, %v544_v41  ;;  %v545_v45 = vadd.f32 %v698_v42, %v627_v34 }
  0xf4   :  { %556 = vst.msk [vmem:[#allocation2 + $0x18] sm:$0xff] %vm552_vm8, %v547_v44 }
  0xf5   :  { %554 = vst.msk [vmem:[#allocation2 + $0x8] sm:$0xff] %vm552_vm8, %v545_v45 }
  0xfe   :  { %v691_v46 = vpop.f32.mrb[4].mxu0 }
  0xff   :  { %v514_v3 = vpop.f32.mrb[5].mxu0 }
 0x100   :  { %v692_v47 = vpop.f32.mrb[6].mxu0 }
 0x101   :  { %v517_v48 = vpop.f32.mrb[7].mxu0 }
 0x10a   :  { %v681_v49 = vpop.f32.mrb[4].mxu1 }
 0x10b   :  { %v699_v50 = vadd.f32 %v691_v46, %v681_v49  ;;  %v385_v51 = vpop.f32.mrb[5].mxu1 }
 0x10c   :  { %v700_v52 = vadd.f32 %v514_v3, %v385_v51  ;;  %v682_v53 = vpop.f32.mrb[6].mxu1 }
 0x10d   :  { %v550_v55 = vadd.f32 %v699_v50, %v627_v34  ;;  %v701_v56 = vadd.f32 %v692_v47, %v682_v53  ;;  %v388_v57 = vpop.f32.mrb[7].mxu1 }
 0x10e   :  { %v548_v58 = vadd.f32 %v700_v52, %v627_v34  ;;  %v702_v59 = vadd.f32 %v517_v48, %v388_v57 }
 0x10f   :  { %559 = vst.msk [vmem:[#allocation2 + $0x30] sm:$0xff] %vm552_vm8, %v550_v55  ;;  %v551_v60 = vadd.f32 %v701_v56, %v627_v34 }
 0x110   :  { %557 = vst.msk [vmem:[#allocation2 + $0x20] sm:$0xff] %vm552_vm8, %v548_v58  ;;  %v549_v61 = vadd.f32 %v702_v59, %v627_v34 }
 0x111   :  { %560 = vst.msk [vmem:[#allocation2 + $0x38] sm:$0xff] %vm552_vm8, %v551_v60 }
 0x112   :  { %558 = vst.msk [vmem:[#allocation2 + $0x28] sm:$0xff] %vm552_vm8, %v549_v61 }
 0x113   :  { %729 = shalt.err (!%p726_p4)
}
 0x114   :  { %s730_s11 = scalar_lea.hbm %s947_s3, 1024 }
 0x115   :  { %p731_p5 = scmp.ne.s32.totalorder %s947_s3, %s730_s11  ;;  %p734_p6 = scmp.lt.u32.totalorder %s730_s11, %s947_s3 }
 0x117   :  { %p736_p7 = pnand %p734_p6, %p731_p5 }
 0x119   :  { %739 = shalt.err (!%p736_p7)
}
 0x11a   :  { %s743_s16 = smov 128   ;;  %s744_s17 = smov 8  }
 0x11b   :  { %572 = dma.vmem_to_hbm [thread:$0]  %s567_s7, 1024, %s947_s3, [#allocation3], %s743_s16, %s743_s16, %s744_s17  }
 0x11c   :  { %740 = dma.done.wait [#allocation3], 1024  }
 0x11d   :  { %741 = vsyncadd [#allocation3], 4294966272 }
 0x11e   :  { %576 = vsyncpa [#allocation3], 1 }

// kernel: _lambda_.9
= control target key start
LH: loop header
LB: loop body
LE: loop exit
PB: predicated region body
PF: predicated region fallthrough
CT: control target
= control target key end

     0   :  { %8 = vsyncpa [#allocation3], 0  ;;  %s1045_s0 = inlined_call_operand.hbm [shape: f32[8,8,32], index: 0, kind: input, shape index: {}]   ;;  %s1046_s1 = inlined_call_operand.hbm [shape: bf16[3,32,4], index: 1, kind: input, shape index: {}]   ;;  %s1047_s2 = inlined_call_operand.vmem [shape: f32[1,4], index: 2, kind: input, shape index: {}]   ;;  %s1048_s3 = inlined_call_operand.vmem [shape: f32[8,8,4], index: 3, kind: output, shape index: {}]  }
   0x1   :  { %9 = vsyncpa [#allocation5], 0  ;;  %s839_s12 = smov [#allocation2]   ;;  %s791_s16 = scalar_lea.hbm %s1045_s0, 1024 }
   0x2   :  { %s15_s13 = sshll.u32 %s839_s12, 4  ;;  %p792_p0 = scmp.ne.s32.totalorder %s1045_s0, %s791_s16  ;;  %s16_s13 = int_to_ptr.vmem [resolvable:$true] %s15_s13 }
   0x3   :  { %p795_p1 = scmp.lt.u32.totalorder %s791_s16, %s1045_s0 }
   0x5   :  { %p797_p2 = pnand %p795_p1, %p792_p0 }
   0x7   :  { %800 = shalt.err (!%p797_p2)
}
   0x8   :  { %s801_s21 = scalar_lea.vmem %s16_s13, 1024  ;;  %p806_p4 = scmp.lt.s32.totalorder %s16_s13, %s16_s13 }
   0x9   :  { %p802_p3 = scmp.ne.s32.totalorder %s16_s13, %s801_s21  ;;  %p807_p5 = scmp.lt.s32.totalorder %s801_s21, %s801_s21 }
   0xb   :  { %p808_p6 = por %p807_p5, %p806_p4 }
   0xd   :  { %p809_p7 = pnand %p808_p6, %p802_p3 }
   0xf   :  { %812 = shalt.err (!%p809_p7)
}
  0x10   :  { %s840_s22 = smov 128   ;;  %s841_s23 = smov 8  }
  0x11   :  { %21 = dma.hbm_to_vmem [thread:$0]  %s1045_s0, 1024, %s16_s13, [#allocation3], %s840_s22, %s840_s22, %s841_s23  }
  0x12   :  { %s842_s26 = smov [#allocation4]   ;;  %s813_s30 = scalar_lea.hbm %s1046_s1, 768 }
  0x13   :  { %s27_s27 = sshll.u32 %s842_s26, 4  ;;  %p814_p8 = scmp.ne.s32.totalorder %s1046_s1, %s813_s30  ;;  %s28_s27 = int_to_ptr.vmem [resolvable:$true] %s27_s27 }
  0x14   :  { %p817_p9 = scmp.lt.u32.totalorder %s813_s30, %s1046_s1 }
  0x16   :  { %p819_p10 = pnand %p817_p9, %p814_p8 }
  0x18   :  { %822 = shalt.err (!%p819_p10)
}
  0x19   :  { %s823_s8 = scalar_lea.vmem %s28_s27, 768  ;;  %p828_p12 = scmp.lt.s32.totalorder %s28_s27, %s28_s27 }
  0x1a   :  { %p824_p11 = scmp.ne.s32.totalorder %s28_s27, %s823_s8  ;;  %p829_p13 = scmp.lt.s32.totalorder %s823_s8, %s823_s8 }
  0x1c   :  { %p830_p0 = por %p829_p13, %p828_p12 }
  0x1e   :  { %p831_p1 = pnand %p830_p0, %p824_p11 }
  0x20   :  { %834 = shalt.err (!%p831_p1)
}
  0x21   :  { %s843_s0 = smov 64   ;;  %s844_s9 = smov 4  }
  0x22   :  { %33 = dma.hbm_to_vmem [thread:$0]  %s1046_s1, 768, %s28_s27, [#allocation5], %s843_s0, %s843_s0, %s844_s9  }
  0x23   :  { %835 = dma.done.wait [#allocation3], 1024  }
  0x24   :  { %836 = vsyncadd [#allocation3], 4294966272 }
  0x25   :  { %837 = dma.done.wait [#allocation5], 768  }
  0x26   :  { %838 = vsyncadd [#allocation5], 4294966528  ;;  %v889_v0 = vld [vmem:[#allocation4] sm:$0xff]   ;;  %v891_v1 = vld [vmem:[#allocation4 + $0x8] sm:$0xff]   ;;  %vm75_vm0 = vcmask 1041408   ;;  %vm280_vm1 = vcmask 261120  }
  0x27   :  { %735 = vmatprep.subr.bf16.mxu0 %v889_v0  ;;  %v787_v2 = vld [vmem:[#allocation4 + $0x10] sm:$0xff]   ;;  %v43_v3 = vld [vmem:[#allocation2] sm:$0xff]  ;;  %v44_v4 = vld [vmem:[#allocation2 + $0x8] sm:$0xff]  ;;  %vm136_vm2 = vsmask.f32 3328  ;;  %vm451_vm4 = vcmask 1042432  }
  0x28   :  { %736 = vmatpush3.bf16.msra.mxu0 %v889_v0  ;;  %v45_v5 = vld [vmem:[#allocation2 + $0x10] sm:$0xff]  ;;  %723 = vmatprep.subr.bf16.mxu1 %v787_v2  ;;  %v59_v6 = vrot.slane %v43_v3, 6  ;;  %v60_v7 = vrot.slane %v44_v4, 6  ;;  %v46_v8 = vld [vmem:[#allocation2 + $0x18] sm:$0xff]  ;;  %vm137_vm3 = vsmask.f32 7440 }
  0x29   :  { %737 = vmatprep.subr.bf16.mxu0 %v891_v1  ;;  %v61_v9 = vrot.slane %v45_v5, 6  ;;  %724 = vmatpush3.bf16.msra.mxu1 %v787_v2  ;;  %v62_v10 = vrot.slane %v46_v8, 6  ;;  %v788_v11 = vld [vmem:[#allocation4 + $0x18] sm:$0xff]   ;;  %vm452_vm5 = vcmask 1046532   ;;  %v789_v16 = vld [vmem:[#allocation4 + $0x20] sm:$0xff]   ;;  %v790_v45 = vld [vmem:[#allocation4 + $0x28] sm:$0xff]  }
  0x2a   :  { %v76_v12 = vsel %vm75_vm0, 0.0, %v59_v6  ;;  %v77_v13 = vsel %vm75_vm0, 0.0, %v60_v7  ;;  %v898_v14 = vpack.c.bf16 %v59_v6, %v59_v6  ;;  %v900_v15 = vpack.c.bf16 %v60_v7, %v60_v7  ;;  %725 = vmatprep.subr.bf16.mxu1 %v788_v11  ;;  %vm927_vm6 = vmor %vm136_vm2, %vm137_vm3  ;;  %v684_v59 = vld [vmem:[%s1047_s2] ss:$0 sm:$0xff] }
  0x2b   :  { %v903_v17 = vpack.c.bf16 %v76_v12, %v76_v12  ;;  %v905_v18 = vpack.c.bf16 %v77_v13, %v77_v13  ;;  %v701_v19 = vpack.c.bf16 %v77_v13, %v76_v12  ;;  %v78_v20 = vsel %vm75_vm0, 0.0, %v61_v9  ;;  %vm935_vm7 = vmor %vm451_vm4, %vm452_vm5 }
  0x2c   :  { %738 = vmatpush3.bf16.msra.mxu0 %v891_v1  ;;  %v456_v21 = vrot.slane %v898_v14, 5  ;;  %v460_v22 = vrot.slane %v900_v15, 5  ;;  %v79_v23 = vsel %vm75_vm0, 0.0, %v62_v10  ;;  %v911_v24 = vpack.c.bf16 %v78_v20, %v78_v20 }
  0x2d   :  { %747 = vmatprep.subr.bf16.mxu0 %v789_v16  ;;  %v140_v25 = vshrl.u32 %v903_v17, 16  ;;  %v143_v26 = vshll.u32 %v903_v17, 16  ;;  %v154_v27 = vshrl.u32 %v905_v18, 16  ;;  %v157_v28 = vshll.u32 %v905_v18, 16  ;;  %739 = vmatprep.mubr.msk.bf16.mxu0 %vm280_vm1, %v701_v19 }
  0x2e   :  { %726 = vmatpush3.bf16.msra.mxu1 %v788_v11  ;;  %v666_v29 = vrot.slane %v903_v17, 9  ;;  %v667_v30 = vrot.slane %v905_v18, 9  ;;  %v690_v31 = vpack.c.bf16 %v61_v9, %v61_v9  ;;  %v691_v32 = vpack.c.bf16 %v79_v23, %v79_v23  ;;  %v48_v11 = vld [vmem:[#allocation2 + $0x28] sm:$0xff]  ;;  %v49_v17 = vld [vmem:[#allocation2 + $0x30] sm:$0xff]  ;;  %v50_v18 = vld [vmem:[#allocation2 + $0x38] sm:$0xff] }
  0x2f   :  { %759 = vmatprep.subr.bf16.mxu1 %v889_v0  ;;  %v142_v33 = vrot.slane %v140_v25, 4  ;;  %v145_v34 = vrot.slane %v143_v26, 5  ;;  %v156_v35 = vrot.slane %v154_v27, 4  ;;  %v159_v36 = vrot.slane %v157_v28, 5 }
  0x30   :  { %v692_v37 = vpack.c.bf16 %v62_v10, %v62_v10  ;;  %v168_v38 = vshrl.u32 %v911_v24, 16  ;;  %v171_v39 = vshll.u32 %v911_v24, 16  ;;  %v182_v40 = vshrl.u32 %v691_v32, 16  ;;  %v47_v10 = vld [vmem:[#allocation2 + $0x20] sm:$0xff] }
  0x31   :  { %v185_v41 = vshll.u32 %v691_v32, 16  ;;  %v702_v42 = vpack.c.bf16 %v79_v23, %v78_v20  ;;  %v668_v43 = vrot.slane %v911_v24, 9  ;;  %v464_v44 = vrot.slane %v690_v31, 5 }
  0x32   :  { %v170_v46 = vrot.slane %v168_v38, 4  ;;  %v173_v47 = vrot.slane %v171_v39, 5  ;;  %v184_v48 = vrot.slane %v182_v40, 4  ;;  %v669_v49 = vrot.slane %v691_v32, 9 }
  0x33   :  { %v187_v50 = vrot.slane %v185_v41, 5  ;;  %740 = vmatmul.mubr.msk.bf16.vlgmr.msra.gmra.mrb[0].mxu0 %vm280_vm1, %v702_v42  ;;  %v468_v51 = vrot.slane %v692_v37, 5  ;;  %v146_v53 = vor.u32 %v145_v34, %v142_v33  ;;  %v149_v54 = vshll.u32 %v898_v14, 16 }
  0x34   :  { %748 = vmatpush3.bf16.msra.mxu0 %v789_v16  ;;  %v160_v55 = vor.u32 %v159_v36, %v156_v35  ;;  %v163_v56 = vshll.u32 %v900_v15, 16  ;;  %v174_v57 = vor.u32 %v173_v47, %v170_v46  ;;  %v177_v58 = vshll.u32 %v690_v31, 16 }
  0x35   :  { %v147_v60 = vrot.slane %v146_v53, 4  ;;  %v151_v61 = vrot.slane %v149_v54, 5  ;;  %v188_v62 = vor.u32 %v187_v50, %v184_v48  ;;  %v191_v63 = vshll.u32 %v692_v37, 16  ;;  %749 = vmatprep.subr.bf16.mxu0 %v790_v45 }
  0x36   :  { %v161_v2 = vrot.slane %v160_v55, 4  ;;  %v165_v3 = vrot.slane %v163_v56, 5  ;;  %v175_v4 = vrot.slane %v174_v57, 4  ;;  %v179_v5 = vrot.slane %v177_v58, 5 }
  0x37   :  { %v152_v6 = vsel %vm927_vm6, %v147_v60, %v151_v61  ;;  %v189_v7 = vrot.slane %v188_v62, 4  ;;  %v193_v8 = vrot.slane %v191_v63, 5  ;;  %v457_v9 = vsel %vm935_vm7, %v666_v29, %v456_v21 }
  0x38   :  { %v166_v12 = vsel %vm927_vm6, %v161_v2, %v165_v3  ;;  %v180_v13 = vsel %vm927_vm6, %v175_v4, %v179_v5  ;;  %750 = vmatpush3.bf16.msra.mxu0 %v790_v45  ;;  %v461_v14 = vsel %vm935_vm7, %v667_v30, %v460_v22  ;;  %v465_v16 = vsel %vm935_vm7, %v668_v43, %v464_v44 }
  0x39   :  { %v646_v19 = vcombine.low %v152_v6, %v166_v12  ;;  %v194_v20 = vsel %vm927_vm6, %v189_v7, %v193_v8  ;;  %v674_v21 = vcombine.low %v457_v9, %v461_v14  ;;  %v469_v23 = vsel %vm935_vm7, %v669_v49, %v468_v51 }
  0x3a   :  { %v647_v24 = vcombine.low %v180_v13, %v194_v20  ;;  %v63_v25 = vrot.slane %v47_v10, 6  ;;  %v64_v26 = vrot.slane %v48_v11, 6  ;;  %v675_v15 = vcombine.low %v465_v16, %v469_v23 }
  0x3b   :  { %727 = vmatprep.mubr.msk.bf16.mxu1 %vm280_vm1, %v646_v19  ;;  %751 = vmatprep.mubr.msk.bf16.mxu0 %vm280_vm1, %v674_v21  ;;  %v65_v22 = vrot.slane %v49_v17, 6  ;;  %v66_v27 = vrot.slane %v50_v18, 6  ;;  %vm615_vm8 = vcmask 31744  }
  0x3c   :  { %728 = vmatmul.mubr.msk.bf16.vlgmr.msra.gmra.mrb[0].mxu1 %vm280_vm1, %v647_v24  ;;  %v961_v28 = vsel %vm75_vm0, 0.0, %v63_v25  ;;  %v964_v29 = vsel %vm75_vm0, 0.0, %v64_v26  ;;  %v694_v30 = vpack.c.bf16 %v63_v25, %v63_v25  ;;  %v696_v31 = vpack.c.bf16 %v64_v26, %v64_v26 }
  0x3d   :  { %761 = vmatpush3.bf16.msra.mxu1 %v889_v0  ;;  %v693_v32 = vpack.c.bf16 %v961_v28, %v961_v28  ;;  %v695_v33 = vpack.c.bf16 %v964_v29, %v964_v29  ;;  %v972_v34 = vsel %vm75_vm0, 0.0, %v65_v22  ;;  %v975_v35 = vsel %vm75_vm0, 0.0, %v66_v27 }
  0x3e   :  { %v205_v36 = vshll.u32 %v694_v30, 16  ;;  %v219_v37 = vshll.u32 %v696_v31, 16  ;;  %v697_v38 = vpack.c.bf16 %v972_v34, %v972_v34  ;;  %v698_v39 = vpack.c.bf16 %v65_v22, %v65_v22  ;;  %760 = vmatprep.subr.bf16.mxu1 %v891_v1 }
  0x3f   :  { %752 = vmatmul.mubr.msk.bf16.vlgmr.msra.gmra.mrb[0].mxu0 %vm280_vm1, %v675_v15  ;;  %v196_v0 = vshrl.u32 %v693_v32, 16  ;;  %v199_v40 = vshll.u32 %v693_v32, 16  ;;  %v210_v41 = vshrl.u32 %v695_v33, 16  ;;  %v213_v42 = vshll.u32 %v695_v33, 16 }
  0x40   :  { %v207_v43 = vrot.slane %v205_v36, 5  ;;  %v221_v44 = vrot.slane %v219_v37, 5  ;;  %v699_v45 = vpack.c.bf16 %v975_v35, %v975_v35  ;;  %v700_v46 = vpack.c.bf16 %v66_v27, %v66_v27 }
  0x41   :  { %v198_v47 = vrot.slane %v196_v0, 4  ;;  %v201_v48 = vrot.slane %v199_v40, 5  ;;  %v212_v49 = vrot.slane %v210_v41, 4  ;;  %v215_v50 = vrot.slane %v213_v42, 5  ;;  %762 = vmatpush3.bf16.msra.mxu1 %v891_v1 }
  0x42   :  { %v224_v51 = vshrl.u32 %v697_v38, 16  ;;  %v227_v53 = vshll.u32 %v697_v38, 16  ;;  %v233_v54 = vshll.u32 %v698_v39, 16  ;;  %v238_v55 = vshrl.u32 %v699_v45, 16 }
  0x43   :  { %v202_v56 = vor.u32 %v201_v48, %v198_v47  ;;  %v216_v57 = vor.u32 %v215_v50, %v212_v49  ;;  %v241_v58 = vshll.u32 %v699_v45, 16  ;;  %v247_v60 = vshll.u32 %v700_v46, 16 }
  0x44   :  { %v226_v61 = vrot.slane %v224_v51, 4  ;;  %v229_v62 = vrot.slane %v227_v53, 5  ;;  %v235_v63 = vrot.slane %v233_v54, 5  ;;  %v240_v2 = vrot.slane %v238_v55, 4 }
  0x45   :  { %v203_v3 = vrot.slane %v202_v56, 4  ;;  %v217_v4 = vrot.slane %v216_v57, 4  ;;  %v243_v5 = vrot.slane %v241_v58, 5  ;;  %v249_v6 = vrot.slane %v247_v60, 5 }
  0x46   :  { %v230_v7 = vor.u32 %v229_v62, %v226_v61  ;;  %v670_v8 = vrot.slane %v693_v32, 9  ;;  %v472_v9 = vrot.slane %v694_v30, 5  ;;  %v671_v1 = vrot.slane %v695_v33, 9 }
  0x47   :  { %v208_v10 = vsel %vm927_vm6, %v203_v3, %v207_v43  ;;  %v222_v11 = vsel %vm927_vm6, %v217_v4, %v221_v44  ;;  %v244_v12 = vor.u32 %v243_v5, %v240_v2  ;;  %v476_v13 = vrot.slane %v696_v31, 5 }
  0x48   :  { %v648_v14 = vcombine.low %v208_v10, %v222_v11  ;;  %v231_v16 = vrot.slane %v230_v7, 4  ;;  %v473_v17 = vsel %vm935_vm7, %v670_v8, %v472_v9  ;;  %v672_v18 = vrot.slane %v697_v38, 9 }
  0x49   :  { %v245_v19 = vrot.slane %v244_v12, 4  ;;  %v477_v20 = vsel %vm935_vm7, %v671_v1, %v476_v13  ;;  %v480_v21 = vrot.slane %v698_v39, 5  ;;  %v673_v23 = vrot.slane %v699_v45, 9 }
  0x4a   :  { %731 = vmatprep.mubr.msk.bf16.mxu1 %vm280_vm1, %v648_v14  ;;  %v236_v24 = vsel %vm927_vm6, %v231_v16, %v235_v63  ;;  %v676_v25 = vcombine.low %v473_v17, %v477_v20  ;;  %v484_v26 = vrot.slane %v700_v46, 5  ;;  %v703_v27 = vpack.c.bf16 %v964_v29, %v961_v28 }
  0x4b   :  { %v250_v15 = vsel %vm927_vm6, %v245_v19, %v249_v6  ;;  %v481_v22 = vsel %vm935_vm7, %v672_v18, %v480_v21  ;;  %v704_v52 = vpack.c.bf16 %v975_v35, %v972_v34 }
  0x4c   :  { %v649_v30 = vcombine.low %v236_v24, %v250_v15  ;;  %755 = vmatprep.mubr.msk.bf16.mxu0 %vm280_vm1, %v676_v25  ;;  %v485_v31 = vsel %vm935_vm7, %v673_v23, %v484_v26 }
  0x4d   :  { %v677_v32 = vcombine.low %v481_v22, %v485_v31 }
  0x4e   :  { %732 = vmatmul.mubr.msk.bf16.gmra.mrb[4].mxu1 %vm280_vm1, %v649_v30 }
  0x4f   :  { %756 = vmatmul.mubr.msk.bf16.gmra.mrb[4].mxu0 %vm280_vm1, %v677_v32  ;;  %743 = vmatprep.mubr.msk.bf16.mxu1 %vm280_vm1, %v703_v27 }
  0x5a   :  { %744 = vmatmul.mubr.msk.bf16.vlgmr.msra.gmra.mrb[4].mxu1 %vm280_vm1, %v704_v52 }
 0x10f   :  { %v729_v33 = vpop.f32.mrb[0].mxu1 }
 0x110   :  { %v327_v28 = vpop.f32.mrb[1].mxu1 }
 0x111   :  { %v730_v29 = vpop.f32.mrb[2].mxu1 }
 0x112   :  { %v330_v36 = vpop.f32.mrb[3].mxu1  ;;  %v753_v37 = vpop.f32.mrb[0].mxu0 }
 0x113   :  { %v763_v38 = vadd.f32 %v753_v37, %v729_v33  ;;  %v561_v39 = vpop.f32.mrb[1].mxu0 }
 0x114   :  { %v764_v0 = vadd.f32 %v561_v39, %v327_v28  ;;  %v754_v40 = vpop.f32.mrb[2].mxu0 }
 0x115   :  { %v609_v41 = vadd.f32 %v763_v38, %v684_v59  ;;  %v765_v42 = vadd.f32 %v754_v40, %v730_v29  ;;  %v564_v43 = vpop.f32.mrb[3].mxu0 }
 0x116   :  { %v607_v34 = vadd.f32 %v764_v0, %v684_v59  ;;  %v766_v35 = vadd.f32 %v564_v43, %v330_v36 }
 0x117   :  { %618 = vst.msk [vmem:[%s1048_s3 + $0x10] sm:$0xff] %vm615_vm8, %v609_v41  ;;  %v610_v44 = vadd.f32 %v765_v42, %v684_v59 }
 0x118   :  { %616 = vst.msk [vmem:[%s1048_s3] sm:$0xff] %vm615_vm8, %v607_v34  ;;  %v608_v45 = vadd.f32 %v766_v35, %v684_v59 }
 0x119   :  { %619 = vst.msk [vmem:[%s1048_s3 + $0x18] sm:$0xff] %vm615_vm8, %v610_v44 }
 0x11a   :  { %617 = vst.msk [vmem:[%s1048_s3 + $0x8] sm:$0xff] %vm615_vm8, %v608_v45 }
 0x122   :  { %v757_v46 = vpop.f32.mrb[4].mxu0 }
 0x123   :  { %v577_v47 = vpop.f32.mrb[5].mxu0 }
 0x124   :  { %v758_v48 = vpop.f32.mrb[6].mxu0 }
 0x125   :  { %v580_v49 = vpop.f32.mrb[7].mxu0 }
 0x12d   :  { %v745_v50 = vpop.f32.mrb[4].mxu1 }
 0x12e   :  { %v767_v51 = vadd.f32 %v757_v46, %v745_v50  ;;  %v436_v53 = vpop.f32.mrb[5].mxu1 }
 0x12f   :  { %v768_v54 = vadd.f32 %v577_v47, %v436_v53  ;;  %v746_v55 = vpop.f32.mrb[6].mxu1 }
 0x130   :  { %v613_v56 = vadd.f32 %v767_v51, %v684_v59  ;;  %v769_v57 = vadd.f32 %v758_v48, %v746_v55  ;;  %v439_v58 = vpop.f32.mrb[7].mxu1 }
 0x131   :  { %v611_v60 = vadd.f32 %v768_v54, %v684_v59  ;;  %v770_v61 = vadd.f32 %v580_v49, %v439_v58 }
 0x132   :  { %622 = vst.msk [vmem:[%s1048_s3 + $0x30] sm:$0xff] %vm615_vm8, %v613_v56  ;;  %v614_v62 = vadd.f32 %v769_v57, %v684_v59 }
 0x133   :  { %620 = vst.msk [vmem:[%s1048_s3 + $0x20] sm:$0xff] %vm615_vm8, %v611_v60  ;;  %v612_v63 = vadd.f32 %v770_v61, %v684_v59 }
 0x134   :  { %623 = vst.msk [vmem:[%s1048_s3 + $0x38] sm:$0xff] %vm615_vm8, %v614_v62 }
 0x135   :  { %621 = vst.msk [vmem:[%s1048_s3 + $0x28] sm:$0xff] %vm615_vm8, %v612_v63 }
 0x136   :  { %628 = vsyncpa [#allocation3], 1 }
 0x137   :  { %629 = vsyncpa [#allocation5], 1 }

// kernel: _lambda_.6
= control target key start
LH: loop header
LB: loop body
LE: loop exit
PB: predicated region body
PF: predicated region fallthrough
CT: control target
= control target key end

     0   :  { %s6622_s0 = inlined_call_operand.hbm [shape: f32[2,4,8,32], index: 0, kind: input, shape index: {}]   ;;  %s6623_s1 = inlined_call_operand.hbm [shape: f32[2,2,8,32], index: 1, kind: input, shape index: {}, may-alias: {1,2}]   ;;  %s6624_s2 = inlined_call_operand.hbm [shape: f32[2,2,8,32], index: 2, kind: input, shape index: {}, may-alias: {1,2}]   ;;  %s6625_s3 = inlined_call_operand.hbm [shape: bf16[5,32,32], index: 3, kind: input, shape index: {}]   ;;  %s6626_s4 = inlined_call_operand.hbm [shape: f32[1,32], index: 4, kind: input, shape index: {}]   ;;  %s6627_s5 = inlined_call_operand.hbm [shape: f32[1,32], index: 5, kind: input, shape index: {}, may-alias: {5,16}]   ;;  %s6628_s6 = inlined_call_operand.hbm [shape: f32[1,32], index: 6, kind: input, shape index: {}, may-alias: {6,17}]   ;;  %s6629_s7 = inlined_call_operand.hbm [shape: bf16[32,128], index: 7, kind: input, shape index: {}]   ;;  %s6630_s8 = inlined_call_operand.hbm [shape: bf16[32,128], index: 8, kind: input, shape index: {}]   ;;  %s6631_s9 = inlined_call_operand.hbm [shape: f32[1,128], index: 9, kind: input, shape index: {}]   ;;  %s6632_s10 = inlined_call_operand.hbm [shape: bf16[32,128], index: 10, kind: input, shape index: {}]   ;;  %s6633_s11 = inlined_call_operand.hbm [shape: bf16[32,128], index: 11, kind: input, shape index: {}]   ;;  %s6634_s12 = inlined_call_operand.hbm [shape: f32[1,128], index: 12, kind: input, shape index: {}]   ;;  %s6635_s13 = inlined_call_operand.hbm [shape: bf16[32,32], index: 13, kind: input, shape index: {}]   ;;  %s6636_s14 = inlined_call_operand.hbm [shape: bf16[32,32], index: 14, kind: input, shape index: {}]   ;;  %s6637_s15 = inlined_call_operand.hbm [shape: f32[1,32], index: 15, kind: input, shape index: {}]   ;;  %s6638_s16 = inlined_call_operand.hbm [shape: f32[1,32], index: 16, kind: input, shape index: {}, may-alias: {5,16}]   ;;  %s6639_s17 = inlined_call_operand.hbm [shape: f32[1,32], index: 17, kind: input, shape index: {}, may-alias: {6,17}]   ;;  %s6640_s18 = inlined_call_operand.hbm [shape: bf16[3,16,16], index: 18, kind: input, shape index: {}]   ;;  %s6641_s19 = inlined_call_operand.hbm [shape: bf16[3,16,16], index: 19, kind: input, shape index: {}]   ;;  %s6642_s20 = inlined_call_operand.hbm [shape: f32[1,32], index: 20, kind: input, shape index: {}]   ;;  %s6643_s21 = inlined_call_operand.hbm [shape: f32[2,4,8,32], index: 21, kind: output, shape index: {0}]   ;;  %s6644_s22 = inlined_call_operand.hbm [shape: f32[2,2,8,32], index: 22, kind: output, shape index: {1}]   ;;  %s6645_s23 = inlined_call_operand.hbm [shape: f32[2,2,8,32], index: 23, kind: output, shape index: {2}]  }
   0x1   :  { %6703 = sst [smem:[#allocation63_spill]] %s6622_s0 }
   0x2   :  { %6704 = sst [smem:[#allocation64_spill]] %s6623_s1 }
   0x3   :  { %6705 = sst [smem:[#allocation65_spill]] %s6624_s2 }
   0x4   :  { %6706 = sst [smem:[#allocation66_spill]] %s6625_s3 }
   0x5   :  { %6707 = sst [smem:[#allocation67_spill]] %s6626_s4 }
   0x6   :  { %6708 = sst [smem:[#allocation68_spill]] %s6627_s5 }
   0x7   :  { %6709 = sst [smem:[#allocation69_spill]] %s6628_s6 }
   0x8   :  { %6710 = sst [smem:[#allocation70_spill]] %s6629_s7 }
   0x9   :  { %6711 = sst [smem:[#allocation71_spill]] %s6630_s8 }
   0xa   :  { %6712 = sst [smem:[#allocation72_spill]] %s6631_s9 }
   0xb   :  { %6713 = sst [smem:[#allocation73_spill]] %s6632_s10 }
   0xc   :  { %6714 = sst [smem:[#allocation74_spill]] %s6633_s11 }
   0xd   :  { %6715 = sst [smem:[#allocation75_spill]] %s6634_s12 }
   0xe   :  { %6716 = sst [smem:[#allocation76_spill]] %s6635_s13 }
   0xf   :  { %6717 = sst [smem:[#allocation77_spill]] %s6636_s14 }
  0x10   :  { %6718 = sst [smem:[#allocation78_spill]] %s6637_s15 }
  0x11   :  { %6719 = sst [smem:[#allocation79_spill]] %s6638_s16 }
  0x12   :  { %6720 = sst [smem:[#allocation80_spill]] %s6639_s17 }
  0x13   :  { %6721 = sst [smem:[#allocation81_spill]] %s6640_s18 }
  0x14   :  { %6722 = sst [smem:[#allocation82_spill]] %s6641_s19 }
  0x15   :  { %6723 = sst [smem:[#allocation83_spill]] %s6642_s20 }
  0x16   :  { %6724 = sst [smem:[#allocation84_spill]] %s6643_s21 }
  0x17   :  { %6725 = sst [smem:[#allocation85_spill]] %s6644_s22 }
  0x18   :  { %6726 = sst [smem:[#allocation86_spill]] %s6645_s23 }
  0x19   :  { %29 = vsyncpa [#allocation5], 0 }
  0x1a   :  { %31 = vsyncpa [#allocation5 + $0x1], 0 }
  0x1b   :  { %32 = vsyncpa [#allocation8], 0 }
  0x1c   :  { %34 = vsyncpa [#allocation8 + $0x1], 0 }
  0x1d   :  { %35 = vsyncpa [#allocation11], 0 }
  0x1e   :  { %36 = vsyncpa [#allocation14], 0 }
  0x1f   :  { %37 = vsyncpa [#allocation17], 0 }
  0x20   :  { %38 = vsyncpa [#allocation20], 0 }
  0x21   :  { %39 = vsyncpa [#allocation23], 0 }
  0x22   :  { %40 = vsyncpa [#allocation26], 0 }
  0x23   :  { %41 = vsyncpa [#allocation29], 0 }
  0x24   :  { %42 = vsyncpa [#allocation32], 0 }
  0x25   :  { %43 = vsyncpa [#allocation35], 0 }
  0x26   :  { %44 = vsyncpa [#allocation6], 0 }
  0x27   :  { %46 = vsyncpa [#allocation6 + $0x1], 0 }
  0x28   :  { %47 = vsyncpa [#allocation39], 0 }
  0x29   :  { %49 = vsyncpa [#allocation39 + $0x1], 0  ;;  %s5460_s4 = smov 0   ;;  %s5462_s30 = smov 0  }
  0x2a   :  { %s5464_s24 = smov 0   ;;  %s5466_s25 = smov 0  }
  0x2b LB: > { %6727 = sst [smem:[#allocation54_spill]] %s5286_s4  ;;  %s5300_s5 = smov [#allocation10]   ;;  %s5298_s25 = sphi %s5466_s25, %s6817_s25   ;;  %s5294_s24 = sphi %s5464_s24, %s6819_s24   ;;  %s5290_s30 = sphi %s5462_s30, %s6821_s30   ;;  %s5286_s4 = sphi %s5460_s4, %s6820_s4  }
  0x2c   : > { %6728 = sst [smem:[#allocation55_spill]] %s5294_s24  ;;  %s606_s1 = sshll.u32 %s5300_s5, 4  ;;  %s5486_s1 = int_to_ptr.vmem [resolvable:$true] %s606_s1 }
  0x2d   : > { %s5481_s26 = sadd.s32 4294967295, %s5298_s25   ;;  %p3654_p0 = scmp.ge.s32.totalorder %s5298_s25, 1 }
  0x2e   : > { %6729 = sst [smem:[#allocation56_spill]] %s5481_s26  ;;  %p6665_p1 = scmp.eq.s32.totalorder %s5481_s26, 0 }
  0x2f   : > { %p594_p2 = scmp.lt.s32.totalorder %s5298_s25, 3  ;;  %s5301_s6 = smov [#allocation13]  }
  0x30   : > { %s631_s27 = sshll.u32 %s5301_s6, 4  ;;  %s5302_s28 = smov [#allocation16]   ;;  %s5501_s27 = int_to_ptr.vmem [resolvable:$true] %s631_s27 }
  0x31   : > { %p5488_p3 = pnand %p3654_p0, %p594_p2  ;;  %s652_s29 = sshll.u32 %s5302_s28, 4  ;;  %s5503_s29 = int_to_ptr.vmem [resolvable:$true] %s652_s29 }
  0x32   : > { %s6733_s5 = sld [smem:[#allocation66_spill]] }
  0x33   : > { %s6730_s2 = scalar_select %p5488_p3, 1, 0 }
  0x34   : > { %p4219_p5 = pneg %p5488_p3 }
  0x35   : > { %6731 = sst [smem:[#allocation57_spill]] %s6730_s2 }
  0x36   : > { %p5497_p6 = pnand %p4219_p5, %p6665_p1 }
  0x38   : > { %s6732_s7 = scalar_select %p5497_p6, 1, 0 }
  0x39   : > { %s4538_s21 = scalar_lea.hbm %s6733_s5, 1280  ;;  %p5513_p8 = pneg %p5497_p6 }
  0x3a   : > { %p4539_p7 = scmp.ne.s32.totalorder %s6733_s5, %s4538_s21  ;;  %p4545_p11 = scmp.lt.u32.totalorder %s4538_s21, %s6733_s5 }
  0x3b   : > { %s6734_s6 = scalar_select %p5513_p8, 1, 0 }
  0x3c   : > { %p4541_p9 = pnand %p5513_p8, %p4539_p7 }
  0x3e   : > { %p4542_p10 = pneg %p4541_p9 }
  0x40   : > { %p4547_p12 = pnand %p4545_p11, %p4542_p10 }
  0x42   : > { %4550 = shalt.err (!%p4547_p12)
}
  0x43   : > { %s4551_s22 = scalar_lea.vmem %s5486_s1, 1280  ;;  %p4559_p5 = scmp.lt.s32.totalorder %s5486_s1, %s5486_s1 }
  0x44   : > { %p4552_p13 = scmp.ne.s32.totalorder %s5486_s1, %s4551_s22  ;;  %p4560_p4 = scmp.lt.s32.totalorder %s4551_s22, %s4551_s22 }
  0x46   : > { %p4554_p0 = pnand %p4552_p13, %p5513_p8  ;;  %p4561_p7 = por %p4560_p4, %p4559_p5 }
  0x48   : > { %p4555_p2 = pneg %p4554_p0 }
  0x4a   : > { %p4562_p9 = pnand %p4561_p7, %p4555_p2 }
  0x4c   : > { %4565 = shalt.err (!%p4562_p9)
}
  0x4d   : > { %s6668_s23 = smov 64   ;;  %s6670_s21 = smov 4  }
  0x4e   : > { %4222 = dma.hbm_to_vmem [thread:$0]  (!%p5497_p6), %s6733_s5, 1280, %s5486_s1, [#allocation11], %s6668_s23, %s6668_s23, %s6670_s21  }
  0x4f   : > { %s6735_s20 = sld [smem:[#allocation68_spill]] }
  0x55   : > { %s4566_s22 = scalar_lea.hbm %s6735_s20, 16 }
  0x56   : > { %p4567_p4 = scmp.ne.s32.totalorder %s6735_s20, %s4566_s22  ;;  %p4573_p12 = scmp.lt.u32.totalorder %s4566_s22, %s6735_s20 }
  0x58   : > { %p4569_p10 = pnand %p4567_p4, %p5513_p8 }
  0x5a   : > { %p4570_p11 = pneg %p4569_p10 }
  0x5c   : > { %p4575_p13 = pnand %p4573_p12, %p4570_p11 }
  0x5e   : > { %4578 = shalt.err (!%p4575_p13)
}
  0x5f   : > { %s4579_s1 = scalar_lea.vmem %s5501_s27, 16  ;;  %s4586_s16 = scalar_lea.vmem %s5501_s27, 32 }
  0x60   : > { %p4580_p0 = scmp.ne.s32.totalorder %s5501_s27, %s4579_s1  ;;  %p4587_p7 = scmp.lt.s32.totalorder %s5501_s27, %s5501_s27 }
  0x61   : > { %p4588_p9 = scmp.lt.s32.totalorder %s4586_s16, %s4579_s1 }
  0x62   : > { %p4582_p2 = pnand %p4580_p0, %p5513_p8 }
  0x63   : > { %p4589_p4 = por %p4588_p9, %p4587_p7 }
  0x64   : > { %p4583_p5 = pneg %p4582_p2 }
  0x66   : > { %p4590_p10 = pnand %p4589_p4, %p4583_p5 }
  0x68   : > { %4593 = shalt.err (!%p4590_p10)
}
  0x69   : > { %4228 = dma.hbm_to_vmem [thread:$0]  (!%p5497_p6), %s6735_s20, 16, %s5501_s27, [#allocation14]  }
  0x6a   : > { %s6736_s3 = sld [smem:[#allocation70_spill]] }
  0x70   : > { %s4594_s0 = scalar_lea.hbm %s6736_s3, 256 }
  0x71   : > { %p4595_p11 = scmp.ne.s32.totalorder %s6736_s3, %s4594_s0  ;;  %p4601_p0 = scmp.lt.u32.totalorder %s4594_s0, %s6736_s3 }
  0x73   : > { %p4597_p12 = pnand %p4595_p11, %p5513_p8 }
  0x75   : > { %p4598_p13 = pneg %p4597_p12 }
  0x77   : > { %p4603_p2 = pnand %p4601_p0, %p4598_p13 }
  0x79   : > { %4606 = shalt.err (!%p4603_p2)
}
  0x7a   : > { %s4607_s27 = scalar_lea.vmem %s5503_s29, 256  ;;  %p4615_p4 = scmp.lt.s32.totalorder %s5503_s29, %s5503_s29 }
  0x7b   : > { %p4608_p5 = scmp.ne.s32.totalorder %s5503_s29, %s4607_s27  ;;  %p4616_p10 = scmp.lt.s32.totalorder %s4607_s27, %s4607_s27 }
  0x7d   : > { %p4610_p7 = pnand %p4608_p5, %p5513_p8  ;;  %p4617_p11 = por %p4616_p10, %p4615_p4 }
  0x7f   : > { %p4611_p9 = pneg %p4610_p7 }
  0x81   : > { %p4618_p12 = pnand %p4617_p11, %p4611_p9 }
  0x83   : > { %4621 = shalt.err (!%p4618_p12)
}
  0x84   : > { %4234 = dma.hbm_to_vmem [thread:$0]  (!%p5497_p6), %s6736_s3, 256, %s5503_s29, [#allocation17], %s6668_s23, %s6668_s23, %s6670_s21  }
  0x85   : > { %s5305_s18 = smov [#allocation19]   ;;  %s5306_s0 = smov [#allocation22]  }
  0x86   : > { %s679_s2 = sshll.u32 %s5305_s18, 4  ;;  %s702_s28 = sshll.u32 %s5306_s0, 4  ;;  %s680_s2 = int_to_ptr.vmem [resolvable:$true] %s679_s2  ;;  %s703_s28 = int_to_ptr.vmem [resolvable:$true] %s702_s28 }
  0x87   : > { %s6737_s9 = sld [smem:[#allocation72_spill]] }
  0x8d   : > { %s4622_s16 = scalar_lea.hbm %s6737_s9, 16 }
  0x8e   : > { %p4623_p13 = scmp.ne.s32.totalorder %s6737_s9, %s4622_s16  ;;  %p4629_p5 = scmp.lt.u32.totalorder %s4622_s16, %s6737_s9 }
  0x90   : > { %p4625_p0 = pnand %p4623_p13, %p5513_p8 }
  0x92   : > { %p4626_p2 = pneg %p4625_p0 }
  0x94   : > { %p4631_p7 = pnand %p4629_p5, %p4626_p2 }
  0x96   : > { %4634 = shalt.err (!%p4631_p7)
}
  0x97   : > { %s4635_s29 = scalar_lea.vmem %s680_s2, 16  ;;  %s4642_s14 = scalar_lea.vmem %s680_s2, 32 }
  0x98   : > { %p4636_p9 = scmp.ne.s32.totalorder %s680_s2, %s4635_s29  ;;  %p4643_p11 = scmp.lt.s32.totalorder %s680_s2, %s680_s2 }
  0x99   : > { %p4644_p12 = scmp.lt.s32.totalorder %s4642_s14, %s4635_s29 }
  0x9a   : > { %p4638_p4 = pnand %p4636_p9, %p5513_p8 }
  0x9b   : > { %p4645_p1 = por %p4644_p12, %p4643_p11 }
  0x9c   : > { %p4639_p10 = pneg %p4638_p4 }
  0x9e   : > { %p4646_p3 = pnand %p4645_p1, %p4639_p10 }
  0xa0   : > { %4649 = shalt.err (!%p4646_p3)
}
  0xa1   : > { %4240 = dma.hbm_to_vmem [thread:$0]  (!%p5497_p6), %s6737_s9, 16, %s680_s2, [#allocation20]  }
  0xa2   : > { %s6738_s11 = sld [smem:[#allocation74_spill]] }
  0xa8   : > { %s4650_s22 = scalar_lea.hbm %s6738_s11, 256 }
  0xa9   : > { %p4651_p13 = scmp.ne.s32.totalorder %s6738_s11, %s4650_s22  ;;  %p4657_p3 = scmp.lt.u32.totalorder %s4650_s22, %s6738_s11 }
  0xab   : > { %p4653_p0 = pnand %p4651_p13, %p5513_p8 }
  0xad   : > { %p4654_p1 = pneg %p4653_p0 }
  0xaf   : > { %p4659_p2 = pnand %p4657_p3, %p4654_p1 }
  0xb1   : > { %4662 = shalt.err (!%p4659_p2)
}
  0xb2   : > { %s4663_s29 = scalar_lea.vmem %s703_s28, 256  ;;  %p4671_p4 = scmp.lt.s32.totalorder %s703_s28, %s703_s28 }
  0xb3   : > { %p4664_p5 = scmp.ne.s32.totalorder %s703_s28, %s4663_s29  ;;  %p4672_p10 = scmp.lt.s32.totalorder %s4663_s29, %s4663_s29 }
  0xb5   : > { %p4666_p7 = pnand %p4664_p5, %p5513_p8  ;;  %p4673_p11 = por %p4672_p10, %p4671_p4 }
  0xb7   : > { %p4667_p9 = pneg %p4666_p7 }
  0xb9   : > { %p4674_p12 = pnand %p4673_p11, %p4667_p9 }
  0xbb   : > { %4677 = shalt.err (!%p4674_p12)
}
  0xbc   : > { %4246 = dma.hbm_to_vmem [thread:$0]  (!%p5497_p6), %s6738_s11, 256, %s703_s28, [#allocation23], %s6668_s23, %s6668_s23, %s6670_s21  }
  0xbd   : > { %s5307_s5 = smov [#allocation25]   ;;  %s5308_s20 = smov [#allocation28]  }
  0xbe   : > { %s726_s18 = sshll.u32 %s5307_s5, 4  ;;  %s753_s0 = sshll.u32 %s5308_s20, 4  ;;  %s727_s18 = int_to_ptr.vmem [resolvable:$true] %s726_s18  ;;  %s754_s0 = int_to_ptr.vmem [resolvable:$true] %s753_s0 }
  0xbf   : > { %s6739_s13 = sld [smem:[#allocation76_spill]] }
  0xc5   : > { %s4678_s16 = scalar_lea.hbm %s6739_s13, 256 }
  0xc6   : > { %p4679_p13 = scmp.ne.s32.totalorder %s6739_s13, %s4678_s16  ;;  %p4685_p3 = scmp.lt.u32.totalorder %s4678_s16, %s6739_s13 }
  0xc8   : > { %p4681_p0 = pnand %p4679_p13, %p5513_p8 }
  0xca   : > { %p4682_p1 = pneg %p4681_p0 }
  0xcc   : > { %p4687_p2 = pnand %p4685_p3, %p4682_p1 }
  0xce   : > { %4690 = shalt.err (!%p4687_p2)
}
  0xcf   : > { %s4691_s28 = scalar_lea.vmem %s727_s18, 256  ;;  %p4699_p4 = scmp.lt.s32.totalorder %s727_s18, %s727_s18 }
  0xd0   : > { %p4692_p5 = scmp.ne.s32.totalorder %s727_s18, %s4691_s28  ;;  %p4700_p10 = scmp.lt.s32.totalorder %s4691_s28, %s4691_s28 }
  0xd2   : > { %p4694_p7 = pnand %p4692_p5, %p5513_p8  ;;  %p4701_p11 = por %p4700_p10, %p4699_p4 }
  0xd4   : > { %p4695_p9 = pneg %p4694_p7 }
  0xd6   : > { %p4702_p12 = pnand %p4701_p11, %p4695_p9 }
  0xd8   : > { %4705 = shalt.err (!%p4702_p12)
}
  0xd9   : > { %4252 = dma.hbm_to_vmem [thread:$0]  (!%p5497_p6), %s6739_s13, 256, %s727_s18, [#allocation26], %s6668_s23, %s6668_s23, %s6670_s21  }
  0xda   : > { %s6740_s15 = sld [smem:[#allocation78_spill]] }
  0xe0   : > { %s4706_s1 = scalar_lea.hbm %s6740_s15, 16 }
  0xe1   : > { %p4707_p13 = scmp.ne.s32.totalorder %s6740_s15, %s4706_s1  ;;  %p4713_p3 = scmp.lt.u32.totalorder %s4706_s1, %s6740_s15 }
  0xe3   : > { %p4709_p0 = pnand %p4707_p13, %p5513_p8 }
  0xe5   : > { %p4710_p1 = pneg %p4709_p0 }
  0xe7   : > { %p4715_p2 = pnand %p4713_p3, %p4710_p1 }
  0xe9   : > { %4718 = shalt.err (!%p4715_p2)
}
  0xea   : > { %s4719_s2 = scalar_lea.vmem %s754_s0, 16  ;;  %s4726_s18 = scalar_lea.vmem %s754_s0, 32 }
  0xeb   : > { %p4720_p5 = scmp.ne.s32.totalorder %s754_s0, %s4719_s2  ;;  %p4727_p4 = scmp.lt.s32.totalorder %s754_s0, %s754_s0 }
  0xec   : > { %p4728_p10 = scmp.lt.s32.totalorder %s4726_s18, %s4719_s2 }
  0xed   : > { %p4722_p7 = pnand %p4720_p5, %p5513_p8 }
  0xee   : > { %p4729_p11 = por %p4728_p10, %p4727_p4 }
  0xef   : > { %p4723_p9 = pneg %p4722_p7 }
  0xf1   : > { %p4730_p12 = pnand %p4729_p11, %p4723_p9 }
  0xf3   : > { %4733 = shalt.err (!%p4730_p12)
}
  0xf4   : > { %4258 = dma.hbm_to_vmem [thread:$0]  (!%p5497_p6), %s6740_s15, 16, %s754_s0, [#allocation29]  }
  0xf5   : > { %s5309_s5 = smov [#allocation31]   ;;  %s5310_s22 = smov [#allocation34]  }
  0xf6   : > { %s775_s20 = sshll.u32 %s5309_s5, 4  ;;  %s798_s1 = sshll.u32 %s5310_s22, 4  ;;  %s776_s20 = int_to_ptr.vmem [resolvable:$true] %s775_s20  ;;  %s799_s1 = int_to_ptr.vmem [resolvable:$true] %s798_s1 }
  0xf7   : > { %s6741_s17 = sld [smem:[#allocation80_spill]] }
  0xfd   : > { %s4734_s12 = scalar_lea.hbm %s6741_s17, 16 }
  0xfe   : > { %p4735_p13 = scmp.ne.s32.totalorder %s6741_s17, %s4734_s12  ;;  %p4741_p3 = scmp.lt.u32.totalorder %s4734_s12, %s6741_s17 }
 0x100   : > { %p4737_p0 = pnand %p4735_p13, %p5513_p8 }
 0x102   : > { %p4738_p1 = pneg %p4737_p0 }
 0x104   : > { %p4743_p2 = pnand %p4741_p3, %p4738_p1 }
 0x106   : > { %4746 = shalt.err (!%p4743_p2)
}
 0x107   : > { %s4747_s0 = scalar_lea.vmem %s776_s20, 16  ;;  %s4754_s14 = scalar_lea.vmem %s776_s20, 32 }
 0x108   : > { %p4748_p5 = scmp.ne.s32.totalorder %s776_s20, %s4747_s0  ;;  %p4755_p4 = scmp.lt.s32.totalorder %s776_s20, %s776_s20 }
 0x109   : > { %p4756_p10 = scmp.lt.s32.totalorder %s4754_s14, %s4747_s0 }
 0x10a   : > { %p4750_p7 = pnand %p4748_p5, %p5513_p8 }
 0x10b   : > { %p4757_p11 = por %p4756_p10, %p4755_p4 }
 0x10c   : > { %p4751_p9 = pneg %p4750_p7 }
 0x10e   : > { %p4758_p12 = pnand %p4757_p11, %p4751_p9 }
 0x110   : > { %4761 = shalt.err (!%p4758_p12)
}
 0x111   : > { %4264 = dma.hbm_to_vmem [thread:$0]  (!%p5497_p6), %s6741_s17, 16, %s776_s20, [#allocation32]  }
 0x112   : > { %s6742_s19 = sld [smem:[#allocation82_spill]] }
 0x118   : > { %s4762_s12 = scalar_lea.hbm %s6742_s19, 384 }
 0x119   : > { %p4763_p13 = scmp.ne.s32.totalorder %s6742_s19, %s4762_s12  ;;  %p4769_p3 = scmp.lt.u32.totalorder %s4762_s12, %s6742_s19 }
 0x11b   : > { %p4765_p0 = pnand %p4763_p13, %p5513_p8 }
 0x11d   : > { %p4766_p1 = pneg %p4765_p0 }
 0x11f   : > { %p4771_p2 = pnand %p4769_p3, %p4766_p1 }
 0x121   : > { %4774 = shalt.err (!%p4771_p2)
}
 0x122   : > { %s4775_s0 = scalar_lea.vmem %s799_s1, 384  ;;  %p4783_p4 = scmp.lt.s32.totalorder %s799_s1, %s799_s1 }
 0x123   : > { %p4776_p5 = scmp.ne.s32.totalorder %s799_s1, %s4775_s0  ;;  %p4784_p10 = scmp.lt.s32.totalorder %s4775_s0, %s4775_s0 }
 0x125   : > { %p4778_p7 = pnand %p4776_p5, %p5513_p8  ;;  %p4785_p11 = por %p4784_p10, %p4783_p4 }
 0x127   : > { %p4779_p9 = pneg %p4778_p7 }
 0x129   : > { %p4786_p12 = pnand %p4785_p11, %p4779_p9 }
 0x12b   : > { %4789 = shalt.err (!%p4786_p12)
}
 0x12c   : > { %4270 = dma.hbm_to_vmem [thread:$0]  (!%p5497_p6), %s6742_s19, 384, %s799_s1, [#allocation35], %s6668_s23, %s6668_s23, %s6670_s21  }
 0x12d   : > { %s6667_s5 = sadd.s32 4294967294, %s5298_s25   ;;  %s5706_s22 = sadd.s32 1, %s5298_s25  }
 0x12e   : > { %6743 = sst [smem:[#allocation58_spill]] %s5706_s22  ;;  %s62_s16 = sadd.s32 1, %s5294_s24 }
 0x12f   : > { %s59_s27 = ssub.s32 %s5298_s25, %s5706_s22  ;;  %p69_p13 = scmp.ne.s32.totalorder %s5294_s24, %s5290_s30 }
 0x130   : > { %p60_p0 = scmp.eq.s32.totalorder %s59_s27, 0  ;;  %p70_p1 = scmp.eq.s32.totalorder %s5298_s25, 0 }
 0x131   : > { %p75_p3 = scmp.ne.s32.totalorder %s5290_s30, %s5286_s4  ;;  %p529_p2 = scmp.eq.s32.totalorder %s5481_s26, 1 }
 0x132   : > { %s5718_s12 = scalar_select %p60_p0, %s5294_s24, %s62_s16  }
 0x133   : > { %p71_p5 = por %p70_p1, %p69_p13  ;;  %p6745_p7 = scmp.eq.s32.totalorder %s5481_s26, 0 }
 0x134   : > { %6744 = sst [smem:[#allocation59_spill]] %s5718_s12  ;;  %p5726_p4 = por %p529_p2, %p69_p13 }
 0x135   : > { %p5722_p9 = por %p6745_p7, %p75_p3  ;;  %p535_p10 = scmp.eq.s32.totalorder %s6667_s5, 1 }
 0x136   : > { %s6748_s29 = scalar_select %p5726_p4, 1, 0 }
 0x137   : > { %s6746_s1 = scalar_select %p5722_p9, 1, 0 }
 0x138   : > { %6749 = sst [smem:[#allocation61_spill]] %s6748_s29  ;;  %p4312_p11 = scmp.lt.s32.totalorder %s5298_s25, 2 }
 0x139   : > { %6747 = sst [smem:[#allocation60_spill]] %s6746_s1  ;;  %s5734_s2 = sand.u32 1, %s5294_s24  }
 0x13a   : > { %p5736_p12 = por %p535_p10, %p75_p3  ;;  %p5740_p0 = pnand %p4312_p11, %p71_p5 }
 0x13b   : > { %s844_s0 = sand.u32 1, %s5298_s25   ;;  %s6673_s20 = sshll.u32 %s5734_s2, 4 }
 0x13c   : > { %s6750_s18 = scalar_select %p5736_p12, 1, 0 }
 0x13d   : > { %s6752_s28 = scalar_select %p5740_p0, 1, 0 }
 0x13e   : > { %6751 = sst [smem:[#allocation62_spill]] %s6750_s18  ;;  %s6674_s14 = sshll.u32 %s5298_s25, 7 }
 0x13f   : > { %s6753_s5 = sld [smem:[#allocation64_spill]]  ;;  %s848_s21 = scalar_lea.vmem [#allocation7], %s6673_s20 }
 0x140   : > { %s854_s3 = sshll.u32 %s848_s21, 4  ;;  %s5758_s9 = scalar_lea.sflag [#allocation8], %s844_s0  ;;  %s5756_s3 = int_to_ptr.vmem [resolvable:$true] %s854_s3 }
 0x141   : > { %p5764_p1 = pneg %p5740_p0 }
 0x143   : > { %s6754_s13 = scalar_select %p5764_p1, 1, 0 }
 0x145   : > { %s5752_s23 = scalar_lea.hbm %s6753_s5, %s6674_s14  ;;  %s4795_s20 = scalar_lea.hbm %s6753_s5, 512 }
 0x146   : > { %s4790_s11 = scalar_lea.hbm %s5752_s23, 256  ;;  %p4796_p5 = scmp.lt.u32.totalorder %s5752_s23, %s6753_s5 }
 0x147   : > { %p4791_p13 = scmp.ne.s32.totalorder %s5752_s23, %s4790_s11  ;;  %p4797_p7 = scmp.lt.u32.totalorder %s4795_s20, %s4790_s11 }
 0x148   : > { %p4799_p11 = scmp.lt.u32.totalorder %s4790_s11, %s5752_s23 }
 0x149   : > { %p4793_p3 = pnand %p5764_p1, %p4791_p13  ;;  %p4798_p10 = por %p4797_p7, %p4796_p5 }
 0x14b   : > { %p4794_p2 = pneg %p4793_p3  ;;  %p4800_p12 = por %p4799_p11, %p4798_p10 }
 0x14d   : > { %p4801_p4 = pnand %p4800_p12, %p4794_p2 }
 0x14f   : > { %4804 = shalt.err (!%p4801_p4)
}
 0x150   : > { %s4805_s0 = scalar_lea.vmem %s5756_s3, 256  ;;  %s5311_s16 = smov [#allocation7]  }
 0x151   : > { %p4806_p13 = scmp.ne.s32.totalorder %s5756_s3, %s4805_s0  ;;  %s4810_s27 = sshll.u32 %s5311_s16, 4  ;;  %s4811_s27 = int_to_ptr.vmem [resolvable:$false] %s4810_s27 }
 0x152   : > { %s4812_s14 = scalar_lea.vmem %s4811_s27, 512  ;;  %p4813_p6 = scmp.lt.s32.totalorder %s5756_s3, %s4811_s27 }
 0x153   : > { %p4808_p3 = pnand %p4806_p13, %p5764_p1  ;;  %p4814_p8 = scmp.lt.s32.totalorder %s4812_s14, %s4805_s0 }
 0x155   : > { %p4809_p9 = pneg %p4808_p3  ;;  %p4815_p5 = por %p4814_p8, %p4813_p6 }
 0x157   : > { %p4816_p7 = pnand %p4815_p5, %p4809_p9 }
 0x159   : > { %4819 = shalt.err (!%p4816_p7)
}
 0x15a   : > { %s6695_s11 = smov 256   ;;  %s6698_s20 = smov 128  }
 0x15b   : > { %s6700_s21 = smov 8   ;;  %s6755_s16 = sshll.u32 %s5298_s25, 7 }
 0x15c   : > { %4280 = dma.hbm_to_vmem [thread:$0]  (!%p5740_p0), %s5752_s23, 256, %s5756_s3, %s5758_s9, %s6695_s11, %s6698_s20, %s6700_s21  }
 0x15d   : > { %s6756_s14 = sld [smem:[#allocation65_spill]]  ;;  %s6757_s15 = sshll.u32 %s5734_s2, 4 }
 0x15e   : > { %s5800_s17 = scalar_lea.vmem [#allocation9], %s6757_s15  ;;  %s5315_s12 = smov [#allocation12]  }
 0x15f   : > { %s620_s24 = sshll.u32 %s5315_s12, 4  ;;  %s6758_s4 = sld [smem:[#allocation67_spill]]  ;;  %s621_s24 = int_to_ptr.vmem [resolvable:$true] %s620_s24 }
 0x160   : > { %p6760_p8 = scmp.ne.s32.totalorder %s6734_s6, 0 }
 0x163   : > { %s5796_s5 = scalar_lea.hbm %s6756_s14, %s6755_s16 }
 0x165   : > { %s6759_s29 = smov %s6758_s4  ;;  %s4820_s26 = scalar_lea.hbm %s6758_s4, 16 }
 0x166   : > { %p4821_p6 = scmp.ne.s32.totalorder %s6759_s29, %s4820_s26  ;;  %p4827_p12 = scmp.lt.u32.totalorder %s4820_s26, %s6759_s29 }
 0x168   : > { %p4823_p9 = pnand %p4821_p6, %p6760_p8 }
 0x16a   : > { %p4824_p4 = pneg %p4823_p9 }
 0x16c   : > { %p4829_p2 = pnand %p4827_p12, %p4824_p4 }
 0x16e   : > { %4832 = shalt.err (!%p4829_p2)
}
 0x16f   : > { %s4833_s15 = scalar_lea.vmem %s621_s24, 16  ;;  %s4840_s4 = scalar_lea.vmem %s621_s24, 32 }
 0x170   : > { %p4834_p10 = scmp.ne.s32.totalorder %s621_s24, %s4833_s15  ;;  %p4841_p3 = scmp.lt.s32.totalorder %s621_s24, %s621_s24 }
 0x171   : > { %p4842_p5 = scmp.lt.s32.totalorder %s4840_s4, %s4833_s15 }
 0x172   : > { %p4836_p11 = pnand %p4834_p10, %p6760_p8 }
 0x173   : > { %p4843_p7 = por %p4842_p5, %p4841_p3 }
 0x174   : > { %p4837_p13 = pneg %p4836_p11 }
 0x176   : > { %p4844_p0 = pnand %p4843_p7, %p4837_p13 }
 0x178   : > { %4847 = shalt.err (!%p4844_p0)
}
 0x179   : > { %p6761_p6 = scmp.ne.s32.totalorder %s6732_s7, 0  ;;  %s5316_s26 = smov [#allocation15]  }
 0x17a   : > { %s642_s1 = sshll.u32 %s5316_s26, 4  ;;  %s5317_s18 = smov [#allocation18]   ;;  %s643_s1 = int_to_ptr.vmem [resolvable:$true] %s642_s1 }
 0x17b   : > { %4225 = dma.hbm_to_vmem [thread:$0]  (!%p6761_p6), %s6759_s29, 16, %s621_s24, [#allocation11]  }
 0x17c   : > { %s665_s0 = sshll.u32 %s5317_s18, 4  ;;  %s6762_s3 = sld [smem:[#allocation69_spill]]  ;;  %s666_s0 = int_to_ptr.vmem [resolvable:$true] %s665_s0 }
 0x182   : > { %s4848_s16 = scalar_lea.hbm %s6762_s3, 16 }
 0x183   : > { %p4849_p0 = scmp.ne.s32.totalorder %s6762_s3, %s4848_s16  ;;  %p4855_p12 = scmp.lt.u32.totalorder %s4848_s16, %s6762_s3 }
 0x185   : > { %p4851_p9 = pnand %p4849_p0, %p6760_p8 }
 0x187   : > { %p4852_p4 = pneg %p4851_p9 }
 0x189   : > { %p4857_p2 = pnand %p4855_p12, %p4852_p4 }
 0x18b   : > { %4860 = shalt.err (!%p4857_p2)
}
 0x18c   : > { %s4861_s24 = scalar_lea.vmem %s643_s1, 16  ;;  %s4868_s12 = scalar_lea.vmem %s643_s1, 32 }
 0x18d   : > { %p4862_p10 = scmp.ne.s32.totalorder %s643_s1, %s4861_s24  ;;  %p4869_p3 = scmp.lt.s32.totalorder %s643_s1, %s643_s1 }
 0x18e   : > { %p4870_p5 = scmp.lt.s32.totalorder %s4868_s12, %s4861_s24 }
 0x18f   : > { %p4864_p11 = pnand %p4862_p10, %p6760_p8 }
 0x190   : > { %p4871_p7 = por %p4870_p5, %p4869_p3 }
 0x191   : > { %p4865_p13 = pneg %p4864_p11 }
 0x193   : > { %p4872_p1 = pnand %p4871_p7, %p4865_p13 }
 0x195   : > { %4875 = shalt.err (!%p4872_p1)
}
 0x196   : > { %4231 = dma.hbm_to_vmem [thread:$0]  (!%p6761_p6), %s6762_s3, 16, %s643_s1, [#allocation14]  }
 0x197   : > { %s6763_s8 = sld [smem:[#allocation71_spill]] }
 0x19d   : > { %s4876_s23 = scalar_lea.hbm %s6763_s8, 256 }
 0x19e   : > { %p4877_p0 = scmp.ne.s32.totalorder %s6763_s8, %s4876_s23  ;;  %p4883_p1 = scmp.lt.u32.totalorder %s4876_s23, %s6763_s8 }
 0x1a0   : > { %p4879_p9 = pnand %p4877_p0, %p6760_p8 }
 0x1a2   : > { %p4880_p4 = pneg %p4879_p9 }
 0x1a4   : > { %p4885_p12 = pnand %p4883_p1, %p4880_p4 }
 0x1a6   : > { %4888 = shalt.err (!%p4885_p12)
}
 0x1a7   : > { %s4889_s24 = scalar_lea.vmem %s666_s0, 256  ;;  %p4897_p13 = scmp.lt.s32.totalorder %s666_s0, %s666_s0 }
 0x1a8   : > { %p4890_p2 = scmp.ne.s32.totalorder %s666_s0, %s4889_s24  ;;  %p4898_p3 = scmp.lt.s32.totalorder %s4889_s24, %s4889_s24 }
 0x1aa   : > { %p4892_p10 = pnand %p4890_p2, %p6760_p8  ;;  %p4899_p5 = por %p4898_p3, %p4897_p13 }
 0x1ac   : > { %p4893_p11 = pneg %p4892_p10 }
 0x1ae   : > { %p4900_p7 = pnand %p4899_p5, %p4893_p11 }
 0x1b0   : > { %4903 = shalt.err (!%p4900_p7)
}
 0x1b1   : > { %s6764_s1 = smov 4   ;;  %s6765_s12 = smov 64  }
 0x1b2   : > { %4237 = dma.hbm_to_vmem [thread:$0]  (!%p6761_p6), %s6763_s8, 256, %s666_s0, [#allocation17], %s6765_s12, %s6765_s12, %s6764_s1  }
 0x1b3   : > { %s5318_s11 = smov [#allocation21]   ;;  %s5319_s23 = smov [#allocation24]  }
 0x1b4   : > { %s689_s27 = sshll.u32 %s5318_s11, 4  ;;  %s716_s16 = sshll.u32 %s5319_s23, 4  ;;  %s690_s27 = int_to_ptr.vmem [resolvable:$true] %s689_s27  ;;  %s717_s16 = int_to_ptr.vmem [resolvable:$true] %s716_s16 }
 0x1b5   : > { %s6766_s10 = sld [smem:[#allocation73_spill]] }
 0x1bb   : > { %s4904_s22 = scalar_lea.hbm %s6766_s10, 256 }
 0x1bc   : > { %p4905_p0 = scmp.ne.s32.totalorder %s6766_s10, %s4904_s22  ;;  %p4911_p1 = scmp.lt.u32.totalorder %s4904_s22, %s6766_s10 }
 0x1be   : > { %p4907_p9 = pnand %p4905_p0, %p6760_p8 }
 0x1c0   : > { %p4908_p4 = pneg %p4907_p9 }
 0x1c2   : > { %p4913_p12 = pnand %p4911_p1, %p4908_p4 }
 0x1c4   : > { %4916 = shalt.err (!%p4913_p12)
}
 0x1c5   : > { %s4917_s0 = scalar_lea.vmem %s690_s27, 256  ;;  %p4925_p13 = scmp.lt.s32.totalorder %s690_s27, %s690_s27 }
 0x1c6   : > { %p4918_p2 = scmp.ne.s32.totalorder %s690_s27, %s4917_s0  ;;  %p4926_p3 = scmp.lt.s32.totalorder %s4917_s0, %s4917_s0 }
 0x1c8   : > { %p4920_p10 = pnand %p4918_p2, %p6760_p8  ;;  %p4927_p5 = por %p4926_p3, %p4925_p13 }
 0x1ca   : > { %p4921_p11 = pneg %p4920_p10 }
 0x1cc   : > { %p4928_p7 = pnand %p4927_p5, %p4921_p11 }
 0x1ce   : > { %4931 = shalt.err (!%p4928_p7)
}
 0x1cf   : > { %4243 = dma.hbm_to_vmem [thread:$0]  (!%p6761_p6), %s6766_s10, 256, %s690_s27, [#allocation20], %s6765_s12, %s6765_s12, %s6764_s1  }
 0x1d0   : > { %s6767_s23 = sld [smem:[#allocation75_spill]] }
 0x1d6   : > { %s4932_s15 = scalar_lea.hbm %s6767_s23, 16 }
 0x1d7   : > { %p4933_p0 = scmp.ne.s32.totalorder %s6767_s23, %s4932_s15  ;;  %p4939_p1 = scmp.lt.u32.totalorder %s4932_s15, %s6767_s23 }
 0x1d9   : > { %p4935_p9 = pnand %p4933_p0, %p6760_p8 }
 0x1db   : > { %p4936_p4 = pneg %p4935_p9 }
 0x1dd   : > { %p4941_p12 = pnand %p4939_p1, %p4936_p4 }
 0x1df   : > { %4944 = shalt.err (!%p4941_p12)
}
 0x1e0   : > { %s4945_s0 = scalar_lea.vmem %s717_s16, 16  ;;  %s4952_s27 = scalar_lea.vmem %s717_s16, 32 }
 0x1e1   : > { %p4946_p2 = scmp.ne.s32.totalorder %s717_s16, %s4945_s0  ;;  %p4953_p13 = scmp.lt.s32.totalorder %s717_s16, %s717_s16 }
 0x1e2   : > { %p4954_p3 = scmp.lt.s32.totalorder %s4952_s27, %s4945_s0 }
 0x1e3   : > { %p4948_p10 = pnand %p4946_p2, %p6760_p8 }
 0x1e4   : > { %p4955_p5 = por %p4954_p3, %p4953_p13 }
 0x1e5   : > { %p4949_p11 = pneg %p4948_p10 }
 0x1e7   : > { %p4956_p7 = pnand %p4955_p5, %p4949_p11 }
 0x1e9   : > { %4959 = shalt.err (!%p4956_p7)
}
 0x1ea   : > { %4249 = dma.hbm_to_vmem [thread:$0]  (!%p6761_p6), %s6767_s23, 16, %s717_s16, [#allocation23]  }
 0x1eb   : > { %s5320_s18 = smov [#allocation27]   ;;  %s5321_s15 = smov [#allocation30]  }
 0x1ec   : > { %s739_s11 = sshll.u32 %s5320_s18, 4  ;;  %s764_s4 = sshll.u32 %s5321_s15, 4  ;;  %s740_s11 = int_to_ptr.vmem [resolvable:$true] %s739_s11  ;;  %s765_s4 = int_to_ptr.vmem [resolvable:$true] %s764_s4 }
 0x1ed   : > { %s6768_s26 = sld [smem:[#allocation77_spill]] }
 0x1f3   : > { %s4960_s19 = scalar_lea.hbm %s6768_s26, 256 }
 0x1f4   : > { %p4961_p0 = scmp.ne.s32.totalorder %s6768_s26, %s4960_s19  ;;  %p4967_p1 = scmp.lt.u32.totalorder %s4960_s19, %s6768_s26 }
 0x1f6   : > { %p4963_p9 = pnand %p4961_p0, %p6760_p8 }
 0x1f8   : > { %p4964_p4 = pneg %p4963_p9 }
 0x1fa   : > { %p4969_p12 = pnand %p4967_p1, %p4964_p4 }
 0x1fc   : > { %4972 = shalt.err (!%p4969_p12)
}
 0x1fd   : > { %s4973_s16 = scalar_lea.vmem %s740_s11, 256  ;;  %p4981_p13 = scmp.lt.s32.totalorder %s740_s11, %s740_s11 }
 0x1fe   : > { %p4974_p2 = scmp.ne.s32.totalorder %s740_s11, %s4973_s16  ;;  %p4982_p3 = scmp.lt.s32.totalorder %s4973_s16, %s4973_s16 }
 0x200   : > { %p4976_p10 = pnand %p4974_p2, %p6760_p8  ;;  %p4983_p5 = por %p4982_p3, %p4981_p13 }
 0x202   : > { %p4977_p11 = pneg %p4976_p10 }
 0x204   : > { %p4984_p7 = pnand %p4983_p5, %p4977_p11 }
 0x206   : > { %4987 = shalt.err (!%p4984_p7)
}
 0x207   : > { %4255 = dma.hbm_to_vmem [thread:$0]  (!%p6761_p6), %s6768_s26, 256, %s740_s11, [#allocation26], %s6765_s12, %s6765_s12, %s6764_s1  }
 0x208   : > { %s6769_s15 = sld [smem:[#allocation79_spill]] }
 0x20e   : > { %s4988_s22 = scalar_lea.hbm %s6769_s15, 16 }
 0x20f   : > { %p4989_p0 = scmp.ne.s32.totalorder %s6769_s15, %s4988_s22  ;;  %p4995_p1 = scmp.lt.u32.totalorder %s4988_s22, %s6769_s15 }
 0x211   : > { %p4991_p9 = pnand %p4989_p0, %p6760_p8 }
 0x213   : > { %p4992_p4 = pneg %p4991_p9 }
 0x215   : > { %p4997_p12 = pnand %p4995_p1, %p4992_p4 }
 0x217   : > { %5000 = shalt.err (!%p4997_p12)
}
 0x218   : > { %s5001_s16 = scalar_lea.vmem %s765_s4, 16  ;;  %s5008_s11 = scalar_lea.vmem %s765_s4, 32 }
 0x219   : > { %p5002_p2 = scmp.ne.s32.totalorder %s765_s4, %s5001_s16  ;;  %p5009_p13 = scmp.lt.s32.totalorder %s765_s4, %s765_s4 }
 0x21a   : > { %p5010_p3 = scmp.lt.s32.totalorder %s5008_s11, %s5001_s16 }
 0x21b   : > { %p5004_p10 = pnand %p5002_p2, %p6760_p8 }
 0x21c   : > { %p5011_p5 = por %p5010_p3, %p5009_p13 }
 0x21d   : > { %p5005_p11 = pneg %p5004_p10 }
 0x21f   : > { %p5012_p7 = pnand %p5011_p5, %p5005_p11 }
 0x221   : > { %5015 = shalt.err (!%p5012_p7)
}
 0x222   : > { %4261 = dma.hbm_to_vmem [thread:$0]  (!%p6761_p6), %s6769_s15, 16, %s765_s4, [#allocation29]  }
 0x223   : > { %s5322_s21 = smov [#allocation33]   ;;  %s5323_s22 = smov [#allocation36]  }
 0x224   : > { %s785_s18 = sshll.u32 %s5322_s21, 4  ;;  %s812_s24 = sshll.u32 %s5323_s22, 4  ;;  %s786_s18 = int_to_ptr.vmem [resolvable:$true] %s785_s18  ;;  %s813_s24 = int_to_ptr.vmem [resolvable:$true] %s812_s24 }
 0x225   : > { %s6770_s20 = sld [smem:[#allocation81_spill]] }
 0x22b   : > { %s5016_s8 = scalar_lea.hbm %s6770_s20, 384 }
 0x22c   : > { %p5017_p0 = scmp.ne.s32.totalorder %s6770_s20, %s5016_s8  ;;  %p5023_p1 = scmp.lt.u32.totalorder %s5016_s8, %s6770_s20 }
 0x22e   : > { %p5019_p9 = pnand %p5017_p0, %p6760_p8 }
 0x230   : > { %p5020_p4 = pneg %p5019_p9 }
 0x232   : > { %p5025_p12 = pnand %p5023_p1, %p5020_p4 }
 0x234   : > { %5028 = shalt.err (!%p5025_p12)
}
 0x235   : > { %s5029_s4 = scalar_lea.vmem %s786_s18, 384  ;;  %p5037_p13 = scmp.lt.s32.totalorder %s786_s18, %s786_s18 }
 0x236   : > { %p5030_p2 = scmp.ne.s32.totalorder %s786_s18, %s5029_s4  ;;  %p5038_p3 = scmp.lt.s32.totalorder %s5029_s4, %s5029_s4 }
 0x238   : > { %p5032_p10 = pnand %p5030_p2, %p6760_p8  ;;  %p5039_p5 = por %p5038_p3, %p5037_p13 }
 0x23a   : > { %p5033_p11 = pneg %p5032_p10 }
 0x23c   : > { %p5040_p7 = pnand %p5039_p5, %p5033_p11 }
 0x23e   : > { %5043 = shalt.err (!%p5040_p7)
}
 0x23f   : > { %4267 = dma.hbm_to_vmem [thread:$0]  (!%p6761_p6), %s6770_s20, 384, %s786_s18, [#allocation32], %s6765_s12, %s6765_s12, %s6764_s1  }
 0x240   : > { %s6771_s22 = sld [smem:[#allocation83_spill]] }
 0x246   : > { %s5044_s0 = scalar_lea.hbm %s6771_s22, 16 }
 0x247   : > { %p5045_p0 = scmp.ne.s32.totalorder %s6771_s22, %s5044_s0  ;;  %p5051_p1 = scmp.lt.u32.totalorder %s5044_s0, %s6771_s22 }
 0x249   : > { %p5047_p9 = pnand %p5045_p0, %p6760_p8 }
 0x24b   : > { %p5048_p4 = pneg %p5047_p9 }
 0x24d   : > { %p5053_p12 = pnand %p5051_p1, %p5048_p4 }
 0x24f   : > { %5056 = shalt.err (!%p5053_p12)
}
 0x250   : > { %s5057_s4 = scalar_lea.vmem %s813_s24, 16  ;;  %s5064_s1 = scalar_lea.vmem %s813_s24, 32 }
 0x251   : > { %p5058_p2 = scmp.ne.s32.totalorder %s813_s24, %s5057_s4  ;;  %p5065_p13 = scmp.lt.s32.totalorder %s813_s24, %s813_s24 }
 0x252   : > { %p5066_p3 = scmp.lt.s32.totalorder %s5064_s1, %s5057_s4 }
 0x253   : > { %p5060_p10 = pnand %p5058_p2, %p6760_p8 }
 0x254   : > { %p5067_p5 = por %p5066_p3, %p5065_p13 }
 0x255   : > { %p5061_p11 = pneg %p5060_p10 }
 0x257   : > { %p5068_p7 = pnand %p5067_p5, %p5061_p11 }
 0x259   : > { %5071 = shalt.err (!%p5068_p7)
}
 0x25a   : > { %4273 = dma.hbm_to_vmem [thread:$0]  (!%p6761_p6), %s6771_s22, 16, %s813_s24, [#allocation35]  }
 0x25b   : > { %s3674_s6 = sshll.u32 %s5734_s2, 5  ;;  %s3832_s10 = sshll.u32 %s5298_s25, 9 }
 0x25c   : > { %s6772_s21 = sld [smem:[#allocation63_spill]]  ;;  %s6773_s27 = sshll.u32 %s5800_s17, 4  ;;  %s5986_s27 = int_to_ptr.vmem [resolvable:$true] %s6773_s27 }
 0x25d   : > { %s827_s7 = scalar_lea.vmem [#allocation4], %s3674_s6  ;;  %s824_s11 = scalar_lea.sflag [#allocation5], %s5734_s2 }
 0x25e   : > { %s834_s16 = sshll.u32 %s827_s7, 4  ;;  %p6774_p6 = scmp.ne.s32.totalorder %s6754_s13, 0  ;;  %s5988_s16 = int_to_ptr.vmem [resolvable:$true] %s834_s16 }
 0x262   : > { %s5982_s0 = scalar_lea.hbm %s6772_s21, %s3832_s10  ;;  %s5077_s17 = scalar_lea.hbm %s6772_s21, 1024 }
 0x263   : > { %s5072_s24 = scalar_lea.hbm %s5982_s0, 512  ;;  %p5078_p4 = scmp.lt.u32.totalorder %s5982_s0, %s6772_s21 }
 0x264   : > { %p5073_p8 = scmp.ne.s32.totalorder %s5982_s0, %s5072_s24  ;;  %p5079_p1 = scmp.lt.u32.totalorder %s5077_s17, %s5072_s24 }
 0x265   : > { %p5081_p2 = scmp.lt.u32.totalorder %s5072_s24, %s5982_s0 }
 0x266   : > { %p5075_p0 = pnand %p5073_p8, %p6774_p6  ;;  %p5080_p12 = por %p5079_p1, %p5078_p4 }
 0x268   : > { %p5076_p9 = pneg %p5075_p0  ;;  %p5082_p10 = por %p5081_p2, %p5080_p12 }
 0x26a   : > { %p5083_p11 = pnand %p5082_p10, %p5076_p9 }
 0x26c   : > { %5086 = shalt.err (!%p5083_p11)
}
 0x26d   : > { %s5087_s18 = scalar_lea.vmem %s5988_s16, 512  ;;  %s5324_s6 = smov [#allocation4]  }
 0x26e   : > { %p5088_p13 = scmp.ne.s32.totalorder %s5988_s16, %s5087_s18  ;;  %s5092_s10 = sshll.u32 %s5324_s6, 4  ;;  %s5093_s10 = int_to_ptr.vmem [resolvable:$false] %s5092_s10 }
 0x26f   : > { %s5094_s8 = scalar_lea.vmem %s5093_s10, 1024  ;;  %p5095_p7 = scmp.lt.s32.totalorder %s5988_s16, %s5093_s10 }
 0x270   : > { %p5090_p3 = pnand %p5088_p13, %p6774_p6  ;;  %p5096_p8 = scmp.lt.s32.totalorder %s5094_s8, %s5087_s18 }
 0x272   : > { %p5091_p5 = pneg %p5090_p3  ;;  %p5097_p0 = por %p5096_p8, %p5095_p7 }
 0x274   : > { %p5098_p4 = pnand %p5097_p0, %p5091_p5 }
 0x276   : > { %5101 = shalt.err (!%p5098_p4)
}
 0x277   : > { %p6775_p9 = scmp.ne.s32.totalorder %s6752_s28, 0  ;;  %s6776_s19 = smov 8  }
 0x278   : > { %s6777_s7 = smov 128   ;;  %s5102_s24 = scalar_lea.hbm %s5796_s5, 256 }
 0x279   : > { %4277 = dma.hbm_to_vmem [thread:$0]  (!%p6775_p9), %s5982_s0, 512, %s5988_s16, %s824_s11, %s6777_s7, %s6777_s7, %s6776_s19  }
 0x27a   : > { %p5103_p1 = scmp.ne.s32.totalorder %s5796_s5, %s5102_s24  ;;  %s5107_s17 = scalar_lea.hbm %s6756_s14, 512 }
 0x27b   : > { %p5108_p10 = scmp.lt.u32.totalorder %s5796_s5, %s6756_s14  ;;  %p5109_p11 = scmp.lt.u32.totalorder %s5107_s17, %s5102_s24 }
 0x27c   : > { %p5105_p12 = pnand %p5103_p1, %p6774_p6  ;;  %p5111_p3 = scmp.lt.u32.totalorder %s5102_s24, %s5796_s5 }
 0x27d   : > { %p5110_p13 = por %p5109_p11, %p5108_p10 }
 0x27e   : > { %p5106_p2 = pneg %p5105_p12 }
 0x27f   : > { %p5112_p5 = por %p5111_p3, %p5110_p13 }
 0x281   : > { %p5113_p7 = pnand %p5112_p5, %p5106_p2 }
 0x283   : > { %5116 = shalt.err (!%p5113_p7)
}
 0x284   : > { %s5117_s2 = scalar_lea.vmem %s5986_s27, 256  ;;  %s5325_s0 = smov [#allocation9]  }
 0x285   : > { %p5118_p8 = scmp.ne.s32.totalorder %s5986_s27, %s5117_s2  ;;  %s5122_s16 = sshll.u32 %s5325_s0, 4  ;;  %s5123_s16 = int_to_ptr.vmem [resolvable:$false] %s5122_s16 }
 0x286   : > { %s5124_s11 = scalar_lea.vmem %s5123_s16, 512  ;;  %p5125_p1 = scmp.lt.s32.totalorder %s5986_s27, %s5123_s16 }
 0x287   : > { %p5120_p0 = pnand %p5118_p8, %p6774_p6  ;;  %p5126_p12 = scmp.lt.s32.totalorder %s5124_s11, %s5117_s2 }
 0x289   : > { %p5121_p4 = pneg %p5120_p0  ;;  %p5127_p10 = por %p5126_p12, %p5125_p1 }
 0x28b   : > { %p5128_p11 = pnand %p5127_p10, %p5121_p4 }
 0x28d   : > { %5131 = shalt.err (!%p5128_p11)
}
 0x28e   : > { %s6778_s18 = smov 256   ;;  %s6779_s13 = sld [smem:[#allocation57_spill]] }
 0x28f   : > { %4283 = dma.hbm_to_vmem [thread:$0]  (!%p6775_p9), %s5796_s5, 256, %s5986_s27, %s5758_s9, %s6778_s18, %s6777_s7, %s6776_s19  }
 0x294   : > { %p6780_p6 = scmp.ne.s32.totalorder %s6779_s13, 0 }
 0x295   : > { %s6781_s6 = sld [smem:[#allocation60_spill]] (!%p6780_p6)  ;;  %s6045_s10 = sand.u32 (!%p6780_p6), 1, %s5290_s30  }
 0x296   : > { %886 = sbr.rel (%p6780_p6) target bundleno = 5275 (0x149b), region = 104  ;;  %s3682_s8 = sshll.u32 (!%p6780_p6), %s6045_s10, 5 }
 0x297   : > { %s889_s24 = scalar_lea.sflag (!%p6780_p6), [#allocation5], %s6045_s10  ;;  %s6051_s28 = scalar_lea.vmem (!%p6780_p6), [#allocation4], %s3682_s8 }
 0x29b   : > { %p6782_p2 = scmp.ne.s32.totalorder (!%p6780_p6), %s6781_s6, 0 }
 0x29d   : > { %5233 = dma.done.wait (%p6782_p2), %s889_s24, 512  }
 0x29e   : > { %5235 = vsyncadd (%p6782_p2), %s889_s24, 4294966784  ;;  %s6783_s9 = sld [smem:[#allocation56_spill]]  ;;  %s6059_s27 = sshll.u32 %s6045_s10, 4 }
 0x29f   : > { %s901_s7 = scalar_lea.vmem [#allocation7], %s6059_s27 }
 0x2a4   : > { %s897_s5 = sand.u32 1, %s6783_s9  }
 0x2a5   : > { %s898_s19 = scalar_lea.sflag [#allocation8], %s897_s5 }
 0x2a6   : > { %5237 = dma.done.wait (%p6782_p2), %s898_s19, 512  }
 0x2a7   : > { %5239 = vsyncadd (%p6782_p2), %s898_s19, 4294966784  ;;  %s910_s3 = scalar_lea.vmem [#allocation9], %s6059_s27  ;;  %p6784_p9 = scmp.eq.s32.totalorder %s6783_s9, 0 }
 0x2a9   : > { %5241 = dma.done.wait (%p6784_p9), [#allocation11], 1296   ;;  %p6785_p13 = pmov %p6784_p9 }
 0x2aa   : > { %p6786_p3 = pmov %p6784_p9 }
 0x2ab   : > { %5243 = vsyncadd (%p6785_p13), [#allocation11], 4294966000 }
 0x2ac   : > { %5245 = dma.done.wait (%p6786_p3), [#allocation14], 32   ;;  %p6787_p5 = pmov %p6786_p3 }
 0x2ad   : > { %p6788_p7 = pmov %p6786_p3 }
 0x2ae   : > { %5247 = vsyncadd (%p6787_p5), [#allocation14], 4294967264 }
 0x2af   : > { %5249 = dma.done.wait (%p6788_p7), [#allocation17], 512   ;;  %p6789_p8 = pmov %p6786_p3 }
 0x2b0   : > { %p6790_p0 = pmov %p6786_p3 }
 0x2b1   : > { %5251 = vsyncadd (%p6789_p8), [#allocation17], 4294966784 }
 0x2b2   : > { %5253 = dma.done.wait (%p6790_p0), [#allocation20], 272   ;;  %p6791_p4 = pmov %p6790_p0 }
 0x2b3   : > { %p6792_p1 = pmov %p6790_p0 }
 0x2b4   : > { %5255 = vsyncadd (%p6791_p4), [#allocation20], 4294967024 }
 0x2b5   : > { %5257 = dma.done.wait (%p6792_p1), [#allocation23], 272   ;;  %p6793_p12 = pmov %p6790_p0 }
 0x2b6   : > { %p6794_p10 = pmov %p6790_p0 }
 0x2b7   : > { %5259 = vsyncadd (%p6793_p12), [#allocation23], 4294967024 }
 0x2b8   : > { %5261 = dma.done.wait (%p6794_p10), [#allocation26], 512   ;;  %p6795_p11 = pmov %p6790_p0 }
 0x2b9   : > { %p6796_p6 = pmov %p6790_p0 }
 0x2ba   : > { %5263 = vsyncadd (%p6795_p11), [#allocation26], 4294966784 }
 0x2bb   : > { %5265 = dma.done.wait (%p6796_p6), [#allocation29], 32   ;;  %p6797_p2 = pmov %p6790_p0 }
 0x2bc   : > { %p6798_p9 = pmov %p6790_p0 }
 0x2bd   : > { %5267 = vsyncadd (%p6797_p2), [#allocation29], 4294967264 }
 0x2be   : > { %5269 = dma.done.wait (%p6798_p9), [#allocation32], 400   ;;  %p6799_p13 = pmov %p6790_p0 }
 0x2bf   : > { %p6800_p3 = pmov %p6790_p0 }
 0x2c0   : > { %5271 = vsyncadd (%p6799_p13), [#allocation32], 4294966896 }
 0x2c1   : > { %5273 = dma.done.wait (%p6800_p3), [#allocation35], 400   ;;  %p6801_p5 = pmov %p6790_p0 }
 0x2c2   : > { %v4398_v0 = vld [vmem:[#allocation10 + $0x10] sm:$0xff]   ;;  %v4399_v1 = vld [vmem:[#allocation10 + $0x18] sm:$0xff]   ;;  %v6106_v2 = vld [vmem:[%s6051_s28] sm:$0xff]  ;;  %vm1106_vm0 = vcmask 261120   ;;  %v5326_v7 = vmov 0.0|0.0   ;;  %vm5328_vm1 = vmmov 0  }
 0x2c3   : > { %5275 = vsyncadd (%p6801_p5), [#allocation35], 4294966896  ;;  %3927 = vmatprep.subr.bf16.mxu0 %v4398_v0  ;;  %v6109_v3 = vld [vmem:[%s6051_s28 + $0x8] sm:$0xff]  ;;  %v1071_v4 = vpack.c.bf16 %v6106_v2, %v6106_v2  ;;  %v6114_v5 = vld [vmem:[%s6051_s28 + $0x10] sm:$0xff]  ;;  %v3712_v10 = vcombine.low %v5326_v7, %v5326_v7  ;;  %s5329_s4 = smov 64   ;;  %s5330_s17 = smov 32  }
 0x2c4   : > { %3928 = vmatpush3.bf16.msra.mxu0 %v4398_v0  ;;  %v4400_v6 = vld [vmem:[#allocation10] sm:$0xff]   ;;  %v3833_v9 = vpack.c.bf16 %v6114_v5, %v6109_v3  ;;  %v4401_v11 = vld [vmem:[#allocation10 + $0x8] sm:$0xff]   ;;  %v3834_v13 = vpack.c.bf16 %v6109_v3, %v6106_v2  ;;  %v4404_v15 = vld [vmem:[#allocation10 + $0x30] sm:$0xff]   ;;  %s6341_s1 = scalar_lea.vmem [#allocation38], %s6059_s27  ;;  %vm2660_vm2 = vcmask 1041408   ;;  %vm3019_vm5 = vcmask 1042432  }
 0x2c5   : > { %3929 = vmatprep.subr.bf16.mxu0 %v4399_v1  ;;  %v3706_v8 = vcombine.low %v5326_v7, %v1071_v4  ;;  %v4402_v12 = vld [vmem:[#allocation10 + $0x20] sm:$0xff]   ;;  %v4403_v14 = vld [vmem:[#allocation10 + $0x28] sm:$0xff]   ;;  %v1069_v16 = vld [vmem:[%s6051_s28 + $0x18] sm:$0xff]  ;;  %vm2693_vm3 = vsmask.f32 3328  ;;  %vm2767_vm6 = vcmask 130048  }
 0x2c6   : > { %v3835_v17 = vpack.c.bf16 %v1069_v16, %v6114_v5  ;;  %v4405_v18 = vld [vmem:[#allocation10 + $0x38] sm:$0xff]   ;;  %v4406_v19 = vld [vmem:[#allocation10 + $0x40] sm:$0xff]   ;;  %v1074_v20 = vpack.c.bf16 %v1069_v16, %v1069_v16  ;;  %v4407_v22 = vld [vmem:[#allocation10 + $0x48] sm:$0xff]   ;;  %vm2694_vm4 = vsmask.f32 7440  ;;  %vm3020_vm7 = vcmask 1046532  }
 0x2c7   : > { %3931 = vmatprep.mubr.msk.bf16.mxu0 %vm1106_vm0, %v3706_v8  ;;  %v3732_v23 = vld [vmem:[#allocation12] ss:$0 sm:$0xff]  ;;  %vm6405_vm8 = vmor %vm2693_vm3, %vm2694_vm4  ;;  %s5331_s12 = smov 112   ;;  %s5332_s2 = smov 16  }
 0x2c8   : > { %3930 = vmatpush3.bf16.msra.mxu0 %v4399_v1  ;;  %v3723_v21 = vcombine.low %v1074_v20, %v5326_v7  ;;  %v6162_v20 = vld [vmem:[#allocation22] sm:$0xff]   ;;  %vm6418_vm9 = vmor %vm3019_vm5, %vm3020_vm7  ;;  %s6806_s0 = sld [smem:[#allocation61_spill]]  ;;  %s5333_s16 = smov 96  }
 0x2c9   : > { %3935 = vmatprep.subr.bf16.mxu0 %v4400_v6  ;;  %s3290_s11 = sshll.u32 %s6341_s1, 4  ;;  %s3828_s18 = sshll.u32 %s6783_s9, 7  ;;  %s6460_s11 = int_to_ptr.vmem [resolvable:$true] %s3290_s11 }
 0x2ca   : > { %s6807_s24 = sld [smem:[#allocation85_spill]] }
 0x2cb   : > { %3932 = vmatmul.mubr.msk.bf16.vlgmr.msra.gmra.mrb[0].mxu0 %vm1106_vm0, %v3833_v9 }
 0x2cc   : > { %3936 = vmatpush3.bf16.msra.mxu0 %v4400_v6  ;;  %3939 = vmatprep.mubr.msk.bf16.mxu0 %vm1106_vm0, %v3712_v10 }
 0x2cd   : > { %3937 = vmatprep.subr.bf16.mxu0 %v4401_v11 }
 0x2ce   : > { %p6809_p8 = scmp.ne.s32.totalorder %s6806_s0, 0 }
 0x2d0   : > { %3938 = vmatpush3.bf16.msra.mxu0 %v4401_v11  ;;  %s6808_s28 = smov %s6807_s24  ;;  %s6468_s19 = scalar_lea.hbm %s6807_s24, %s3828_s18 }
 0x2d1   : > { %3943 = vmatprep.subr.bf16.mxu0 %v4402_v12 }
 0x2d7   : > { %3940 = vmatmul.mubr.msk.bf16.vlgmr.msra.gmra.mrb[0].mxu0 %vm1106_vm0, %v3834_v13 }
 0x2d8   : > { %3944 = vmatpush3.bf16.msra.mxu0 %v4402_v12  ;;  %3947 = vmatprep.mubr.msk.bf16.mxu0 %vm1106_vm0, %v3834_v13 }
 0x2d9   : > { %3945 = vmatprep.subr.bf16.mxu0 %v4403_v14 }
 0x2dc   : > { %3946 = vmatpush3.bf16.msra.mxu0 %v4403_v14 }
 0x2dd   : > { %3951 = vmatprep.subr.bf16.mxu0 %v4404_v15 }
 0x2e3   : > { %3948 = vmatmul.mubr.msk.bf16.vlgmr.msra.gmra.mrb[0].mxu0 %vm1106_vm0, %v3835_v17 }
 0x2e4   : > { %3952 = vmatpush3.bf16.msra.mxu0 %v4404_v15  ;;  %3955 = vmatprep.mubr.msk.bf16.mxu0 %vm1106_vm0, %v3833_v9 }
 0x2e5   : > { %3953 = vmatprep.subr.bf16.mxu0 %v4405_v18 }
 0x2e8   : > { %3954 = vmatpush3.bf16.msra.mxu0 %v4405_v18  ;;  %v4410_v18 = vld [vmem:[#allocation21] sm:$0xff]  }
 0x2e9   : > { %3959 = vmatprep.subr.bf16.mxu0 %v4406_v19 }
 0x2ef   : > { %3956 = vmatmul.mubr.msk.bf16.vlgmr.msra.gmra.mrb[0].mxu0 %vm1106_vm0, %v3723_v21  ;;  %v6166_v21 = vld [vmem:[#allocation22 + $0x8] sm:$0xff]  }
 0x2f0   : > { %3960 = vmatpush3.bf16.msra.mxu0 %v4406_v19  ;;  %3963 = vmatprep.mubr.msk.bf16.mxu0 %vm1106_vm0, %v3835_v17  ;;  %v4409_v17 = vld [vmem:[#allocation16 + $0x8] sm:$0xff]   ;;  %v5327_v19 = vmov 0.0  }
 0x2f1   : > { %3961 = vmatprep.subr.bf16.mxu0 %v4407_v22 }
 0x2f4   : > { %3962 = vmatpush3.bf16.msra.mxu0 %v4407_v22 }
 0x2f5   : > { %4007 = vmatprep.subr.bf16.mxu0 %v5327_v19 }
 0x2fb   : > { %3964 = vmatmul.mubr.msk.bf16.vlgmr.msra.gmra.mrb[0].mxu0 %vm1106_vm0, %v3712_v10 }
 0x2fc   : > { %4011 = vmatprep.mubr.msk.bf16.mxu0 %vm5328_vm1, %v5327_v19  ;;  %4008 = vmatpush3.bf16.msra.mxu0 %v6162_v20 }
 0x2fd   : > { %4009 = vmatprep.subr.bf16.mxu0 %v5327_v19 }
 0x300   : > { %4010 = vmatpush3.bf16.msra.mxu0 %v6166_v21 }
 0x301   : > { %4023 = vmatprep.subr.bf16.mxu0 %v5327_v19 }
 0x3ce   : > { %v3965_v24 = vpop.f32.mrb[0].mxu0 }
 0x3cf   : > { %v1460_v25 = vadd.f32 %v3965_v24, %v3732_v23  ;;  %v1432_v26 = vpop.f32.mrb[1].mxu0 }
 0x3d0   : > { %v1458_v27 = vadd.f32 %v3732_v23, %v1432_v26  ;;  %v3966_v28 = vpop.f32.mrb[2].mxu0 }
 0x3d1   : > { %v3735_v29 = vmul.f32 -1.442695, %v1460_v25  ;;  %v1461_v30 = vadd.f32 %v3966_v28, %v3732_v23  ;;  %v1435_v31 = vpop.f32.mrb[3].mxu0 }
 0x3d2   : > { %v3733_v32 = vmul.f32 -1.442695, %v1458_v27  ;;  %v1459_v33 = vadd.f32 %v3732_v23, %v1435_v31 }
 0x3d3   : > { %4426 = vpow2.f32 %v3735_v29  ;;  %v3736_v34 = vmul.f32 -1.442695, %v1461_v30 }
 0x3d4   : > { %4428 = vpow2.f32 %v3733_v32  ;;  %v3734_v35 = vmul.f32 -1.442695, %v1459_v33 }
 0x3d5   : > { %4430 = vpow2.f32 %v3736_v34 }
 0x3d6   : > { %4432 = vpow2.f32 %v3734_v35 }
 0x3dd   : > { %v4427_v36 = vpop.eup %4426 }
 0x3de   : > { %v4429_v37 = vpop.eup %4428  ;;  %v1476_v38 = vadd.f32 1.0, %v4427_v36  ;;  %v3737_v36 = vld [vmem:[#allocation13] ss:$0 sm:$0xff] }
 0x3df   : > { %v4431_v39 = vpop.eup %4430  ;;  %v1474_v40 = vadd.f32 1.0, %v4429_v37 }
 0x3e0   : > { %v4433_v41 = vpop.eup %4432  ;;  %4434 = vrcp.f32 %v1476_v38  ;;  %v1477_v42 = vadd.f32 1.0, %v4431_v39 }
 0x3e1   : > { %4436 = vrcp.f32 %v1474_v40  ;;  %v1475_v43 = vadd.f32 1.0, %v4433_v41 }
 0x3e2   : > { %4438 = vrcp.f32 %v1477_v42  ;;  %v3738_v42 = vld [vmem:[#allocation15] ss:$0 sm:$0xff] }
 0x3e3   : > { %4440 = vrcp.f32 %v1475_v43 }
 0x3ea   : > { %v4435_v44 = vpop.eup %4434 }
 0x3eb   : > { %v4437_v45 = vpop.eup %4436  ;;  %v1488_v46 = vmul.f32 %v4435_v44, %v1460_v25 }
 0x3ec   : > { %v4439_v47 = vpop.eup %4438  ;;  %v1486_v48 = vmul.f32 %v4437_v45, %v1458_v27 }
 0x3ed   : > { %v4441_v49 = vpop.eup %4440  ;;  %v1489_v50 = vmul.f32 %v4439_v47, %v1461_v30  ;;  %v6133_v51 = vadd.f32 %v1488_v46, %v6114_v5 }
 0x3ee   : > { %v1487_v52 = vmul.f32 %v4441_v49, %v1459_v33  ;;  %v6136_v53 = vadd.f32 %v1486_v48, %v6106_v2 }
 0x3ef   : > { %v6138_v54 = vadd.f32 %v1489_v50, %v1069_v16  ;;  %v1500_v55 = vsel %vm1106_vm0, %v6133_v51, 0.0  ;;  %v4408_v16 = vld [vmem:[#allocation16] sm:$0xff]  }
 0x3f0   : > { %v6143_v56 = vadd.f32 %v1487_v52, %v6109_v3  ;;  %1501 = vadd.xlane.f32.xlu1 %v1500_v55  ;;  %v1494_v57 = vsel %vm1106_vm0, %v6136_v53, 0.0  ;;  %3967 = vmatprep.subr.bf16.mxu1 %v4408_v16 }
 0x3f1   : > { %1495 = vadd.xlane.f32.xlu0 %v1494_v57  ;;  %v1503_v58 = vsel %vm1106_vm0, %v6138_v54, 0.0  ;;  %3968 = vmatpush3.bf16.msra.mxu1 %v4408_v16 }
 0x3f2   : > { %v1497_v59 = vsel %vm1106_vm0, %v6143_v56, 0.0  ;;  %3969 = vmatprep.subr.bf16.mxu1 %v4409_v17 }
 0x3f4   : > { %1504 = vadd.xlane.f32.xlu1 %v1503_v58  ;;  %v4411_v58 = vld [vmem:[#allocation21 + $0x8] sm:$0xff]  }
 0x3f5   : > { %1498 = vadd.xlane.f32.xlu0 %v1497_v59  ;;  %3970 = vmatpush3.bf16.msra.mxu1 %v4409_v17  ;;  %v6173_v59 = vld [vmem:[#allocation18] sm:$0xff]  }
 0x3f6   : > { %3975 = vmatprep.subr.bf16.mxu1 %v4410_v18 }
 0x47d   : > { %v1502_v60 = vpop.xlane.xlu1 %1501 }
 0x47e   : > { %v1509_v61 = vmul.f32 0.03125, %v1502_v60  ;;  %v1496_v62 = vpop.xlane.xlu0 %1495  ;;  %v6178_v60 = vld [vmem:[#allocation18 + $0x8] sm:$0xff]  }
 0x47f   : > { %v1507_v63 = vmul.f32 0.03125, %v1496_v62 }
 0x480   : > { %v1513_v0 = vsub.f32 %v6133_v51, %v1509_v61  ;;  %v1741_v61 = vld [vmem:[%s901_s7] sm:$0xff] }
 0x481   : > { %v1511_v1 = vsub.f32 %v6136_v53, %v1507_v63  ;;  %v1505_v2 = vpop.xlane.xlu1 %1504  ;;  %v1745_v62 = vpack.c.bf16 %v1741_v61, %v1741_v61  ;;  %v1742_v63 = vld [vmem:[%s901_s7 + $0x8] sm:$0xff]  ;;  %s6472_s7 = scalar_lea.sflag [#allocation39], %s897_s5 }
 0x482   : > { %v1510_v3 = vmul.f32 0.03125, %v1505_v2  ;;  %v1499_v4 = vpop.xlane.xlu0 %1498  ;;  %v1517_v10 = vmul.f32 %v1513_v0, %v1513_v0 }
 0x483   : > { %v1508_v5 = vmul.f32 0.03125, %v1499_v4  ;;  %v1515_v6 = vmul.f32 %v1511_v1, %v1511_v1 }
 0x484   : > { %v1514_v7 = vsub.f32 %v6138_v54, %v1510_v3  ;;  %v1525_v12 = vsel %vm1106_vm0, %v1517_v10, 0.0 }
 0x485   : > { %v1512_v8 = vsub.f32 %v6143_v56, %v1508_v5  ;;  %v1519_v9 = vsel %vm1106_vm0, %v1515_v6, 0.0 }
 0x486   : > { %1520 = vadd.xlane.f32.xlu0 %v1519_v9  ;;  %v1518_v14 = vmul.f32 %v1514_v7, %v1514_v7  ;;  %v3746_v9 = vld [vmem:[#allocation24] ss:$0 sm:$0xff] }
 0x487   : > { %v1516_v11 = vmul.f32 %v1512_v8, %v1512_v8 }
 0x488   : > { %v1528_v15 = vsel %vm1106_vm0, %v1518_v14, 0.0 }
 0x489   : > { %v1522_v13 = vsel %vm1106_vm0, %v1516_v11, 0.0 }
 0x48a   : > { %1526 = vadd.xlane.f32.xlu0 %v1525_v12  ;;  %1523 = vadd.xlane.f32.xlu1 %v1522_v13 }
 0x48e   : > { %1529 = vadd.xlane.f32.xlu1 %v1528_v15 }
 0x513   : > { %v1521_v22 = vpop.xlane.xlu0 %1520 }
 0x514   : > { %v1531_v23 = vmul.f32 0.03125, %v1521_v22 }
 0x516   : > { %v1535_v24 = vadd.f32 1e-05, %v1531_v23 }
 0x517   : > { %v1524_v25 = vpop.xlane.xlu1 %1523  ;;  %v1527_v26 = vpop.xlane.xlu0 %1526 }
 0x518   : > { %4442 = vrsqrt.f32 %v1535_v24  ;;  %v1532_v27 = vmul.f32 0.03125, %v1524_v25  ;;  %v1533_v28 = vmul.f32 0.03125, %v1527_v26 }
 0x51a   : > { %v1536_v29 = vadd.f32 1e-05, %v1532_v27  ;;  %v1537_v30 = vadd.f32 1e-05, %v1533_v28 }
 0x51b   : > { %v1530_v31 = vpop.xlane.xlu1 %1529 }
 0x51c   : > { %4444 = vrsqrt.f32 %v1536_v29  ;;  %v1534_v32 = vmul.f32 0.03125, %v1530_v31 }
 0x51d   : > { %4446 = vrsqrt.f32 %v1537_v30 }
 0x51e   : > { %v1538_v33 = vadd.f32 1e-05, %v1534_v32 }
 0x520   : > { %4448 = vrsqrt.f32 %v1538_v33  ;;  %v1744_v33 = vld [vmem:[%s910_s3 + $0x8] sm:$0xff] }
 0x522   : > { %v4443_v34 = vpop.eup %4442 }
 0x523   : > { %v1543_v35 = vmul.f32 %v4443_v34, %v1511_v1  ;;  %v3739_v1 = vld [vmem:[#allocation19] ss:$0 sm:$0xff] }
 0x525   : > { %v1554_v40 = vmul.f32 %v3737_v36, %v1543_v35  ;;  %v1743_v35 = vld [vmem:[%s910_s3] sm:$0xff]  ;;  %s5132_s3 = scalar_lea.vmem %s6460_s11, 256 }
 0x526   : > { %v4445_v37 = vpop.eup %4444  ;;  %p5133_p7 = scmp.ne.s32.totalorder %s6460_s11, %s5132_s3 }
 0x527   : > { %v4447_v38 = vpop.eup %4446  ;;  %v1544_v39 = vmul.f32 %v4445_v37, %v1512_v8  ;;  %v1565_v46 = vadd.f32 %v3738_v42, %v1554_v40 }
 0x528   : > { %v1545_v41 = vmul.f32 %v4447_v38, %v1513_v0  ;;  %v1802_v0 = vpack.c.bf16 %v1742_v63, %v1742_v63  ;;  %p5134_p0 = pnand %p5133_p7, %p6809_p8 }
 0x529   : > { %v1555_v43 = vmul.f32 %v3737_v36, %v1544_v39 }
 0x52a   : > { %v4449_v44 = vpop.eup %4448  ;;  %v1556_v48 = vmul.f32 %v3737_v36, %v1545_v41  ;;  %p5135_p4 = pneg %p5134_p0 }
 0x52b   : > { %v1546_v45 = vmul.f32 %v4449_v44, %v1514_v7  ;;  %v1566_v47 = vadd.f32 %v3738_v42, %v1555_v43 }
 0x52c   : > { %v1567_v52 = vadd.f32 %v3738_v42, %v1556_v48 }
 0x52d   : > { %v3836_v49 = vpack.c.bf16 %v1566_v47, %v1565_v46  ;;  %v1557_v50 = vmul.f32 %v3737_v36, %v1546_v45 }
 0x52f   : > { %3971 = vmatprep.mubr.msk.bf16.mxu1 %vm1106_vm0, %v3836_v49  ;;  %v1568_v55 = vadd.f32 %v3738_v42, %v1557_v50 }
 0x531   : > { %v3837_v57 = vpack.c.bf16 %v1568_v55, %v1567_v52 }
 0x533   : > { %3972 = vmatmul.mubr.msk.bf16.vlgmr.msra.gmra.mrb[0].mxu1 %vm1106_vm0, %v3837_v57 }
 0x534   : > { %3976 = vmatpush3.bf16.msra.mxu1 %v4410_v18  ;;  %3979 = vmatprep.mubr.msk.bf16.mxu1 %vm1106_vm0, %v3836_v49 }
 0x535   : > { %3977 = vmatprep.subr.bf16.mxu1 %v4411_v58 }
 0x538   : > { %3978 = vmatpush3.bf16.msra.mxu1 %v4411_v58 }
 0x539   : > { %3983 = vmatprep.subr.bf16.mxu1 %v5327_v19 }
 0x53b   : > { %3980 = vmatmul.mubr.msk.bf16.vlgmr.msra.gmra.mrb[4].mxu1 %vm1106_vm0, %v3837_v57 }
 0x53c   : > { %3984 = vmatpush3.bf16.msra.mxu1 %v6173_v59  ;;  %3987 = vmatprep.mubr.msk.bf16.mxu1 %vm5328_vm1, %v5327_v19 }
 0x53d   : > { %3985 = vmatprep.subr.bf16.mxu1 %v5327_v19 }
 0x540   : > { %3986 = vmatpush3.bf16.msra.mxu1 %v6178_v60 }
 0x541   : > { %3991 = vmatprep.subr.bf16.mxu1 %v5327_v19 }
 0x543   : > { %3988 = vmatmul.mubr.msk.bf16.vlgmr.msra.gmra.mrb[8].mxu1 %vm1106_vm0, %v1745_v62 }
 0x544   : > { %3992 = vmatpush3.bf16.msra.mxu1 %v6162_v20  ;;  %3995 = vmatprep.mubr.msk.bf16.mxu1 %vm5328_vm1, %v5327_v19 }
 0x545   : > { %3993 = vmatprep.subr.bf16.mxu1 %v5327_v19 }
 0x548   : > { %3994 = vmatpush3.bf16.msra.mxu1 %v6166_v21 }
 0x549   : > { %3999 = vmatprep.subr.bf16.mxu1 %v5327_v19 }
 0x54b   : > { %3996 = vmatmul.mubr.msk.bf16.vlgmr.msra.gmra.mrb[12].mxu1 %vm1106_vm0, %v1802_v0 }
 0x54c   : > { %4000 = vmatpush3.bf16.msra.mxu1 %v6173_v59  ;;  %4003 = vmatprep.mubr.msk.bf16.mxu1 %vm5328_vm1, %v5327_v19 }
 0x54d   : > { %4001 = vmatprep.subr.bf16.mxu1 %v5327_v19 }
 0x550   : > { %4002 = vmatpush3.bf16.msra.mxu1 %v6178_v60 }
 0x551   : > { %4015 = vmatprep.subr.bf16.mxu1 %v5327_v19 }
 0x606   : > { %v3973_v2 = vpop.f32.mrb[0].mxu1 }
 0x607   : > { %v6203_v3 = vadd.f32 %v3973_v2, %v3739_v1  ;;  %v1646_v4 = vpop.f32.mrb[1].mxu1 }
 0x608   : > { %v3974_v5 = vpop.f32.mrb[2].mxu1  ;;  %v1647_v17 = vadd.f32 %v3739_v1, %v1646_v4 }
 0x609   : > { %v6205_v6 = vadd.f32 %v3974_v5, %v3739_v1  ;;  %v1649_v7 = vpop.f32.mrb[3].mxu1 }
 0x60a   : > { %v6207_v8 = vadd.f32 %v3739_v1, %v1649_v7 }
 0x60e   : > { %v3981_v10 = vpop.f32.mrb[4].mxu1 }
 0x60f   : > { %v6209_v11 = vadd.f32 %v3981_v10, %v3746_v9  ;;  %v1718_v12 = vpop.f32.mrb[5].mxu1 }
 0x610   : > { %v6211_v13 = vadd.f32 %v3746_v9, %v1718_v12  ;;  %v3982_v14 = vpop.f32.mrb[6].mxu1 }
 0x611   : > { %v1721_v15 = vpop.f32.mrb[7].mxu1  ;;  %v1730_v26 = vadd.f32 %v3982_v14, %v3746_v9 }
 0x612   : > { %v6213_v16 = vadd.f32 %v3746_v9, %v1721_v15 }
 0x616   : > { %v1795_v18 = vpop.f32.mrb[8].mxu1 }
 0x617   : > { %v1801_v22 = vadd.f32 %v1795_v18, %v1647_v17  ;;  %v3989_v23 = vpop.f32.mrb[9].mxu1 }
 0x618   : > { %v1798_v24 = vpop.f32.mrb[10].mxu1 }
 0x619   : > { %4450 = vtanh.f32 %v1801_v22  ;;  %v3990_v25 = vpop.f32.mrb[11].mxu1  ;;  %v3757_v37 = vmul.f32 -1.442695, %v1801_v22 }
 0x61e   : > { %v1852_v27 = vpop.f32.mrb[12].mxu1 }
 0x61f   : > { %v1858_v28 = vadd.f32 %v1852_v27, %v1730_v26  ;;  %v3997_v29 = vpop.f32.mrb[13].mxu1 }
 0x620   : > { %v1855_v30 = vpop.f32.mrb[14].mxu1 }
 0x621   : > { %4452 = vtanh.f32 %v1858_v28  ;;  %v3998_v31 = vpop.f32.mrb[15].mxu1  ;;  %v3758_v36 = vmul.f32 -1.442695, %v1858_v28 }
 0x623   : > { %v4451_v32 = vpop.eup %4450  ;;  %4454 = vpow2.f32 %v3758_v36 }
 0x624   : > { %1872 = vrot.lane.b32.xlu1 %v4451_v32, %s5329_s4  ;;  %4456 = vpow2.f32 %v3757_v37 }
 0x628   : > { %1895 = vrot.lane.b32.xlu1 %v1744_v33, %s5330_s17 }
 0x62b   : > { %v4453_v34 = vpop.eup %4452 }
 0x62c   : > { %1900 = vrot.lane.b32.xlu0 %v4453_v34, %s5329_s4 }
 0x62d   : > { %v4455_v38 = vpop.eup %4454 }
 0x62e   : > { %v1890_v39 = vadd.f32 1.0, %v4455_v38  ;;  %v4457_v40 = vpop.eup %4456 }
 0x62f   : > { %v1862_v41 = vadd.f32 1.0, %v4457_v40 }
 0x630   : > { %1867 = vrot.lane.b32.xlu0 %v1743_v35, %s5330_s17  ;;  %4458 = vrcp.f32 %v1890_v39 }
 0x631   : > { %4460 = vrcp.f32 %v1862_v41 }
 0x63a   : > { %v4459_v42 = vpop.eup %4458 }
 0x63b   : > { %v4461_v46 = vpop.eup %4460 }
 0x696   : > { %v1873_v45 = vpop.permute.xlu1 %1872 }
 0x697   : > { %v1875_v47 = vmul.f32 %v4461_v46, %v1873_v45 }
 0x69a   : > { %v1896_v48 = vpop.permute.xlu1 %1895 }
 0x69b   : > { %v1898_v49 = vmul.f32 %v4459_v42, %v1896_v48 }
 0x69e   : > { %v1901_v43 = vpop.permute.xlu0 %1900 }
 0x69f   : > { %v1903_v44 = vmul.f32 %v4459_v42, %v1901_v43 }
 0x6a1   : > { %1905 = vrot.lane.b32.xlu1 %v1903_v44, %s5330_s17 }
 0x6a2   : > { %v1868_v50 = vpop.permute.xlu0 %1867 }
 0x6a3   : > { %v1870_v57 = vmul.f32 %v4461_v46, %v1868_v50 }
 0x6a5   : > { %1877 = vrot.lane.b32.xlu1 %v1875_v47, %s5330_s17 }
 0x713   : > { %v1906_v52 = vpop.permute.xlu1 %1905 }
 0x714   : > { %v6225_v55 = vadd.f32 %v1906_v52, %v1898_v49 }
 0x716   : > { %4462 = vtanh.f32 %v6225_v55 }
 0x717   : > { %v1878_v58 = vpop.permute.xlu1 %1877 }
 0x718   : > { %v6228_v61 = vadd.f32 %v1878_v58, %v1870_v57 }
 0x71a   : > { %4464 = vtanh.f32 %v6228_v61 }
 0x720   : > { %v4463_v62 = vpop.eup %4462 }
 0x721   : > { %1911 = vrot.lane.b32.xlu0 %v4463_v62, %s5329_s4 }
 0x724   : > { %v4465_v63 = vpop.eup %4464 }
 0x725   : > { %1883 = vrot.lane.b32.xlu1 %v4465_v63, %s5329_s4 }
 0x793   : > { %v1912_v0 = vpop.permute.xlu0 %1911 }
 0x794   : > { %v6233_v1 = vmul.f32 %v4459_v42, %v1912_v0 }
 0x796   : > { %v1974_v2 = vpack.c.bf16 %v6233_v1, %v6233_v1 }
 0x797   : > { %v1884_v4 = vpop.permute.xlu1 %1883 }
 0x798   : > { %v6237_v5 = vmul.f32 %v4461_v46, %v1884_v4  ;;  %1976 = vrot.lane.b32.xlu0 %v1974_v2, %s5330_s17 }
 0x79a   : > { %v1926_v7 = vpack.c.bf16 %v6237_v5, %v6237_v5 }
 0x79c   : > { %1928 = vrot.lane.b32.xlu1 %v1926_v7, %s5330_s17 }
 0x80a   : > { %v1977_v9 = vpop.permute.xlu0 %1976 }
 0x80b   : > { %4012 = vmatmul.mubr.msk.bf16.vlgmr.msra.gmra.mrb[4].mxu0 %vm1106_vm0, %v1977_v9 }
 0x80c   : > { %4024 = vmatpush3.bf16.msra.mxu0 %v6162_v20  ;;  %4027 = vmatprep.mubr.msk.bf16.mxu0 %vm5328_vm1, %v5327_v19 }
 0x80d   : > { %4025 = vmatprep.subr.bf16.mxu0 %v5327_v19 }
 0x80e   : > { %v1929_v10 = vpop.permute.xlu1 %1928 }
 0x80f   : > { %4004 = vmatmul.mubr.msk.bf16.vlgmr.msra.gmra.mrb[16].mxu1 %vm1106_vm0, %v1929_v10 }
 0x810   : > { %4016 = vmatpush3.bf16.msra.mxu1 %v6173_v59  ;;  %4026 = vmatpush3.bf16.msra.mxu0 %v6166_v21 }
 0x811   : > { %4017 = vmatprep.subr.bf16.mxu1 %v5327_v19  ;;  %4019 = vmatprep.mubr.msk.bf16.mxu1 %vm5328_vm1, %v5327_v19 }
 0x812   : > { %4039 = vmatprep.subr.bf16.mxu0 %v5327_v19 }
 0x814   : > { %4018 = vmatpush3.bf16.msra.mxu1 %v6178_v60 }
 0x815   : > { %4031 = vmatprep.subr.bf16.mxu1 %v5327_v19 }
 0x8de   : > { %v2015_v12 = vpop.f32.mrb[4].mxu0 }
 0x8df   : > { %v2021_v14 = vadd.f32 %v2015_v12, %v6209_v11  ;;  %v4013_v15 = vpop.f32.mrb[5].mxu0 }
 0x8e0   : > { %v2018_v17 = vpop.f32.mrb[6].mxu0 }
 0x8e1   : > { %4466 = vtanh.f32 %v2021_v14  ;;  %v4014_v18 = vpop.f32.mrb[7].mxu0  ;;  %v3762_v29 = vmul.f32 -1.442695, %v2021_v14 }
 0x8e2   : > { %v1967_v22 = vpop.f32.mrb[16].mxu1 }
 0x8e3   : > { %v1973_v23 = vadd.f32 %v1967_v22, %v6207_v8  ;;  %v4005_v24 = vpop.f32.mrb[17].mxu1 }
 0x8e4   : > { %v1970_v25 = vpop.f32.mrb[18].mxu1 }
 0x8e5   : > { %4468 = vtanh.f32 %v1973_v23  ;;  %v4006_v26 = vpop.f32.mrb[19].mxu1  ;;  %v3761_v11 = vmul.f32 -1.442695, %v1973_v23 }
 0x8e6   : > { %4470 = vpow2.f32 %v3762_v29 }
 0x8e7   : > { %4472 = vpow2.f32 %v3761_v11 }
 0x8eb   : > { %v4467_v27 = vpop.eup %4466 }
 0x8ec   : > { %2055 = vrot.lane.b32.xlu0 %v4467_v27, %s5329_s4 }
 0x8ef   : > { %v4469_v28 = vpop.eup %4468 }
 0x8f0   : > { %2031 = vrot.lane.b32.xlu1 %v4469_v28, %s5329_s4  ;;  %v4471_v30 = vpop.eup %4470 }
 0x8f1   : > { %v2049_v31 = vadd.f32 1.0, %v4471_v30  ;;  %v4473_v32 = vpop.eup %4472 }
 0x8f2   : > { %v2025_v33 = vadd.f32 1.0, %v4473_v32 }
 0x8f3   : > { %4474 = vrcp.f32 %v2049_v31 }
 0x8f4   : > { %4476 = vrcp.f32 %v2025_v33 }
 0x8fd   : > { %v4475_v8 = vpop.eup %4474 }
 0x8fe   : > { %v4477_v36 = vpop.eup %4476  ;;  %v2053_v39 = vmul.f32 %v4475_v8, %v6225_v55 }
 0x8ff   : > { %v2029_v42 = vmul.f32 %v4477_v36, %v6228_v61 }
 0x95e   : > { %v2056_v34 = vpop.permute.xlu0 %2055 }
 0x95f   : > { %v2058_v35 = vmul.f32 %v4475_v8, %v2056_v34 }
 0x961   : > { %2060 = vrot.lane.b32.xlu0 %v2058_v35, %s5330_s17 }
 0x962   : > { %v2032_v37 = vpop.permute.xlu1 %2031 }
 0x963   : > { %v2034_v38 = vmul.f32 %v4477_v36, %v2032_v37 }
 0x965   : > { %2036 = vrot.lane.b32.xlu1 %v2034_v38, %s5330_s17 }
 0x9d3   : > { %v2061_v40 = vpop.permute.xlu0 %2060 }
 0x9d4   : > { %v6264_v41 = vadd.f32 %v2061_v40, %v2053_v39 }
 0x9d6   : > { %4478 = vtanh.f32 %v6264_v41 }
 0x9d7   : > { %v2037_v43 = vpop.permute.xlu1 %2036 }
 0x9d8   : > { %v6268_v44 = vadd.f32 %v2037_v43, %v2029_v42 }
 0x9da   : > { %4480 = vtanh.f32 %v6268_v44 }
 0x9e0   : > { %v4479_v45 = vpop.eup %4478 }
 0x9e1   : > { %2066 = vrot.lane.b32.xlu0 %v4479_v45, %s5329_s4 }
 0x9e4   : > { %v4481_v46 = vpop.eup %4480 }
 0x9e5   : > { %2042 = vrot.lane.b32.xlu1 %v4481_v46, %s5329_s4 }
 0xa53   : > { %v2067_v47 = vpop.permute.xlu0 %2066 }
 0xa54   : > { %v6273_v48 = vmul.f32 %v4475_v8, %v2067_v47 }
 0xa56   : > { %v2130_v49 = vpack.c.bf16 %v6273_v48, %v6273_v48 }
 0xa57   : > { %v2043_v50 = vpop.permute.xlu1 %2042 }
 0xa58   : > { %v6277_v52 = vmul.f32 %v4477_v36, %v2043_v50  ;;  %2132 = vrot.lane.b32.xlu0 %v2130_v49, %s5330_s17 }
 0xa5a   : > { %v2082_v55 = vpack.c.bf16 %v6277_v52, %v6277_v52 }
 0xa5c   : > { %2084 = vrot.lane.b32.xlu1 %v2082_v55, %s5330_s17 }
 0xaca   : > { %v2133_v57 = vpop.permute.xlu0 %2132 }
 0xacb   : > { %4028 = vmatmul.mubr.msk.bf16.vlgmr.msra.gmra.mrb[8].mxu0 %vm1106_vm0, %v2133_v57 }
 0xacc   : > { %4040 = vmatpush3.bf16.msra.mxu0 %v6162_v20  ;;  %4043 = vmatprep.mubr.msk.bf16.mxu0 %vm5328_vm1, %v5327_v19 }
 0xacd   : > { %4041 = vmatprep.subr.bf16.mxu0 %v5327_v19 }
 0xace   : > { %v2085_v58 = vpop.permute.xlu1 %2084 }
 0xacf   : > { %4020 = vmatmul.mubr.msk.bf16.vlgmr.msra.gmra.mrb[20].mxu1 %vm1106_vm0, %v2085_v58 }
 0xad0   : > { %4032 = vmatpush3.bf16.msra.mxu1 %v6173_v59  ;;  %4042 = vmatpush3.bf16.msra.mxu0 %v6166_v21 }
 0xad1   : > { %4033 = vmatprep.subr.bf16.mxu1 %v5327_v19  ;;  %4035 = vmatprep.mubr.msk.bf16.mxu1 %vm5328_vm1, %v5327_v19 }
 0xad4   : > { %4034 = vmatpush3.bf16.msra.mxu1 %v6178_v60 }
 0xb9e   : > { %v2171_v20 = vpop.f32.mrb[8].mxu0 }
 0xb9f   : > { %v2177_v61 = vadd.f32 %v2171_v20, %v6213_v16  ;;  %v4029_v62 = vpop.f32.mrb[9].mxu0 }
 0xba0   : > { %v2174_v63 = vpop.f32.mrb[10].mxu0 }
 0xba1   : > { %4482 = vtanh.f32 %v2177_v61  ;;  %v4030_v0 = vpop.f32.mrb[11].mxu0  ;;  %v3766_v60 = vmul.f32 -1.442695, %v2177_v61 }
 0xba2   : > { %v2123_v2 = vpop.f32.mrb[20].mxu1 }
 0xba3   : > { %v2129_v4 = vadd.f32 %v2123_v2, %v6203_v3  ;;  %v4021_v59 = vpop.f32.mrb[21].mxu1 }
 0xba4   : > { %v2126_v7 = vpop.f32.mrb[22].mxu1 }
 0xba5   : > { %4484 = vtanh.f32 %v2129_v4  ;;  %v4022_v21 = vpop.f32.mrb[23].mxu1  ;;  %v3765_v16 = vmul.f32 -1.442695, %v2129_v4 }
 0xba6   : > { %4486 = vpow2.f32 %v3766_v60 }
 0xba7   : > { %4488 = vpow2.f32 %v3765_v16 }
 0xbab   : > { %v4483_v9 = vpop.eup %4482 }
 0xbac   : > { %2211 = vrot.lane.b32.xlu0 %v4483_v9, %s5329_s4 }
 0xbaf   : > { %v4485_v19 = vpop.eup %4484 }
 0xbb0   : > { %2187 = vrot.lane.b32.xlu1 %v4485_v19, %s5329_s4  ;;  %v4487_v10 = vpop.eup %4486 }
 0xbb1   : > { %v2205_v12 = vadd.f32 1.0, %v4487_v10  ;;  %v4489_v14 = vpop.eup %4488 }
 0xbb2   : > { %v2181_v15 = vadd.f32 1.0, %v4489_v14  ;;  %v4416_v14 = vld [vmem:[#allocation27] sm:$0xff]  }
 0xbb3   : > { %4490 = vrcp.f32 %v2205_v12  ;;  %4047 = vmatprep.subr.bf16.mxu1 %v4416_v14 }
 0xbb4   : > { %4492 = vrcp.f32 %v2181_v15  ;;  %v4417_v15 = vld [vmem:[#allocation27 + $0x8] sm:$0xff]  }
 0xbbd   : > { %v4491_v3 = vpop.eup %4490 }
 0xbbe   : > { %v4493_v22 = vpop.eup %4492  ;;  %v2209_v25 = vmul.f32 %v4491_v3, %v6264_v41 }
 0xbbf   : > { %v2185_v28 = vmul.f32 %v4493_v22, %v6268_v44 }
 0xc1e   : > { %v2212_v17 = vpop.permute.xlu0 %2211 }
 0xc1f   : > { %v2214_v18 = vmul.f32 %v4491_v3, %v2212_v17 }
 0xc21   : > { %2216 = vrot.lane.b32.xlu0 %v2214_v18, %s5330_s17 }
 0xc22   : > { %v2188_v23 = vpop.permute.xlu1 %2187 }
 0xc23   : > { %v2190_v24 = vmul.f32 %v4493_v22, %v2188_v23 }
 0xc25   : > { %2192 = vrot.lane.b32.xlu1 %v2190_v24, %s5330_s17 }
 0xc93   : > { %v2217_v26 = vpop.permute.xlu0 %2216 }
 0xc94   : > { %v2219_v27 = vadd.f32 %v2217_v26, %v2209_v25 }
 0xc96   : > { %4494 = vtanh.f32 %v2219_v27 }
 0xc97   : > { %v2193_v29 = vpop.permute.xlu1 %2192 }
 0xc98   : > { %v2195_v11 = vadd.f32 %v2193_v29, %v2185_v28 }
 0xc9a   : > { %4496 = vtanh.f32 %v2195_v11 }
 0xca0   : > { %v4495_v30 = vpop.eup %4494 }
 0xca1   : > { %2222 = vrot.lane.b32.xlu0 %v4495_v30, %s5329_s4 }
 0xca4   : > { %v4497_v31 = vpop.eup %4496 }
 0xca5   : > { %2198 = vrot.lane.b32.xlu1 %v4497_v31, %s5329_s4 }
 0xd13   : > { %v2223_v32 = vpop.permute.xlu0 %2222 }
 0xd14   : > { %v2225_v33 = vmul.f32 %v4491_v3, %v2223_v32 }
 0xd16   : > { %v2286_v8 = vpack.c.bf16 %v2225_v33, %v2225_v33 }
 0xd17   : > { %v2199_v34 = vpop.permute.xlu1 %2198 }
 0xd18   : > { %v2201_v35 = vmul.f32 %v4493_v22, %v2199_v34  ;;  %2288 = vrot.lane.b32.xlu0 %v2286_v8, %s5330_s17  ;;  %v4418_v22 = vld [vmem:[#allocation25] sm:$0xff]  }
 0xd1a   : > { %v2238_v36 = vpack.c.bf16 %v2201_v35, %v2201_v35 }
 0xd1c   : > { %2240 = vrot.lane.b32.xlu1 %v2238_v36, %s5330_s17 }
 0xd8a   : > { %v2289_v37 = vpop.permute.xlu0 %2288 }
 0xd8b   : > { %4044 = vmatmul.mubr.msk.bf16.vlgmr.msra.gmra.mrb[12].mxu0 %vm1106_vm0, %v2289_v37 }
 0xd8e   : > { %v2241_v38 = vpop.permute.xlu1 %2240 }
 0xd8f   : > { %4036 = vmatmul.mubr.msk.bf16.vlgmr.msra.gmra.mrb[24].mxu1 %vm1106_vm0, %v2241_v38 }
 0xd90   : > { %4048 = vmatpush3.bf16.msra.mxu1 %v4416_v14 }
 0xd91   : > { %4049 = vmatprep.subr.bf16.mxu1 %v4417_v15 }
 0xd94   : > { %4050 = vmatpush3.bf16.msra.mxu1 %v4417_v15 }
 0xd95   : > { %4055 = vmatprep.subr.bf16.mxu1 %v4418_v22 }
 0xe5e   : > { %v2327_v39 = vpop.f32.mrb[12].mxu0 }
 0xe5f   : > { %v2333_v40 = vadd.f32 %v2327_v39, %v6211_v13  ;;  %v4045_v41 = vpop.f32.mrb[13].mxu0  ;;  %v3779_v39 = vld [vmem:[#allocation28] ss:$0 sm:$0xff] }
 0xe60   : > { %v2330_v42 = vpop.f32.mrb[14].mxu0 }
 0xe61   : > { %4498 = vtanh.f32 %v2333_v40  ;;  %v4046_v43 = vpop.f32.mrb[15].mxu0  ;;  %v3770_v57 = vmul.f32 -1.442695, %v2333_v40 }
 0xe62   : > { %v2279_v44 = vpop.f32.mrb[24].mxu1 }
 0xe63   : > { %v2285_v45 = vadd.f32 %v2279_v44, %v6205_v6  ;;  %v4037_v46 = vpop.f32.mrb[25].mxu1 }
 0xe64   : > { %v2282_v47 = vpop.f32.mrb[26].mxu1 }
 0xe65   : > { %4500 = vtanh.f32 %v2285_v45  ;;  %v4038_v49 = vpop.f32.mrb[27].mxu1  ;;  %v3769_v13 = vmul.f32 -1.442695, %v2285_v45 }
 0xe66   : > { %4502 = vpow2.f32 %v3770_v57 }
 0xe67   : > { %4504 = vpow2.f32 %v3769_v13 }
 0xe6b   : > { %v4499_v50 = vpop.eup %4498 }
 0xe6c   : > { %2367 = vrot.lane.b32.xlu0 %v4499_v50, %s5329_s4 }
 0xe6f   : > { %v4501_v55 = vpop.eup %4500 }
 0xe70   : > { %2343 = vrot.lane.b32.xlu1 %v4501_v55, %s5329_s4  ;;  %v4503_v58 = vpop.eup %4502 }
 0xe71   : > { %v2361_v20 = vadd.f32 1.0, %v4503_v58  ;;  %v4505_v61 = vpop.eup %4504 }
 0xe72   : > { %v2337_v62 = vadd.f32 1.0, %v4505_v61 }
 0xe73   : > { %4506 = vrcp.f32 %v2361_v20 }
 0xe74   : > { %4508 = vrcp.f32 %v2337_v62 }
 0xe7d   : > { %v4507_v6 = vpop.eup %4506 }
 0xe7e   : > { %v4509_v2 = vpop.eup %4508  ;;  %v2365_v7 = vmul.f32 %v4507_v6, %v2219_v27 }
 0xe7f   : > { %v2341_v19 = vmul.f32 %v4509_v2, %v2195_v11 }
 0xede   : > { %v2368_v63 = vpop.permute.xlu0 %2367 }
 0xedf   : > { %v2370_v0 = vmul.f32 %v4507_v6, %v2368_v63 }
 0xee1   : > { %2372 = vrot.lane.b32.xlu0 %v2370_v0, %s5330_s17 }
 0xee2   : > { %v2344_v4 = vpop.permute.xlu1 %2343 }
 0xee3   : > { %v2346_v59 = vmul.f32 %v4509_v2, %v2344_v4 }
 0xee5   : > { %2348 = vrot.lane.b32.xlu1 %v2346_v59, %s5330_s17 }
 0xf53   : > { %v2373_v21 = vpop.permute.xlu0 %2372 }
 0xf54   : > { %v6315_v9 = vadd.f32 %v2373_v21, %v2365_v7 }
 0xf56   : > { %4510 = vtanh.f32 %v6315_v9 }
 0xf57   : > { %v2349_v60 = vpop.permute.xlu1 %2348 }
 0xf58   : > { %v6318_v16 = vadd.f32 %v2349_v60, %v2341_v19 }
 0xf5a   : > { %4512 = vtanh.f32 %v6318_v16 }
 0xf60   : > { %v4511_v10 = vpop.eup %4510 }
 0xf61   : > { %2378 = vrot.lane.b32.xlu0 %v4511_v10, %s5329_s4 }
 0xf64   : > { %v4513_v12 = vpop.eup %4512 }
 0xf65   : > { %2233 = vrot.lane.b32.xlu0 %v2225_v33, %s5330_s17  ;;  %2354 = vrot.lane.b32.xlu1 %v4513_v12, %s5329_s4  ;;  %v4419_v33 = vld [vmem:[#allocation25 + $0x8] sm:$0xff]   ;;  %s5334_s4 = smov [#allocation38]  }
 0xf69   : > { %1921 = vrot.lane.b32.xlu0 %v6233_v1, %s5330_s17 }
 0xf6d   : > { %1916 = vrot.lane.b32.xlu0 %v6237_v5, %s5330_s17 }
 0xf71   : > { %2227 = vrot.lane.b32.xlu0 %v2201_v35, %s5330_s17 }
 0xfd3   : > { %v2379_v3 = vpop.permute.xlu0 %2378 }
 0xfd4   : > { %v2381_v17 = vmul.f32 %v4507_v6, %v2379_v3 }
 0xfd6   : > { %2389 = vrot.lane.b32.xlu1 %v2381_v17, %s5330_s17  ;;  %v4420_v17 = vld [vmem:[#allocation33 + $0x8] sm:$0xff]  }
 0xfd7   : > { %v2234_v18 = vpop.permute.xlu0 %2233  ;;  %v2355_v5 = vpop.permute.xlu1 %2354  ;;  %4063 = vmatprep.subr.bf16.mxu0 %v4420_v17 }
 0xfd8   : > { %2237 = vst.msk [vmem:[#allocation3 + $0x8] sm:$0xff] %vm1106_vm0, %v2234_v18  ;;  %v2357_v24 = vmul.f32 %v4509_v2, %v2355_v5  ;;  %4064 = vmatpush3.bf16.msra.mxu0 %v4420_v17  ;;  %v6382_v18 = vld [vmem:[#allocation33] sm:$0xff]  }
 0xfd9   : > { %4069 = vmatprep.subr.bf16.mxu0 %v6382_v18 }
 0xfda   : > { %2077 = vrot.lane.b32.xlu1 %v6273_v48, %s5330_s17 }
 0xfdb   : > { %v1922_v1 = vpop.permute.xlu0 %1921 }
 0xfdc   : > { %1925 = vst.msk [vmem:[#allocation3 + $0x18] sm:$0xff] %vm1106_vm0, %v1922_v1 }
 0xfde   : > { %2071 = vrot.lane.b32.xlu1 %v6277_v52, %s5330_s17 }
 0xfdf   : > { %v1917_v23 = vpop.permute.xlu0 %1916  ;;  %v2412_v28 = vld [vmem:[#allocation3 + $0x8] sm:$0xff] }
 0xfe0   : > { %1919 = vst.msk [vmem:[#allocation2] sm:$0xff] %vm1106_vm0, %v1917_v23 }
 0xfe2   : > { %2383 = vrot.lane.b32.xlu1 %v2357_v24, %s5330_s17  ;;  %s5136_s17 = sshll.u32 %s5334_s4, 4  ;;  %s5137_s17 = int_to_ptr.vmem [resolvable:$false] %s5136_s17 }
 0xfe3   : > { %v2228_v25 = vpop.permute.xlu0 %2227  ;;  %v2414_v31 = vld [vmem:[#allocation3 + $0x18] sm:$0xff]  ;;  %p5139_p1 = scmp.lt.s32.totalorder %s6460_s11, %s5137_s17 }
 0xfe4   : > { %2231 = vst.msk [vmem:[#allocation2 + $0x10] sm:$0xff] %vm1106_vm0, %v2228_v25 }
 0xfe7   : > { %v2405_v8 = vld [vmem:[#allocation2] sm:$0xff] }
 0xfeb   : > { %v2407_v37 = vld [vmem:[#allocation2 + $0x10] sm:$0xff] }
0x1048   : > { %v2390_v26 = vpop.permute.xlu1 %2389 }
0x1049   : > { %2392 = vst.msk [vmem:[#allocation3] sm:$0xff] %vm1106_vm0, %v2390_v26  ;;  %2394 = vst.msk [vmem:[%s6341_s1 + $0x8] sm:$0xff] %vm1106_vm0, %v2390_v26 }
0x104c   : > { %v2078_v48 = vpop.permute.xlu1 %2077 }
0x104d   : > { %2081 = vst.msk [vmem:[#allocation3 + $0x10] sm:$0xff] %vm1106_vm0, %v2078_v48 }
0x1050   : > { %v2072_v52 = vpop.permute.xlu1 %2071  ;;  %v2411_v27 = vld [vmem:[#allocation3] sm:$0xff] }
0x1051   : > { %2075 = vst.msk [vmem:[#allocation2 + $0x8] sm:$0xff] %vm1106_vm0, %v2072_v52  ;;  %v2415_v29 = vpack.c.bf16 %v2412_v28, %v2411_v27 }
0x1053   : > { %4051 = vmatprep.mubr.msk.bf16.mxu1 %vm1106_vm0, %v2415_v29 }
0x1054   : > { %v2384_v11 = vpop.permute.xlu1 %2383  ;;  %v2413_v30 = vld [vmem:[#allocation3 + $0x10] sm:$0xff] }
0x1055   : > { %2387 = vst.msk [vmem:[#allocation2 + $0x18] sm:$0xff] %vm1106_vm0, %v2384_v11  ;;  %2393 = vst.msk [vmem:[%s6341_s1] sm:$0xff] %vm1106_vm0, %v2384_v11  ;;  %v2416_v32 = vpack.c.bf16 %v2414_v31, %v2413_v30  ;;  %v3780_v31 = vld [vmem:[#allocation30] ss:$0 sm:$0xff]  ;;  %s5138_s1 = scalar_lea.vmem %s5137_s17, 512 }
0x1056   : > { %p5140_p12 = scmp.lt.s32.totalorder %s5138_s1, %s5132_s3 }
0x1057   : > { %4052 = vmatmul.mubr.msk.bf16.vlgmr.msra.gmra.mrb[28].mxu1 %vm1106_vm0, %v2416_v32 }
0x1058   : > { %4056 = vmatpush3.bf16.msra.mxu1 %v4418_v22  ;;  %v2406_v34 = vld [vmem:[#allocation2 + $0x8] sm:$0xff]  ;;  %v4423_v22 = vld [vmem:[#allocation34 + $0x8] sm:$0xff]   ;;  %p5141_p10 = por %p5140_p12, %p5139_p1 }
0x1059   : > { %v2409_v35 = vpack.c.bf16 %v2406_v34, %v2405_v8  ;;  %4057 = vmatprep.subr.bf16.mxu1 %v4419_v33  ;;  %v3781_v8 = vld [vmem:[#allocation31] ss:$0 sm:$0xff] }
0x105a   : > { %p5142_p11 = pnand %p5141_p10, %p5135_p4 }
0x105b   : > { %4059 = vmatprep.mubr.msk.bf16.mxu1 %vm1106_vm0, %v2409_v35 }
0x105c   : > { %4058 = vmatpush3.bf16.msra.mxu1 %v4419_v33  ;;  %v2408_v36 = vld [vmem:[#allocation2 + $0x18] sm:$0xff] }
0x105d   : > { %v2410_v38 = vpack.c.bf16 %v2408_v36, %v2407_v37  ;;  %4075 = vmatprep.subr.bf16.mxu1 %v4423_v22 }
0x1063   : > { %4060 = vmatmul.mubr.msk.bf16.vlgmr.msra.gmra.mrb[28].mxu1 %vm1106_vm0, %v2410_v38 }
0x1064   : > { %4076 = vmatpush3.bf16.msra.mxu1 %v4423_v22 }
0x1136   : > { %v4061_v40 = vpop.f32.mrb[28].mxu1 }
0x1137   : > { %v2544_v41 = vpop.f32.mrb[29].mxu1  ;;  %v2568_v42 = vadd.f32 %v4061_v40, %v3779_v39 }
0x1138   : > { %v2566_v43 = vadd.f32 %v3779_v39, %v2544_v41  ;;  %v4062_v44 = vpop.f32.mrb[30].mxu1 }
0x1139   : > { %v2547_v45 = vpop.f32.mrb[31].mxu1  ;;  %v6358_v49 = vadd.f32 %v2568_v42, %v6133_v51  ;;  %v2569_v50 = vadd.f32 %v4062_v44, %v3779_v39 }
0x113a   : > { %v6355_v46 = vadd.f32 %v2566_v43, %v6136_v53  ;;  %v2567_v47 = vadd.f32 %v3779_v39, %v2547_v45 }
0x113b   : > { %v6368_v58 = vadd.f32 %v2569_v50, %v6138_v54  ;;  %v2580_v53 = vsel %vm1106_vm0, %v6358_v49, 0.0 }
0x113c   : > { %v6361_v55 = vadd.f32 %v2567_v47, %v6143_v56  ;;  %v2574_v57 = vsel %vm1106_vm0, %v6355_v46, 0.0 }
0x113d   : > { %2575 = vadd.xlane.f32.xlu0 %v2574_v57  ;;  %v2583_v51 = vsel %vm1106_vm0, %v6368_v58, 0.0 }
0x113e   : > { %v2577_v13 = vsel %vm1106_vm0, %v6361_v55, 0.0 }
0x113f   : > { %2578 = vadd.xlane.f32.xlu1 %v2577_v13 }
0x1141   : > { %2581 = vadd.xlane.f32.xlu0 %v2580_v53 }
0x1145   : > { %2584 = vadd.xlane.f32.xlu0 %v2583_v51 }
0x11ca   : > { %v2576_v56 = vpop.xlane.xlu0 %2575 }
0x11cb   : > { %v2586_v20 = vmul.f32 0.03125, %v2576_v56 }
0x11cc   : > { %v2579_v61 = vpop.xlane.xlu1 %2578 }
0x11cd   : > { %v2590_v62 = vsub.f32 %v6355_v46, %v2586_v20  ;;  %v2587_v6 = vmul.f32 0.03125, %v2579_v61 }
0x11ce   : > { %v2582_v63 = vpop.xlane.xlu0 %2581 }
0x11cf   : > { %v2591_v0 = vsub.f32 %v6361_v55, %v2587_v6  ;;  %v2588_v2 = vmul.f32 0.03125, %v2582_v63  ;;  %v2594_v54 = vmul.f32 %v2590_v62, %v2590_v62 }
0x11d1   : > { %v2592_v4 = vsub.f32 %v6358_v49, %v2588_v2  ;;  %v2598_v59 = vsel %vm1106_vm0, %v2594_v54, 0.0  ;;  %v2595_v7 = vmul.f32 %v2591_v0, %v2591_v0 }
0x11d2   : > { %2599 = vadd.xlane.f32.xlu0 %v2598_v59  ;;  %v2585_v21 = vpop.xlane.xlu0 %2584 }
0x11d3   : > { %v2589_v19 = vmul.f32 0.03125, %v2585_v21  ;;  %v2601_v60 = vsel %vm1106_vm0, %v2595_v7, 0.0  ;;  %v2596_v10 = vmul.f32 %v2592_v4, %v2592_v4 }
0x11d4   : > { %2602 = vadd.xlane.f32.xlu1 %v2601_v60 }
0x11d5   : > { %v2593_v12 = vsub.f32 %v6368_v58, %v2589_v19  ;;  %v2604_v14 = vsel %vm1106_vm0, %v2596_v10, 0.0 }
0x11d6   : > { %2605 = vadd.xlane.f32.xlu0 %v2604_v14 }
0x11d7   : > { %v2597_v15 = vmul.f32 %v2593_v12, %v2593_v12 }
0x11d9   : > { %v2607_v3 = vsel %vm1106_vm0, %v2597_v15, 0.0 }
0x11da   : > { %2608 = vadd.xlane.f32.xlu1 %v2607_v3 }
0x125f   : > { %v2600_v1 = vpop.xlane.xlu0 %2599 }
0x1260   : > { %v2610_v5 = vmul.f32 0.03125, %v2600_v1 }
0x1261   : > { %v2603_v23 = vpop.xlane.xlu1 %2602 }
0x1262   : > { %v2614_v24 = vadd.f32 1e-05, %v2610_v5  ;;  %v2611_v25 = vmul.f32 0.03125, %v2603_v23 }
0x1263   : > { %v2606_v26 = vpop.xlane.xlu0 %2605 }
0x1264   : > { %4514 = vrsqrt.f32 %v2614_v24  ;;  %v2615_v48 = vadd.f32 1e-05, %v2611_v25  ;;  %v2612_v52 = vmul.f32 0.03125, %v2606_v26 }
0x1266   : > { %4516 = vrsqrt.f32 %v2615_v48  ;;  %v2616_v27 = vadd.f32 1e-05, %v2612_v52 }
0x1267   : > { %v2609_v28 = vpop.xlane.xlu1 %2608 }
0x1268   : > { %4518 = vrsqrt.f32 %v2616_v27  ;;  %v2613_v29 = vmul.f32 0.03125, %v2609_v28  ;;  %v4424_v27 = vld [vmem:[#allocation34] sm:$0xff]  }
0x1269   : > { %4081 = vmatprep.subr.bf16.mxu1 %v4424_v27 }
0x126a   : > { %v2617_v11 = vadd.f32 1e-05, %v2613_v29 }
0x126c   : > { %4520 = vrsqrt.f32 %v2617_v11 }
0x126e   : > { %v4515_v30 = vpop.eup %4514 }
0x126f   : > { %v2622_v32 = vmul.f32 %v4515_v30, %v2590_v62 }
0x1270   : > { %v4517_v33 = vpop.eup %4516 }
0x1271   : > { %v2633_v34 = vmul.f32 %v3780_v31, %v2622_v32  ;;  %v2623_v35 = vmul.f32 %v4517_v33, %v2591_v0 }
0x1272   : > { %v4519_v36 = vpop.eup %4518 }
0x1273   : > { %v2634_v37 = vmul.f32 %v3780_v31, %v2623_v35  ;;  %v2624_v38 = vmul.f32 %v4519_v36, %v2592_v4  ;;  %v2644_v39 = vadd.f32 %v3781_v8, %v2633_v34 }
0x1275   : > { %v2645_v40 = vadd.f32 %v3781_v8, %v2634_v37  ;;  %v2652_v41 = vrot.slane %v2644_v39, 6  ;;  %v2635_v43 = vmul.f32 %v3780_v31, %v2624_v38 }
0x1276   : > { %v4521_v42 = vpop.eup %4520 }
0x1277   : > { %v2625_v44 = vmul.f32 %v4521_v42, %v2593_v12  ;;  %v2653_v45 = vrot.slane %v2645_v40, 6  ;;  %v6386_v47 = vsel %vm2660_vm2, 0.0, %v2652_v41  ;;  %v6388_v50 = vpack.c.bf16 %v2652_v41, %v2652_v41 }
0x1278   : > { %v6392_v57 = vpack.c.bf16 %v6386_v47, %v6386_v47  ;;  %v2646_v62 = vadd.f32 %v3781_v8, %v2635_v43 }
0x1279   : > { %v2636_v13 = vmul.f32 %v3780_v31, %v2625_v44  ;;  %v6395_v53 = vsel %vm2660_vm2, 0.0, %v2653_v45  ;;  %v3841_v51 = vpack.c.bf16 %v2653_v45, %v2653_v45  ;;  %v2706_v6 = vshll.u32 %v6388_v50, 16 }
0x127a   : > { %v3840_v56 = vpack.c.bf16 %v6395_v53, %v6395_v53  ;;  %v2697_v20 = vshrl.u32 %v6392_v57, 16  ;;  %v2700_v61 = vshll.u32 %v6392_v57, 16  ;;  %v2654_v60 = vrot.slane %v2646_v62, 6 }
0x127b   : > { %v2720_v4 = vshll.u32 %v3841_v51, 16  ;;  %v2647_v59 = vadd.f32 %v3781_v8, %v2636_v13  ;;  %v2708_v10 = vrot.slane %v2706_v6, 5  ;;  %v3028_v3 = vrot.slane %v3841_v51, 5  ;;  %v4422_v6 = vld [vmem:[#allocation33 + $0x10] sm:$0xff]  }
0x127c   : > { %v2699_v63 = vrot.slane %v2697_v20, 4  ;;  %v2702_v0 = vrot.slane %v2700_v61, 5  ;;  %v2711_v2 = vshrl.u32 %v3840_v56, 16  ;;  %v2714_v54 = vshll.u32 %v3840_v56, 16 }
0x127d   : > { %v2655_v12 = vrot.slane %v2647_v59, 6  ;;  %v2663_v17 = vsel %vm2660_vm2, 0.0, %v2654_v60  ;;  %v2722_v1 = vrot.slane %v2720_v4, 5  ;;  %v3807_v5 = vrot.slane %v3840_v56, 9 }
0x127e   : > { %v2703_v7 = vor.u32 %v2702_v0, %v2699_v63  ;;  %v2713_v21 = vrot.slane %v2711_v2, 4  ;;  %v2716_v19 = vrot.slane %v2714_v54, 5  ;;  %v3842_v24 = vpack.c.bf16 %v2663_v17, %v2663_v17 }
0x127f   : > { %v2664_v23 = vsel %vm2660_vm2, 0.0, %v2655_v12  ;;  %v3843_v26 = vpack.c.bf16 %v2654_v60, %v2654_v60  ;;  %v3845_v52 = vpack.c.bf16 %v2655_v12, %v2655_v12  ;;  %v3806_v28 = vrot.slane %v6392_v57, 9 }
0x1280   : > { %v2704_v14 = vrot.slane %v2703_v7, 4  ;;  %v2717_v15 = vor.u32 %v2716_v19, %v2713_v21  ;;  %v3844_v48 = vpack.c.bf16 %v2664_v23, %v2664_v23  ;;  %v3024_v29 = vrot.slane %v6388_v50, 5  ;;  %v4425_v21 = vld [vmem:[#allocation34 + $0x10] sm:$0xff]  }
0x1281   : > { %v2725_v11 = vshrl.u32 %v3842_v24, 16  ;;  %v2728_v30 = vshll.u32 %v3842_v24, 16  ;;  %v3029_v36 = vsel %vm6418_vm9, %v3807_v5, %v3028_v3  ;;  %v2734_v39 = vshll.u32 %v3843_v26, 16 }
0x1282   : > { %v2718_v25 = vrot.slane %v2717_v15, 4  ;;  %v2709_v31 = vsel %vm6405_vm8, %v2704_v14, %v2708_v10  ;;  %v2739_v8 = vshrl.u32 %v3844_v48, 16  ;;  %v2742_v34 = vshll.u32 %v3844_v48, 16 }
0x1283   : > { %v2727_v37 = vrot.slane %v2725_v11, 4  ;;  %v2730_v38 = vrot.slane %v2728_v30, 5  ;;  %v2748_v42 = vshll.u32 %v3845_v52, 16  ;;  %v3025_v44 = vsel %vm6418_vm9, %v3806_v28, %v3024_v29 }
0x1284   : > { %v2723_v32 = vsel %vm6405_vm8, %v2718_v25, %v2722_v1  ;;  %v2741_v40 = vrot.slane %v2739_v8, 4  ;;  %v2744_v41 = vrot.slane %v2742_v34, 5  ;;  %v3810_v50 = vcombine.low %v3025_v44, %v3029_v36 }
0x1285   : > { %v3790_v35 = vcombine.low %v2709_v31, %v2723_v32  ;;  %v2731_v43 = vor.u32 %v2730_v38, %v2727_v37  ;;  %v2736_v13 = vrot.slane %v2734_v39, 5  ;;  %v2750_v56 = vrot.slane %v2748_v42, 5 }
0x1286   : > { %v2745_v45 = vor.u32 %v2744_v41, %v2741_v40  ;;  %v3846_v63 = vpack.c.bf16 %v6395_v53, %v6386_v47  ;;  %v3809_v0 = vrot.slane %v3844_v48, 9  ;;  %v3036_v2 = vrot.slane %v3845_v52, 5 }
0x1287   : > { %2889 = vrot.lane.b32.xlu0 %v3790_v35, %s5331_s12  ;;  %4065 = vmatprep.mubr.msk.bf16.mxu0 %vm2767_vm6, %v3790_v35  ;;  %v2732_v57 = vrot.slane %v2731_v43, 4  ;;  %v3808_v54 = vrot.slane %v3842_v24, 9  ;;  %v3032_v4 = vrot.slane %v3843_v26, 5  ;;  %v3847_v59 = vpack.c.bf16 %v2664_v23, %v2663_v17 }
0x1288   : > { %v2746_v51 = vrot.slane %v2745_v45, 4  ;;  %v3037_v7 = vsel %vm6418_vm9, %v3809_v0, %v3036_v2 }
0x1289   : > { %v2737_v20 = vsel %vm6405_vm8, %v2732_v57, %v2736_v13  ;;  %v3033_v47 = vsel %vm6418_vm9, %v3808_v54, %v3032_v4 }
0x128a   : > { %v2751_v61 = vsel %vm6405_vm8, %v2746_v51, %v2750_v56  ;;  %v3811_v53 = vcombine.low %v3033_v47, %v3037_v7 }
0x128b   : > { %3115 = vrot.lane.b32.xlu0 %v3810_v50, %s5331_s12  ;;  %v3791_v62 = vcombine.low %v2737_v20, %v2751_v61 }
0x128d   : > { %2891 = vrot.lane.b32.xlu1 %v3791_v62, %s5331_s12  ;;  %4066 = vmatmul.mubr.msk.bf16.vlgmr.msra.gmra.mrb[16].mxu0 %vm2767_vm6, %v3791_v62 }
0x128e   : > { %4071 = vmatprep.mubr.msk.bf16.mxu0 %vm2767_vm6, %v3846_v63  ;;  %4070 = vmatpush3.bf16.msra.mxu0 %v6382_v18 }
0x128f   : > { %4087 = vmatprep.subr.bf16.mxu0 %v4422_v6 }
0x1291   : > { %2954 = vrot.lane.b32.xlu1 %v3846_v63, %s5331_s12 }
0x1295   : > { %2956 = vrot.lane.b32.xlu1 %v3847_v59, %s5331_s12 }
0x1299   : > { %3117 = vrot.lane.b32.xlu1 %v3811_v53, %s5331_s12  ;;  %4072 = vmatmul.mubr.msk.bf16.vlgmr.msra.gmra.mrb[16].mxu0 %vm2767_vm6, %v3847_v59 }
0x129a   : > { %4089 = vmatprep.mubr.msk.bf16.mxu0 %vm2767_vm6, %v3810_v50  ;;  %4088 = vmatpush3.bf16.msra.mxu0 %v4422_v6 }
0x12a5   : > { %4090 = vmatmul.mubr.msk.bf16.vlgmr.msra.gmra.mrb[16].mxu0 %vm2767_vm6, %v3811_v53 }
0x12f9   : > { %v2890_v18 = vpop.permute.xlu0 %2889 }
0x12fa   : > { %4077 = vmatprep.mubr.msk.bf16.mxu1 %vm2767_vm6, %v2890_v18 }
0x12fd   : > { %v3116_v12 = vpop.permute.xlu0 %3115 }
0x12ff   : > { %v2892_v19 = vpop.permute.xlu1 %2891 }
0x1300   : > { %4078 = vmatmul.mubr.msk.bf16.vlgmr.msra.gmra.mrb[32].mxu1 %vm2767_vm6, %v2892_v19 }
0x1301   : > { %4082 = vmatpush3.bf16.msra.mxu1 %v4424_v27 }
0x1302   : > { %4093 = vmatprep.subr.bf16.mxu1 %v4425_v21 }
0x1303   : > { %v2955_v60 = vpop.permute.xlu1 %2954 }
0x1304   : > { %4083 = vmatprep.mubr.msk.bf16.mxu1 %vm2767_vm6, %v2955_v60 }
0x1307   : > { %v2957_v10 = vpop.permute.xlu1 %2956 }
0x130b   : > { %v3118_v14 = vpop.permute.xlu1 %3117 }
0x130c   : > { %4084 = vmatmul.mubr.msk.bf16.vlgmr.msra.gmra.mrb[32].mxu1 %vm2767_vm6, %v2957_v10 }
0x130d   : > { %4094 = vmatpush3.bf16.msra.mxu1 %v4425_v21  ;;  %4095 = vmatprep.mubr.msk.bf16.mxu1 %vm2767_vm6, %v3116_v12 }
0x1318   : > { %4096 = vmatmul.mubr.msk.bf16.vlgmr.msra.gmra.mrb[32].mxu1 %vm2767_vm6, %v3118_v14 }
0x1378   : > { %v4091_v15 = vpop.f32.mrb[16].mxu0 }
0x1379   : > { %v3093_v3 = vpop.f32.mrb[17].mxu0 }
0x137a   : > { %v6455_v17 = vpop.f32.mrb[18].mxu0 }
0x137b   : > { %v3096_v22 = vpop.f32.mrb[19].mxu0 }
0x13eb   : > { %v4097_v1 = vpop.f32.mrb[32].mxu1 }
0x13ec   : > { %v3165_v5 = vpop.f32.mrb[33].mxu1 }
0x13ed   : > { %3188 = vrot.lane.b32.xlu0 %v3165_v5, %s5332_s2  ;;  %v4098_v23 = vpop.f32.mrb[34].mxu1 }
0x13ee   : > { %v3168_v24 = vpop.f32.mrb[35].mxu1 }
0x13ef   : > { %3190 = vrot.lane.b32.xlu1 %v3168_v24, %s5332_s2 }
0x13f1   : > { %3192 = vrot.lane.b32.xlu0 %v4097_v1, %s5332_s2 }
0x13f3   : > { %3194 = vrot.lane.b32.xlu1 %v4098_v23, %s5332_s2 }
0x13f5   : > { %2397 = vrot.lane.b32.xlu0 %v6318_v16, %s5333_s16 }
0x13f7   : > { %2399 = vrot.lane.b32.xlu1 %v6315_v9, %s5333_s16 }
0x13f8   : > { %5145 = shalt.err (!%p5142_p11)
}
0x13f9   : > { %s5146_s5 = scalar_lea.hbm %s6468_s19, 256  ;;  %s5150_s16 = scalar_lea.hbm %s6808_s28, 512 }
0x13fa   : > { %p5147_p6 = scmp.ne.s32.totalorder %s6468_s19, %s5146_s5  ;;  %p5151_p13 = scmp.lt.u32.totalorder %s6468_s19, %s6808_s28 }
0x13fb   : > { %p5152_p3 = scmp.lt.u32.totalorder %s5150_s16, %s5146_s5  ;;  %p5154_p7 = scmp.lt.u32.totalorder %s5146_s5, %s6468_s19 }
0x13fc   : > { %p5148_p2 = pnand %p5147_p6, %p6809_p8 }
0x13fd   : > { %p5153_p5 = por %p5152_p3, %p5151_p13 }
0x13fe   : > { %p5149_p9 = pneg %p5148_p2 }
0x13ff   : > { %p5155_p0 = por %p5154_p7, %p5153_p5 }
0x1401   : > { %p5156_p4 = pnand %p5155_p0, %p5149_p9 }
0x1403   : > { %5159 = shalt.err (!%p5156_p4)
}
0x1404   : > { %s5335_s24 = smov 128   ;;  %s5336_s3 = smov 256   ;;  %v3818_v9 = vld [vmem:[#allocation36] ss:$0 sm:$0xff] }
0x1405   : > { %s5337_s4 = smov 8   ;;  %s6810_s1 = sld [smem:[#allocation86_spill]] }
0x1406   : > { %4214 = dma.vmem_to_hbm [thread:$0]  (%p6809_p8), %s6460_s11, 256, %s6468_s19, %s6472_s7, %s5335_s24, %s5336_s3, %s5337_s4  }
0x1407   : > { %s1064_s11 = scalar_lea.vmem [#allocation40], %s6059_s27  ;;  %s5338_s2 = smov [#allocation40]  }
0x1408   : > { %s3305_s19 = sshll.u32 %s1064_s11, 4  ;;  %s5164_s16 = sshll.u32 %s5338_s2, 4  ;;  %s6516_s19 = int_to_ptr.vmem [resolvable:$true] %s3305_s19  ;;  %s5165_s16 = int_to_ptr.vmem [resolvable:$false] %s5164_s16 }
0x1409   : > { %s5160_s12 = scalar_lea.vmem %s6516_s19, 256  ;;  %s5166_s13 = scalar_lea.vmem %s5165_s16, 512 }
0x140a   : > { %p5161_p1 = scmp.ne.s32.totalorder %s6516_s19, %s5160_s12  ;;  %p5167_p11 = scmp.lt.s32.totalorder %s6516_s19, %s5165_s16 }
0x140b   : > { %s6524_s5 = scalar_lea.hbm %s6810_s1, %s3828_s18  ;;  %p5168_p6 = scmp.lt.s32.totalorder %s5166_s13, %s5160_s12 }
0x140c   : > { %p5162_p12 = pnand %p5161_p1, %p6809_p8 }
0x140d   : > { %p5169_p2 = por %p5168_p6, %p5167_p11 }
0x140e   : > { %p5163_p10 = pneg %p5162_p12 }
0x1410   : > { %p5170_p9 = pnand %p5169_p2, %p5163_p10 }
0x145f   : > { %v3189_v16 = vpop.permute.xlu0 %3188 }
0x1460   : > { %v3200_v25 = vsel %vm2767_vm6, %v3093_v3, %v3189_v16 }
0x1461   : > { %v6500_v26 = vadd.f32 %v3818_v9, %v3200_v25  ;;  %v3191_v48 = vpop.permute.xlu1 %3190 }
0x1462   : > { %v3201_v52 = vsel %vm2767_vm6, %v3096_v22, %v3191_v48 }
0x1463   : > { %v3819_v27 = vmul.f32 -1.442695, %v6500_v26  ;;  %v6504_v28 = vadd.f32 %v3818_v9, %v3201_v52  ;;  %v3193_v29 = vpop.permute.xlu0 %3192 }
0x1464   : > { %v3202_v11 = vsel %vm2767_vm6, %v4091_v15, %v3193_v29 }
0x1465   : > { %4522 = vpow2.f32 %v3819_v27  ;;  %v3820_v30 = vmul.f32 -1.442695, %v6504_v28  ;;  %v6508_v31 = vadd.f32 %v3818_v9, %v3202_v11  ;;  %v3195_v32 = vpop.permute.xlu1 %3194 }
0x1466   : > { %v3203_v33 = vsel %vm2767_vm6, %v6455_v17, %v3195_v32 }
0x1467   : > { %4524 = vpow2.f32 %v3820_v30  ;;  %v3821_v8 = vmul.f32 -1.442695, %v6508_v31  ;;  %v6514_v34 = vadd.f32 %v3818_v9, %v3203_v33  ;;  %v2398_v35 = vpop.permute.xlu0 %2397 }
0x1468   : > { %2403 = vst.msk [vmem:[%s1064_s11] sm:$0xff] %vm1106_vm0, %v2398_v35 }
0x1469   : > { %4526 = vpow2.f32 %v3821_v8  ;;  %v3822_v36 = vmul.f32 -1.442695, %v6514_v34  ;;  %v2400_v37 = vpop.permute.xlu1 %2399 }
0x146a   : > { %2404 = vst.msk [vmem:[%s1064_s11 + $0x8] sm:$0xff] %vm1106_vm0, %v2400_v37 }
0x146b   : > { %4528 = vpow2.f32 %v3822_v36 }
0x146c   : > { %5173 = shalt.err (!%p5170_p9)
}
0x146d   : > { %s5174_s18 = scalar_lea.hbm %s6524_s5, 256  ;;  %s5178_s27 = scalar_lea.hbm %s6810_s1, 512 }
0x146e   : > { %p5175_p13 = scmp.ne.s32.totalorder %s6524_s5, %s5174_s18  ;;  %p5179_p7 = scmp.lt.u32.totalorder %s6524_s5, %s6810_s1 }
0x146f   : > { %p5180_p0 = scmp.lt.u32.totalorder %s5178_s27, %s5174_s18  ;;  %p5182_p1 = scmp.lt.u32.totalorder %s5174_s18, %s6524_s5 }
0x1470   : > { %p5176_p3 = pnand %p5175_p13, %p6809_p8 }
0x1471   : > { %p5181_p4 = por %p5180_p0, %p5179_p7 }
0x1472   : > { %p5177_p5 = pneg %p5176_p3 }
0x1473   : > { %p5183_p12 = por %p5182_p1, %p5181_p4 }
0x1475   : > { %p5184_p10 = pnand %p5183_p12, %p5177_p5 }
0x1477   : > { %5187 = shalt.err (!%p5184_p10)
}
0x1478   : > { %4215 = dma.vmem_to_hbm [thread:$0]  (%p6809_p8), %s6516_s19, 256, %s6524_s5, %s6472_s7, %s5335_s24, %s5336_s3, %s5337_s4   ;;  %v4523_v38 = vpop.eup %4522 }
0x1479   : > { %v3227_v39 = vadd.f32 1.0, %v4523_v38  ;;  %v4525_v40 = vpop.eup %4524  ;;  %s1050_s7 = scalar_lea.vmem [#allocation37], %s3682_s8  ;;  %s3848_s3 = sshll.u32 %s6783_s9, 9 }
0x147a   : > { %v3228_v41 = vadd.f32 1.0, %v4525_v40  ;;  %v4527_v42 = vpop.eup %4526  ;;  %s3275_s19 = sshll.u32 %s1050_s7, 4  ;;  %s6811_s12 = sld [smem:[#allocation84_spill]]  ;;  %s6572_s19 = int_to_ptr.vmem [resolvable:$true] %s3275_s19 }
0x147b   : > { %4530 = vrcp.f32 %v3227_v39  ;;  %v3229_v43 = vadd.f32 1.0, %v4527_v42  ;;  %v4529_v44 = vpop.eup %4528  ;;  %s3252_s9 = scalar_lea.sflag [#allocation6], %s6045_s10  ;;  %s5188_s13 = scalar_lea.vmem %s6572_s19, 512 }
0x147c   : > { %4532 = vrcp.f32 %v3228_v41  ;;  %v3230_v45 = vadd.f32 1.0, %v4529_v44  ;;  %p5189_p11 = scmp.ne.s32.totalorder %s6572_s19, %s5188_s13  ;;  %s5339_s18 = smov [#allocation37]  }
0x147d   : > { %4534 = vrcp.f32 %v3229_v43  ;;  %s5192_s6 = sshll.u32 %s5339_s18, 4  ;;  %s5193_s6 = int_to_ptr.vmem [resolvable:$false] %s5192_s6 }
0x147e   : > { %4536 = vrcp.f32 %v3230_v45  ;;  %p5190_p6 = pnand %p5189_p11, %p6809_p8  ;;  %s5194_s11 = scalar_lea.vmem %s5193_s6, 1024 }
0x147f   : > { %p5195_p9 = scmp.lt.s32.totalorder %s6572_s19, %s5193_s6  ;;  %p5196_p13 = scmp.lt.s32.totalorder %s5194_s11, %s5188_s13 }
0x1480   : > { %s6570_s16 = scalar_lea.hbm %s6811_s12, %s3848_s3  ;;  %p5191_p2 = pneg %p5190_p6 }
0x1481   : > { %p5197_p3 = por %p5196_p13, %p5195_p9 }
0x1483   : > { %p5198_p5 = pnand %p5197_p3, %p5191_p2 }
0x1485   : > { %v4531_v50 = vpop.eup %4530 }
0x1486   : > { %v3239_v57 = vmul.f32 %v4531_v50, %v6500_v26  ;;  %v4533_v13 = vpop.eup %4532 }
0x1487   : > { %v3240_v56 = vmul.f32 %v4533_v13, %v6504_v28  ;;  %v4535_v20 = vpop.eup %4534 }
0x1488   : > { %v3243_v51 = vadd.f32 %v3239_v57, %v6355_v46  ;;  %v3241_v62 = vmul.f32 %v4535_v20, %v6508_v31  ;;  %v4537_v6 = vpop.eup %4536 }
0x1489   : > { %v3244_v61 = vadd.f32 %v3240_v56, %v6361_v55  ;;  %v3242_v63 = vmul.f32 %v4537_v6, %v6514_v34 }
0x148a   : > { %3247 = vst.msk [vmem:[%s1050_s7] sm:$0xff] %vm1106_vm0, %v3243_v51  ;;  %v3245_v46 = vadd.f32 %v3241_v62, %v6358_v49 }
0x148b   : > { %3248 = vst.msk [vmem:[%s1050_s7 + $0x8] sm:$0xff] %vm1106_vm0, %v3244_v61  ;;  %v3246_v0 = vadd.f32 %v3242_v63, %v6368_v58 }
0x148c   : > { %3249 = vst.msk [vmem:[%s1050_s7 + $0x10] sm:$0xff] %vm1106_vm0, %v3245_v46 }
0x148d   : > { %3250 = vst.msk [vmem:[%s1050_s7 + $0x18] sm:$0xff] %vm1106_vm0, %v3246_v0 }
0x148e   : > { %5201 = shalt.err (!%p5198_p5)
}
0x148f   : > { %s5202_s27 = scalar_lea.hbm %s6570_s16, 512  ;;  %s5206_s7 = scalar_lea.hbm %s6811_s12, 1024 }
0x1490   : > { %p5203_p7 = scmp.ne.s32.totalorder %s6570_s16, %s5202_s27  ;;  %p5207_p1 = scmp.lt.u32.totalorder %s6570_s16, %s6811_s12 }
0x1491   : > { %p5208_p12 = scmp.lt.u32.totalorder %s5206_s7, %s5202_s27  ;;  %p5210_p11 = scmp.lt.u32.totalorder %s5202_s27, %s6570_s16 }
0x1492   : > { %p5204_p0 = pnand %p5203_p7, %p6809_p8 }
0x1493   : > { %p5209_p10 = por %p5208_p12, %p5207_p1 }
0x1494   : > { %p5205_p4 = pneg %p5204_p0 }
0x1495   : > { %p5211_p6 = por %p5210_p11, %p5209_p10 }
0x1497   : > { %p5212_p2 = pnand %p5211_p6, %p5205_p4 }
0x1499   : > { %5215 = shalt.err (!%p5212_p2)
}
0x149a   : > { %4213 = dma.vmem_to_hbm [thread:$0]  (%p6809_p8), %s6572_s19, 512, %s6570_s16, %s3252_s9, %s5335_s24, %s5335_s24, %s5337_s4  }
0x149b PF: > { %s6812_s5 = sld [smem:[#allocation54_spill]]  ;;  %s6813_s13 = sld [smem:[#allocation62_spill]] }
0x149c   : > { %p6815_p13 = scmp.ge.s32.totalorder %s5298_s25, 2 }
0x14a1   : > { %s3320_s18 = sand.u32 1, %s6812_s5   ;;  %p6814_p9 = scmp.ne.s32.totalorder %s6813_s13, 0 }
0x14a2   : > { %s3321_s6 = scalar_lea.sflag [#allocation6], %s3320_s18 }
0x14a3   : > { %p4285_p3 = pnand %p6815_p13, %p6814_p9 }
0x14a5   : > { %5277 = dma.done.wait (!%p4285_p3), %s3321_s6, 512  }
0x14a6   : > { %5279 = vsyncadd (!%p4285_p3), %s3321_s6, 4294966784  ;;  %s6816_s0 = sadd.s32 4294967294, %s5298_s25  }
0x14a7   : > { %s3329_s11 = sand.u32 1, %s6816_s0  }
0x14a8   : > { %s3330_s27 = scalar_lea.sflag [#allocation39], %s3329_s11 }
0x14a9   : > { %5281 = dma.done.wait (!%p4285_p3), %s3330_s27, 512  }
0x14aa   : > { %5283 = vsyncadd (!%p4285_p3), %s3330_s27, 4294966784  ;;  %s6817_s25 = sld [smem:[#allocation58_spill]]  ;;  %s6818_s10 = sld [smem:[#allocation55_spill]] }
0x14ab   : > { %s6819_s24 = sld [smem:[#allocation59_spill]]  ;;  %s6820_s4 = smov %s5290_s30 }
0x14b0   : > { %p52_p8 = scmp.ge.s32.totalorder %s6817_s25, 4   ;;  %s6821_s30 = smov %s6818_s10 }
0x14b2   :  { %54 = sbr.rel (!%p52_p8) target bundleno = 43 (0x2b), region = 291 }
0x14b9   :  { %3344 = vsyncpa [#allocation5], 1 }
0x14ba   :  { %3346 = vsyncpa [#allocation5 + $0x1], 1 }
0x14bb   :  { %3347 = vsyncpa [#allocation8], 1 }
0x14bc   :  { %3349 = vsyncpa [#allocation8 + $0x1], 1 }
0x14bd   :  { %3350 = vsyncpa [#allocation11], 1 }
0x14be   :  { %3351 = vsyncpa [#allocation14], 1 }
0x14bf   :  { %3352 = vsyncpa [#allocation17], 1 }
0x14c0   :  { %3353 = vsyncpa [#allocation20], 1 }
0x14c1   :  { %3354 = vsyncpa [#allocation23], 1 }
0x14c2   :  { %3355 = vsyncpa [#allocation26], 1 }
0x14c3   :  { %3356 = vsyncpa [#allocation29], 1 }
0x14c4   :  { %3357 = vsyncpa [#allocation32], 1 }
0x14c5   :  { %3358 = vsyncpa [#allocation35], 1 }
0x14c6   :  { %3359 = vsyncpa [#allocation6], 1 }
0x14c7   :  { %3361 = vsyncpa [#allocation6 + $0x1], 1 }
0x14c8   :  { %3362 = vsyncpa [#allocation39], 1 }
0x14c9   :  { %3364 = vsyncpa [#allocation39 + $0x1], 1 }

// kernel: _lambda_.7
= control target key start
LH: loop header
LB: loop body
LE: loop exit
PB: predicated region body
PF: predicated region fallthrough
CT: control target
= control target key end

     0   :  { %v5507_v1 = vmov 0   ;;  %vm93_vm0 = vcmask 523264   ;;  %v38_v39 = vlaneseq  ;;  %vm418_vm1 = vcmask 1041409   ;;  %s5500_s1 = inlined_call_operand.vmem [shape: bf16[2,64,256], index: 1, kind: input, shape index: {}]   ;;  %s5501_s0 = inlined_call_operand.vmem [shape: f32[2,2,8,64], index: 0, kind: input, shape index: {}]   ;;  %s5502_s2 = inlined_call_operand.vmem [shape: bf16[2,64,256], index: 2, kind: input, shape index: {}]   ;;  %s5503_s3 = inlined_call_operand.vmem [shape: f32[2,1,256], index: 3, kind: input, shape index: {}]   ;;  %s5504_s4 = inlined_call_operand.vmem [shape: f32[2,1,64], index: 4, kind: input, shape index: {}]   ;;  %s5505_s5 = inlined_call_operand.vmem [shape: f32[2,1,64], index: 5, kind: input, shape index: {}]   ;;  %s5506_s6 = inlined_call_operand.vmem [shape: f32[16,2,64], index: 6, kind: output, shape index: {}]  }
   0x1   :  { %v3638_v0 = vld [vmem:[%s5500_s1 + $0x4] ss:$8 sps:$4 sm:$0xff]   ;;  %129 = vmatprep.mubr.bf16.mxu0 %v5507_v1  ;;  %255 = vmatprep.mubr.bf16.mxu1 %v5507_v1  ;;  %v3640_v2 = vld [vmem:[%s5500_s1] ss:$8 sps:$4 sm:$0xff]   ;;  %v3641_v3 = vld [vmem:[%s5500_s1 + $0x14] ss:$8 sps:$4 sm:$0xff]  }
   0x2   :  { %97 = vmatprep.subr.bf16.mxu0 %v3638_v0  ;;  %v3643_v4 = vld [vmem:[%s5500_s1 + $0x44] ss:$8 sps:$4 sm:$0xff]   ;;  %v3645_v5 = vld [vmem:[%s5500_s1 + $0x10] ss:$8 sps:$4 sm:$0xff]   ;;  %v3646_v6 = vld [vmem:[%s5500_s1 + $0x40] ss:$8 sps:$4 sm:$0xff]  }
   0x3   :  { %98 = vmatpush1.bf16.msra.mxu0 %v3640_v2  ;;  %v3647_v7 = vld [vmem:[%s5500_s1 + $0x24] ss:$8 sps:$4 sm:$0xff]   ;;  %223 = vmatprep.subr.bf16.mxu1 %v3643_v4  ;;  %v3649_v8 = vld [vmem:[%s5500_s1 + $0x54] ss:$8 sps:$4 sm:$0xff]   ;;  %v3652_v9 = vld [vmem:[%s5500_s1 + $0x50] ss:$8 sps:$4 sm:$0xff]  }
   0x4   :  { %99 = vmatprep.subr.bf16.mxu0 %v3641_v3  ;;  %224 = vmatpush1.bf16.msra.mxu1 %v3646_v6  ;;  %v3651_v10 = vld [vmem:[%s5500_s1 + $0x20] ss:$8 sps:$4 sm:$0xff]   ;;  %v3653_v11 = vld [vmem:[%s5500_s1 + $0x34] ss:$8 sps:$4 sm:$0xff]   ;;  %v3655_v12 = vld [vmem:[%s5500_s1 + $0x64] ss:$8 sps:$4 sm:$0xff]  }
   0x5   :  { %225 = vmatprep.subr.bf16.mxu1 %v3649_v8  ;;  %v3657_v13 = vld [vmem:[%s5500_s1 + $0x30] ss:$8 sps:$4 sm:$0xff]   ;;  %v3658_v14 = vld [vmem:[%s5500_s1 + $0x60] ss:$8 sps:$4 sm:$0xff]   ;;  %v3659_v17 = vld [vmem:[%s5500_s1 + $0x74] ss:$8 sps:$4 sm:$0xff]  }
   0x6   :  { %v24_v15 = vld [vmem:[%s5501_s0] sm:$0xff]  ;;  %v25_v16 = vld [vmem:[%s5501_s0 + $0x8] sm:$0xff]  ;;  %v3663_v20 = vld [vmem:[%s5500_s1 + $0x70] ss:$8 sps:$4 sm:$0xff]   ;;  %v39_v43 = vshrl.u32 %v38_v39, 7  ;;  %vm423_vm2 = vcmask 517120  }
   0x7   :  { %100 = vmatpush1.bf16.msra.mxu0 %v3645_v5  ;;  %v4219_v18 = vld [vmem:[%s5502_s2 + $0x4] ss:$8 sps:$4 sm:$0xff]   ;;  %v3634_v19 = vpack.c.bf16 %v25_v16, %v24_v15  ;;  %v3446_v21 = vld [vmem:[%s5501_s0 + $0x10] sm:$0xff]  ;;  %v4230_v22 = vld [vmem:[%s5502_s2] ss:$8 sps:$4 sm:$0xff]   ;;  %vm834_vm3 = vcmask 1042434  }
   0x8   :  { %101 = vmatprep.subr.bf16.mxu0 %v3647_v7  ;;  %226 = vmatpush1.bf16.msra.mxu1 %v3652_v9  ;;  %v4235_v23 = vld [vmem:[%s5502_s2 + $0x44] ss:$8 sps:$4 sm:$0xff]   ;;  %v3447_v24 = vld [vmem:[%s5501_s0 + $0x18] sm:$0xff]  ;;  %v4255_v28 = vld [vmem:[%s5502_s2 + $0x40] ss:$8 sps:$4 sm:$0xff]   ;;  %v40_v49 = vsub.s32 0, %v39_v43 }
   0x9   :  { %227 = vmatprep.subr.bf16.mxu1 %v3655_v12  ;;  %v4244_v25 = vld [vmem:[%s5502_s2 + $0x14] ss:$8 sps:$4 sm:$0xff]   ;;  %v3635_v26 = vpack.c.bf16 %v3447_v24, %v3446_v21  ;;  %v4250_v27 = vld [vmem:[%s5502_s2 + $0x10] ss:$8 sps:$4 sm:$0xff]   ;;  %v4268_v30 = vld [vmem:[%s5502_s2 + $0x24] ss:$8 sps:$4 sm:$0xff]  }
   0xa   :  { %v4262_v29 = vld [vmem:[%s5502_s2 + $0x54] ss:$8 sps:$4 sm:$0xff]   ;;  %v4276_v31 = vld [vmem:[%s5502_s2 + $0x50] ss:$8 sps:$4 sm:$0xff]   ;;  %v4284_v32 = vld [vmem:[%s5502_s2 + $0x20] ss:$8 sps:$4 sm:$0xff]  }
   0xb   :  { %102 = vmatpush1.bf16.msra.mxu0 %v3651_v10  ;;  %v4289_v33 = vld [vmem:[%s5502_s2 + $0x64] ss:$8 sps:$4 sm:$0xff]   ;;  %v4295_v34 = vld [vmem:[%s5502_s2 + $0x34] ss:$8 sps:$4 sm:$0xff]   ;;  %v4301_v35 = vld [vmem:[%s5502_s2 + $0x60] ss:$8 sps:$4 sm:$0xff]  }
   0xc   :  { %103 = vmatprep.subr.bf16.mxu0 %v3653_v11  ;;  %228 = vmatpush1.bf16.msra.mxu1 %v3658_v14  ;;  %v4308_v36 = vld [vmem:[%s5502_s2 + $0x30] ss:$8 sps:$4 sm:$0xff]   ;;  %v4313_v37 = vld [vmem:[%s5502_s2 + $0x74] ss:$8 sps:$4 sm:$0xff]   ;;  %v36_v50 = vld [vmem:[%s5503_s3] sm:$0x3] }
   0xd   :  { %229 = vmatprep.subr.bf16.mxu1 %v3659_v17  ;;  %v4320_v38 = vld [vmem:[%s5502_s2 + $0x70] ss:$8 sps:$4 sm:$0xff]   ;;  %v3456_v51 = vld [vmem:[%s5503_s3 + $0x2] sm:$0x3]  ;;  %v41_v52 = vrot.slane %v36_v50, %v40_v49  ;;  %v44_v63 = vsub.s32 1, %v39_v43  ;;  %s4127_s3 = smov 64  }
   0xe   :  { %v168_v53 = vrot.slane %v3456_v51, %v40_v49  ;;  %vm839_vm4 = vcmask 518145   ;;  %vm1214_vm5 = vcmask 1043459   ;;  %vm1219_vm6 = vcmask 519170  }
   0xf   :  { %104 = vmatpush1.bf16.msra.mxu0 %v3657_v13  ;;  %v45_v12 = vrot.slane %v36_v50, %v44_v63  ;;  %v172_v15 = vrot.slane %v3456_v51, %v44_v63  ;;  %vm1597_vm7 = vcmask 1044484   ;;  %vm1602_vm8 = vcmask 520195  }
  0x10   :  { %318 = vmatprep.subr.bf16.mxu0 %v4219_v18  ;;  %230 = vmatpush1.bf16.msra.mxu1 %v3663_v20  ;;  %vm1981_vm9 = vcmask 1045509   ;;  %vm1986_vm10 = vcmask 521220   ;;  %vm2365_vm11 = vcmask 1046534   ;;  %vm2370_vm12 = vcmask 522245  }
  0x11   :  { %536 = vmatprep.subr.bf16.mxu1 %v4235_v23  ;;  %vm2749_vm13 = vcmask 1047559   ;;  %vm2754_vm14 = vcmask 523270   ;;  %vm3143_vm15 = vcmask 516096  }
  0x12   :  { %3445 = vmatmul.mubr.msk.bf16.vlgmr.msra.gmra.mrb[0].mxu0 %vm93_vm0, %v3634_v19 }
  0x13   :  { %319 = vmatpush1.bf16.msra.mxu0 %v4230_v22  ;;  %350 = vmatprep.mubr.bf16.mxu0 %v5507_v1 }
  0x14   :  { %320 = vmatprep.subr.bf16.mxu0 %v4244_v25  ;;  %3466 = vmatmul.mubr.msk.bf16.vlgmr.msra.gmra.mrb[0].mxu1 %vm93_vm0, %v3635_v26 }
  0x15   :  { %537 = vmatpush1.bf16.msra.mxu1 %v4255_v28  ;;  %568 = vmatprep.mubr.bf16.mxu1 %v5507_v1 }
  0x16   :  { %538 = vmatprep.subr.bf16.mxu1 %v4262_v29 }
  0x17   :  { %321 = vmatpush1.bf16.msra.mxu0 %v4250_v27 }
  0x18   :  { %322 = vmatprep.subr.bf16.mxu0 %v4268_v30 }
  0x19   :  { %539 = vmatpush1.bf16.msra.mxu1 %v4276_v31 }
  0x1a   :  { %540 = vmatprep.subr.bf16.mxu1 %v4289_v33 }
  0x1b   :  { %323 = vmatpush1.bf16.msra.mxu0 %v4284_v32 }
  0x1c   :  { %324 = vmatprep.subr.bf16.mxu0 %v4295_v34 }
  0x1d   :  { %541 = vmatpush1.bf16.msra.mxu1 %v4301_v35 }
  0x1e   :  { %542 = vmatprep.subr.bf16.mxu1 %v4313_v37 }
  0x1f   :  { %325 = vmatpush1.bf16.msra.mxu0 %v4308_v36 }
  0x20   :  { %728 = vmatprep.subr.bf16.mxu0 %v4219_v18 }
  0x21   :  { %543 = vmatpush1.bf16.msra.mxu1 %v4320_v38 }
  0x22   :  { %351 = vmatmul.mubr.bf16.vlgmr.msra.gmra.mrb[4].mxu0 %v5507_v1  ;;  %918 = vmatprep.subr.bf16.mxu1 %v4235_v23 }
  0x23   :  { %729 = vmatpush1.bf16.msra.mxu0 %v4230_v22  ;;  %760 = vmatprep.mubr.bf16.mxu0 %v5507_v1 }
  0x24   :  { %730 = vmatprep.subr.bf16.mxu0 %v4244_v25  ;;  %569 = vmatmul.mubr.bf16.vlgmr.msra.gmra.mrb[4].mxu1 %v5507_v1 }
  0x25   :  { %919 = vmatpush1.bf16.msra.mxu1 %v4255_v28  ;;  %950 = vmatprep.mubr.bf16.mxu1 %v5507_v1 }
  0x26   :  { %920 = vmatprep.subr.bf16.mxu1 %v4262_v29 }
  0x27   :  { %731 = vmatpush1.bf16.msra.mxu0 %v4250_v27 }
  0x28   :  { %732 = vmatprep.subr.bf16.mxu0 %v4268_v30 }
  0x29   :  { %921 = vmatpush1.bf16.msra.mxu1 %v4276_v31 }
  0x2a   :  { %922 = vmatprep.subr.bf16.mxu1 %v4289_v33 }
  0x2b   :  { %733 = vmatpush1.bf16.msra.mxu0 %v4284_v32 }
  0x2c   :  { %734 = vmatprep.subr.bf16.mxu0 %v4295_v34 }
  0x2d   :  { %923 = vmatpush1.bf16.msra.mxu1 %v4301_v35 }
  0x2e   :  { %924 = vmatprep.subr.bf16.mxu1 %v4313_v37 }
  0x2f   :  { %735 = vmatpush1.bf16.msra.mxu0 %v4308_v36 }
  0x30   :  { %1106 = vmatprep.subr.bf16.mxu0 %v4219_v18 }
  0x31   :  { %925 = vmatpush1.bf16.msra.mxu1 %v4320_v38 }
  0x32   :  { %1298 = vmatprep.subr.bf16.mxu1 %v4235_v23 }
  0xe5   :  { %v131_v40 = vpop.f32.mrb[0].mxu0 }
  0xe6   :  { %v133_v41 = vpop.f32.mrb[1].mxu0  ;;  %v4353_v54 = vadd.f32 %v131_v40, %v41_v52 }
  0xe7   :  { %v135_v42 = vpop.f32.mrb[2].mxu0  ;;  %v257_v45 = vpop.f32.mrb[0].mxu1  ;;  %v4365_v16 = vadd.f32 %v133_v41, %v45_v12 }
  0xe8   :  { %v137_v44 = vpop.f32.mrb[3].mxu0  ;;  %v259_v46 = vpop.f32.mrb[1].mxu1  ;;  %v4355_v56 = vadd.f32 %v135_v42, %v41_v52  ;;  %v4357_v57 = vadd.f32 %v257_v45, %v168_v53 }
  0xe9   :  { %v261_v47 = vpop.f32.mrb[2].mxu1  ;;  %v4367_v19 = vadd.f32 %v137_v44, %v45_v12  ;;  %v4369_v20 = vadd.f32 %v259_v46, %v172_v15 }
  0xea   :  { %v263_v48 = vpop.f32.mrb[3].mxu1  ;;  %v4360_v61 = vadd.f32 %v261_v47, %v168_v53 }
  0xeb   :  { %v4372_v24 = vadd.f32 %v263_v48, %v172_v15 }
  0xf5   :  { %v352_v55 = vpop.f32.mrb[4].mxu0 }
  0xf6   :  { %v361_v58 = vrot.slane %v352_v55, 1  ;;  %v367_v59 = vadd.f32 %v352_v55, %v4353_v54  ;;  %v354_v60 = vpop.f32.mrb[5].mxu0 }
  0xf7   :  { %v356_v62 = vpop.f32.mrb[6].mxu0  ;;  %v570_v4 = vpop.f32.mrb[4].mxu1  ;;  %v362_v17 = vrot.slane %v354_v60, 1  ;;  %v368_v21 = vadd.f32 %v354_v60, %v4365_v16 }
  0xf8   :  { %v369_v0 = vadd.f32 %v361_v58, %v4355_v56  ;;  %v3483_v2 = vmul.f32 -1.442695, %v367_v59  ;;  %v357_v3 = vpop.f32.mrb[7].mxu0  ;;  %v579_v5 = vrot.slane %v570_v4, 1  ;;  %v572_v6 = vpop.f32.mrb[5].mxu1  ;;  %v585_v8 = vadd.f32 %v570_v4, %v4357_v57 }
  0xf9   :  { %v574_v9 = vpop.f32.mrb[6].mxu1  ;;  %v580_v26 = vrot.slane %v572_v6, 1  ;;  %v370_v40 = vadd.f32 %v362_v17, %v4367_v19  ;;  %v586_v41 = vadd.f32 %v572_v6, %v4369_v20  ;;  %v3485_v3 = vmul.f32 -1.442695, %v368_v21 }
  0xfa   :  { %3686 = vpow2.f32 %v3483_v2  ;;  %v3484_v7 = vmul.f32 -1.442695, %v369_v0  ;;  %v587_v10 = vadd.f32 %v579_v5, %v4360_v61  ;;  %v575_v11 = vpop.f32.mrb[7].mxu1  ;;  %v3497_v13 = vmul.f32 -1.442695, %v585_v8 }
  0xfb   :  { %v588_v44 = vadd.f32 %v580_v26, %v4372_v24  ;;  %v3486_v4 = vmul.f32 -1.442695, %v370_v40  ;;  %v3499_v5 = vmul.f32 -1.442695, %v586_v41 }
  0xfc   :  { %3688 = vpow2.f32 %v3484_v7  ;;  %v3498_v14 = vmul.f32 -1.442695, %v587_v10 }
  0xfd   :  { %3690 = vpow2.f32 %v3497_v13  ;;  %v3500_v6 = vmul.f32 -1.442695, %v588_v44 }
  0xfe   :  { %3692 = vpow2.f32 %v3498_v14 }
  0xff   :  { %3694 = vtanh.f32 %v368_v21 }
 0x104   :  { %v3687_v39 = vpop.eup %3686 }
 0x105   :  { %v377_v42 = vadd.f32 1.0, %v3687_v39 }
 0x106   :  { %v3689_v43 = vpop.eup %3688 }
 0x107   :  { %v378_v45 = vadd.f32 1.0, %v3689_v43  ;;  %3696 = vrcp.f32 %v377_v42  ;;  %v3691_v46 = vpop.eup %3690 }
 0x108   :  { %3698 = vtanh.f32 %v370_v40  ;;  %v3693_v47 = vpop.eup %3692  ;;  %v595_v49 = vadd.f32 1.0, %v3691_v46 }
 0x109   :  { %3700 = vrcp.f32 %v378_v45  ;;  %v596_v48 = vadd.f32 1.0, %v3693_v47  ;;  %v3695_v50 = vpop.eup %3694 }
 0x10a   :  { %3702 = vtanh.f32 %v586_v41 }
 0x10b   :  { %3704 = vtanh.f32 %v588_v44 }
 0x10c   :  { %3706 = vrcp.f32 %v595_v49 }
 0x10d   :  { %3708 = vrcp.f32 %v596_v48 }
 0x10e   :  { %3710 = vpow2.f32 %v3485_v3 }
 0x10f   :  { %3712 = vpow2.f32 %v3486_v4 }
 0x110   :  { %3714 = vpow2.f32 %v3499_v5 }
 0x111   :  { %v3697_v51 = vpop.eup %3696  ;;  %3716 = vpow2.f32 %v3500_v6 }
 0x112   :  { %v3699_v52 = vpop.eup %3698  ;;  %v399_v53 = vmul.f32 %v3697_v51, %v3695_v50  ;;  %v397_v11 = vmul.f32 0.0, %v3697_v51 }
 0x113   :  { %v3701_v55 = vpop.eup %3700 }
 0x114   :  { %v3703_v58 = vpop.eup %3702  ;;  %403 = vrot.lane.b32.xlu1 %v399_v53, %s4127_s3  ;;  %v400_v59 = vmul.f32 %v3701_v55, %v3699_v52  ;;  %v398_v17 = vmul.f32 0.0, %v3701_v55 }
 0x115   :  { %v3705_v60 = vpop.eup %3704 }
 0x116   :  { %v3707_v62 = vpop.eup %3706  ;;  %405 = vrot.lane.b32.xlu0 %v400_v59, %s4127_s3 }
 0x117   :  { %v3709_v63 = vpop.eup %3708  ;;  %v617_v0 = vmul.f32 %v3707_v62, %v3703_v58  ;;  %v615_v42 = vmul.f32 0.0, %v3707_v62 }
 0x118   :  { %v618_v2 = vmul.f32 %v3709_v63, %v3705_v60  ;;  %v3711_v7 = vpop.eup %3710  ;;  %v616_v41 = vmul.f32 0.0, %v3709_v63 }
 0x119   :  { %621 = vrot.lane.b32.xlu1 %v617_v0, %s4127_s3  ;;  %v3713_v8 = vpop.eup %3712  ;;  %v391_v9 = vadd.f32 1.0, %v3711_v7 }
 0x11a   :  { %623 = vrot.lane.b32.xlu0 %v618_v2, %s4127_s3  ;;  %v3715_v10 = vpop.eup %3714  ;;  %v392_v13 = vadd.f32 1.0, %v3713_v8 }
 0x11b   :  { %v3717_v12 = vpop.eup %3716  ;;  %3718 = vrcp.f32 %v391_v9  ;;  %v609_v21 = vadd.f32 1.0, %v3715_v10 }
 0x11c   :  { %v610_v39 = vadd.f32 1.0, %v3717_v12 }
 0x125   :  { %v3719_v47 = vpop.eup %3718 }
 0x186   :  { %v404_v14 = vpop.permute.xlu1 %403 }
 0x187   :  { %v4381_v15 = vadd.f32 %v404_v14, %v397_v11 }
 0x188   :  { %v406_v26 = vpop.permute.xlu0 %405 }
 0x189   :  { %3720 = vtanh.f32 %v4381_v15  ;;  %v4384_v40 = vadd.f32 %v406_v26, %v398_v17 }
 0x18a   :  { %3722 = vrcp.f32 %v392_v13 }
 0x18b   :  { %3724 = vtanh.f32 %v4384_v40  ;;  %v622_v43 = vpop.permute.xlu1 %621 }
 0x18c   :  { %3726 = vrcp.f32 %v609_v21  ;;  %v4387_v45 = vadd.f32 %v622_v43, %v615_v42  ;;  %v624_v44 = vpop.permute.xlu0 %623 }
 0x18d   :  { %3728 = vrcp.f32 %v610_v39  ;;  %v4389_v46 = vadd.f32 %v624_v44, %v616_v41 }
 0x18e   :  { %3730 = vtanh.f32 %v4387_v45 }
 0x18f   :  { %3732 = vtanh.f32 %v4389_v46 }
 0x193   :  { %v3721_v49 = vpop.eup %3720 }
 0x194   :  { %v3723_v48 = vpop.eup %3722  ;;  %v4393_v50 = vmul.f32 %v3721_v49, %v3719_v47 }
 0x195   :  { %v3725_v51 = vpop.eup %3724 }
 0x196   :  { %v3727_v52 = vpop.eup %3726  ;;  %v4395_v53 = vmul.f32 %v3725_v51, %v3723_v48  ;;  %v714_v59 = vpack.c.bf16 %v4393_v50, %v4393_v50 }
 0x197   :  { %v3729_v55 = vpop.eup %3728 }
 0x198   :  { %v3731_v58 = vpop.eup %3730  ;;  %v715_v60 = vpack.c.bf16 %v4395_v53, %v4395_v53  ;;  %v718_v3 = vunpack.c.l.b16 %v714_v59 }
 0x199   :  { %v3733_v62 = vpop.eup %3732  ;;  %v4401_v63 = vmul.f32 %v3731_v58, %v3727_v52 }
 0x19a   :  { %v719_v0 = vunpack.c.l.b16 %v715_v60  ;;  %v4403_v2 = vmul.f32 %v3733_v62, %v3729_v55 }
 0x19b   :  { %v904_v5 = vpack.c.bf16 %v4401_v63, %v4401_v63 }
 0x19c   :  { %v720_v4 = vrot.slane %v719_v0, 7  ;;  %v905_v6 = vpack.c.bf16 %v4403_v2, %v4403_v2 }
 0x19d   :  { %v908_v10 = vunpack.c.l.b16 %v904_v5 }
 0x19e   :  { %v721_v7 = vsel %vm418_vm1, %v720_v4, %v718_v3  ;;  %v909_v8 = vunpack.c.l.b16 %v905_v6 }
 0x19f   :  { %v722_v9 = vpack.c.b16 %v721_v7, %v721_v7 }
 0x1a0   :  { %v910_v11 = vrot.slane %v909_v8, 7 }
 0x1a1   :  { %723 = vrot.lane.b32.xlu0 %v722_v9, %s4127_s3 }
 0x1a2   :  { %v911_v12 = vsel %vm418_vm1, %v910_v11, %v908_v10 }
 0x1a3   :  { %v912_v13 = vpack.c.b16 %v911_v12, %v911_v12 }
 0x1a5   :  { %913 = vrot.lane.b32.xlu1 %v912_v13, %s4127_s3 }
 0x213   :  { %v724_v14 = vpop.permute.xlu0 %723 }
 0x214   :  { %3506 = vmatmul.mubr.msk.bf16.vlgmr.msra.gmra.mrb[8].mxu0 %vm93_vm0, %v724_v14 }
 0x215   :  { %1107 = vmatpush1.bf16.msra.mxu0 %v4230_v22  ;;  %1138 = vmatprep.mubr.bf16.mxu0 %v5507_v1 }
 0x216   :  { %1108 = vmatprep.subr.bf16.mxu0 %v4244_v25 }
 0x217   :  { %v914_v17 = vpop.permute.xlu1 %913 }
 0x218   :  { %3514 = vmatmul.mubr.msk.bf16.vlgmr.msra.gmra.mrb[8].mxu1 %vm93_vm0, %v914_v17 }
 0x219   :  { %1109 = vmatpush1.bf16.msra.mxu0 %v4250_v27  ;;  %1299 = vmatpush1.bf16.msra.mxu1 %v4255_v28 }
 0x21a   :  { %1110 = vmatprep.subr.bf16.mxu0 %v4268_v30  ;;  %1300 = vmatprep.subr.bf16.mxu1 %v4262_v29 }
 0x21b   :  { %1330 = vmatprep.mubr.bf16.mxu1 %v5507_v1 }
 0x21d   :  { %1111 = vmatpush1.bf16.msra.mxu0 %v4284_v32  ;;  %1301 = vmatpush1.bf16.msra.mxu1 %v4276_v31 }
 0x21e   :  { %1112 = vmatprep.subr.bf16.mxu0 %v4295_v34  ;;  %1302 = vmatprep.subr.bf16.mxu1 %v4289_v33 }
 0x221   :  { %1113 = vmatpush1.bf16.msra.mxu0 %v4308_v36  ;;  %1303 = vmatpush1.bf16.msra.mxu1 %v4301_v35 }
 0x222   :  { %1304 = vmatprep.subr.bf16.mxu1 %v4313_v37  ;;  %1489 = vmatprep.subr.bf16.mxu0 %v4219_v18 }
 0x225   :  { %1305 = vmatpush1.bf16.msra.mxu1 %v4320_v38 }
 0x226   :  { %1682 = vmatprep.subr.bf16.mxu1 %v4235_v23 }
 0x2e7   :  { %v762_v21 = vpop.f32.mrb[8].mxu0 }
 0x2e8   :  { %v771_v26 = vrot.slane %v762_v21, 7  ;;  %v779_v39 = vadd.f32 %v762_v21, %v4355_v56  ;;  %v764_v42 = vpop.f32.mrb[9].mxu0 }
 0x2e9   :  { %v766_v43 = vpop.f32.mrb[10].mxu0  ;;  %v772_v3 = vrot.slane %v764_v42, 7  ;;  %v780_v4 = vadd.f32 %v764_v42, %v4367_v19 }
 0x2ea   :  { %v777_v41 = vadd.f32 %v771_v26, %v4353_v54  ;;  %v3508_v44 = vmul.f32 -1.442695, %v779_v39  ;;  %v767_v47 = vpop.f32.mrb[11].mxu0  ;;  %v810_v39 = vrot.slane %v4384_v40, 7 }
 0x2eb   :  { %v952_v49 = vpop.f32.mrb[8].mxu1  ;;  %v778_v7 = vadd.f32 %v772_v3, %v4365_v16 }
 0x2ec   :  { %v3507_v48 = vmul.f32 -1.442695, %v777_v41  ;;  %3734 = vpow2.f32 %v3508_v44  ;;  %v961_v51 = vrot.slane %v952_v49, 7  ;;  %v969_v52 = vadd.f32 %v952_v49, %v4360_v61  ;;  %v954_v55 = vpop.f32.mrb[9].mxu1 }
 0x2ed   :  { %v956_v58 = vpop.f32.mrb[10].mxu1  ;;  %v962_v5 = vrot.slane %v954_v55, 7  ;;  %v970_v12 = vadd.f32 %v954_v55, %v4372_v24  ;;  %v809_v41 = vrot.slane %v4381_v15, 7  ;;  %v3509_v15 = vmul.f32 -1.442695, %v778_v7 }
 0x2ee   :  { %3736 = vpow2.f32 %v3507_v48  ;;  %v967_v59 = vadd.f32 %v961_v51, %v4357_v57  ;;  %v3516_v60 = vmul.f32 -1.442695, %v969_v52  ;;  %v957_v62 = vpop.f32.mrb[11].mxu1  ;;  %v1000_v58 = vrot.slane %v4389_v46, 7 }
 0x2ef   :  { %v968_v10 = vadd.f32 %v962_v5, %v4369_v20 }
 0x2f0   :  { %v3515_v0 = vmul.f32 -1.442695, %v967_v59  ;;  %3738 = vpow2.f32 %v3516_v60  ;;  %v999_v60 = vrot.slane %v4387_v45, 7  ;;  %v3518_v45 = vmul.f32 -1.442695, %v970_v12 }
 0x2f1   :  { %v3517_v46 = vmul.f32 -1.442695, %v968_v10 }
 0x2f2   :  { %3740 = vpow2.f32 %v3515_v0 }
 0x2f3   :  { %3742 = vtanh.f32 %v780_v4 }
 0x2f6   :  { %v3735_v6 = vpop.eup %3734 }
 0x2f7   :  { %v788_v8 = vadd.f32 1.0, %v3735_v6  ;;  %v3510_v6 = vmul.f32 -1.442695, %v780_v4 }
 0x2f8   :  { %v3737_v9 = vpop.eup %3736 }
 0x2f9   :  { %v787_v11 = vadd.f32 1.0, %v3737_v9  ;;  %3744 = vrcp.f32 %v788_v8 }
 0x2fa   :  { %3746 = vtanh.f32 %v778_v7  ;;  %v3739_v13 = vpop.eup %3738 }
 0x2fb   :  { %3748 = vrcp.f32 %v787_v11  ;;  %v978_v17 = vadd.f32 1.0, %v3739_v13 }
 0x2fc   :  { %v3741_v14 = vpop.eup %3740  ;;  %3750 = vtanh.f32 %v968_v10 }
 0x2fd   :  { %v977_v21 = vadd.f32 1.0, %v3741_v14  ;;  %3752 = vtanh.f32 %v970_v12  ;;  %v3743_v26 = vpop.eup %3742 }
 0x2fe   :  { %3754 = vrcp.f32 %v978_v17 }
 0x2ff   :  { %3756 = vrcp.f32 %v977_v21 }
 0x300   :  { %3758 = vpow2.f32 %v3509_v15 }
 0x301   :  { %3760 = vpow2.f32 %v3510_v6 }
 0x302   :  { %3762 = vpow2.f32 %v3517_v46 }
 0x303   :  { %v3745_v42 = vpop.eup %3744  ;;  %3764 = vpow2.f32 %v3518_v45 }
 0x304   :  { %v3747_v43 = vpop.eup %3746  ;;  %v816_v44 = vmul.f32 %v3745_v42, %v3743_v26  ;;  %v814_v47 = vmul.f32 %v3745_v42, %v810_v39 }
 0x305   :  { %v3749_v49 = vpop.eup %3748 }
 0x306   :  { %v3751_v48 = vpop.eup %3750  ;;  %v815_v51 = vmul.f32 %v3749_v49, %v3747_v43  ;;  %v813_v52 = vmul.f32 %v3749_v49, %v809_v41 }
 0x307   :  { %v3753_v55 = vpop.eup %3752 }
 0x308   :  { %v3755_v59 = vpop.eup %3754  ;;  %819 = vrot.lane.b32.xlu0 %v815_v51, %s4127_s3 }
 0x309   :  { %v3757_v62 = vpop.eup %3756  ;;  %v1006_v40 = vmul.f32 %v3755_v59, %v3753_v55  ;;  %v1004_v0 = vmul.f32 %v3755_v59, %v1000_v58 }
 0x30a   :  { %v1005_v3 = vmul.f32 %v3757_v62, %v3751_v48  ;;  %v1003_v5 = vmul.f32 %v3757_v62, %v999_v60  ;;  %v3759_v8 = vpop.eup %3758 }
 0x30b   :  { %v3761_v9 = vpop.eup %3760  ;;  %v801_v11 = vadd.f32 1.0, %v3759_v8 }
 0x30c   :  { %1009 = vrot.lane.b32.xlu1 %v1005_v3, %s4127_s3  ;;  %821 = vrot.lane.b32.xlu0 %v816_v44, %s4127_s3  ;;  %v3763_v13 = vpop.eup %3762  ;;  %v802_v17 = vadd.f32 1.0, %v3761_v9 }
 0x30d   :  { %3766 = vrcp.f32 %v801_v11  ;;  %v991_v26 = vadd.f32 1.0, %v3763_v13  ;;  %v3765_v39 = vpop.eup %3764 }
 0x30e   :  { %v992_v42 = vadd.f32 1.0, %v3765_v39 }
 0x310   :  { %1011 = vrot.lane.b32.xlu1 %v1006_v40, %s4127_s3 }
 0x317   :  { %v3767_v44 = vpop.eup %3766 }
 0x37a   :  { %v820_v14 = vpop.permute.xlu0 %819 }
 0x37b   :  { %v4449_v21 = vadd.f32 %v820_v14, %v813_v52 }
 0x37d   :  { %3768 = vtanh.f32 %v4449_v21 }
 0x37e   :  { %v1010_v4 = vpop.permute.xlu1 %1009  ;;  %v822_v7 = vpop.permute.xlu0 %821  ;;  %3770 = vrcp.f32 %v802_v17 }
 0x37f   :  { %v4452_v10 = vadd.f32 %v1010_v4, %v1003_v5  ;;  %v4454_v12 = vadd.f32 %v822_v7, %v814_v47  ;;  %3772 = vrcp.f32 %v991_v26 }
 0x381   :  { %3774 = vtanh.f32 %v4452_v10 }
 0x382   :  { %3776 = vtanh.f32 %v4454_v12  ;;  %v1012_v43 = vpop.permute.xlu1 %1011 }
 0x383   :  { %v4458_v41 = vadd.f32 %v1012_v43, %v1004_v0  ;;  %3778 = vrcp.f32 %v992_v42 }
 0x385   :  { %3780 = vtanh.f32 %v4458_v41 }
 0x387   :  { %v3769_v49 = vpop.eup %3768 }
 0x388   :  { %v4461_v48 = vmul.f32 %v3769_v49, %v3767_v44  ;;  %v3771_v51 = vpop.eup %3770 }
 0x389   :  { %v3773_v52 = vpop.eup %3772 }
 0x38a   :  { %v1092_v47 = vpack.c.bf16 %v4461_v48, %v4461_v48 }
 0x38b   :  { %v3775_v55 = vpop.eup %3774 }
 0x38c   :  { %v3777_v58 = vpop.eup %3776  ;;  %v4465_v59 = vmul.f32 %v3775_v55, %v3773_v52  ;;  %v1096_v62 = vunpack.c.l.b16 %v1092_v47 }
 0x38d   :  { %v4467_v60 = vmul.f32 %v3777_v58, %v3771_v51  ;;  %v3779_v40 = vpop.eup %3778 }
 0x38e   :  { %v1284_v0 = vpack.c.bf16 %v4465_v59, %v4465_v59  ;;  %v1098_v45 = vrot.slane %v1096_v62, 1 }
 0x38f   :  { %v3781_v3 = vpop.eup %3780  ;;  %v1093_v5 = vpack.c.bf16 %v4467_v60, %v4467_v60 }
 0x390   :  { %v4473_v15 = vmul.f32 %v3781_v3, %v3779_v40  ;;  %v1288_v6 = vunpack.c.l.b16 %v1284_v0 }
 0x391   :  { %v1097_v46 = vunpack.c.l.b16 %v1093_v5 }
 0x392   :  { %v1285_v8 = vpack.c.bf16 %v4473_v15, %v4473_v15  ;;  %v1290_v14 = vrot.slane %v1288_v6, 1 }
 0x393   :  { %v1099_v9 = vsel %vm418_vm1, %v1097_v46, %v1098_v45 }
 0x394   :  { %v1100_v11 = vpack.c.b16 %v1099_v9, %v1099_v9  ;;  %v1289_v13 = vunpack.c.l.b16 %v1285_v8 }
 0x396   :  { %1101 = vrot.lane.b32.xlu0 %v1100_v11, %s4127_s3  ;;  %v1291_v17 = vsel %vm418_vm1, %v1289_v13, %v1290_v14 }
 0x397   :  { %v1292_v26 = vpack.c.b16 %v1291_v17, %v1291_v17 }
 0x399   :  { %1293 = vrot.lane.b32.xlu1 %v1292_v26, %s4127_s3 }
 0x408   :  { %v1102_v39 = vpop.permute.xlu0 %1101 }
 0x409   :  { %3524 = vmatmul.mubr.msk.bf16.vlgmr.msra.gmra.mrb[12].mxu0 %vm93_vm0, %v1102_v39 }
 0x40a   :  { %1490 = vmatpush1.bf16.msra.mxu0 %v4230_v22  ;;  %1521 = vmatprep.mubr.bf16.mxu0 %v5507_v1 }
 0x40b   :  { %v1294_v4 = vpop.permute.xlu1 %1293  ;;  %1491 = vmatprep.subr.bf16.mxu0 %v4244_v25 }
 0x40c   :  { %3532 = vmatmul.mubr.msk.bf16.vlgmr.msra.gmra.mrb[12].mxu1 %vm93_vm0, %v1294_v4 }
 0x40d   :  { %1683 = vmatpush1.bf16.msra.mxu1 %v4255_v28  ;;  %1714 = vmatprep.mubr.bf16.mxu1 %v5507_v1 }
 0x40e   :  { %1492 = vmatpush1.bf16.msra.mxu0 %v4250_v27  ;;  %1684 = vmatprep.subr.bf16.mxu1 %v4262_v29 }
 0x40f   :  { %1493 = vmatprep.subr.bf16.mxu0 %v4268_v30 }
 0x411   :  { %1685 = vmatpush1.bf16.msra.mxu1 %v4276_v31 }
 0x412   :  { %1494 = vmatpush1.bf16.msra.mxu0 %v4284_v32  ;;  %1686 = vmatprep.subr.bf16.mxu1 %v4289_v33 }
 0x413   :  { %1495 = vmatprep.subr.bf16.mxu0 %v4295_v34 }
 0x415   :  { %1687 = vmatpush1.bf16.msra.mxu1 %v4301_v35 }
 0x416   :  { %1496 = vmatpush1.bf16.msra.mxu0 %v4308_v36  ;;  %1688 = vmatprep.subr.bf16.mxu1 %v4313_v37 }
 0x417   :  { %1873 = vmatprep.subr.bf16.mxu0 %v4219_v18 }
 0x419   :  { %1689 = vmatpush1.bf16.msra.mxu1 %v4320_v38 }
 0x41a   :  { %2066 = vmatprep.subr.bf16.mxu1 %v4235_v23 }
 0x4dc   :  { %v1140_v22 = vpop.f32.mrb[12].mxu0 }
 0x4dd   :  { %v1149_v25 = vrot.slane %v1140_v22, 6  ;;  %v1151_v27 = vrot.slane %v1140_v22, 7  ;;  %v1142_v28 = vpop.f32.mrb[13].mxu0 }
 0x4de   :  { %v1144_v29 = vpop.f32.mrb[14].mxu0  ;;  %v1150_v40 = vrot.slane %v1142_v28, 6  ;;  %v1152_v0 = vrot.slane %v1142_v28, 7 }
 0x4df   :  { %v1157_v30 = vadd.f32 %v1149_v25, %v4353_v54  ;;  %v1159_v31 = vadd.f32 %v1151_v27, %v4355_v56  ;;  %v1145_v7 = vpop.f32.mrb[15].mxu0  ;;  %v1332_v42 = vpop.f32.mrb[12].mxu1  ;;  %v1189_v27 = vrot.slane %v4449_v21, 7  ;;  %v1190_v29 = vrot.slane %v4454_v12, 7 }
 0x4e0   :  { %v1341_v43 = vrot.slane %v1332_v42, 6  ;;  %v1343_v44 = vrot.slane %v1332_v42, 7  ;;  %v1334_v49 = vpop.f32.mrb[13].mxu1  ;;  %v1158_v3 = vadd.f32 %v1150_v40, %v4365_v16  ;;  %v1160_v5 = vadd.f32 %v1152_v0, %v4367_v19 }
 0x4e1   :  { %v3525_v51 = vmul.f32 -1.442695, %v1157_v30  ;;  %v3526_v18 = vmul.f32 -1.442695, %v1159_v31  ;;  %v1336_v47 = vpop.f32.mrb[14].mxu1  ;;  %v1342_v6 = vrot.slane %v1334_v49, 6 }
 0x4e2   :  { %v1349_v52 = vadd.f32 %v1341_v43, %v4357_v57  ;;  %v1351_v23 = vadd.f32 %v1343_v44, %v4360_v61  ;;  %v1337_v55 = vpop.f32.mrb[15].mxu1  ;;  %v1344_v46 = vrot.slane %v1334_v49, 7 }
 0x4e3   :  { %3782 = vpow2.f32 %v3525_v51  ;;  %v1350_v13 = vadd.f32 %v1342_v6, %v4369_v20  ;;  %v1381_v51 = vrot.slane %v4452_v10, 7 }
 0x4e4   :  { %3784 = vpow2.f32 %v3526_v18  ;;  %v3533_v58 = vmul.f32 -1.442695, %v1349_v52  ;;  %v3534_v62 = vmul.f32 -1.442695, %v1351_v23  ;;  %v1352_v14 = vadd.f32 %v1344_v46, %v4372_v24 }
 0x4e5   :  { %v1382_v52 = vrot.slane %v4458_v41, 7  ;;  %v3535_v40 = vmul.f32 -1.442695, %v1350_v13 }
 0x4e6   :  { %3786 = vpow2.f32 %v3533_v58  ;;  %v3527_v58 = vmul.f32 -1.442695, %v1158_v3  ;;  %v3536_v10 = vmul.f32 -1.442695, %v1352_v14 }
 0x4e7   :  { %3788 = vpow2.f32 %v3534_v62  ;;  %v3528_v62 = vmul.f32 -1.442695, %v1160_v5 }
 0x4e8   :  { %3790 = vtanh.f32 %v1158_v3 }
 0x4e9   :  { %3792 = vtanh.f32 %v1160_v5 }
 0x4ed   :  { %v3783_v45 = vpop.eup %3782 }
 0x4ee   :  { %v3785_v8 = vpop.eup %3784  ;;  %v1167_v9 = vadd.f32 1.0, %v3783_v45 }
 0x4ef   :  { %v1168_v11 = vadd.f32 1.0, %v3785_v8 }
 0x4f0   :  { %3794 = vrcp.f32 %v1167_v9  ;;  %v3787_v17 = vpop.eup %3786 }
 0x4f1   :  { %3796 = vrcp.f32 %v1168_v11  ;;  %v3789_v26 = vpop.eup %3788  ;;  %v1359_v39 = vadd.f32 1.0, %v3787_v17 }
 0x4f2   :  { %3798 = vtanh.f32 %v1350_v13  ;;  %v1360_v4 = vadd.f32 1.0, %v3789_v26  ;;  %v3791_v22 = vpop.eup %3790 }
 0x4f3   :  { %3800 = vtanh.f32 %v1352_v14  ;;  %v3793_v25 = vpop.eup %3792 }
 0x4f4   :  { %3802 = vrcp.f32 %v1359_v39 }
 0x4f5   :  { %3804 = vrcp.f32 %v1360_v4 }
 0x4f6   :  { %3806 = vpow2.f32 %v3527_v58 }
 0x4f7   :  { %3808 = vpow2.f32 %v3528_v62 }
 0x4f8   :  { %3810 = vpow2.f32 %v3535_v40 }
 0x4f9   :  { %3812 = vpow2.f32 %v3536_v10 }
 0x4fa   :  { %v3795_v28 = vpop.eup %3794 }
 0x4fb   :  { %v3797_v30 = vpop.eup %3796  ;;  %v1195_v31 = vmul.f32 %v3795_v28, %v3791_v22  ;;  %v1193_v7 = vmul.f32 %v3795_v28, %v1189_v27 }
 0x4fc   :  { %v1196_v42 = vmul.f32 %v3797_v30, %v3793_v25  ;;  %v1194_v43 = vmul.f32 %v3797_v30, %v1190_v29  ;;  %v3799_v44 = vpop.eup %3798 }
 0x4fd   :  { %1199 = vrot.lane.b32.xlu0 %v1195_v31, %s4127_s3  ;;  %v3801_v49 = vpop.eup %3800 }
 0x4fe   :  { %1201 = vrot.lane.b32.xlu1 %v1196_v42, %s4127_s3  ;;  %v3803_v18 = vpop.eup %3802 }
 0x4ff   :  { %v3805_v21 = vpop.eup %3804  ;;  %v1387_v47 = vmul.f32 %v3803_v18, %v3799_v44  ;;  %v1385_v23 = vmul.f32 %v3803_v18, %v1381_v51 }
 0x500   :  { %v1388_v12 = vmul.f32 %v3805_v21, %v3801_v49  ;;  %v1386_v55 = vmul.f32 %v3805_v21, %v1382_v52  ;;  %v3807_v0 = vpop.eup %3806 }
 0x501   :  { %1391 = vrot.lane.b32.xlu0 %v1387_v47, %s4127_s3  ;;  %v3809_v6 = vpop.eup %3808  ;;  %v1181_v41 = vadd.f32 1.0, %v3807_v0 }
 0x502   :  { %1393 = vrot.lane.b32.xlu1 %v1388_v12, %s4127_s3  ;;  %v1182_v46 = vadd.f32 1.0, %v3809_v6  ;;  %v3811_v45 = vpop.eup %3810 }
 0x503   :  { %v3813_v8 = vpop.eup %3812  ;;  %3814 = vrcp.f32 %v1181_v41  ;;  %v1373_v3 = vadd.f32 1.0, %v3811_v45 }
 0x504   :  { %3816 = vrcp.f32 %v1182_v46  ;;  %v1374_v26 = vadd.f32 1.0, %v3813_v8  ;;  %v4553_v8 = vld [vmem:[%s5502_s2] ss:$8 sps:$4 sm:$0xff]  }
 0x50d   :  { %v3815_v22 = vpop.eup %3814 }
 0x50e   :  { %v3817_v25 = vpop.eup %3816 }
 0x56f   :  { %v1200_v9 = vpop.permute.xlu0 %1199 }
 0x570   :  { %v1202_v11 = vpop.permute.xlu1 %1201  ;;  %v4517_v17 = vadd.f32 %v1200_v9, %v1193_v7  ;;  %v4560_v9 = vld [vmem:[%s5502_s2 + $0x14] ss:$8 sps:$4 sm:$0xff]  }
 0x571   :  { %v4519_v5 = vadd.f32 %v1202_v11, %v1194_v43 }
 0x572   :  { %3818 = vtanh.f32 %v4517_v17 }
 0x573   :  { %3820 = vtanh.f32 %v4519_v5  ;;  %v1392_v13 = vpop.permute.xlu0 %1391 }
 0x574   :  { %3822 = vrcp.f32 %v1373_v3  ;;  %v1394_v14 = vpop.permute.xlu1 %1393  ;;  %v4523_v39 = vadd.f32 %v1392_v13, %v1385_v23  ;;  %v4567_v3 = vld [vmem:[%s5502_s2 + $0x10] ss:$8 sps:$4 sm:$0xff]   ;;  %v4579_v13 = vld [vmem:[%s5502_s2 + $0x24] ss:$8 sps:$4 sm:$0xff]  }
 0x575   :  { %3824 = vrcp.f32 %v1374_v26  ;;  %v4525_v4 = vadd.f32 %v1394_v14, %v1386_v55  ;;  %v4573_v26 = vld [vmem:[%s5502_s2 + $0x40] ss:$8 sps:$4 sm:$0xff]   ;;  %v4585_v14 = vld [vmem:[%s5502_s2 + $0x54] ss:$8 sps:$4 sm:$0xff]  }
 0x576   :  { %3826 = vtanh.f32 %v4523_v39 }
 0x577   :  { %3828 = vtanh.f32 %v4525_v4 }
 0x57c   :  { %v3819_v27 = vpop.eup %3818 }
 0x57d   :  { %v3821_v28 = vpop.eup %3820  ;;  %v4529_v29 = vmul.f32 %v3819_v27, %v3815_v22  ;;  %v4593_v22 = vld [vmem:[%s5502_s2 + $0x50] ss:$8 sps:$4 sm:$0xff]  }
 0x57e   :  { %v4531_v30 = vmul.f32 %v3821_v28, %v3817_v25  ;;  %v3823_v31 = vpop.eup %3822  ;;  %v4603_v25 = vld [vmem:[%s5502_s2 + $0x4] ss:$8 sps:$4 sm:$0xff]  }
 0x57f   :  { %v1474_v7 = vpack.c.bf16 %v4529_v29, %v4529_v29  ;;  %v3825_v42 = vpop.eup %3824 }
 0x580   :  { %v1475_v43 = vpack.c.bf16 %v4531_v30, %v4531_v30  ;;  %v3827_v44 = vpop.eup %3826 }
 0x581   :  { %v1478_v49 = vunpack.c.l.b16 %v1474_v7  ;;  %v3829_v51 = vpop.eup %3828  ;;  %v4537_v52 = vmul.f32 %v3827_v44, %v3823_v31 }
 0x582   :  { %v1479_v18 = vunpack.c.l.b16 %v1475_v43  ;;  %v4539_v47 = vmul.f32 %v3829_v51, %v3825_v42 }
 0x583   :  { %v1480_v21 = vrot.slane %v1478_v49, 2  ;;  %v1667_v12 = vpack.c.bf16 %v4537_v52, %v4537_v52 }
 0x584   :  { %v1481_v23 = vrot.slane %v1479_v18, 1  ;;  %v1668_v55 = vpack.c.bf16 %v4539_v47, %v4539_v47 }
 0x585   :  { %v1671_v62 = vunpack.c.l.b16 %v1667_v12 }
 0x586   :  { %v1482_v58 = vsel %vm418_vm1, %v1481_v23, %v1480_v21  ;;  %v1672_v10 = vunpack.c.l.b16 %v1668_v55 }
 0x587   :  { %v1483_v40 = vpack.c.b16 %v1482_v58, %v1482_v58  ;;  %v1673_v0 = vrot.slane %v1671_v62, 2 }
 0x588   :  { %v1674_v6 = vrot.slane %v1672_v10, 1 }
 0x589   :  { %1484 = vrot.lane.b32.xlu0 %v1483_v40, %s4127_s3 }
 0x58a   :  { %v1675_v41 = vsel %vm418_vm1, %v1674_v6, %v1673_v0 }
 0x58b   :  { %v1676_v46 = vpack.c.b16 %v1675_v41, %v1675_v41 }
 0x58d   :  { %1677 = vrot.lane.b32.xlu1 %v1676_v46, %s4127_s3 }
 0x5fb   :  { %v1485_v45 = vpop.permute.xlu0 %1484 }
 0x5fc   :  { %3542 = vmatmul.mubr.msk.bf16.vlgmr.msra.gmra.mrb[16].mxu0 %vm93_vm0, %v1485_v45 }
 0x5fd   :  { %1874 = vmatpush1.bf16.msra.mxu0 %v4553_v8  ;;  %1905 = vmatprep.mubr.bf16.mxu0 %v5507_v1 }
 0x5fe   :  { %1875 = vmatprep.subr.bf16.mxu0 %v4560_v9 }
 0x5ff   :  { %v1678_v11 = vpop.permute.xlu1 %1677 }
 0x600   :  { %3550 = vmatmul.mubr.msk.bf16.vlgmr.msra.gmra.mrb[16].mxu1 %vm93_vm0, %v1678_v11 }
 0x601   :  { %1876 = vmatpush1.bf16.msra.mxu0 %v4567_v3  ;;  %2067 = vmatpush1.bf16.msra.mxu1 %v4573_v26 }
 0x602   :  { %1877 = vmatprep.subr.bf16.mxu0 %v4579_v13  ;;  %2068 = vmatprep.subr.bf16.mxu1 %v4585_v14 }
 0x603   :  { %2098 = vmatprep.mubr.bf16.mxu1 %v5507_v1 }
 0x605   :  { %1878 = vmatpush1.bf16.msra.mxu0 %v4284_v32  ;;  %2069 = vmatpush1.bf16.msra.mxu1 %v4593_v22  ;;  %v4611_v32 = vld [vmem:[%s5502_s2 + $0x44] ss:$8 sps:$4 sm:$0xff]  }
 0x606   :  { %1879 = vmatprep.subr.bf16.mxu0 %v4295_v34  ;;  %2070 = vmatprep.subr.bf16.mxu1 %v4289_v33 }
 0x609   :  { %1880 = vmatpush1.bf16.msra.mxu0 %v4308_v36  ;;  %2071 = vmatpush1.bf16.msra.mxu1 %v4301_v35 }
 0x60a   :  { %2257 = vmatprep.subr.bf16.mxu0 %v4603_v25  ;;  %2072 = vmatprep.subr.bf16.mxu1 %v4313_v37 }
 0x60d   :  { %2073 = vmatpush1.bf16.msra.mxu1 %v4320_v38 }
 0x60e   :  { %2450 = vmatprep.subr.bf16.mxu1 %v4611_v32 }
 0x6cf   :  { %v1523_v33 = vpop.f32.mrb[16].mxu0 }
 0x6d0   :  { %v1532_v34 = vrot.slane %v1523_v33, 5  ;;  %v1534_v35 = vrot.slane %v1523_v33, 6  ;;  %v1525_v36 = vpop.f32.mrb[17].mxu0 }
 0x6d1   :  { %v1527_v27 = vpop.f32.mrb[18].mxu0  ;;  %v1533_v12 = vrot.slane %v1525_v36, 5  ;;  %v1535_v58 = vrot.slane %v1525_v36, 6 }
 0x6d2   :  { %v1540_v28 = vadd.f32 %v1532_v34, %v4353_v54  ;;  %v1542_v31 = vadd.f32 %v1534_v35, %v4355_v56  ;;  %v1528_v7 = vpop.f32.mrb[19].mxu0 }
 0x6d3   :  { %v1716_v38 = vpop.f32.mrb[16].mxu1  ;;  %v1541_v40 = vadd.f32 %v1533_v12, %v4365_v16  ;;  %v1543_v10 = vadd.f32 %v1535_v58, %v4367_v19  ;;  %v1765_v12 = vrot.slane %v4523_v39, 7  ;;  %v1766_v58 = vrot.slane %v4525_v4, 7 }
 0x6d4   :  { %v3543_v37 = vmul.f32 -1.442695, %v1540_v28  ;;  %v3544_v42 = vmul.f32 -1.442695, %v1542_v31  ;;  %v1725_v43 = vrot.slane %v1716_v38, 5  ;;  %v1718_v44 = vpop.f32.mrb[17].mxu1 }
 0x6d5   :  { %v1727_v49 = vrot.slane %v1716_v38, 6  ;;  %v1720_v51 = vpop.f32.mrb[18].mxu1  ;;  %v1726_v0 = vrot.slane %v1718_v44, 5  ;;  %v1728_v6 = vrot.slane %v1718_v44, 6  ;;  %v1573_v38 = vrot.slane %v4519_v5, 7 }
 0x6d6   :  { %3830 = vpow2.f32 %v3543_v37  ;;  %v1733_v18 = vadd.f32 %v1725_v43, %v4357_v57  ;;  %v1721_v21 = vpop.f32.mrb[19].mxu1  ;;  %v1572_v37 = vrot.slane %v4517_v17, 7 }
 0x6d7   :  { %3832 = vpow2.f32 %v3544_v42  ;;  %v1735_v23 = vadd.f32 %v1727_v49, %v4360_v61  ;;  %v1734_v33 = vadd.f32 %v1726_v0, %v4369_v20  ;;  %v1736_v34 = vadd.f32 %v1728_v6, %v4372_v24 }
 0x6d8   :  { %v3551_v55 = vmul.f32 -1.442695, %v1733_v18 }
 0x6d9   :  { %v3552_v62 = vmul.f32 -1.442695, %v1735_v23  ;;  %v3554_v39 = vmul.f32 -1.442695, %v1736_v34 }
 0x6da   :  { %3834 = vpow2.f32 %v3551_v55 }
 0x6db   :  { %3836 = vpow2.f32 %v3552_v62 }
 0x6dc   :  { %3838 = vtanh.f32 %v1541_v40 }
 0x6dd   :  { %3840 = vtanh.f32 %v1543_v10 }
 0x6e0   :  { %v3831_v41 = vpop.eup %3830 }
 0x6e1   :  { %v3833_v46 = vpop.eup %3832  ;;  %v1550_v45 = vadd.f32 1.0, %v3831_v41  ;;  %v3545_v41 = vmul.f32 -1.442695, %v1541_v40 }
 0x6e2   :  { %v1551_v11 = vadd.f32 1.0, %v3833_v46  ;;  %v3546_v46 = vmul.f32 -1.442695, %v1543_v10 }
 0x6e3   :  { %3842 = vrcp.f32 %v1550_v45  ;;  %v3553_v45 = vmul.f32 -1.442695, %v1734_v33 }
 0x6e4   :  { %3844 = vrcp.f32 %v1551_v11  ;;  %v3835_v35 = vpop.eup %3834 }
 0x6e5   :  { %v3837_v36 = vpop.eup %3836  ;;  %v1743_v27 = vadd.f32 1.0, %v3835_v35  ;;  %3846 = vtanh.f32 %v1734_v33 }
 0x6e6   :  { %v1744_v28 = vadd.f32 1.0, %v3837_v36  ;;  %3848 = vtanh.f32 %v1736_v34  ;;  %v3839_v31 = vpop.eup %3838 }
 0x6e7   :  { %3850 = vrcp.f32 %v1743_v27  ;;  %v3841_v7 = vpop.eup %3840 }
 0x6e8   :  { %3852 = vrcp.f32 %v1744_v28 }
 0x6e9   :  { %3854 = vpow2.f32 %v3545_v41 }
 0x6ea   :  { %3856 = vpow2.f32 %v3546_v46 }
 0x6eb   :  { %3858 = vpow2.f32 %v3553_v45 }
 0x6ec   :  { %3860 = vpow2.f32 %v3554_v39 }
 0x6ed   :  { %v3843_v42 = vpop.eup %3842 }
 0x6ee   :  { %v3845_v43 = vpop.eup %3844  ;;  %v1578_v44 = vmul.f32 %v3843_v42, %v3839_v31  ;;  %v1576_v49 = vmul.f32 %v3843_v42, %v1572_v37 }
 0x6ef   :  { %v1579_v51 = vmul.f32 %v3845_v43, %v3841_v7  ;;  %v1577_v18 = vmul.f32 %v3845_v43, %v1573_v38  ;;  %v3847_v21 = vpop.eup %3846 }
 0x6f0   :  { %1582 = vrot.lane.b32.xlu0 %v1578_v44, %s4127_s3  ;;  %v3849_v23 = vpop.eup %3848 }
 0x6f1   :  { %1584 = vrot.lane.b32.xlu1 %v1579_v51, %s4127_s3  ;;  %v3851_v55 = vpop.eup %3850 }
 0x6f2   :  { %v3853_v17 = vpop.eup %3852  ;;  %v1771_v62 = vmul.f32 %v3851_v55, %v3847_v21  ;;  %v1769_v0 = vmul.f32 %v3851_v55, %v1765_v12 }
 0x6f3   :  { %v1772_v5 = vmul.f32 %v3853_v17, %v3849_v23  ;;  %v1770_v6 = vmul.f32 %v3853_v17, %v1766_v58  ;;  %v3855_v11 = vpop.eup %3854 }
 0x6f4   :  { %1775 = vrot.lane.b32.xlu0 %v1771_v62, %s4127_s3  ;;  %v3857_v35 = vpop.eup %3856  ;;  %v1564_v4 = vadd.f32 1.0, %v3855_v11 }
 0x6f5   :  { %1777 = vrot.lane.b32.xlu1 %v1772_v5, %s4127_s3  ;;  %v1565_v36 = vadd.f32 1.0, %v3857_v35  ;;  %v3859_v27 = vpop.eup %3858 }
 0x6f6   :  { %v3861_v28 = vpop.eup %3860  ;;  %3862 = vrcp.f32 %v1564_v4  ;;  %v1757_v40 = vadd.f32 1.0, %v3859_v27 }
 0x6f7   :  { %3864 = vrcp.f32 %v1565_v36  ;;  %v1758_v42 = vadd.f32 1.0, %v3861_v28 }
 0x700   :  { %v3863_v44 = vpop.eup %3862 }
 0x762   :  { %v1583_v31 = vpop.permute.xlu0 %1582 }
 0x763   :  { %v1585_v7 = vpop.permute.xlu1 %1584  ;;  %v4630_v37 = vadd.f32 %v1583_v31, %v1576_v49  ;;  %v3865_v49 = vpop.eup %3864 }
 0x764   :  { %v4632_v10 = vadd.f32 %v1585_v7, %v1577_v18 }
 0x765   :  { %3866 = vtanh.f32 %v4630_v37 }
 0x766   :  { %3868 = vtanh.f32 %v4632_v10  ;;  %v1776_v33 = vpop.permute.xlu0 %1775 }
 0x767   :  { %3870 = vrcp.f32 %v1757_v40  ;;  %v1778_v34 = vpop.permute.xlu1 %1777  ;;  %v4636_v38 = vadd.f32 %v1776_v33, %v1769_v0 }
 0x768   :  { %3872 = vrcp.f32 %v1758_v42  ;;  %v4638_v43 = vadd.f32 %v1778_v34, %v1770_v6 }
 0x769   :  { %3874 = vtanh.f32 %v4636_v38 }
 0x76a   :  { %3876 = vtanh.f32 %v4638_v43 }
 0x76f   :  { %v3867_v51 = vpop.eup %3866 }
 0x770   :  { %v3869_v18 = vpop.eup %3868  ;;  %v4642_v21 = vmul.f32 %v3867_v51, %v3863_v44  ;;  %v4675_v44 = vld [vmem:[%s5502_s2 + $0x20] ss:$8 sps:$4 sm:$0xff]   ;;  %v4688_v51 = vld [vmem:[%s5502_s2 + $0x64] ss:$8 sps:$4 sm:$0xff]  }
 0x771   :  { %v4644_v23 = vmul.f32 %v3869_v18, %v3865_v49  ;;  %v3871_v12 = vpop.eup %3870  ;;  %v4682_v49 = vld [vmem:[%s5502_s2 + $0x34] ss:$8 sps:$4 sm:$0xff]   ;;  %v4694_v18 = vld [vmem:[%s5502_s2 + $0x30] ss:$8 sps:$4 sm:$0xff]  }
 0x772   :  { %v1858_v55 = vpack.c.bf16 %v4642_v21, %v4642_v21  ;;  %v3873_v58 = vpop.eup %3872 }
 0x773   :  { %v1859_v17 = vpack.c.bf16 %v4644_v23, %v4644_v23  ;;  %v3875_v62 = vpop.eup %3874 }
 0x774   :  { %v1862_v0 = vunpack.c.l.b16 %v1858_v55  ;;  %v3877_v5 = vpop.eup %3876  ;;  %v4650_v41 = vmul.f32 %v3875_v62, %v3871_v12  ;;  %v4700_v12 = vld [vmem:[%s5502_s2 + $0x60] ss:$8 sps:$4 sm:$0xff]   ;;  %v4707_v55 = vld [vmem:[%s5502_s2 + $0x74] ss:$8 sps:$4 sm:$0xff]  }
 0x775   :  { %v1863_v6 = vunpack.c.l.b16 %v1859_v17  ;;  %v4652_v45 = vmul.f32 %v3877_v5, %v3873_v58  ;;  %v4713_v58 = vld [vmem:[%s5502_s2 + $0x70] ss:$8 sps:$4 sm:$0xff]  }
 0x776   :  { %5519 = vst [vmem:[#allocation2_spill] sm:$0xff] %v4650_v41  ;;  %v1864_v46 = vrot.slane %v1862_v0, 3  ;;  %v2051_v11 = vpack.c.bf16 %v4650_v41, %v4650_v41 }
 0x777   :  { %5520 = vst [vmem:[#allocation3_spill] sm:$0xff] %v4652_v45  ;;  %v1865_v39 = vrot.slane %v1863_v6, 2  ;;  %v2052_v35 = vpack.c.bf16 %v4652_v45, %v4652_v45 }
 0x778   :  { %v2055_v36 = vunpack.c.l.b16 %v2051_v11 }
 0x779   :  { %v1866_v4 = vsel %vm418_vm1, %v1865_v39, %v1864_v46  ;;  %v2056_v28 = vunpack.c.l.b16 %v2052_v35 }
 0x77a   :  { %v1867_v27 = vpack.c.b16 %v1866_v4, %v1866_v4  ;;  %v2057_v31 = vrot.slane %v2055_v36, 3 }
 0x77b   :  { %v2058_v7 = vrot.slane %v2056_v28, 2 }
 0x77c   :  { %1868 = vrot.lane.b32.xlu0 %v1867_v27, %s4127_s3 }
 0x77d   :  { %v2059_v40 = vsel %vm418_vm1, %v2058_v7, %v2057_v31 }
 0x77e   :  { %v2060_v42 = vpack.c.b16 %v2059_v40, %v2059_v40 }
 0x780   :  { %2061 = vrot.lane.b32.xlu1 %v2060_v42, %s4127_s3 }
 0x7ee   :  { %v1869_v33 = vpop.permute.xlu0 %1868 }
 0x7ef   :  { %3560 = vmatmul.mubr.msk.bf16.vlgmr.msra.gmra.mrb[20].mxu0 %vm93_vm0, %v1869_v33 }
 0x7f0   :  { %2258 = vmatpush1.bf16.msra.mxu0 %v4553_v8  ;;  %2289 = vmatprep.mubr.bf16.mxu0 %v5507_v1 }
 0x7f1   :  { %2259 = vmatprep.subr.bf16.mxu0 %v4560_v9 }
 0x7f2   :  { %v2062_v34 = vpop.permute.xlu1 %2061 }
 0x7f3   :  { %3568 = vmatmul.mubr.msk.bf16.vlgmr.msra.gmra.mrb[20].mxu1 %vm93_vm0, %v2062_v34 }
 0x7f4   :  { %2260 = vmatpush1.bf16.msra.mxu0 %v4567_v3  ;;  %2451 = vmatpush1.bf16.msra.mxu1 %v4573_v26 }
 0x7f5   :  { %2261 = vmatprep.subr.bf16.mxu0 %v4579_v13  ;;  %2452 = vmatprep.subr.bf16.mxu1 %v4585_v14 }
 0x7f6   :  { %2482 = vmatprep.mubr.bf16.mxu1 %v5507_v1 }
 0x7f8   :  { %2262 = vmatpush1.bf16.msra.mxu0 %v4675_v44  ;;  %2453 = vmatpush1.bf16.msra.mxu1 %v4593_v22 }
 0x7f9   :  { %2263 = vmatprep.subr.bf16.mxu0 %v4682_v49  ;;  %2454 = vmatprep.subr.bf16.mxu1 %v4688_v51 }
 0x7fc   :  { %2264 = vmatpush1.bf16.msra.mxu0 %v4694_v18  ;;  %2455 = vmatpush1.bf16.msra.mxu1 %v4700_v12 }
 0x7fd   :  { %2641 = vmatprep.subr.bf16.mxu0 %v4603_v25  ;;  %2456 = vmatprep.subr.bf16.mxu1 %v4707_v55 }
 0x800   :  { %2457 = vmatpush1.bf16.msra.mxu1 %v4713_v58 }
 0x801   :  { %2834 = vmatprep.subr.bf16.mxu1 %v4611_v32 }
 0x8c2   :  { %v1907_v17 = vpop.f32.mrb[20].mxu0 }
 0x8c3   :  { %v1916_v62 = vrot.slane %v1907_v17, 4  ;;  %v1918_v0 = vrot.slane %v1907_v17, 5  ;;  %v1909_v5 = vpop.f32.mrb[21].mxu0 }
 0x8c4   :  { %v1911_v6 = vpop.f32.mrb[22].mxu0  ;;  %v1917_v34 = vrot.slane %v1909_v5, 4 }
 0x8c5   :  { %v1924_v46 = vadd.f32 %v1916_v62, %v4353_v54  ;;  %v1926_v39 = vadd.f32 %v1918_v0, %v4355_v56  ;;  %v1912_v11 = vpop.f32.mrb[23].mxu0  ;;  %v1919_v62 = vrot.slane %v1909_v5, 5 }
 0x8c6   :  { %v2100_v36 = vpop.f32.mrb[20].mxu1  ;;  %v1925_v0 = vadd.f32 %v1917_v34, %v4365_v16 }
 0x8c7   :  { %v3561_v35 = vmul.f32 -1.442695, %v1924_v46  ;;  %v3562_v4 = vmul.f32 -1.442695, %v1926_v39  ;;  %v2109_v27 = vrot.slane %v2100_v36, 4  ;;  %v2102_v28 = vpop.f32.mrb[21].mxu1  ;;  %v1927_v46 = vadd.f32 %v1919_v62, %v4367_v19 }
 0x8c8   :  { %v2111_v31 = vrot.slane %v2100_v36, 5  ;;  %v2104_v7 = vpop.f32.mrb[22].mxu1  ;;  %v2110_v39 = vrot.slane %v2102_v28, 4  ;;  %v2112_v11 = vrot.slane %v2102_v28, 5 }
 0x8c9   :  { %3878 = vpow2.f32 %v3561_v35  ;;  %v2117_v40 = vadd.f32 %v2109_v27, %v4357_v57  ;;  %v2105_v42 = vpop.f32.mrb[23].mxu1 }
 0x8ca   :  { %3880 = vpow2.f32 %v3562_v4  ;;  %v2119_v33 = vadd.f32 %v2111_v31, %v4360_v61  ;;  %v2118_v31 = vadd.f32 %v2110_v39, %v4369_v20  ;;  %v2120_v5 = vadd.f32 %v2112_v11, %v4372_v24 }
 0x8cb   :  { %v3569_v17 = vmul.f32 -1.442695, %v2117_v40 }
 0x8cc   :  { %v3570_v6 = vmul.f32 -1.442695, %v2119_v33 }
 0x8cd   :  { %3882 = vpow2.f32 %v3569_v17  ;;  %v1956_v17 = vrot.slane %v4630_v37, 7 }
 0x8ce   :  { %3884 = vpow2.f32 %v3570_v6  ;;  %v1957_v6 = vrot.slane %v4632_v10, 7 }
 0x8cf   :  { %3886 = vtanh.f32 %v1925_v0 }
 0x8d0   :  { %3888 = vtanh.f32 %v1927_v46 }
 0x8d3   :  { %v3879_v35 = vpop.eup %3878 }
 0x8d4   :  { %v3881_v36 = vpop.eup %3880  ;;  %v1934_v4 = vadd.f32 1.0, %v3879_v35 }
 0x8d5   :  { %v1935_v27 = vadd.f32 1.0, %v3881_v36 }
 0x8d6   :  { %3890 = vrcp.f32 %v1934_v4 }
 0x8d7   :  { %3892 = vrcp.f32 %v1935_v27  ;;  %v3883_v7 = vpop.eup %3882 }
 0x8d8   :  { %v3885_v40 = vpop.eup %3884  ;;  %v2127_v42 = vadd.f32 1.0, %v3883_v7  ;;  %3894 = vtanh.f32 %v2118_v31 }
 0x8d9   :  { %v2128_v33 = vadd.f32 1.0, %v3885_v40  ;;  %3896 = vtanh.f32 %v2120_v5  ;;  %v3887_v28 = vpop.eup %3886  ;;  %v2149_v40 = vrot.slane %v4636_v38, 7  ;;  %v3572_v38 = vmul.f32 -1.442695, %v2120_v5 }
 0x8da   :  { %3898 = vrcp.f32 %v2127_v42  ;;  %v3889_v34 = vpop.eup %3888 }
 0x8db   :  { %3900 = vrcp.f32 %v2128_v33  ;;  %v2150_v33 = vrot.slane %v4638_v43, 7 }
 0x8e0   :  { %v3891_v62 = vpop.eup %3890 }
 0x8e1   :  { %v3893_v39 = vpop.eup %3892  ;;  %v1962_v35 = vmul.f32 %v3891_v62, %v3887_v28  ;;  %v1960_v36 = vmul.f32 %v3891_v62, %v1956_v17  ;;  %v3563_v28 = vmul.f32 -1.442695, %v1925_v0  ;;  %v3571_v17 = vmul.f32 -1.442695, %v2118_v31 }
 0x8e2   :  { %v1963_v11 = vmul.f32 %v3893_v39, %v3889_v34  ;;  %v1961_v4 = vmul.f32 %v3893_v39, %v1957_v6  ;;  %v3895_v27 = vpop.eup %3894  ;;  %v3564_v34 = vmul.f32 -1.442695, %v1927_v46 }
 0x8e3   :  { %1966 = vrot.lane.b32.xlu0 %v1962_v35, %s4127_s3  ;;  %v3897_v7 = vpop.eup %3896  ;;  %3902 = vpow2.f32 %v3563_v28 }
 0x8e4   :  { %1968 = vrot.lane.b32.xlu1 %v1963_v11, %s4127_s3  ;;  %v3899_v42 = vpop.eup %3898  ;;  %3904 = vpow2.f32 %v3564_v34 }
 0x8e5   :  { %v3901_v37 = vpop.eup %3900  ;;  %v2155_v1 = vmul.f32 %v3899_v42, %v3895_v27  ;;  %v2153_v41 = vmul.f32 %v3899_v42, %v2149_v40  ;;  %3906 = vpow2.f32 %v3571_v17 }
 0x8e6   :  { %v2156_v10 = vmul.f32 %v3901_v37, %v3897_v7  ;;  %v2154_v45 = vmul.f32 %v3901_v37, %v2150_v33  ;;  %3908 = vpow2.f32 %v3572_v38 }
 0x8e7   :  { %2159 = vrot.lane.b32.xlu0 %v2155_v1, %s4127_s3 }
 0x8e8   :  { %2161 = vrot.lane.b32.xlu1 %v2156_v10, %s4127_s3 }
 0x8ed   :  { %v3903_v62 = vpop.eup %3902 }
 0x8ee   :  { %v3905_v6 = vpop.eup %3904  ;;  %v1948_v43 = vadd.f32 1.0, %v3903_v62 }
 0x8ef   :  { %v1949_v39 = vadd.f32 1.0, %v3905_v6  ;;  %v3907_v35 = vpop.eup %3906 }
 0x8f0   :  { %v3909_v11 = vpop.eup %3908  ;;  %3910 = vrcp.f32 %v1948_v43  ;;  %v2141_v0 = vadd.f32 1.0, %v3907_v35 }
 0x8f1   :  { %3912 = vrcp.f32 %v1949_v39  ;;  %v2142_v40 = vadd.f32 1.0, %v3909_v11 }
 0x955   :  { %v1967_v27 = vpop.permute.xlu0 %1966 }
 0x956   :  { %v1969_v7 = vpop.permute.xlu1 %1968  ;;  %v4733_v1 = vadd.f32 %v1967_v27, %v1960_v36  ;;  %v3911_v36 = vpop.eup %3910 }
 0x957   :  { %v4735_v46 = vadd.f32 %v1969_v7, %v1961_v4  ;;  %v3913_v4 = vpop.eup %3912 }
 0x958   :  { %3914 = vtanh.f32 %v4733_v1 }
 0x959   :  { %3916 = vtanh.f32 %v4735_v46  ;;  %v2160_v31 = vpop.permute.xlu0 %2159 }
 0x95a   :  { %3918 = vrcp.f32 %v2141_v0  ;;  %v2162_v5 = vpop.permute.xlu1 %2161  ;;  %v4739_v42 = vadd.f32 %v2160_v31, %v2153_v41 }
 0x95b   :  { %3920 = vrcp.f32 %v2142_v40  ;;  %v4741_v33 = vadd.f32 %v2162_v5, %v2154_v45 }
 0x95c   :  { %3922 = vtanh.f32 %v4739_v42 }
 0x95d   :  { %3924 = vtanh.f32 %v4741_v33 }
 0x962   :  { %v3915_v37 = vpop.eup %3914 }
 0x963   :  { %v3917_v10 = vpop.eup %3916  ;;  %v4745_v28 = vmul.f32 %v3915_v37, %v3911_v36 }
 0x964   :  { %v4747_v34 = vmul.f32 %v3917_v10, %v3913_v4  ;;  %v3919_v17 = vpop.eup %3918 }
 0x965   :  { %5521 = vst [vmem:[#allocation4_spill] sm:$0xff] %v4745_v28  ;;  %v2242_v41 = vpack.c.bf16 %v4745_v28, %v4745_v28  ;;  %v3921_v38 = vpop.eup %3920 }
 0x966   :  { %v2243_v45 = vpack.c.bf16 %v4747_v34, %v4747_v34  ;;  %v3923_v62 = vpop.eup %3922 }
 0x967   :  { %v2246_v6 = vunpack.c.l.b16 %v2242_v41  ;;  %v3925_v43 = vpop.eup %3924  ;;  %v4753_v35 = vmul.f32 %v3923_v62, %v3919_v17 }
 0x968   :  { %v2247_v39 = vunpack.c.l.b16 %v2243_v45  ;;  %v4755_v27 = vmul.f32 %v3925_v43, %v3921_v38  ;;  %v5524_v45 = vmov 0  }
 0x969   :  { %5522 = vst [vmem:[#allocation5_spill] sm:$0xff] %v4753_v35  ;;  %v2248_v11 = vrot.slane %v2246_v6, 4  ;;  %v2435_v0 = vpack.c.bf16 %v4753_v35, %v4753_v35 }
 0x96a   :  { %5523 = vst [vmem:[#allocation6_spill] sm:$0xff] %v4755_v27  ;;  %v2249_v7 = vrot.slane %v2247_v39, 3  ;;  %v2436_v40 = vpack.c.bf16 %v4755_v27, %v4755_v27 }
 0x96b   :  { %v2439_v5 = vunpack.c.l.b16 %v2435_v0 }
 0x96c   :  { %v2250_v31 = vsel %vm418_vm1, %v2249_v7, %v2248_v11  ;;  %v2440_v4 = vunpack.c.l.b16 %v2436_v40 }
 0x96d   :  { %v2251_v36 = vpack.c.b16 %v2250_v31, %v2250_v31  ;;  %v2441_v37 = vrot.slane %v2439_v5, 4 }
 0x96e   :  { %v2442_v10 = vrot.slane %v2440_v4, 3 }
 0x96f   :  { %2252 = vrot.lane.b32.xlu0 %v2251_v36, %s4127_s3 }
 0x970   :  { %v2443_v17 = vsel %vm418_vm1, %v2442_v10, %v2441_v37 }
 0x971   :  { %v2444_v41 = vpack.c.b16 %v2443_v17, %v2443_v17 }
 0x973   :  { %2445 = vrot.lane.b32.xlu1 %v2444_v41, %s4127_s3 }
 0x9e1   :  { %v2253_v38 = vpop.permute.xlu0 %2252 }
 0x9e2   :  { %3578 = vmatmul.mubr.msk.bf16.vlgmr.msra.gmra.mrb[24].mxu0 %vm93_vm0, %v2253_v38 }
 0x9e3   :  { %2642 = vmatpush1.bf16.msra.mxu0 %v4553_v8  ;;  %2673 = vmatprep.mubr.bf16.mxu0 %v5524_v45 }
 0x9e4   :  { %2643 = vmatprep.subr.bf16.mxu0 %v4560_v9 }
 0x9e5   :  { %v2446_v62 = vpop.permute.xlu1 %2445 }
 0x9e6   :  { %3586 = vmatmul.mubr.msk.bf16.vlgmr.msra.gmra.mrb[24].mxu1 %vm93_vm0, %v2446_v62 }
 0x9e7   :  { %2644 = vmatpush1.bf16.msra.mxu0 %v4567_v3  ;;  %2835 = vmatpush1.bf16.msra.mxu1 %v4573_v26 }
 0x9e8   :  { %2645 = vmatprep.subr.bf16.mxu0 %v4579_v13  ;;  %2836 = vmatprep.subr.bf16.mxu1 %v4585_v14 }
 0x9e9   :  { %2866 = vmatprep.mubr.bf16.mxu1 %v5524_v45 }
 0x9eb   :  { %2646 = vmatpush1.bf16.msra.mxu0 %v4675_v44  ;;  %2837 = vmatpush1.bf16.msra.mxu1 %v4593_v22 }
 0x9ec   :  { %2647 = vmatprep.subr.bf16.mxu0 %v4682_v49  ;;  %2838 = vmatprep.subr.bf16.mxu1 %v4688_v51 }
 0x9ef   :  { %2648 = vmatpush1.bf16.msra.mxu0 %v4694_v18  ;;  %2839 = vmatpush1.bf16.msra.mxu1 %v4700_v12 }
 0x9f0   :  { %3025 = vmatprep.subr.bf16.mxu0 %v4603_v25  ;;  %2840 = vmatprep.subr.bf16.mxu1 %v4707_v55 }
 0x9f3   :  { %2841 = vmatpush1.bf16.msra.mxu1 %v4713_v58 }
 0x9f4   :  { %3237 = vmatprep.subr.bf16.mxu1 %v4611_v32 }
 0xab5   :  { %v2291_v6 = vpop.f32.mrb[24].mxu0 }
 0xab6   :  { %v2300_v43 = vrot.slane %v2291_v6, 3  ;;  %v2302_v39 = vrot.slane %v2291_v6, 4  ;;  %v2293_v11 = vpop.f32.mrb[25].mxu0 }
 0xab7   :  { %v2295_v7 = vpop.f32.mrb[26].mxu0  ;;  %v2301_v62 = vrot.slane %v2293_v11, 3 }
 0xab8   :  { %v2308_v0 = vadd.f32 %v2300_v43, %v4353_v54  ;;  %v2310_v40 = vadd.f32 %v2302_v39, %v4355_v56  ;;  %v2296_v31 = vpop.f32.mrb[27].mxu0  ;;  %v2303_v43 = vrot.slane %v2293_v11, 4 }
 0xab9   :  { %v2484_v4 = vpop.f32.mrb[24].mxu1  ;;  %v2309_v39 = vadd.f32 %v2301_v62, %v4365_v16 }
 0xaba   :  { %v3579_v5 = vmul.f32 -1.442695, %v2308_v0  ;;  %v3580_v36 = vmul.f32 -1.442695, %v2310_v40  ;;  %v2493_v25 = vrot.slane %v2484_v4, 3  ;;  %v2486_v37 = vpop.f32.mrb[25].mxu1  ;;  %v2311_v0 = vadd.f32 %v2303_v43, %v4367_v19 }
 0xabb   :  { %v2495_v10 = vrot.slane %v2484_v4, 4  ;;  %v2488_v17 = vpop.f32.mrb[26].mxu1  ;;  %v2494_v40 = vrot.slane %v2486_v37, 3  ;;  %v2496_v31 = vrot.slane %v2486_v37, 4 }
 0xabc   :  { %3926 = vpow2.f32 %v3579_v5  ;;  %v2501_v32 = vadd.f32 %v2493_v25, %v4357_v57  ;;  %v2489_v41 = vpop.f32.mrb[27].mxu1 }
 0xabd   :  { %3928 = vpow2.f32 %v3580_v36  ;;  %v2503_v38 = vadd.f32 %v2495_v10, %v4360_v61  ;;  %v2502_v10 = vadd.f32 %v2494_v40, %v4369_v20  ;;  %v2504_v11 = vadd.f32 %v2496_v31, %v4372_v24 }
 0xabe   :  { %v3587_v6 = vmul.f32 -1.442695, %v2501_v32 }
 0xabf   :  { %v3588_v7 = vmul.f32 -1.442695, %v2503_v38 }
 0xac0   :  { %3930 = vpow2.f32 %v3587_v6  ;;  %v2340_v6 = vrot.slane %v4733_v1, 7 }
 0xac1   :  { %3932 = vpow2.f32 %v3588_v7  ;;  %v2341_v7 = vrot.slane %v4735_v46, 7 }
 0xac2   :  { %3934 = vtanh.f32 %v2309_v39 }
 0xac3   :  { %3936 = vtanh.f32 %v2311_v0 }
 0xac6   :  { %v3927_v5 = vpop.eup %3926 }
 0xac7   :  { %v3929_v4 = vpop.eup %3928  ;;  %v2318_v36 = vadd.f32 1.0, %v3927_v5 }
 0xac8   :  { %v2319_v25 = vadd.f32 1.0, %v3929_v4 }
 0xac9   :  { %3938 = vrcp.f32 %v2318_v36 }
 0xaca   :  { %3940 = vrcp.f32 %v2319_v25  ;;  %v3931_v17 = vpop.eup %3930 }
 0xacb   :  { %v3933_v32 = vpop.eup %3932  ;;  %v2511_v41 = vadd.f32 1.0, %v3931_v17  ;;  %3942 = vtanh.f32 %v2502_v10 }
 0xacc   :  { %v2512_v38 = vadd.f32 1.0, %v3933_v32  ;;  %3944 = vtanh.f32 %v2504_v11  ;;  %v3935_v37 = vpop.eup %3934  ;;  %v2533_v32 = vrot.slane %v4739_v42, 7  ;;  %v3590_v42 = vmul.f32 -1.442695, %v2504_v11 }
 0xacd   :  { %3946 = vrcp.f32 %v2511_v41  ;;  %v3937_v62 = vpop.eup %3936 }
 0xace   :  { %3948 = vrcp.f32 %v2512_v38  ;;  %v2534_v38 = vrot.slane %v4741_v33, 7 }
 0xad3   :  { %v3939_v43 = vpop.eup %3938 }
 0xad4   :  { %v3941_v40 = vpop.eup %3940  ;;  %v2346_v5 = vmul.f32 %v3939_v43, %v3935_v37  ;;  %v2344_v4 = vmul.f32 %v3939_v43, %v2340_v6  ;;  %v3581_v37 = vmul.f32 -1.442695, %v2309_v39  ;;  %v3589_v6 = vmul.f32 -1.442695, %v2502_v10 }
 0xad5   :  { %v2347_v31 = vmul.f32 %v3941_v40, %v3937_v62  ;;  %v2345_v36 = vmul.f32 %v3941_v40, %v2341_v7  ;;  %v3943_v25 = vpop.eup %3942  ;;  %v3582_v62 = vmul.f32 -1.442695, %v2311_v0 }
 0xad6   :  { %2350 = vrot.lane.b32.xlu0 %v2346_v5, %s4127_s3  ;;  %v3945_v17 = vpop.eup %3944  ;;  %3950 = vpow2.f32 %v3581_v37 }
 0xad7   :  { %2352 = vrot.lane.b32.xlu1 %v2347_v31, %s4127_s3  ;;  %v3947_v41 = vpop.eup %3946  ;;  %3952 = vpow2.f32 %v3582_v62 }
 0xad8   :  { %v3949_v1 = vpop.eup %3948  ;;  %v2539_v35 = vmul.f32 %v3947_v41, %v3943_v25  ;;  %v2537_v27 = vmul.f32 %v3947_v41, %v2533_v32  ;;  %3954 = vpow2.f32 %v3589_v6 }
 0xad9   :  { %v2540_v46 = vmul.f32 %v3949_v1, %v3945_v17  ;;  %v2538_v28 = vmul.f32 %v3949_v1, %v2534_v38  ;;  %3956 = vpow2.f32 %v3590_v42 }
 0xada   :  { %2543 = vrot.lane.b32.xlu0 %v2539_v35, %s4127_s3 }
 0xadb   :  { %2545 = vrot.lane.b32.xlu1 %v2540_v46, %s4127_s3 }
 0xae0   :  { %v3951_v43 = vpop.eup %3950 }
 0xae1   :  { %v3953_v7 = vpop.eup %3952  ;;  %v2332_v33 = vadd.f32 1.0, %v3951_v43 }
 0xae2   :  { %v2333_v40 = vadd.f32 1.0, %v3953_v7  ;;  %v3955_v5 = vpop.eup %3954 }
 0xae3   :  { %v3957_v31 = vpop.eup %3956  ;;  %3958 = vrcp.f32 %v2332_v33  ;;  %v2525_v39 = vadd.f32 1.0, %v3955_v5 }
 0xae4   :  { %3960 = vrcp.f32 %v2333_v40  ;;  %v2526_v32 = vadd.f32 1.0, %v3957_v31 }
 0xb48   :  { %v2351_v25 = vpop.permute.xlu0 %2350 }
 0xb49   :  { %v2353_v17 = vpop.permute.xlu1 %2352  ;;  %v4801_v35 = vadd.f32 %v2351_v25, %v2344_v4  ;;  %v3959_v4 = vpop.eup %3958 }
 0xb4a   :  { %v4803_v0 = vadd.f32 %v2353_v17, %v2345_v36  ;;  %v3961_v36 = vpop.eup %3960 }
 0xb4b   :  { %3962 = vtanh.f32 %v4801_v35 }
 0xb4c   :  { %3964 = vtanh.f32 %v4803_v0  ;;  %v2544_v10 = vpop.permute.xlu0 %2543 }
 0xb4d   :  { %3966 = vrcp.f32 %v2525_v39  ;;  %v2546_v11 = vpop.permute.xlu1 %2545  ;;  %v4807_v41 = vadd.f32 %v2544_v10, %v2537_v27 }
 0xb4e   :  { %3968 = vrcp.f32 %v2526_v32  ;;  %v4809_v38 = vadd.f32 %v2546_v11, %v2538_v28 }
 0xb4f   :  { %3970 = vtanh.f32 %v4807_v41 }
 0xb50   :  { %3972 = vtanh.f32 %v4809_v38 }
 0xb55   :  { %v3963_v1 = vpop.eup %3962 }
 0xb56   :  { %v3965_v46 = vpop.eup %3964  ;;  %v4813_v37 = vmul.f32 %v3963_v1, %v3959_v4 }
 0xb57   :  { %v4815_v62 = vmul.f32 %v3965_v46, %v3961_v36  ;;  %v3967_v6 = vpop.eup %3966  ;;  %v417_v46 = vrot.slane %v4395_v53, 7 }
 0xb58   :  { %v2626_v27 = vpack.c.bf16 %v4813_v37, %v4813_v37  ;;  %v3969_v42 = vpop.eup %3968 }
 0xb59   :  { %v2627_v28 = vpack.c.bf16 %v4815_v62, %v4815_v62  ;;  %v3971_v43 = vpop.eup %3970 }
 0xb5a   :  { %v2630_v7 = vunpack.c.l.b16 %v2626_v27  ;;  %v3973_v33 = vpop.eup %3972  ;;  %v4821_v5 = vmul.f32 %v3971_v43, %v3967_v6 }
 0xb5b   :  { %v2631_v40 = vunpack.c.l.b16 %v2627_v28  ;;  %v4823_v25 = vmul.f32 %v3973_v33, %v3969_v42  ;;  %v419_v28 = vsel %vm418_vm1, %v417_v46, %v4393_v50 }
 0xb5c   :  { %v2632_v31 = vrot.slane %v2630_v7, 5  ;;  %v2819_v39 = vpack.c.bf16 %v4821_v5, %v4821_v5 }
 0xb5d   :  { %v2633_v17 = vrot.slane %v2631_v40, 4  ;;  %v2820_v32 = vpack.c.bf16 %v4823_v25, %v4823_v25 }
 0xb5e   :  { %v2823_v11 = vunpack.c.l.b16 %v2819_v39 }
 0xb5f   :  { %v2634_v10 = vsel %vm418_vm1, %v2633_v17, %v2632_v31  ;;  %v2824_v36 = vunpack.c.l.b16 %v2820_v32 }
 0xb60   :  { %v2635_v4 = vpack.c.b16 %v2634_v10, %v2634_v10  ;;  %v2825_v1 = vrot.slane %v2823_v11, 5 }
 0xb61   :  { %v2826_v6 = vrot.slane %v2824_v36, 4 }
 0xb62   :  { %2636 = vrot.lane.b32.xlu0 %v2635_v4, %s4127_s3 }
 0xb63   :  { %v2827_v27 = vsel %vm418_vm1, %v2826_v6, %v2825_v1 }
 0xb64   :  { %v2828_v42 = vpack.c.b16 %v2827_v27, %v2827_v27 }
 0xb66   :  { %420 = vrot.lane.b32.xlu0 %v419_v28, %s4127_s3  ;;  %2829 = vrot.lane.b32.xlu1 %v2828_v42, %s4127_s3 }
 0xbd4   :  { %v2637_v43 = vpop.permute.xlu0 %2636 }
 0xbd5   :  { %3596 = vmatmul.mubr.msk.bf16.vlgmr.msra.gmra.mrb[28].mxu0 %vm93_vm0, %v2637_v43 }
 0xbd6   :  { %3026 = vmatpush1.bf16.msra.mxu0 %v4553_v8  ;;  %3057 = vmatprep.mubr.bf16.mxu0 %v5524_v45  ;;  %v4859_v8 = vld [vmem:[%s5504_s4] ss:$0 sm:$0xff] }
 0xbd7   :  { %3027 = vmatprep.subr.bf16.mxu0 %v4560_v9  ;;  %v4122_v9 = vld [vmem:[%s5501_s0] sm:$0xff] }
 0xbd8   :  { %v421_v7 = vpop.permute.xlu0 %420  ;;  %v2830_v33 = vpop.permute.xlu1 %2829 }
 0xbd9   :  { %v424_v40 = vsel %vm423_vm2, %v421_v7, 0.0  ;;  %3604 = vmatmul.mubr.msk.bf16.vlgmr.msra.gmra.mrb[28].mxu1 %vm93_vm0, %v2830_v33 }
 0xbda   :  { %425 = vadd.xlane.f32.xlu1 %v424_v40  ;;  %3028 = vmatpush1.bf16.msra.mxu0 %v4567_v3  ;;  %v635_v3 = vrot.slane %v4403_v2, 7 }
 0xbdb   :  { %3238 = vmatpush1.bf16.msra.mxu1 %v4573_v26  ;;  %3029 = vmatprep.subr.bf16.mxu0 %v4579_v13  ;;  %v4123_v26 = vld [vmem:[%s5501_s0 + $0x8] sm:$0xff] }
 0xbdc   :  { %3239 = vmatprep.subr.bf16.mxu1 %v4585_v14  ;;  %3269 = vmatprep.mubr.bf16.mxu1 %v5524_v45  ;;  %v636_v13 = vsel %vm418_vm1, %v635_v3, %v4401_v63 }
 0xbde   :  { %3030 = vmatpush1.bf16.msra.mxu0 %v4675_v44 }
 0xbdf   :  { %3240 = vmatpush1.bf16.msra.mxu1 %v4593_v22  ;;  %3031 = vmatprep.subr.bf16.mxu0 %v4682_v49 }
 0xbe0   :  { %3241 = vmatprep.subr.bf16.mxu1 %v4688_v51 }
 0xbe2   :  { %3032 = vmatpush1.bf16.msra.mxu0 %v4694_v18 }
 0xbe3   :  { %3242 = vmatpush1.bf16.msra.mxu1 %v4700_v12 }
 0xbe4   :  { %3243 = vmatprep.subr.bf16.mxu1 %v4707_v55 }
 0xbe7   :  { %3244 = vmatpush1.bf16.msra.mxu1 %v4713_v58 }
 0xbeb   :  { %462 = vrot.lane.b32.xlu1 %v4859_v8, %s4127_s3 }
 0xbef   :  { %480 = vrot.lane.b32.xlu1 %v4122_v9, %s4127_s3 }
 0xbf3   :  { %482 = vrot.lane.b32.xlu1 %v4123_v26, %s4127_s3 }
 0xbf7   :  { %637 = vrot.lane.b32.xlu1 %v636_v13, %s4127_s3 }
 0xc67   :  { %v426_v14 = vpop.xlane.xlu1 %425 }
 0xc68   :  { %v428_v22 = vmul.f32 0.015625, %v426_v14 }
 0xc6a   :  { %v430_v44 = vrot.slane %v428_v22, 1  ;;  %v4876_v49 = vsub.f32 %v4393_v50, %v428_v22 }
 0xc6c   :  { %v4879_v51 = vsub.f32 %v4395_v53, %v430_v44  ;;  %v435_v12 = vmul.f32 %v4876_v49, %v4876_v49 }
 0xc6e   :  { %v436_v18 = vmul.f32 %v4879_v51, %v4879_v51 }
 0xc70   :  { %v439_v55 = vrot.slane %v436_v18, 7 }
 0xc72   :  { %v440_v58 = vsel %vm418_vm1, %v439_v55, %v435_v12 }
 0xc73   :  { %441 = vrot.lane.b32.xlu0 %v440_v58, %s4127_s3 }
 0xca8   :  { %v2675_v45 = vpop.f32.mrb[28].mxu0 }
 0xca9   :  { %v2684_v31 = vrot.slane %v2675_v45, 2  ;;  %v2686_v17 = vrot.slane %v2675_v45, 3  ;;  %v2677_v39 = vpop.f32.mrb[29].mxu0 }
 0xcaa   :  { %v2679_v50 = vpop.f32.mrb[30].mxu0  ;;  %v2685_v7 = vrot.slane %v2677_v39, 2  ;;  %v2687_v40 = vrot.slane %v2677_v39, 3 }
 0xcab   :  { %v2692_v32 = vadd.f32 %v2684_v31, %v4353_v54  ;;  %v2694_v53 = vadd.f32 %v2686_v17, %v4355_v56  ;;  %v2680_v10 = vpop.f32.mrb[31].mxu0 }
 0xcac   :  { %v2868_v36 = vpop.f32.mrb[28].mxu1  ;;  %v4892_v3 = vadd.f32 %v2685_v7, %v4365_v16  ;;  %v4895_v26 = vadd.f32 %v2687_v40, %v4367_v19  ;;  %v2918_v7 = vrot.slane %v4809_v38, 7 }
 0xcad   :  { %v3597_v11 = vmul.f32 -1.442695, %v2692_v32  ;;  %v3598_v4 = vmul.f32 -1.442695, %v2694_v53  ;;  %v2877_v1 = vrot.slane %v2868_v36, 2  ;;  %v2870_v46 = vpop.f32.mrb[29].mxu1 }
 0xcae   :  { %v2879_v6 = vrot.slane %v2868_v36, 3  ;;  %v2872_v27 = vpop.f32.mrb[30].mxu1  ;;  %v2878_v13 = vrot.slane %v2870_v46, 2  ;;  %v2880_v14 = vrot.slane %v2870_v46, 3  ;;  %v2724_v53 = vrot.slane %v4801_v35, 7 }
 0xcaf   :  { %3974 = vpow2.f32 %v3597_v11  ;;  %v2885_v42 = vadd.f32 %v2877_v1, %v4357_v57  ;;  %v2873_v28 = vpop.f32.mrb[31].mxu1  ;;  %v2725_v11 = vrot.slane %v4803_v0, 7 }
 0xcb0   :  { %3976 = vpow2.f32 %v3598_v4  ;;  %v2887_v43 = vadd.f32 %v2879_v6, %v4360_v61  ;;  %v4900_v55 = vadd.f32 %v2878_v13, %v4369_v20  ;;  %v4903_v58 = vadd.f32 %v2880_v14, %v4372_v24 }
 0xcb1   :  { %v3605_v33 = vmul.f32 -1.442695, %v2885_v42  ;;  %v2917_v28 = vrot.slane %v4807_v41, 7  ;;  %v4931_v41 = vld [vmem:[%s5505_s5] ss:$0 sm:$0xff] }
 0xcb2   :  { %v3606_v9 = vmul.f32 -1.442695, %v2887_v43 }
 0xcb3   :  { %3978 = vpow2.f32 %v3605_v33 }
 0xcb4   :  { %3980 = vpow2.f32 %v3606_v9 }
 0xcb5   :  { %3982 = vtanh.f32 %v4892_v3 }
 0xcb6   :  { %3984 = vtanh.f32 %v4895_v26 }
 0xcb9   :  { %v3975_v22 = vpop.eup %3974 }
 0xcba   :  { %v3977_v44 = vpop.eup %3976  ;;  %v2702_v18 = vadd.f32 1.0, %v3975_v22 }
 0xcbb   :  { %v2703_v12 = vadd.f32 1.0, %v3977_v44 }
 0xcbc   :  { %3986 = vrcp.f32 %v2702_v18  ;;  %v463_v18 = vpop.permute.xlu1 %462 }
 0xcbd   :  { %3988 = vrcp.f32 %v2703_v12  ;;  %v3979_v45 = vpop.eup %3978 }
 0xcbe   :  { %v3981_v31 = vpop.eup %3980  ;;  %v2895_v17 = vadd.f32 1.0, %v3979_v45  ;;  %3990 = vtanh.f32 %v4900_v55 }
 0xcbf   :  { %v2896_v39 = vadd.f32 1.0, %v3981_v31  ;;  %3992 = vtanh.f32 %v4903_v58  ;;  %v3983_v50 = vpop.eup %3982 }
 0xcc0   :  { %3994 = vrcp.f32 %v2895_v17  ;;  %v3985_v32 = vpop.eup %3984  ;;  %v4936_v17 = vpop.permute.xlu1 %480 }
 0xcc1   :  { %3996 = vrcp.f32 %v2896_v39 }
 0xcc6   :  { %v3987_v10 = vpop.eup %3986 }
 0xcc7   :  { %v3989_v4 = vpop.eup %3988  ;;  %v4909_v36 = vmul.f32 %v3987_v10, %v3983_v50  ;;  %v4911_v1 = vmul.f32 %v3987_v10, %v2724_v53 }
 0xcc8   :  { %v4913_v46 = vmul.f32 %v3989_v4, %v3985_v32  ;;  %v4915_v6 = vmul.f32 %v3989_v4, %v2725_v11  ;;  %v3991_v27 = vpop.eup %3990  ;;  %v4939_v4 = vpop.permute.xlu1 %482 }
 0xcc9   :  { %v3993_v42 = vpop.eup %3992 }
 0xcca   :  { %v3995_v43 = vpop.eup %3994 }
 0xccb   :  { %v3997_v35 = vpop.eup %3996  ;;  %v4919_v33 = vmul.f32 %v3995_v43, %v3991_v27  ;;  %v4921_v0 = vmul.f32 %v3995_v43, %v2917_v28 }
 0xccc   :  { %v4923_v40 = vmul.f32 %v3997_v35, %v3993_v42  ;;  %v4925_v9 = vmul.f32 %v3997_v35, %v2918_v7  ;;  %v4124_v35 = vld [vmem:[%s5501_s0 + $0x10] sm:$0xff] }
 0xce5   :  { %v442_v13 = vpop.permute.xlu0 %441 }
 0xce6   :  { %v444_v14 = vsel %vm423_vm2, %v442_v13, 0.0  ;;  %v833_v13 = vrot.slane %v4467_v60, 7 }
 0xce7   :  { %445 = vadd.xlane.f32.xlu0 %v444_v14  ;;  %v4125_v14 = vld [vmem:[%s5501_s0 + $0x18] sm:$0xff] }
 0xcfd   :  { %473 = vrot.lane.b32.xlu0 %v4931_v41, %s4127_s3 }
 0xd74   :  { %v446_v38 = vpop.xlane.xlu0 %445 }
 0xd75   :  { %v447_v22 = vmul.f32 0.015625, %v446_v38  ;;  %v835_v38 = vsel %vm834_vm3, %v833_v13, %v4461_v48 }
 0xd77   :  { %v448_v44 = vadd.f32 1e-05, %v447_v22 }
 0xd78   :  { %v474_v32 = vpop.permute.xlu0 %473 }
 0xd79   :  { %3998 = vrsqrt.f32 %v448_v44 }
 0xd83   :  { %v3999_v12 = vpop.eup %3998 }
 0xd84   :  { %v451_v45 = vrot.slane %v3999_v12, 1  ;;  %v454_v31 = vmul.f32 %v3999_v12, %v4876_v49  ;;  %v638_v49 = vpop.permute.xlu1 %637 }
 0xd85   :  { %v640_v7 = vsel %vm423_vm2, %v638_v49, 0.0 }
 0xd86   :  { %v455_v39 = vmul.f32 %v451_v45, %v4879_v51  ;;  %v465_v50 = vmul.f32 %v463_v18, %v454_v31  ;;  %v4949_v51 = vld [vmem:[%s5504_s4 + $0x1] ss:$0 sm:$0xff] }
 0xd88   :  { %v466_v53 = vmul.f32 %v463_v18, %v455_v39  ;;  %v476_v10 = vadd.f32 %v474_v32, %v465_v50 }
 0xd8a   :  { %v477_v11 = vadd.f32 %v474_v32, %v466_v53  ;;  %v486_v42 = vadd.f32 %v4936_v17, %v476_v10 }
 0xd8c   :  { %v487_v27 = vadd.f32 %v4939_v4, %v477_v11 }
 0xd8e   :  { %v490_v28 = vrot.slane %v487_v27, 7  ;;  %v4977_v27 = vld [vmem:[%s5505_s5 + $0x1] ss:$0 sm:$0xff] }
 0xd90   :  { %v491_v43 = vsel %vm418_vm1, %v490_v28, %v486_v42 }
 0xd91   :  { %492 = vrot.lane.b32.xlu0 %v491_v43, %s4127_s3 }
 0xdb0   :  { %641 = vadd.xlane.f32.xlu0 %v640_v7 }
 0xdc6   :  { %678 = vrot.lane.b32.xlu0 %v4949_v51, %s4127_s3 }
 0xdca   :  { %697 = vrot.lane.b32.xlu0 %v4124_v35, %s4127_s3 }
 0xdce   :  { %699 = vrot.lane.b32.xlu0 %v4125_v14, %s4127_s3 }
 0xdd2   :  { %836 = vrot.lane.b32.xlu0 %v835_v38, %s4127_s3 }
 0xe03   :  { %v493_v22 = vpop.permute.xlu0 %492 }
 0xe04   :  { %495 = vst.msk [vmem:[%s5506_s6] sm:$0x3] %vm423_vm2, %v493_v22 }
 0xe3d   :  { %v642_v44 = vpop.xlane.xlu0 %641 }
 0xe3e   :  { %v643_v18 = vmul.f32 0.015625, %v642_v44 }
 0xe40   :  { %v645_v12 = vrot.slane %v643_v18, 1  ;;  %v648_v45 = vsub.f32 %v4401_v63, %v643_v18 }
 0xe41   :  { %v679_v28 = vpop.permute.xlu0 %678 }
 0xe42   :  { %v649_v31 = vsub.f32 %v4403_v2, %v645_v12  ;;  %v650_v50 = vmul.f32 %v648_v45, %v648_v45 }
 0xe44   :  { %v651_v39 = vmul.f32 %v649_v31, %v649_v31 }
 0xe45   :  { %v4981_v35 = vpop.permute.xlu0 %697 }
 0xe46   :  { %v654_v32 = vrot.slane %v651_v39, 7 }
 0xe48   :  { %v655_v53 = vsel %vm418_vm1, %v654_v32, %v650_v50 }
 0xe49   :  { %656 = vrot.lane.b32.xlu1 %v655_v53, %s4127_s3  ;;  %v4983_v12 = vpop.permute.xlu0 %699 }
 0xebb   :  { %v657_v10 = vpop.permute.xlu1 %656 }
 0xebc   :  { %v659_v11 = vsel %vm423_vm2, %v657_v10, 0.0 }
 0xebd   :  { %660 = vadd.xlane.f32.xlu1 %v659_v11 }
 0xece   :  { %690 = vrot.lane.b32.xlu1 %v4977_v27, %s4127_s3 }
 0xf4a   :  { %v661_v63 = vpop.xlane.xlu1 %660 }
 0xf4b   :  { %v662_v2 = vmul.f32 0.015625, %v661_v63 }
 0xf4d   :  { %v663_v42 = vadd.f32 1e-05, %v662_v2 }
 0xf4e   :  { %v691_v38 = vpop.permute.xlu1 %690 }
 0xf4f   :  { %4000 = vrsqrt.f32 %v663_v42 }
 0xf59   :  { %v4001_v43 = vpop.eup %4000 }
 0xf5a   :  { %v666_v49 = vrot.slane %v4001_v43, 1  ;;  %v669_v7 = vmul.f32 %v4001_v43, %v648_v45  ;;  %v837_v45 = vpop.permute.xlu0 %836 }
 0xf5c   :  { %v670_v13 = vmul.f32 %v666_v49, %v649_v31  ;;  %v681_v14 = vmul.f32 %v679_v28, %v669_v7  ;;  %v840_v31 = vsel %vm839_vm4, %v837_v45, 0.0 }
 0xf5e   :  { %v682_v22 = vmul.f32 %v679_v28, %v670_v13  ;;  %v693_v44 = vadd.f32 %v691_v38, %v681_v14 }
 0xf60   :  { %v694_v18 = vadd.f32 %v691_v38, %v682_v22  ;;  %v703_v50 = vadd.f32 %v4981_v35, %v693_v44 }
 0xf62   :  { %v704_v39 = vadd.f32 %v4983_v12, %v694_v18 }
 0xf64   :  { %v707_v32 = vrot.slane %v704_v39, 7 }
 0xf66   :  { %v708_v53 = vsel %vm418_vm1, %v707_v32, %v703_v50 }
 0xf67   :  { %709 = vrot.lane.b32.xlu1 %v708_v53, %s4127_s3 }
 0xf8b   :  { %841 = vadd.xlane.f32.xlu1 %v840_v31 }
 0xf9c   :  { %877 = vrot.lane.b32.xlu1 %v4859_v8, %s4127_s3 }
 0xfd9   :  { %v710_v10 = vpop.permute.xlu1 %709 }
 0xfda   :  { %3505 = vst.msk [vmem:[%s5506_s6 + $0x10] sm:$0x3] %vm423_vm2, %v710_v10 }
0x1018   :  { %v842_v11 = vpop.xlane.xlu1 %841 }
0x1019   :  { %v843_v63 = vmul.f32 0.015625, %v842_v11 }
0x101b   :  { %v845_v2 = vrot.slane %v843_v63, 1  ;;  %v848_v42 = vsub.f32 %v4461_v48, %v843_v63 }
0x101d   :  { %v849_v28 = vsub.f32 %v4467_v60, %v845_v2  ;;  %v850_v49 = vmul.f32 %v848_v42, %v848_v42  ;;  %v878_v60 = vpop.permute.xlu1 %877 }
0x101f   :  { %v851_v43 = vmul.f32 %v849_v28, %v849_v28 }
0x1021   :  { %v854_v7 = vrot.slane %v851_v43, 7 }
0x1023   :  { %v855_v13 = vsel %vm834_vm3, %v854_v7, %v850_v49  ;;  %v1023_v7 = vrot.slane %v4473_v15, 7 }
0x1024   :  { %856 = vrot.lane.b32.xlu0 %v855_v13, %s4127_s3  ;;  %v3600_v13 = vmul.f32 -1.442695, %v4895_v26 }
0x1096   :  { %v857_v14 = vpop.permute.xlu0 %856 }
0x1097   :  { %v859_v38 = vsel %vm839_vm4, %v857_v14, 0.0  ;;  %v3607_v14 = vmul.f32 -1.442695, %v4900_v55 }
0x1098   :  { %860 = vadd.xlane.f32.xlu0 %v859_v38 }
0x10ae   :  { %888 = vrot.lane.b32.xlu0 %v4931_v41, %s4127_s3 }
0x1125   :  { %v861_v22 = vpop.xlane.xlu0 %860 }
0x1126   :  { %v862_v44 = vmul.f32 0.015625, %v861_v22 }
0x1128   :  { %v863_v18 = vadd.f32 1e-05, %v862_v44 }
0x1129   :  { %v889_v45 = vpop.permute.xlu0 %888 }
0x112a   :  { %4002 = vrsqrt.f32 %v863_v18 }
0x1134   :  { %v4003_v48 = vpop.eup %4002 }
0x1135   :  { %v866_v39 = vrot.slane %v4003_v48, 1  ;;  %v869_v50 = vmul.f32 %v4003_v48, %v848_v42  ;;  %v1024_v42 = vsel %vm834_vm3, %v1023_v7, %v4465_v59  ;;  %v1213_v7 = vrot.slane %v4531_v30, 7 }
0x1137   :  { %v870_v32 = vmul.f32 %v866_v39, %v849_v28  ;;  %v880_v53 = vmul.f32 %v878_v60, %v869_v50  ;;  %v3599_v28 = vmul.f32 -1.442695, %v4892_v3 }
0x1139   :  { %v881_v31 = vmul.f32 %v878_v60, %v870_v32  ;;  %v891_v10 = vadd.f32 %v889_v45, %v880_v53  ;;  %4004 = vpow2.f32 %v3599_v28 }
0x113a   :  { %4006 = vpow2.f32 %v3600_v13  ;;  %v1215_v13 = vsel %vm1214_vm5, %v1213_v7, %v4529_v29 }
0x113b   :  { %v892_v11 = vadd.f32 %v889_v45, %v881_v31  ;;  %v893_v2 = vadd.f32 %v891_v10, %v4936_v17  ;;  %4008 = vpow2.f32 %v3607_v14 }
0x113d   :  { %v894_v63 = vadd.f32 %v892_v11, %v4939_v4 }
0x113f   :  { %v897_v43 = vrot.slane %v894_v63, 7 }
0x1141   :  { %v898_v49 = vsel %vm834_vm3, %v897_v43, %v893_v2 }
0x1142   :  { %899 = vrot.lane.b32.xlu1 %v898_v49, %s4127_s3 }
0x1146   :  { %1025 = vrot.lane.b32.xlu1 %v1024_v42, %s4127_s3 }
0x114a   :  { %2734 = vrot.lane.b32.xlu1 %v4909_v36, %s4127_s3  ;;  %v3608_v36 = vmul.f32 -1.442695, %v4903_v58 }
0x114c   :  { %4010 = vpow2.f32 %v3608_v36 }
0x114e   :  { %2736 = vrot.lane.b32.xlu1 %v4913_v46, %s4127_s3  ;;  %v4005_v46 = vpop.eup %4004 }
0x114f   :  { %v4007_v26 = vpop.eup %4006 }
0x1150   :  { %v2717_v44 = vadd.f32 1.0, %v4007_v26  ;;  %v4009_v58 = vpop.eup %4008 }
0x1151   :  { %v2909_v60 = vadd.f32 1.0, %v4009_v58 }
0x1152   :  { %2927 = vrot.lane.b32.xlu1 %v4919_v33, %s4127_s3 }
0x1156   :  { %2929 = vrot.lane.b32.xlu1 %v4923_v40, %s4127_s3  ;;  %v2716_v40 = vadd.f32 1.0, %v4005_v46  ;;  %v4011_v39 = vpop.eup %4010 }
0x1158   :  { %4012 = vrcp.f32 %v2716_v40 }
0x1162   :  { %v4013_v53 = vpop.eup %4012 }
0x11b4   :  { %v900_v38 = vpop.permute.xlu1 %899 }
0x11b5   :  { %3513 = vst.msk [vmem:[%s5506_s6 + $0x1] sm:$0x6] %vm839_vm4, %v900_v38 }
0x11b8   :  { %v1026_v33 = vpop.permute.xlu1 %1025 }
0x11b9   :  { %v1028_v3 = vsel %vm839_vm4, %v1026_v33, 0.0 }
0x11ba   :  { %1029 = vadd.xlane.f32.xlu0 %v1028_v3 }
0x11bc   :  { %v2735_v22 = vpop.permute.xlu1 %2734 }
0x11bd   :  { %v5029_v55 = vadd.f32 %v2735_v22, %v4911_v1  ;;  %v2910_v1 = vadd.f32 1.0, %v4011_v39 }
0x11bf   :  { %4014 = vtanh.f32 %v5029_v55 }
0x11c0   :  { %v2737_v18 = vpop.permute.xlu1 %2736  ;;  %4016 = vrcp.f32 %v2717_v44 }
0x11c1   :  { %v5033_v48 = vadd.f32 %v2737_v18, %v4915_v6 }
0x11c3   :  { %4018 = vtanh.f32 %v5033_v48 }
0x11c4   :  { %v2928_v50 = vpop.permute.xlu1 %2927  ;;  %4020 = vrcp.f32 %v2909_v60 }
0x11c5   :  { %v5037_v32 = vadd.f32 %v2928_v50, %v4921_v0 }
0x11c7   :  { %4022 = vtanh.f32 %v5037_v32 }
0x11c8   :  { %v2930_v45 = vpop.permute.xlu1 %2929  ;;  %4024 = vrcp.f32 %v2910_v1 }
0x11c9   :  { %v4015_v31 = vpop.eup %4014  ;;  %v5041_v10 = vadd.f32 %v2930_v45, %v4925_v9 }
0x11ca   :  { %v5043_v6 = vmul.f32 %v4015_v31, %v4013_v53  ;;  %v4017_v11 = vpop.eup %4016 }
0x11cb   :  { %4026 = vtanh.f32 %v5041_v10 }
0x11cc   :  { %v3010_v7 = vpack.c.bf16 %v5043_v6, %v5043_v6 }
0x11cd   :  { %v4019_v63 = vpop.eup %4018 }
0x11ce   :  { %v5046_v2 = vmul.f32 %v4019_v63, %v4017_v11  ;;  %v4021_v0 = vpop.eup %4020 }
0x11d0   :  { %1065 = vrot.lane.b32.xlu0 %v4949_v51, %s4127_s3  ;;  %v3011_v11 = vpack.c.bf16 %v5046_v2, %v5046_v2 }
0x11d1   :  { %v4023_v43 = vpop.eup %4022 }
0x11d2   :  { %v5050_v49 = vmul.f32 %v4023_v43, %v4021_v0  ;;  %v4025_v9 = vpop.eup %4024 }
0x11d4   :  { %1076 = vrot.lane.b32.xlu0 %v4977_v27, %s4127_s3 }
0x11d5   :  { %v4027_v42 = vpop.eup %4026 }
0x11d6   :  { %v5055_v28 = vmul.f32 %v4027_v42, %v4025_v9 }
0x11d8   :  { %1216 = vrot.lane.b32.xlu0 %v1215_v13, %s4127_s3  ;;  %v3015_v13 = vunpack.c.l.b16 %v3011_v11 }
0x1247   :  { %v1030_v14 = vpop.xlane.xlu0 %1029 }
0x1248   :  { %v1031_v38 = vmul.f32 0.015625, %v1030_v14  ;;  %v3223_v14 = vpack.c.bf16 %v5055_v28, %v5055_v28 }
0x124a   :  { %v1033_v36 = vrot.slane %v1031_v38, 1  ;;  %v1036_v33 = vsub.f32 %v4465_v59, %v1031_v38 }
0x124b   :  { %v1066_v46 = vpop.permute.xlu0 %1065 }
0x124c   :  { %v1037_v3 = vsub.f32 %v4473_v15, %v1033_v36  ;;  %v1038_v22 = vmul.f32 %v1036_v33, %v1036_v33 }
0x124e   :  { %v1039_v40 = vmul.f32 %v1037_v3, %v1037_v3 }
0x124f   :  { %v1077_v26 = vpop.permute.xlu0 %1076 }
0x1250   :  { %v1042_v44 = vrot.slane %v1039_v40, 7  ;;  %v3014_v40 = vunpack.c.l.b16 %v3010_v7 }
0x1252   :  { %v1043_v58 = vsel %vm834_vm3, %v1042_v44, %v1038_v22 }
0x1253   :  { %1044 = vrot.lane.b32.xlu1 %v1043_v58, %s4127_s3  ;;  %v1217_v18 = vpop.permute.xlu0 %1216  ;;  %v3227_v58 = vunpack.c.l.b16 %v3223_v14  ;;  %v1405_v14 = vrot.slane %v4539_v47, 7 }
0x1254   :  { %v1220_v60 = vsel %vm1219_vm6, %v1217_v18, 0.0 }
0x1255   :  { %1221 = vadd.xlane.f32.xlu0 %v1220_v60 }
0x126b   :  { %1257 = vrot.lane.b32.xlu0 %v4859_v8, %s4127_s3 }
0x126f   :  { %1268 = vrot.lane.b32.xlu0 %v4931_v41, %s4127_s3 }
0x12c5   :  { %v1045_v59 = vpop.permute.xlu1 %1044 }
0x12c6   :  { %v1047_v15 = vsel %vm839_vm4, %v1045_v59, 0.0  ;;  %v3016_v59 = vrot.slane %v3014_v40, 6 }
0x12c7   :  { %1048 = vadd.xlane.f32.xlu1 %v1047_v15 }
0x12e2   :  { %v1222_v63 = vpop.xlane.xlu0 %1221 }
0x12e3   :  { %v1223_v9 = vmul.f32 0.015625, %v1222_v63 }
0x12e5   :  { %v1225_v22 = vrot.slane %v1223_v9, 1  ;;  %v1228_v11 = vsub.f32 %v4529_v29, %v1223_v9 }
0x12e7   :  { %v1229_v15 = vsub.f32 %v4531_v30, %v1225_v22  ;;  %v1230_v30 = vmul.f32 %v1228_v11, %v1228_v11  ;;  %v1258_v22 = vpop.permute.xlu0 %1257 }
0x1354   :  { %v1049_v39 = vpop.xlane.xlu1 %1048 }
0x1355   :  { %v1050_v50 = vmul.f32 0.015625, %v1049_v39 }
0x1357   :  { %v1051_v1 = vadd.f32 1e-05, %v1050_v50  ;;  %v3229_v50 = vrot.slane %v3227_v58, 5 }
0x1359   :  { %4028 = vrsqrt.f32 %v1051_v1 }
0x1363   :  { %v4029_v53 = vpop.eup %4028 }
0x1364   :  { %v1054_v45 = vrot.slane %v4029_v53, 1  ;;  %v1057_v31 = vmul.f32 %v4029_v53, %v1036_v33  ;;  %v3222_v33 = vpack.c.bf16 %v5050_v49, %v5050_v49 }
0x1366   :  { %v1058_v0 = vmul.f32 %v1054_v45, %v1037_v3  ;;  %v1068_v43 = vmul.f32 %v1066_v46, %v1057_v31  ;;  %v3017_v3 = vrot.slane %v3015_v13, 5  ;;  %v1231_v31 = vmul.f32 %v1229_v15, %v1229_v15 }
0x1368   :  { %v1069_v42 = vmul.f32 %v1066_v46, %v1058_v0  ;;  %v1079_v38 = vadd.f32 %v1077_v26, %v1068_v43  ;;  %v3226_v46 = vunpack.c.l.b16 %v3222_v33  ;;  %v1234_v0 = vrot.slane %v1231_v31, 7 }
0x136a   :  { %v1080_v36 = vadd.f32 %v1077_v26, %v1069_v42  ;;  %v1081_v18 = vadd.f32 %v1079_v38, %v4981_v35  ;;  %v3018_v26 = vsel %vm418_vm1, %v3017_v3, %v3016_v59  ;;  %v3228_v1 = vrot.slane %v3226_v46, 6  ;;  %v1269_v59 = vpop.permute.xlu0 %1268 }
0x136b   :  { %v3019_v53 = vpack.c.b16 %v3018_v26, %v3018_v26  ;;  %v1235_v43 = vsel %vm1214_vm5, %v1234_v0, %v1230_v30  ;;  %v1406_v38 = vsel %vm1214_vm5, %v1405_v14, %v4537_v52 }
0x136c   :  { %v1082_v44 = vadd.f32 %v1080_v36, %v4983_v12  ;;  %v3230_v45 = vsel %vm418_vm1, %v3229_v50, %v3228_v1 }
0x136d   :  { %v3231_v63 = vpack.c.b16 %v3230_v45, %v3230_v45 }
0x136e   :  { %v1085_v60 = vrot.slane %v1082_v44, 7 }
0x1370   :  { %v1086_v39 = vsel %vm834_vm3, %v1085_v60, %v1081_v18 }
0x1371   :  { %1087 = vrot.lane.b32.xlu1 %v1086_v39, %s4127_s3 }
0x1375   :  { %3020 = vrot.lane.b32.xlu1 %v3019_v53, %s4127_s3 }
0x1379   :  { %3232 = vrot.lane.b32.xlu1 %v3231_v63, %s4127_s3 }
0x137d   :  { %1236 = vrot.lane.b32.xlu1 %v1235_v43, %s4127_s3 }
0x13e3   :  { %v1088_v7 = vpop.permute.xlu1 %1087 }
0x13e4   :  { %3523 = vst.msk [vmem:[%s5506_s6 + $0x11] sm:$0x6] %vm839_vm4, %v1088_v7 }
0x13e7   :  { %v3021_v42 = vpop.permute.xlu1 %3020 }
0x13e8   :  { %3614 = vmatmul.mubr.msk.bf16.vlgmr.msra.gmra.mrb[32].mxu0 %vm93_vm0, %v3021_v42 }
0x13eb   :  { %v3233_v13 = vpop.permute.xlu1 %3232 }
0x13ec   :  { %3623 = vmatmul.mubr.msk.bf16.vlgmr.msra.gmra.mrb[32].mxu1 %vm93_vm0, %v3233_v13  ;;  %vm3139_vm0 = vcmask 523271  }
0x13ef   :  { %v1237_v29 = vpop.permute.xlu1 %1236 }
0x13f0   :  { %v1239_v9 = vsel %vm1219_vm6, %v1237_v29, 0.0 }
0x13f1   :  { %1240 = vadd.xlane.f32.xlu1 %v1239_v9 }
0x1402   :  { %1407 = vrot.lane.b32.xlu1 %v1406_v38, %s4127_s3 }
0x147e   :  { %v1241_v36 = vpop.xlane.xlu1 %1240 }
0x147f   :  { %v1242_v40 = vmul.f32 0.015625, %v1241_v36 }
0x1481   :  { %v1243_v33 = vadd.f32 1e-05, %v1242_v40 }
0x1482   :  { %v1408_v31 = vpop.permute.xlu1 %1407 }
0x1483   :  { %4030 = vrsqrt.f32 %v1243_v33  ;;  %v1410_v63 = vsel %vm1219_vm6, %v1408_v31, 0.0 }
0x148d   :  { %v4031_v44 = vpop.eup %4030 }
0x148e   :  { %v1246_v3 = vrot.slane %v4031_v44, 1  ;;  %v1249_v58 = vmul.f32 %v4031_v44, %v1228_v11 }
0x1490   :  { %v1250_v18 = vmul.f32 %v1246_v3, %v1229_v15  ;;  %v1260_v60 = vmul.f32 %v1258_v22, %v1249_v58 }
0x1492   :  { %v1261_v46 = vmul.f32 %v1258_v22, %v1250_v18  ;;  %v1271_v39 = vadd.f32 %v1269_v59, %v1260_v60 }
0x1494   :  { %v1272_v26 = vadd.f32 %v1269_v59, %v1261_v46  ;;  %v1273_v1 = vadd.f32 %v1271_v39, %v4936_v17 }
0x1496   :  { %v1274_v50 = vadd.f32 %v1272_v26, %v4939_v4 }
0x1498   :  { %v1277_v53 = vrot.slane %v1274_v50, 7 }
0x149a   :  { %v1278_v45 = vsel %vm1214_vm5, %v1277_v53, %v1273_v1 }
0x149b   :  { %1279 = vrot.lane.b32.xlu0 %v1278_v45, %s4127_s3 }
0x14ba   :  { %1411 = vadd.xlane.f32.xlu0 %v1410_v63  ;;  %v1596_v63 = vrot.slane %v4644_v23, 7 }
0x14bb   :  { %v3059_v11 = vpop.f32.mrb[32].mxu0 }
0x14bc   :  { %v3068_v15 = vrot.slane %v3059_v11, 1  ;;  %v3070_v0 = vrot.slane %v3059_v11, 2  ;;  %v3061_v30 = vpop.f32.mrb[33].mxu0 }
0x14bd   :  { %v3063_v43 = vpop.f32.mrb[34].mxu0  ;;  %v3071_v60 = vrot.slane %v3061_v30, 2 }
0x14be   :  { %v3076_v7 = vadd.f32 %v3068_v15, %v4353_v54  ;;  %v3078_v42 = vadd.f32 %v3070_v0, %v4355_v56  ;;  %v3064_v13 = vpop.f32.mrb[35].mxu0  ;;  %v3069_v54 = vrot.slane %v3061_v30, 1  ;;  %v3108_v15 = vrot.slane %v5029_v55, 7 }
0x14bf   :  { %v3271_v29 = vpop.f32.mrb[32].mxu1  ;;  %v5114_v59 = vadd.f32 %v3071_v60, %v4367_v19  ;;  %v3109_v30 = vrot.slane %v5033_v48, 7  ;;  %v3321_v55 = vrot.slane %v5041_v10, 7 }
0x14c0   :  { %v3615_v9 = vmul.f32 -1.442695, %v3076_v7  ;;  %v3616_v14 = vmul.f32 -1.442695, %v3078_v42  ;;  %v3280_v38 = vrot.slane %v3271_v29, 1  ;;  %v3282_v36 = vrot.slane %v3271_v29, 2 }
0x14c1   :  { %v3273_v40 = vpop.f32.mrb[33].mxu1  ;;  %v5111_v56 = vadd.f32 %v3069_v54, %v4365_v16 }
0x14c2   :  { %4032 = vpow2.f32 %v3615_v9  ;;  %v3288_v33 = vadd.f32 %v3280_v38, %v4357_v57  ;;  %v3290_v22 = vadd.f32 %v3282_v36, %v4360_v61  ;;  %v3275_v44 = vpop.f32.mrb[34].mxu1  ;;  %v3281_v46 = vrot.slane %v3273_v40, 1 }
0x14c3   :  { %4034 = vpow2.f32 %v3616_v14  ;;  %v3276_v3 = vpop.f32.mrb[35].mxu1  ;;  %v3283_v39 = vrot.slane %v3273_v40, 2  ;;  %v3320_v38 = vrot.slane %v5037_v32, 7 }
0x14c4   :  { %v3624_v58 = vmul.f32 -1.442695, %v3288_v33  ;;  %v3625_v18 = vmul.f32 -1.442695, %v3290_v22  ;;  %v5119_v1 = vadd.f32 %v3281_v46, %v4369_v20 }
0x14c5   :  { %v5122_v16 = vadd.f32 %v3283_v39, %v4372_v24  ;;  %v1598_v24 = vsel %vm1597_vm7, %v1596_v63, %v4642_v21 }
0x14c6   :  { %4036 = vpow2.f32 %v3624_v58 }
0x14c7   :  { %4038 = vpow2.f32 %v3625_v18 }
0x14c8   :  { %4040 = vtanh.f32 %v5111_v56 }
0x14c9   :  { %4042 = vtanh.f32 %v5114_v59 }
0x14cc   :  { %v4033_v57 = vpop.eup %4032 }
0x14cd   :  { %v4035_v26 = vpop.eup %4034  ;;  %v3086_v61 = vadd.f32 1.0, %v4033_v57 }
0x14ce   :  { %v3087_v50 = vadd.f32 1.0, %v4035_v26 }
0x14cf   :  { %4044 = vrcp.f32 %v3086_v61 }
0x14d0   :  { %4046 = vrcp.f32 %v3087_v50  ;;  %1447 = vrot.lane.b32.xlu0 %v4949_v51, %s4127_s3  ;;  %v4037_v19 = vpop.eup %4036 }
0x14d1   :  { %v4039_v53 = vpop.eup %4038  ;;  %v3298_v45 = vadd.f32 1.0, %v4037_v19  ;;  %4048 = vtanh.f32 %v5119_v1 }
0x14d2   :  { %v3299_v31 = vadd.f32 1.0, %v4039_v53  ;;  %4050 = vtanh.f32 %v5122_v16  ;;  %v4041_v20 = vpop.eup %4040 }
0x14d3   :  { %4052 = vrcp.f32 %v3298_v45  ;;  %v4043_v11 = vpop.eup %4042 }
0x14d4   :  { %1458 = vrot.lane.b32.xlu0 %v4977_v27, %s4127_s3  ;;  %4054 = vrcp.f32 %v3299_v31 }
0x14d8   :  { %1599 = vrot.lane.b32.xlu0 %v1598_v24, %s4127_s3 }
0x14d9   :  { %v4045_v0 = vpop.eup %4044 }
0x14da   :  { %v4047_v43 = vpop.eup %4046  ;;  %v5136_v7 = vmul.f32 %v4045_v0, %v4041_v20  ;;  %v5138_v42 = vmul.f32 %v4045_v0, %v3108_v15 }
0x14db   :  { %v5140_v13 = vmul.f32 %v4047_v43, %v4043_v11  ;;  %v5142_v29 = vmul.f32 %v4047_v43, %v3109_v30  ;;  %v4049_v9 = vpop.eup %4048 }
0x14dc   :  { %v4051_v14 = vpop.eup %4050 }
0x14dd   :  { %v4053_v36 = vpop.eup %4052 }
0x14de   :  { %v4055_v40 = vpop.eup %4054  ;;  %v5146_v33 = vmul.f32 %v4053_v36, %v4049_v9  ;;  %v5148_v48 = vmul.f32 %v4053_v36, %v3320_v38 }
0x14df   :  { %v5150_v22 = vmul.f32 %v4055_v40, %v4051_v14  ;;  %v5152_v44 = vmul.f32 %v4055_v40, %v3321_v55 }
0x150d   :  { %v1280_v3 = vpop.permute.xlu0 %1279 }
0x150e   :  { %3531 = vst.msk [vmem:[%s5506_s6 + $0x2] sm:$0xc] %vm1219_vm6, %v1280_v3 }
0x1547   :  { %v1412_v58 = vpop.xlane.xlu0 %1411 }
0x1548   :  { %v1413_v32 = vmul.f32 0.015625, %v1412_v58 }
0x154a   :  { %v1415_v18 = vrot.slane %v1413_v32, 1  ;;  %v1418_v10 = vsub.f32 %v4537_v52, %v1413_v32 }
0x154b   :  { %v1448_v54 = vpop.permute.xlu0 %1447 }
0x154c   :  { %v1419_v60 = vsub.f32 %v4539_v47, %v1415_v18  ;;  %v1420_v57 = vmul.f32 %v1418_v10, %v1418_v10 }
0x154e   :  { %v1421_v46 = vmul.f32 %v1419_v60, %v1419_v60 }
0x154f   :  { %v1459_v39 = vpop.permute.xlu0 %1458 }
0x1550   :  { %v1424_v26 = vrot.slane %v1421_v46, 7 }
0x1552   :  { %v1425_v61 = vsel %vm1214_vm5, %v1424_v26, %v1420_v57 }
0x1553   :  { %1426 = vrot.lane.b32.xlu1 %v1425_v61, %s4127_s3  ;;  %v1600_v50 = vpop.permute.xlu0 %1599 }
0x1554   :  { %v1603_v19 = vsel %vm1602_vm8, %v1600_v50, 0.0 }
0x1555   :  { %1604 = vadd.xlane.f32.xlu0 %v1603_v19 }
0x156b   :  { %1640 = vrot.lane.b32.xlu0 %v4859_v8, %s4127_s3 }
0x15c5   :  { %v1427_v53 = vpop.permute.xlu1 %1426 }
0x15c6   :  { %v1429_v52 = vsel %vm1219_vm6, %v1427_v53, 0.0 }
0x15c7   :  { %1430 = vadd.xlane.f32.xlu1 %v1429_v52 }
0x15e2   :  { %v1605_v63 = vpop.xlane.xlu0 %1604 }
0x15e3   :  { %v1606_v20 = vmul.f32 0.015625, %v1605_v63 }
0x15e5   :  { %v1608_v11 = vrot.slane %v1606_v20, 1  ;;  %v1611_v40 = vsub.f32 %v4642_v21, %v1606_v20 }
0x15e6   :  { %v1641_v61 = vpop.permute.xlu0 %1640 }
0x15e7   :  { %v1612_v9 = vsub.f32 %v4644_v23, %v1608_v11 }
0x15e9   :  { %v1614_v36 = vmul.f32 %v1612_v9, %v1612_v9 }
0x15eb   :  { %v1617_v18 = vrot.slane %v1614_v36, 7 }
0x1654   :  { %v1431_v47 = vpop.xlane.xlu1 %1430 }
0x1655   :  { %v1432_v45 = vmul.f32 0.015625, %v1431_v47 }
0x1657   :  { %v1433_v31 = vadd.f32 1e-05, %v1432_v45 }
0x1659   :  { %4056 = vrsqrt.f32 %v1433_v31 }
0x1663   :  { %v4057_v24 = vpop.eup %4056 }
0x1664   :  { %v1436_v15 = vrot.slane %v4057_v24, 1  ;;  %v1439_v0 = vmul.f32 %v4057_v24, %v1418_v10  ;;  %v1613_v10 = vmul.f32 %v1611_v40, %v1611_v40 }
0x1666   :  { %v1440_v30 = vmul.f32 %v1436_v15, %v1419_v60  ;;  %v1450_v43 = vmul.f32 %v1448_v54, %v1439_v0  ;;  %v1618_v60 = vsel %vm1597_vm7, %v1617_v18, %v1613_v10  ;;  %v5525_v0 = vld [vmem:[#allocation3_spill] sm:$0xff] }
0x1668   :  { %v1451_v14 = vmul.f32 %v1448_v54, %v1440_v30  ;;  %v1461_v8 = vadd.f32 %v1459_v39, %v1450_v43  ;;  %v1789_v30 = vrot.slane %v5525_v0, 7  ;;  %v5526_v43 = vld [vmem:[#allocation2_spill] sm:$0xff] }
0x166a   :  { %v1462_v38 = vadd.f32 %v1459_v39, %v1451_v14  ;;  %v1463_v3 = vadd.f32 %v1461_v8, %v4981_v35  ;;  %v1790_v14 = vsel %vm1597_vm7, %v1789_v30, %v5526_v43 }
0x166c   :  { %v1464_v55 = vadd.f32 %v1462_v38, %v4983_v12 }
0x166e   :  { %v1467_v58 = vrot.slane %v1464_v55, 7 }
0x1670   :  { %v1468_v32 = vsel %vm1214_vm5, %v1467_v58, %v1463_v3 }
0x1671   :  { %1469 = vrot.lane.b32.xlu1 %v1468_v32, %s4127_s3 }
0x1675   :  { %1619 = vrot.lane.b32.xlu1 %v1618_v60, %s4127_s3 }
0x16e3   :  { %v1470_v23 = vpop.permute.xlu1 %1469 }
0x16e4   :  { %3541 = vst.msk [vmem:[%s5506_s6 + $0x12] sm:$0xc] %vm1219_vm6, %v1470_v23 }
0x16e7   :  { %v1620_v21 = vpop.permute.xlu1 %1619 }
0x16e8   :  { %v1622_v54 = vsel %vm1602_vm8, %v1620_v21, 0.0 }
0x16e9   :  { %1623 = vadd.xlane.f32.xlu1 %v1622_v54 }
0x16fa   :  { %1651 = vrot.lane.b32.xlu1 %v4931_v41, %s4127_s3 }
0x1776   :  { %v1624_v46 = vpop.xlane.xlu1 %1623 }
0x1777   :  { %v1625_v39 = vmul.f32 0.015625, %v1624_v46 }
0x1779   :  { %v1626_v57 = vadd.f32 1e-05, %v1625_v39 }
0x177a   :  { %v1652_v47 = vpop.permute.xlu1 %1651 }
0x177b   :  { %4058 = vrsqrt.f32 %v1626_v57 }
0x1785   :  { %v4059_v26 = vpop.eup %4058 }
0x1786   :  { %v1629_v50 = vrot.slane %v4059_v26, 1  ;;  %v1632_v19 = vmul.f32 %v4059_v26, %v1611_v40 }
0x1788   :  { %v1633_v53 = vmul.f32 %v1629_v50, %v1612_v9  ;;  %v1643_v52 = vmul.f32 %v1641_v61, %v1632_v19 }
0x178a   :  { %v1644_v45 = vmul.f32 %v1641_v61, %v1633_v53  ;;  %v1654_v31 = vadd.f32 %v1652_v47, %v1643_v52 }
0x178c   :  { %v1655_v63 = vadd.f32 %v1652_v47, %v1644_v45  ;;  %v1656_v24 = vadd.f32 %v1654_v31, %v4936_v17 }
0x178e   :  { %v1657_v20 = vadd.f32 %v1655_v63, %v4939_v4 }
0x1790   :  { %v1660_v11 = vrot.slane %v1657_v20, 7 }
0x1792   :  { %v1661_v15 = vsel %vm1597_vm7, %v1660_v11, %v1656_v24 }
0x1793   :  { %1662 = vrot.lane.b32.xlu0 %v1661_v15, %s4127_s3  ;;  %v1980_v15 = vrot.slane %v4747_v34, 7 }
0x1797   :  { %1791 = vrot.lane.b32.xlu0 %v1790_v14, %s4127_s3 }
0x1805   :  { %v1663_v9 = vpop.permute.xlu0 %1662 }
0x1806   :  { %3549 = vst.msk [vmem:[%s5506_s6 + $0x3] sm:$0x18] %vm1602_vm8, %v1663_v9 }
0x1809   :  { %v1792_v8 = vpop.permute.xlu0 %1791 }
0x180a   :  { %v1794_v38 = vsel %vm1602_vm8, %v1792_v8, 0.0 }
0x180b   :  { %1795 = vadd.xlane.f32.xlu0 %v1794_v38  ;;  %v5219_v38 = vld [vmem:[%s5504_s4] ss:$0 sm:$0xff] }
0x1821   :  { %1831 = vrot.lane.b32.xlu0 %v4949_v51, %s4127_s3 }
0x1898   :  { %v1796_v36 = vpop.xlane.xlu0 %1795 }
0x1899   :  { %v1797_v55 = vmul.f32 0.015625, %v1796_v36 }
0x189b   :  { %v1799_v40 = vrot.slane %v1797_v55, 1  ;;  %v1802_v3 = vsub.f32 %v5526_v43, %v1797_v55 }
0x189c   :  { %v1832_v26 = vpop.permute.xlu0 %1831 }
0x189d   :  { %v1803_v58 = vsub.f32 %v5525_v0, %v1799_v40  ;;  %v1804_v18 = vmul.f32 %v1802_v3, %v1802_v3  ;;  %v5527_v0 = vld [vmem:[#allocation4_spill] sm:$0xff] }
0x189e   :  { %v1982_v30 = vsel %vm1981_vm9, %v1980_v15, %v5527_v0 }
0x189f   :  { %v1805_v32 = vmul.f32 %v1803_v58, %v1803_v58 }
0x18a1   :  { %v1808_v10 = vrot.slane %v1805_v32, 7 }
0x18a3   :  { %v1809_v60 = vsel %vm1597_vm7, %v1808_v10, %v1804_v18 }
0x18a4   :  { %1810 = vrot.lane.b32.xlu1 %v1809_v60, %s4127_s3 }
0x1916   :  { %v1811_v23 = vpop.permute.xlu1 %1810 }
0x1917   :  { %v1813_v21 = vsel %vm1602_vm8, %v1811_v23, 0.0 }
0x1918   :  { %1814 = vadd.xlane.f32.xlu1 %v1813_v21 }
0x1929   :  { %1842 = vrot.lane.b32.xlu1 %v4977_v27, %s4127_s3 }
0x19a5   :  { %v1815_v54 = vpop.xlane.xlu1 %1814 }
0x19a6   :  { %v1816_v46 = vmul.f32 0.015625, %v1815_v54 }
0x19a8   :  { %v1817_v39 = vadd.f32 1e-05, %v1816_v46 }
0x19a9   :  { %v1843_v52 = vpop.permute.xlu1 %1842 }
0x19aa   :  { %4060 = vrsqrt.f32 %v1817_v39 }
0x19b4   :  { %v4061_v57 = vpop.eup %4060 }
0x19b5   :  { %v1820_v61 = vrot.slane %v4061_v57, 1  ;;  %v1823_v50 = vmul.f32 %v4061_v57, %v1802_v3 }
0x19b7   :  { %v1824_v19 = vmul.f32 %v1820_v61, %v1803_v58  ;;  %v1834_v53 = vmul.f32 %v1832_v26, %v1823_v50 }
0x19b9   :  { %v1835_v47 = vmul.f32 %v1832_v26, %v1824_v19  ;;  %v1845_v45 = vadd.f32 %v1843_v52, %v1834_v53 }
0x19bb   :  { %v1846_v31 = vadd.f32 %v1843_v52, %v1835_v47  ;;  %v1847_v20 = vadd.f32 %v1845_v45, %v4981_v35 }
0x19bd   :  { %v1848_v63 = vadd.f32 %v1846_v31, %v4983_v12 }
0x19bf   :  { %v1851_v24 = vrot.slane %v1848_v63, 7 }
0x19c1   :  { %v1852_v11 = vsel %vm1597_vm7, %v1851_v24, %v1847_v20  ;;  %v5528_v20 = vld [vmem:[#allocation6_spill] sm:$0xff] }
0x19c2   :  { %1853 = vrot.lane.b32.xlu0 %v1852_v11, %s4127_s3  ;;  %v2173_v24 = vrot.slane %v5528_v20, 7  ;;  %v5529_v11 = vld [vmem:[#allocation5_spill] sm:$0xff] }
0x19c4   :  { %v2174_v15 = vsel %vm1981_vm9, %v2173_v24, %v5529_v11 }
0x19c6   :  { %1983 = vrot.lane.b32.xlu0 %v1982_v30, %s4127_s3 }
0x1a34   :  { %v1854_v43 = vpop.permute.xlu0 %1853 }
0x1a35   :  { %3559 = vst.msk [vmem:[%s5506_s6 + $0x13] sm:$0x18] %vm1602_vm8, %v1854_v43 }
0x1a38   :  { %v1984_v14 = vpop.permute.xlu0 %1983 }
0x1a39   :  { %v1987_v9 = vsel %vm1986_vm10, %v1984_v14, 0.0  ;;  %v2364_v14 = vrot.slane %v4815_v62, 7 }
0x1a3a   :  { %1988 = vadd.xlane.f32.xlu0 %v1987_v9 }
0x1a3b   :  { %v2366_v9 = vsel %vm2365_vm11, %v2364_v14, %v4813_v37 }
0x1a50   :  { %2024 = vrot.lane.b32.xlu0 %v5219_v38, %s4127_s3 }
0x1ac7   :  { %v1989_v8 = vpop.xlane.xlu0 %1988 }
0x1ac8   :  { %v1990_v36 = vmul.f32 0.015625, %v1989_v8 }
0x1aca   :  { %v1992_v55 = vrot.slane %v1990_v36, 1  ;;  %v1995_v40 = vsub.f32 %v5527_v0, %v1990_v36 }
0x1acc   :  { %v1996_v3 = vsub.f32 %v4747_v34, %v1992_v55  ;;  %v1997_v32 = vmul.f32 %v1995_v40, %v1995_v40  ;;  %v2025_v34 = vpop.permute.xlu0 %2024 }
0x1ace   :  { %v1998_v58 = vmul.f32 %v1996_v3, %v1996_v3 }
0x1ad0   :  { %v2001_v18 = vrot.slane %v1998_v58, 7 }
0x1ad2   :  { %v2002_v10 = vsel %vm1981_vm9, %v2001_v18, %v1997_v32 }
0x1ad3   :  { %2003 = vrot.lane.b32.xlu1 %v2002_v10, %s4127_s3 }
0x1b45   :  { %v2004_v60 = vpop.permute.xlu1 %2003 }
0x1b46   :  { %v2006_v23 = vsel %vm1986_vm10, %v2004_v60, 0.0 }
0x1b47   :  { %2007 = vadd.xlane.f32.xlu1 %v2006_v23 }
0x1b58   :  { %2035 = vrot.lane.b32.xlu1 %v4931_v41, %s4127_s3 }
0x1bd4   :  { %v2008_v21 = vpop.xlane.xlu1 %2007 }
0x1bd5   :  { %v2009_v54 = vmul.f32 0.015625, %v2008_v21  ;;  %v3618_v21 = vmul.f32 -1.442695, %v5114_v59 }
0x1bd7   :  { %v2010_v46 = vadd.f32 1e-05, %v2009_v54  ;;  %v3627_v54 = vmul.f32 -1.442695, %v5122_v16 }
0x1bd8   :  { %v2036_v19 = vpop.permute.xlu1 %2035 }
0x1bd9   :  { %4062 = vrsqrt.f32 %v2010_v46  ;;  %v3617_v46 = vmul.f32 -1.442695, %v5111_v56 }
0x1bda   :  { %4064 = vpow2.f32 %v3618_v21 }
0x1bdb   :  { %4066 = vpow2.f32 %v3627_v54 }
0x1bdc   :  { %4068 = vpow2.f32 %v3617_v46 }
0x1be3   :  { %v4063_v39 = vpop.eup %4062 }
0x1be4   :  { %v2013_v57 = vrot.slane %v4063_v39, 1  ;;  %v2016_v26 = vmul.f32 %v4063_v39, %v1995_v40  ;;  %v4065_v39 = vpop.eup %4064 }
0x1be6   :  { %v2017_v61 = vmul.f32 %v2013_v57, %v1996_v3  ;;  %v2027_v50 = vmul.f32 %v2025_v34, %v2016_v26  ;;  %v4067_v57 = vpop.eup %4066 }
0x1be7   :  { %v3313_v26 = vadd.f32 1.0, %v4067_v57  ;;  %v4069_v16 = vpop.eup %4068 }
0x1be8   :  { %v2028_v53 = vmul.f32 %v2025_v34, %v2017_v61  ;;  %v2038_v52 = vadd.f32 %v2036_v19, %v2027_v50  ;;  %v3100_v50 = vadd.f32 1.0, %v4069_v16  ;;  %v5330_v16 = vld [vmem:[%s5505_s5] ss:$0 sm:$0xff] }
0x1bea   :  { %v2039_v47 = vadd.f32 %v2036_v19, %v2028_v53  ;;  %v2040_v31 = vadd.f32 %v2038_v52, %v4936_v17 }
0x1bec   :  { %v2041_v45 = vadd.f32 %v2039_v47, %v4939_v4 }
0x1bee   :  { %v2044_v63 = vrot.slane %v2041_v45, 7 }
0x1bf0   :  { %v2045_v41 = vsel %vm1981_vm9, %v2044_v63, %v2040_v31 }
0x1bf1   :  { %2046 = vrot.lane.b32.xlu0 %v2045_v41, %s4127_s3 }
0x1bf5   :  { %2175 = vrot.lane.b32.xlu0 %v2174_v15, %s4127_s3 }
0x1c63   :  { %v2047_v0 = vpop.permute.xlu0 %2046 }
0x1c64   :  { %3567 = vst.msk [vmem:[%s5506_s6 + $0x4] sm:$0x30] %vm1986_vm10, %v2047_v0 }
0x1c67   :  { %v2176_v30 = vpop.permute.xlu0 %2175 }
0x1c68   :  { %v2178_v43 = vsel %vm1986_vm10, %v2176_v30, 0.0 }
0x1c69   :  { %2179 = vadd.xlane.f32.xlu0 %v2178_v43 }
0x1c7f   :  { %2215 = vrot.lane.b32.xlu0 %v4949_v51, %s4127_s3 }
0x1c83   :  { %2226 = vrot.lane.b32.xlu0 %v4977_v27, %s4127_s3 }
0x1c87   :  { %2367 = vrot.lane.b32.xlu0 %v2366_v9, %s4127_s3 }
0x1cf6   :  { %v2180_v8 = vpop.xlane.xlu0 %2179 }
0x1cf7   :  { %v2181_v36 = vmul.f32 0.015625, %v2180_v8 }
0x1cf9   :  { %v2183_v55 = vrot.slane %v2181_v36, 1  ;;  %v5254_v3 = vsub.f32 %v5529_v11, %v2181_v36 }
0x1cfa   :  { %v5251_v40 = vpop.permute.xlu0 %2215 }
0x1cfb   :  { %v5257_v51 = vsub.f32 %v5528_v20, %v2183_v55  ;;  %v2188_v32 = vmul.f32 %v5254_v3, %v5254_v3 }
0x1cfd   :  { %v2189_v27 = vmul.f32 %v5257_v51, %v5257_v51 }
0x1cfe   :  { %v5261_v58 = vpop.permute.xlu0 %2226 }
0x1cff   :  { %v2192_v18 = vrot.slane %v2189_v27, 7 }
0x1d01   :  { %v2193_v10 = vsel %vm1981_vm9, %v2192_v18, %v2188_v32 }
0x1d02   :  { %2194 = vrot.lane.b32.xlu1 %v2193_v10, %s4127_s3  ;;  %v2368_v60 = vpop.permute.xlu0 %2367 }
0x1d03   :  { %v2371_v23 = vsel %vm2370_vm12, %v2368_v60, 0.0 }
0x1d04   :  { %2372 = vadd.xlane.f32.xlu0 %v2371_v23 }
0x1d06   :  { %3120 = vrot.lane.b32.xlu1 %v5140_v13, %s4127_s3  ;;  %v3626_v13 = vmul.f32 -1.442695, %v5119_v1 }
0x1d08   :  { %4070 = vpow2.f32 %v3626_v13 }
0x1d0a   :  { %3332 = vrot.lane.b32.xlu1 %v5150_v22, %s4127_s3 }
0x1d0e   :  { %3118 = vrot.lane.b32.xlu1 %v5136_v7, %s4127_s3  ;;  %v3101_v7 = vadd.f32 1.0, %v4065_v39 }
0x1d10   :  { %4072 = vrcp.f32 %v3101_v7 }
0x1d12   :  { %3330 = vrot.lane.b32.xlu1 %v5146_v33, %s4127_s3  ;;  %v4071_v1 = vpop.eup %4070 }
0x1d13   :  { %v3312_v52 = vadd.f32 1.0, %v4071_v1 }
0x1d1a   :  { %v4073_v47 = vpop.eup %4072 }
0x1d74   :  { %v2195_v34 = vpop.permute.xlu1 %2194 }
0x1d75   :  { %v2197_v22 = vsel %vm1986_vm10, %v2195_v34, 0.0 }
0x1d76   :  { %2198 = vadd.xlane.f32.xlu1 %v2197_v22 }
0x1d78   :  { %v3121_v33 = vpop.permute.xlu1 %3120 }
0x1d79   :  { %v3125_v59 = vadd.f32 %v3121_v33, %v5142_v29 }
0x1d7b   :  { %4074 = vtanh.f32 %v3125_v59  ;;  %v2941_v59 = vrot.slane %v5055_v28, 7 }
0x1d7c   :  { %v3333_v56 = vpop.permute.xlu1 %3332  ;;  %4076 = vrcp.f32 %v3313_v26 }
0x1d7d   :  { %v3337_v61 = vadd.f32 %v3333_v56, %v5152_v44  ;;  %v2942_v26 = vsel %vm2749_vm13, %v2941_v59, %v5050_v49 }
0x1d7f   :  { %4078 = vtanh.f32 %v3337_v61 }
0x1d80   :  { %v3119_v19 = vpop.permute.xlu1 %3118  ;;  %4080 = vrcp.f32 %v3100_v50 }
0x1d81   :  { %v3124_v53 = vadd.f32 %v3119_v19, %v5138_v42 }
0x1d83   :  { %4082 = vtanh.f32 %v3124_v53 }
0x1d84   :  { %v3331_v45 = vpop.permute.xlu1 %3330  ;;  %4084 = vrcp.f32 %v3312_v52 }
0x1d85   :  { %v4075_v29 = vpop.eup %4074  ;;  %v3336_v31 = vadd.f32 %v3331_v45, %v5148_v48 }
0x1d86   :  { %v5285_v63 = vmul.f32 %v4075_v29, %v4073_v47  ;;  %v4077_v44 = vpop.eup %4076 }
0x1d87   :  { %4086 = vtanh.f32 %v3336_v31 }
0x1d88   :  { %v3132_v56 = vrot.slane %v5285_v63, 7 }
0x1d89   :  { %v4079_v41 = vpop.eup %4078 }
0x1d8a   :  { %v5287_v20 = vmul.f32 %v4079_v41, %v4077_v44  ;;  %v4081_v24 = vpop.eup %4080 }
0x1d8c   :  { %v3344_v11 = vrot.slane %v5287_v20, 7 }
0x1d8d   :  { %v4083_v42 = vpop.eup %4082 }
0x1d8e   :  { %3347 = vrot.lane.b32.xlu0 %v3344_v11, %s4127_s3  ;;  %v5291_v15 = vmul.f32 %v4083_v42, %v4081_v24  ;;  %v4085_v0 = vpop.eup %4084 }
0x1d91   :  { %v4087_v30 = vpop.eup %4086  ;;  %v2373_v8 = vpop.xlane.xlu0 %2372 }
0x1d92   :  { %v5293_v43 = vmul.f32 %v4087_v30, %v4085_v0  ;;  %2408 = vrot.lane.b32.xlu0 %v5219_v38, %s4127_s3  ;;  %v2374_v36 = vmul.f32 0.015625, %v2373_v8 }
0x1d94   :  { %v2376_v27 = vrot.slane %v2374_v36, 1 }
0x1d96   :  { %v5301_v23 = vsub.f32 %v4815_v62, %v2376_v27  ;;  %2419 = vrot.lane.b32.xlu0 %v5330_v16, %s4127_s3 }
0x1d98   :  { %v2382_v13 = vmul.f32 %v5301_v23, %v5301_v23 }
0x1d9a   :  { %v2385_v22 = vrot.slane %v2382_v13, 7 }
0x1e00   :  { %v3348_v44 = vpop.permute.xlu0 %3347 }
0x1e01   :  { %v3354_v41 = vsel %vm3143_vm15, %v3348_v44, 0.0 }
0x1e03   :  { %v2199_v48 = vpop.xlane.xlu1 %2198 }
0x1e04   :  { %v2200_v14 = vmul.f32 0.015625, %v2199_v48 }
0x1e06   :  { %v2201_v9 = vadd.f32 1e-05, %v2200_v14  ;;  %v2409_v14 = vpop.permute.xlu0 %2408 }
0x1e08   :  { %4088 = vrsqrt.f32 %v2201_v9 }
0x1e12   :  { %v4089_v55 = vpop.eup %4088 }
0x1e13   :  { %v2204_v32 = vrot.slane %v4089_v55, 1  ;;  %v2207_v18 = vmul.f32 %v4089_v55, %v5254_v3  ;;  %v2379_v3 = vsub.f32 %v4813_v37, %v2374_v36  ;;  %v2748_v37 = vrot.slane %v5046_v2, 7 }
0x1e15   :  { %v2208_v10 = vmul.f32 %v2204_v32, %v5257_v51  ;;  %v2218_v60 = vmul.f32 %v5251_v40, %v2207_v18  ;;  %v2750_v33 = vsel %vm2749_vm13, %v2748_v37, %v5043_v6  ;;  %v2420_v32 = vpop.permute.xlu0 %2419 }
0x1e17   :  { %v2219_v21 = vmul.f32 %v5251_v40, %v2208_v10  ;;  %v2229_v54 = vadd.f32 %v5261_v58, %v2218_v60  ;;  %v2381_v40 = vmul.f32 %v2379_v3, %v2379_v3 }
0x1e19   :  { %v2230_v46 = vadd.f32 %v5261_v58, %v2219_v21  ;;  %v2231_v51 = vadd.f32 %v2229_v54, %v4981_v35  ;;  %v2386_v7 = vsel %vm2365_vm11, %v2385_v22, %v2381_v40  ;;  %v2557_v58 = vrot.slane %v4823_v25, 7 }
0x1e1b   :  { %v2232_v39 = vadd.f32 %v2230_v46, %v4983_v12  ;;  %v2558_v57 = vsel %vm2365_vm11, %v2557_v58, %v4821_v5 }
0x1e1d   :  { %v2235_v34 = vrot.slane %v2232_v39, 7 }
0x1e1f   :  { %v2236_v62 = vsel %vm1981_vm9, %v2235_v34, %v2231_v51 }
0x1e20   :  { %2237 = vrot.lane.b32.xlu1 %v2236_v62, %s4127_s3 }
0x1e24   :  { %2387 = vrot.lane.b32.xlu1 %v2386_v7, %s4127_s3 }
0x1e28   :  { %2559 = vrot.lane.b32.xlu1 %v2558_v57, %s4127_s3 }
0x1e2c   :  { %2751 = vrot.lane.b32.xlu1 %v2750_v33, %s4127_s3  ;;  %v5368_v33 = vld [vmem:[%s5505_s5 + $0x1] ss:$0 sm:$0xff] }
0x1e30   :  { %2943 = vrot.lane.b32.xlu1 %v2942_v26, %s4127_s3 }
0x1e34   :  { %3135 = vrot.lane.b32.xlu1 %v3132_v56, %s4127_s3 }
0x1e38   :  { %3133 = vrot.lane.b32.xlu1 %v5291_v15, %s4127_s3 }
0x1e3c   :  { %3345 = vrot.lane.b32.xlu1 %v5293_v43, %s4127_s3 }
0x1e92   :  { %v2238_v61 = vpop.permute.xlu1 %2237 }
0x1e93   :  { %3577 = vst.msk [vmem:[%s5506_s6 + $0x14] sm:$0x30] %vm1986_vm10, %v2238_v61 }
0x1e96   :  { %v2388_v50 = vpop.permute.xlu1 %2387 }
0x1e97   :  { %v2390_v1 = vsel %vm2370_vm12, %v2388_v50, 0.0 }
0x1e98   :  { %2391 = vadd.xlane.f32.xlu1 %v2390_v1 }
0x1e9a   :  { %v2560_v19 = vpop.permute.xlu1 %2559 }
0x1e9b   :  { %v2562_v39 = vsel %vm2370_vm12, %v2560_v19, 0.0 }
0x1e9e   :  { %v2752_v53 = vpop.permute.xlu1 %2751 }
0x1e9f   :  { %v2755_v52 = vsel %vm2754_vm14, %v2752_v53, 0.0 }
0x1ea0   :  { %2756 = vadd.xlane.f32.xlu1 %v2755_v52  ;;  %v5385_v52 = vld [vmem:[%s5504_s4 + $0x1] ss:$0 sm:$0xff] }
0x1ea2   :  { %v2944_v47 = vpop.permute.xlu1 %2943 }
0x1ea3   :  { %v2946_v45 = vsel %vm2754_vm14, %v2944_v47, 0.0 }
0x1ea4   :  { %2947 = vadd.xlane.f32.xlu1 %v2946_v45 }
0x1ea6   :  { %v3136_v29 = vpop.permute.xlu1 %3135 }
0x1ea7   :  { %v3144_v31 = vsel %vm3143_vm15, %v3136_v29, 0.0 }
0x1ea8   :  { %3145 = vadd.xlane.f32.xlu1 %v3144_v31 }
0x1eaa   :  { %v3134_v24 = vpop.permute.xlu1 %3133 }
0x1eab   :  { %v3140_v11 = vsel %vm3139_vm0, %v3134_v24, 0.0 }
0x1eac   :  { %3355 = vadd.xlane.f32.xlu1 %v3354_v41 }
0x1eae   :  { %v3346_v42 = vpop.permute.xlu1 %3345 }
0x1eb0   :  { %3141 = vadd.xlane.f32.xlu1 %v3140_v11 }
0x1f25   :  { %v2392_v0 = vpop.xlane.xlu1 %2391 }
0x1f26   :  { %v2393_v30 = vmul.f32 0.015625, %v2392_v0 }
0x1f28   :  { %v2394_v48 = vadd.f32 1e-05, %v2393_v30 }
0x1f2a   :  { %4090 = vrsqrt.f32 %v2394_v48 }
0x1f2d   :  { %v2757_v59 = vpop.xlane.xlu1 %2756 }
0x1f31   :  { %v2948_v26 = vpop.xlane.xlu1 %2947 }
0x1f32   :  { %v2949_v1 = vmul.f32 0.015625, %v2948_v26 }
0x1f34   :  { %v4091_v9 = vpop.eup %4090  ;;  %v2951_v19 = vrot.slane %v2949_v1, 1  ;;  %v5392_v45 = vsub.f32 %v5050_v49, %v2949_v1  ;;  %v2758_v49 = vmul.f32 0.015625, %v2757_v59 }
0x1f35   :  { %v2397_v8 = vrot.slane %v4091_v9, 1  ;;  %v2400_v36 = vmul.f32 %v4091_v9, %v2379_v3  ;;  %v3351_v3 = vsel %vm3139_vm0, %v3346_v42, 0.0 }
0x1f36   :  { %v5380_v53 = vsub.f32 %v5055_v28, %v2951_v19  ;;  %v2956_v28 = vmul.f32 %v5392_v45, %v5392_v45  ;;  %v2760_v0 = vrot.slane %v2758_v49, 1 }
0x1f37   :  { %v2401_v55 = vmul.f32 %v2397_v8, %v5301_v23  ;;  %v2411_v27 = vmul.f32 %v2409_v14, %v2400_v36 }
0x1f38   :  { %v2957_v47 = vmul.f32 %v5380_v53, %v5380_v53 }
0x1f39   :  { %v2412_v18 = vmul.f32 %v2409_v14, %v2401_v55  ;;  %v2422_v10 = vadd.f32 %v2420_v32, %v2411_v27  ;;  %v2764_v55 = vsub.f32 %v5046_v2, %v2760_v0 }
0x1f3a   :  { %v2960_v29 = vrot.slane %v2957_v47, 7 }
0x1f3b   :  { %v2423_v60 = vadd.f32 %v2420_v32, %v2412_v18  ;;  %v2424_v54 = vadd.f32 %v2422_v10, %v4936_v17  ;;  %v2766_v10 = vmul.f32 %v2764_v55, %v2764_v55 }
0x1f3c   :  { %v2961_v31 = vsel %vm2749_vm13, %v2960_v29, %v2956_v28 }
0x1f3d   :  { %v2425_v21 = vadd.f32 %v2423_v60, %v4939_v4 }
0x1f3f   :  { %v2428_v46 = vrot.slane %v2425_v21, 7  ;;  %v2763_v21 = vsub.f32 %v5043_v6, %v2758_v49 }
0x1f41   :  { %v2429_v13 = vsel %vm2365_vm11, %v2428_v46, %v2424_v54 }
0x1f42   :  { %2430 = vrot.lane.b32.xlu0 %v2429_v13, %s4127_s3  ;;  %v2769_v13 = vrot.slane %v2766_v10, 7 }
0x1f61   :  { %2563 = vadd.xlane.f32.xlu0 %v2562_v39 }
0x1f65   :  { %3352 = vadd.xlane.f32.xlu0 %v3351_v3  ;;  %v2765_v3 = vmul.f32 %v2763_v21, %v2763_v21 }
0x1fb4   :  { %v2431_v23 = vpop.permute.xlu0 %2430 }
0x1fb5   :  { %3585 = vst.msk [vmem:[%s5506_s6 + $0x5] sm:$0x60] %vm2370_vm12, %v2431_v23  ;;  %v2770_v23 = vsel %vm2749_vm13, %v2769_v13, %v2765_v3 }
0x1fee   :  { %v2564_v51 = vpop.xlane.xlu0 %2563 }
0x1fef   :  { %v2565_v34 = vmul.f32 0.015625, %v2564_v51 }
0x1ff1   :  { %v2567_v22 = vrot.slane %v2565_v34, 1  ;;  %v2570_v62 = vsub.f32 %v4821_v5, %v2565_v34  ;;  %v5372_v5 = vpop.xlane.xlu1 %3145 }
0x1ff2   :  { %v3353_v44 = vpop.xlane.xlu0 %3352  ;;  %v3148_v47 = vmul.f32 0.015625, %v5372_v5 }
0x1ff3   :  { %v2571_v40 = vsub.f32 %v4823_v25, %v2567_v22  ;;  %v2572_v58 = vmul.f32 %v2570_v62, %v2570_v62 }
0x1ff5   :  { %v2573_v7 = vmul.f32 %v2571_v40, %v2571_v40  ;;  %v5374_v25 = vpop.xlane.xlu1 %3355 }
0x1ff7   :  { %v2576_v57 = vrot.slane %v2573_v7, 7 }
0x1ff9   :  { %v2577_v37 = vsel %vm2365_vm11, %v2576_v57, %v2572_v58  ;;  %v5376_v56 = vpop.xlane.xlu1 %3141 }
0x1ffa   :  { %2578 = vrot.lane.b32.xlu1 %v2577_v37, %s4127_s3  ;;  %v3147_v29 = vmul.f32 0.015625, %v5376_v56 }
0x1ffc   :  { %v5425_v49 = vsub.f32 %v5291_v15, %v3147_v29 }
0x1ffe   :  { %2610 = vrot.lane.b32.xlu1 %v5368_v33, %s4127_s3 }
0x206c   :  { %v2579_v61 = vpop.permute.xlu1 %2578 }
0x206d   :  { %v2581_v50 = vsel %vm2370_vm12, %v2579_v61, 0.0 }
0x206e   :  { %2582 = vadd.xlane.f32.xlu0 %v2581_v50 }
0x2070   :  { %v2611_v36 = vpop.permute.xlu1 %2610 }
0x2084   :  { %2599 = vrot.lane.b32.xlu0 %v5385_v52, %s4127_s3 }
0x2088   :  { %2792 = vrot.lane.b32.xlu0 %v5219_v38, %s4127_s3 }
0x208c   :  { %2962 = vrot.lane.b32.xlu0 %v2961_v31, %s4127_s3 }
0x2090   :  { %2803 = vrot.lane.b32.xlu0 %v5330_v16, %s4127_s3 }
0x20fb   :  { %v2583_v41 = vpop.xlane.xlu0 %2582 }
0x20fc   :  { %v2584_v24 = vmul.f32 0.015625, %v2583_v41 }
0x20fe   :  { %v2585_v11 = vadd.f32 1e-05, %v2584_v24  ;;  %v3151_v24 = vrot.slane %v3148_v47, 1 }
0x20ff   :  { %v2600_v14 = vpop.permute.xlu0 %2599 }
0x2100   :  { %4092 = vrsqrt.f32 %v2585_v11  ;;  %v3358_v11 = vmul.f32 0.015625, %v5374_v25  ;;  %v5430_v5 = vsub.f32 %v5285_v63, %v3151_v24 }
0x2102   :  { %v3361_v56 = vrot.slane %v3358_v11, 1  ;;  %v3157_v15 = vmul.f32 %v5430_v5, %v5430_v5 }
0x2104   :  { %v5439_v25 = vsub.f32 %v5287_v20, %v3361_v56 }
0x2106   :  { %v3367_v63 = vmul.f32 %v5439_v25, %v5439_v25 }
0x210a   :  { %v4093_v42 = vpop.eup %4092 }
0x210b   :  { %v2588_v30 = vrot.slane %v4093_v42, 1  ;;  %v2591_v48 = vmul.f32 %v4093_v42, %v2570_v62  ;;  %v3357_v42 = vmul.f32 0.015625, %v3353_v44 }
0x210d   :  { %v2592_v9 = vmul.f32 %v2588_v30, %v2571_v40  ;;  %v2602_v8 = vmul.f32 %v2600_v14, %v2591_v48  ;;  %v2793_v40 = vpop.permute.xlu0 %2792  ;;  %v3156_v30 = vmul.f32 %v5425_v49, %v5425_v49  ;;  %v3364_v48 = vsub.f32 %v5293_v43, %v3357_v42 }
0x210f   :  { %v2603_v27 = vmul.f32 %v2600_v14, %v2592_v9  ;;  %v2613_v32 = vadd.f32 %v2611_v36, %v2602_v8  ;;  %v3366_v44 = vmul.f32 %v3364_v48, %v3364_v48  ;;  %v3160_v14 = vrot.slane %v3157_v15, 7 }
0x2110   :  { %v3370_v9 = vrot.slane %v3367_v63, 7 }
0x2111   :  { %v2614_v18 = vadd.f32 %v2611_v36, %v2603_v27  ;;  %v2615_v54 = vadd.f32 %v2613_v32, %v4981_v35  ;;  %v2963_v58 = vpop.permute.xlu0 %2962 }
0x2112   :  { %v2965_v43 = vsel %vm2754_vm14, %v2963_v58, 0.0 }
0x2113   :  { %v2616_v60 = vadd.f32 %v2614_v18, %v4983_v12 }
0x2115   :  { %v2619_v46 = vrot.slane %v2616_v60, 7  ;;  %v2804_v61 = vpop.permute.xlu0 %2803 }
0x2117   :  { %v2620_v39 = vsel %vm2365_vm11, %v2619_v46, %v2615_v54 }
0x2118   :  { %2621 = vrot.lane.b32.xlu1 %v2620_v39, %s4127_s3 }
0x211c   :  { %2771 = vrot.lane.b32.xlu1 %v2770_v23, %s4127_s3 }
0x218a   :  { %v2622_v2 = vpop.permute.xlu1 %2621 }
0x218b   :  { %3595 = vst.msk [vmem:[%s5506_s6 + $0x15] sm:$0x60] %vm2370_vm12, %v2622_v2 }
0x218e   :  { %v2772_v6 = vpop.permute.xlu1 %2771 }
0x218f   :  { %v2774_v51 = vsel %vm2754_vm14, %v2772_v6, 0.0 }
0x2190   :  { %2775 = vadd.xlane.f32.xlu1 %v2774_v51 }
0x21a1   :  { %2983 = vrot.lane.b32.xlu1 %v5385_v52, %s4127_s3 }
0x21a5   :  { %2994 = vrot.lane.b32.xlu1 %v5368_v33, %s4127_s3 }
0x221d   :  { %v2776_v34 = vpop.xlane.xlu1 %2775 }
0x221e   :  { %v2777_v22 = vmul.f32 0.015625, %v2776_v34 }
0x2220   :  { %v2778_v62 = vadd.f32 1e-05, %v2777_v22 }
0x2221   :  { %v2984_v54 = vpop.permute.xlu1 %2983 }
0x2222   :  { %4094 = vrsqrt.f32 %v2778_v62 }
0x2225   :  { %v2995_v2 = vpop.permute.xlu1 %2994 }
0x222c   :  { %v4095_v7 = vpop.eup %4094 }
0x222d   :  { %v2781_v57 = vrot.slane %v4095_v7, 1  ;;  %v2784_v37 = vmul.f32 %v4095_v7, %v2763_v21 }
0x222f   :  { %v2785_v59 = vmul.f32 %v2781_v57, %v2764_v55  ;;  %v2795_v26 = vmul.f32 %v2793_v40, %v2784_v37 }
0x2231   :  { %v2796_v50 = vmul.f32 %v2793_v40, %v2785_v59  ;;  %v2806_v1 = vadd.f32 %v2804_v61, %v2795_v26 }
0x2233   :  { %v2807_v19 = vadd.f32 %v2804_v61, %v2796_v50  ;;  %v2808_v31 = vadd.f32 %v2806_v1, %v4936_v17 }
0x2235   :  { %v2809_v28 = vadd.f32 %v2807_v19, %v4939_v4 }
0x2237   :  { %v2812_v41 = vrot.slane %v2809_v28, 7 }
0x2239   :  { %v2813_v0 = vsel %vm2749_vm13, %v2812_v41, %v2808_v31 }
0x223a   :  { %2814 = vrot.lane.b32.xlu0 %v2813_v0, %s4127_s3 }
0x223e   :  { %3161 = vrot.lane.b32.xlu0 %v3156_v30, %s4127_s3 }
0x2242   :  { %3371 = vrot.lane.b32.xlu0 %v3366_v44, %s4127_s3 }
0x2246   :  { %3163 = vrot.lane.b32.xlu0 %v3160_v14, %s4127_s3 }
0x224a   :  { %3373 = vrot.lane.b32.xlu0 %v3370_v9, %s4127_s3 }
0x2269   :  { %2966 = vadd.xlane.f32.xlu0 %v2965_v43 }
0x227f   :  { %3192 = vrot.lane.b32.xlu0 %v5219_v38, %s4127_s3 }
0x22ac   :  { %v2815_v20 = vpop.permute.xlu0 %2814 }
0x22ad   :  { %3603 = vst.msk [vmem:[%s5506_s6 + $0x6] sm:$0xc0] %vm2754_vm14, %v2815_v20 }
0x22b0   :  { %v3162_v8 = vpop.permute.xlu0 %3161 }
0x22b1   :  { %v3167_v40 = vsel %vm3139_vm0, %v3162_v8, 0.0 }
0x22b4   :  { %v3372_v36 = vpop.permute.xlu0 %3371 }
0x22b5   :  { %v3377_v55 = vsel %vm3139_vm0, %v3372_v36, 0.0 }
0x22b6   :  { %3378 = vadd.xlane.f32.xlu0 %v3377_v55 }
0x22b8   :  { %v3164_v27 = vpop.permute.xlu0 %3163 }
0x22b9   :  { %v3170_v32 = vsel %vm3143_vm15, %v3164_v27, 0.0 }
0x22ba   :  { %3171 = vadd.xlane.f32.xlu0 %v3170_v32 }
0x22bc   :  { %v3374_v18 = vpop.permute.xlu0 %3373 }
0x22bd   :  { %v3380_v10 = vsel %vm3143_vm15, %v3374_v18, 0.0 }
0x22be   :  { %3381 = vadd.xlane.f32.xlu0 %v3380_v10 }
0x22d4   :  { %3402 = vrot.lane.b32.xlu0 %v5385_v52, %s4127_s3 }
0x22d8   :  { %3413 = vrot.lane.b32.xlu0 %v5368_v33, %s4127_s3 }
0x22f6   :  { %v2967_v38 = vpop.xlane.xlu0 %2966 }
0x22f7   :  { %v2968_v60 = vmul.f32 0.015625, %v2967_v38 }
0x22f9   :  { %v2969_v21 = vadd.f32 1e-05, %v2968_v60 }
0x22fb   :  { %4096 = vrsqrt.f32 %v2969_v21 }
0x2305   :  { %v4097_v46 = vpop.eup %4096 }
0x2306   :  { %v2972_v13 = vrot.slane %v4097_v46, 1  ;;  %v2975_v39 = vmul.f32 %v4097_v46, %v5392_v45  ;;  %v3193_v45 = vpop.permute.xlu0 %3192 }
0x2308   :  { %v2976_v3 = vmul.f32 %v2972_v13, %v5380_v53  ;;  %v2986_v23 = vmul.f32 %v2984_v54, %v2975_v39 }
0x230a   :  { %v2987_v6 = vmul.f32 %v2984_v54, %v2976_v3  ;;  %v2997_v51 = vadd.f32 %v2995_v2, %v2986_v23 }
0x230c   :  { %v2998_v34 = vadd.f32 %v2995_v2, %v2987_v6  ;;  %v2999_v33 = vadd.f32 %v2997_v51, %v4981_v35 }
0x230e   :  { %v3000_v52 = vadd.f32 %v2998_v34, %v4983_v12 }
0x2310   :  { %v3003_v22 = vrot.slane %v3000_v52, 7 }
0x2312   :  { %v3004_v62 = vsel %vm2749_vm13, %v3003_v22, %v2999_v33 }
0x2313   :  { %3005 = vrot.lane.b32.xlu1 %v3004_v62, %s4127_s3 }
0x2337   :  { %3168 = vadd.xlane.f32.xlu1 %v3167_v40 }
0x2343   :  { %v3379_v7 = vpop.xlane.xlu0 %3378 }
0x2344   :  { %v3383_v53 = vmul.f32 0.015625, %v3379_v7 }
0x2346   :  { %v3385_v58 = vadd.f32 1e-05, %v3383_v53 }
0x2347   :  { %v3172_v57 = vpop.xlane.xlu0 %3171 }
0x2348   :  { %4098 = vrsqrt.f32 %v3385_v58  ;;  %3203 = vrot.lane.b32.xlu1 %v5330_v16, %s4127_s3  ;;  %v3174_v0 = vmul.f32 0.015625, %v3172_v57 }
0x234a   :  { %v3176_v56 = vadd.f32 1e-05, %v3174_v0 }
0x234b   :  { %v3382_v37 = vpop.xlane.xlu0 %3381 }
0x234c   :  { %v3384_v59 = vmul.f32 0.015625, %v3382_v37 }
0x234e   :  { %v3386_v26 = vadd.f32 1e-05, %v3384_v59 }
0x234f   :  { %v3403_v1 = vpop.permute.xlu0 %3402 }
0x2350   :  { %4100 = vrsqrt.f32 %v3386_v26 }
0x2351   :  { %4102 = vrsqrt.f32 %v3176_v56 }
0x2352   :  { %v4099_v61 = vpop.eup %4098 }
0x2353   :  { %v3394_v50 = vmul.f32 %v4099_v61, %v3364_v48  ;;  %v3414_v41 = vpop.permute.xlu0 %3413 }
0x2355   :  { %v3405_v19 = vmul.f32 %v3403_v1, %v3394_v50 }
0x235a   :  { %v4101_v47 = vpop.eup %4100 }
0x235b   :  { %v3391_v29 = vrot.slane %v4101_v47, 1 }
0x235d   :  { %v3395_v28 = vmul.f32 %v3391_v29, %v5439_v25  ;;  %v4103_v25 = vpop.eup %4102 }
0x235e   :  { %v3181_v44 = vrot.slane %v4103_v25, 1 }
0x235f   :  { %v3406_v31 = vmul.f32 %v3403_v1, %v3395_v28 }
0x2361   :  { %v3417_v24 = vadd.f32 %v3414_v41, %v3406_v31 }
0x2363   :  { %v3419_v11 = vadd.f32 %v3417_v24, %v4983_v12  ;;  %v3185_v12 = vmul.f32 %v3181_v44, %v5430_v5  ;;  %v3416_v5 = vadd.f32 %v3414_v41, %v3405_v19 }
0x2365   :  { %v3422_v42 = vrot.slane %v3419_v11, 7  ;;  %v3196_v43 = vmul.f32 %v3193_v45, %v3185_v12 }
0x2367   :  { %3425 = vrot.lane.b32.xlu1 %v3422_v42, %s4127_s3 }
0x2385   :  { %v3006_v16 = vpop.permute.xlu1 %3005 }
0x2386   :  { %3613 = vst.msk [vmem:[%s5506_s6 + $0x16] sm:$0xc0] %vm2754_vm14, %v3006_v16 }
0x23c4   :  { %v3169_v30 = vpop.xlane.xlu1 %3168 }
0x23c5   :  { %v3173_v48 = vmul.f32 0.015625, %v3169_v30 }
0x23c7   :  { %v3175_v15 = vadd.f32 1e-05, %v3173_v48 }
0x23c8   :  { %v3204_v63 = vpop.permute.xlu1 %3203 }
0x23c9   :  { %4104 = vrsqrt.f32 %v3175_v15  ;;  %v3207_v8 = vadd.f32 %v3204_v63, %v3196_v43 }
0x23cb   :  { %v3209_v32 = vadd.f32 %v3207_v8, %v4939_v4 }
0x23cd   :  { %v3212_v18 = vrot.slane %v3209_v32, 7 }
0x23d3   :  { %v4105_v14 = vpop.eup %4104 }
0x23d4   :  { %v3184_v9 = vmul.f32 %v4105_v14, %v5425_v49  ;;  %v3418_v49 = vadd.f32 %v3416_v5, %v4981_v35 }
0x23d6   :  { %v3195_v20 = vmul.f32 %v3193_v45, %v3184_v9 }
0x23d8   :  { %v3206_v36 = vadd.f32 %v3204_v63, %v3195_v20 }
0x23d9   :  { %v3426_v55 = vpop.permute.xlu1 %3425 }
0x23da   :  { %v3208_v27 = vadd.f32 %v3206_v36, %v4936_v17  ;;  %3633 = vst.msk [vmem:[%s5506_s6 + $0x1f] sm:$0x1] %vm3143_vm15, %v3426_v55 }
0x23dc   :  { %3213 = vrot.lane.b32.xlu0 %v3208_v27, %s4127_s3 }
0x23e0   :  { %3215 = vrot.lane.b32.xlu0 %v3212_v18, %s4127_s3 }
0x23e4   :  { %3423 = vrot.lane.b32.xlu0 %v3418_v49, %s4127_s3 }
0x244e   :  { %v3214_v10 = vpop.permute.xlu0 %3213 }
0x244f   :  { %3621 = vst.msk [vmem:[%s5506_s6 + $0x7] sm:$0x80] %vm3139_vm0, %v3214_v10 }
0x2452   :  { %v3216_v17 = vpop.permute.xlu0 %3215 }
0x2453   :  { %3622 = vst.msk [vmem:[%s5506_s6 + $0xf] sm:$0x1] %vm3143_vm15, %v3216_v17 }
0x2456   :  { %v3424_v4 = vpop.permute.xlu0 %3423 }
0x2457   :  { %3632 = vst.msk [vmem:[%s5506_s6 + $0x17] sm:$0x80] %vm3139_vm0, %v3424_v4 }

</bundles_post_ra>
